<compile_context>
chip_gen: v7x
topology: tpu7x:2x2x1
jax: 0.10.0
libtpu: 0.0.40
codegen_flags: <defaults>
</compile_context>

<pallas_src>
import functools

import jax
import jax.numpy as jnp
from jax.experimental import pallas as pl
from jax.experimental.pallas import tpu as pltpu

_BN_EPS = 1e-5
_DIST_SLAB_BYTES = 4 * 1024 * 1024       # cap for the per-step [N, T] f32 distance slab


# ----------------------------- helpers ---------------------------------------

def _act(x):
    # TODO(synk): eu.activate_func source unavailable; using GELU (tanh approximation).
    return jax.nn.gelu(x)


def _vmem_limit_bytes():
    """Generation-aware VMEM budget: ~70% of physical, capped (v7x has 64 MiB/core)."""
    try:
        cap = int(pltpu.get_tpu_info().vmem_capacity_bytes)
    except Exception:
        cap = 128 * 1024 * 1024
    return int(min(96 * 1024 * 1024, max(32 * 1024 * 1024, 0.7 * cap)))


def _compiler_params(n_grid_dims):
    return pltpu.CompilerParams(
        dimension_semantics=("parallel",) * n_grid_dims,
        vmem_limit_bytes=_vmem_limit_bytes())


def _pick_tile(n, target):
    """Largest multiple-of-128 divisor of n that is <= target (or n itself)."""
    if n <= 128:
        return n
    if n % 128 != 0:
        # TODO(synk): for ragged point counts, pad N to a multiple of 128 and mask the
        # padded candidates out of the kNN instead of this single full-N tile fallback.
        return n
    best, t = 128, 128
    while t <= target:
        if n % t == 0:
            best = t
        t += 128
    return best


def _edge_tile(n, target):
    # Keep the in-kernel [N, T] f32 distance slab modest (matters on v7x's 64 MiB VMEM).
    cap = max(128, (_DIST_SLAB_BYTES // max(4 * n, 1)) // 128 * 128)
    return _pick_tile(n, min(target, cap))


# ----------------------------- kernels ----------------------------------------

def _edge_layer_kernel(cen_ref, xcl_ref, xcf_ref, w1n_ref, w1c_ref, b1_ref,
                       w2_ref, b2_ref, o_ref, *, k):
    """Fused DGCNN edge layer for one (batch, point-tile) grid step.

    cen_ref : [1, C, T]  query points, channels-first (T points on the lane axis)
    xcl_ref : [1, N, C]  all points of this batch element, channels-last  (distance lhs)
    xcf_ref : [1, C, N]  all points of this batch element, channels-first (gather lhs)
    w*/b*   : folded conv+BN weights (bf16) / biases (f32, shape [H, 1])
    o_ref   : [1, H2, T] max-over-k edge features, channels-first
    """
    f32 = jnp.float32
    cen = cen_ref[0]                                   # [C, T]
    x_cl = xcl_ref[0]                                  # [N, C]
    x_cf = xcf_ref[0]                                  # [C, N]
    n = x_cl.shape[0]
    t = cen.shape[1]
    h2_dim = w2_ref.shape[0]

    # Negative squared distance with the per-query constant term dropped (ordering only).
    inner = jnp.dot(x_cl, cen, preferred_element_type=f32)                      # [N, T]
    sq = jnp.sum(x_cl.astype(f32) * x_cl.astype(f32), axis=1, keepdims=True)    # [N, 1]
    d = 2.0 * inner - sq                                                        # [N, T]

    row = jax.lax.broadcasted_iota(jnp.int32, (n, t), 0).astype(f32)            # candidate ids

    w1n = w1n_ref[...]
    w1c = w1c_ref[...]
    w2 = w2_ref[...]
    b2 = b2_ref[...]
    cen_f32 = cen.astype(f32)
    # Center half of layer 1 is shared by every edge of a point: compute it once per point.
    h_cen = jnp.dot(w1c, cen.astype(jnp.bfloat16),
                    preferred_element_type=f32) + b1_ref[...]                   # [H1, T]

    acc = jnp.full((h2_dim, t), -jnp.inf, dtype=f32)
    for _ in range(k):                                  # k is small & static: unrolled
        # masked argmax over candidates (lowest index wins exact ties)
        m = jnp.max(d, axis=0, keepdims=True)                                   # [1, T]
        hit = d == m
        first = jnp.min(jnp.where(hit, row, f32(n)), axis=0, keepdims=True)     # [1, T]
        one_hot = row == first                                                  # [N, T]
        d = jnp.where(one_hot, f32(-1e30), d)
        # gather this neighbor of every query with a one-hot matmul on the MXU
        sel = jnp.where(one_hot, 1.0, 0.0).astype(x_cf.dtype)                   # [N, T]
        nei = jnp.dot(x_cf, sel, preferred_element_type=f32)                    # [C, T]
        diff = (nei - cen_f32).astype(jnp.bfloat16)                             # "nei - cen"
        h1 = _act(jnp.dot(w1n, diff, preferred_element_type=f32) + h_cen)       # [H1, T]
        h2 = jnp.dot(w2, h1.astype(jnp.bfloat16),
                     preferred_element_type=f32) + b2                           # [H2, T]
        acc = jnp.maximum(acc, _act(h2))
    o_ref[0] = acc.astype(o_ref.dtype)


def _mlp1d_kernel(x1_ref, x2_ref, w1a_ref, w1b_ref, b1_ref, w2_ref, b2_ref, o_ref):
    """Fused 2-layer 1x1 Conv1d MLP over channel-concat(x1, x2), channels-first tiles."""
    f32 = jnp.float32
    a = x1_ref[0]                                      # [C1, T]
    b = x2_ref[0]                                      # [C2, T]
    # Channel concat folded into split first-layer weights: W1 @ [a; b] = W1a@a + W1b@b.
    h = (jnp.dot(w1a_ref[...], a.astype(jnp.bfloat16), preferred_element_type=f32)
         + jnp.dot(w1b_ref[...], b.astype(jnp.bfloat16), preferred_element_type=f32)
         + b1_ref[...])
    h = _act(h)
    h = jnp.dot(w2_ref[...], h.astype(jnp.bfloat16),
                preferred_element_type=f32) + b2_ref[...]
    o_ref[0] = _act(h).astype(o_ref.dtype)


# ----------------------------- pallas wrappers --------------------------------

def _fold_bn(layer):
    """Fold eval-mode BatchNorm into the preceding 1x1 conv. W: [Cout, Cin] bf16, b: [Cout, 1] f32."""
    scale = layer['gamma'] * jax.lax.rsqrt(layer['var'] + _BN_EPS)               # [Cout]
    w = (layer['w'] * scale[:, None]).astype(jnp.bfloat16)                       # [Cout, Cin]
    b = ((layer['b'] - layer['mean']) * scale + layer['beta'])[:, None]          # [Cout, 1]
    return w, b.astype(jnp.float32)


def dgcnn_edge_layer(x_cf, x_cl, layers, k, *, out_dtype=jnp.bfloat16, row_tile=256):
    """x_cf: [bs, C, N], x_cl: [bs, N, C] -> [bs, C_out, N] (fused knn + edge MLP + max)."""
    bs, c, n = x_cf.shape
    l1, l2 = layers
    w1, b1 = _fold_bn(l1)                      # [H1, 2C]
    w2, b2 = _fold_bn(l2)                      # [H2, H1]
    # torch.cat([nei - cen, cen], channel): split layer-1 weight columns so the center
    # half is applied once per point and the concat is never materialized.
    w1n, w1c = w1[:, :c], w1[:, c:]
    h1_dim, h2_dim = w1.shape[0], w2.shape[0]
    t = _edge_tile(n, row_tile)
    kern = functools.partial(_edge_layer_kernel, k=k)
    return pl.pallas_call(
        kern,
        out_shape=jax.ShapeDtypeStruct((bs, h2_dim, n), out_dtype),
        grid=(bs, n // t),
        in_specs=[
            pl.BlockSpec((1, c, t), lambda b, i: (b, 0, i)),    # query tile (channels-first)
            pl.BlockSpec((1, n, c), lambda b, i: (b, 0, 0)),    # all points, channels-last (resident)
            pl.BlockSpec((1, c, n), lambda b, i: (b, 0, 0)),    # all points, channels-first (resident)
            pl.BlockSpec((h1_dim, c), lambda b, i: (0, 0)),
            pl.BlockSpec((h1_dim, c), lambda b, i: (0, 0)),
            pl.BlockSpec((h1_dim, 1), lambda b, i: (0, 0)),
            pl.BlockSpec((h2_dim, h1_dim), lambda b, i: (0, 0)),
            pl.BlockSpec((h2_dim, 1), lambda b, i: (0, 0)),
        ],
        out_specs=pl.BlockSpec((1, h2_dim, t), lambda b, i: (b, 0, i)),
        compiler_params=_compiler_params(2),
    )(x_cf, x_cl, x_cf, w1n, w1c, b1, w2, b2)


def mlp1d(x1, x2, layers, *, out_dtype=jnp.float32, row_tile=1024):
    """x1: [bs, C1, N], x2: [bs, C2, N] -> [bs, C_out, N] (conv3 over channel concat)."""
    bs, c1, n = x1.shape
    c2 = x2.shape[1]
    l1, l2 = layers
    w1, b1 = _fold_bn(l1)
    w2, b2 = _fold_bn(l2)
    w1a, w1b = w1[:, :c1], w1[:, c1:]
    h1_dim, h2_dim = w1.shape[0], w2.shape[0]
    t = _pick_tile(n, row_tile)
    return pl.pallas_call(
        _mlp1d_kernel,
        out_shape=jax.ShapeDtypeStruct((bs, h2_dim, n), out_dtype),
        grid=(bs, n // t),
        in_specs=[
            pl.BlockSpec((1, c1, t), lambda b, i: (b, 0, i)),
            pl.BlockSpec((1, c2, t), lambda b, i: (b, 0, i)),
            pl.BlockSpec((h1_dim, c1), lambda b, i: (0, 0)),
            pl.BlockSpec((h1_dim, c2), lambda b, i: (0, 0)),
            pl.BlockSpec((h1_dim, 1), lambda b, i: (0, 0)),
            pl.BlockSpec((h2_dim, h1_dim), lambda b, i: (0, 0)),
            pl.BlockSpec((h2_dim, 1), lambda b, i: (0, 0)),
        ],
        out_specs=pl.BlockSpec((1, h2_dim, t), lambda b, i: (b, 0, i)),
        compiler_params=_compiler_params(2),
    )(x1, x2, w1a, w1b, b1, w2, b2)


# ----------------------------- model glue --------------------------------------

def _init_conv_bn(key, cin, cout):
    w = jax.random.normal(key, (cout, cin), jnp.float32) * (1.0 / float(cin) ** 0.5)
    return dict(w=w,
                b=jnp.zeros((cout,), jnp.float32),
                gamma=jnp.ones((cout,), jnp.float32),
                beta=jnp.zeros((cout,), jnp.float32),
                mean=jnp.zeros((cout,), jnp.float32),
                var=jnp.ones((cout,), jnp.float32))


def _init_mlp(key, channels):
    layers = []
    for cin, cout in zip(channels[:-1], channels[1:]):
        key, sub = jax.random.split(key)
        layers.append(_init_conv_bn(sub, cin, cout))
    return key, tuple(layers)


def init_params(key, emb_in, emb_out):
    emb_inc = (emb_out / (4 * emb_in)) ** 0.25
    l1_0 = emb_in * 2
    l1_1 = int(l1_0 * emb_inc)
    l1_2 = int(l1_0 * emb_inc ** 2)
    l2_0 = l1_2 * 2
    l2_1 = int(l2_0 * emb_inc)
    l2_2 = emb_out
    l3_0 = l2_2 + l1_2
    l3_1 = int((emb_out / l3_0) ** 0.5 * l3_0)
    l3_2 = emb_out
    key, conv1 = _init_mlp(key, (l1_0, l1_1, l1_2))
    key, conv2 = _init_mlp(key, (l2_0, l2_1, l2_2))
    key, conv3 = _init_mlp(key, (l3_0, l3_1, l3_2))
    return dict(conv1=conv1, conv2=conv2, conv3=conv3)


def gcn_encoder_forward(x, params, *, n_near):
    """x: [bs, C_in, n_point] (PyTorch layout) -> [bs, emb_out, n_point]."""
    x_cf = x.astype(jnp.float32)                             # channels-first, f32 for first kNN
    x_cl = jnp.transpose(x_cf, (0, 2, 1))                    # cheap XLA transpose of [bs,N,C_in]
    x1 = dgcnn_edge_layer(x_cf, x_cl, params['conv1'], n_near)   # [bs, l1_2, N] bf16
    x1_cl = jnp.transpose(x1, (0, 2, 1))
    x2 = dgcnn_edge_layer(x1, x1_cl, params['conv2'], n_near)    # [bs, emb_out, N] bf16
    # conv3 over torch.cat((x1, x2), dim=1); already PyTorch channels-first layout.
    return mlp1d(x1, x2, params['conv3'])                    # [bs, emb_out, N] f32


# ----------------------------- demo --------------------------------------------

if __name__ == "__main__":
    key = jax.random.PRNGKey(0)
    bs, c_in, n_point = 2, 2, 128
    emb_out, n_near = 32, 8

    k_x, k_p = jax.random.split(key)
    x = jax.random.normal(k_x, (bs, c_in, n_point), jnp.float32)
    params = init_params(k_p, c_in, emb_out)

    fwd = jax.jit(functools.partial(gcn_encoder_forward, n_near=n_near))
    out = jax.block_until_ready(fwd(x, params))

    assert out.shape == (bs, emb_out, n_point), out.shape
    assert out.dtype == jnp.float32
    assert bool(jnp.all(jnp.isfinite(out)))
    print("KERNEL_OK")
</pallas_src>

<mosaic_0001>
module attributes {stable_mosaic.version = 11 : i64} {
  func.func @_edge_layer_kernel(%arg0: i32, %arg1: i32, %arg2: memref<1x2x128xf32, #tpu.memory_space<vmem>>, %arg3: memref<1x128x2xf32, #tpu.memory_space<vmem>>, %arg4: memref<1x2x128xf32, #tpu.memory_space<vmem>>, %arg5: memref<5x2xbf16, #tpu.memory_space<vmem>>, %arg6: memref<5x2xbf16, #tpu.memory_space<vmem>>, %arg7: memref<5x1xf32, #tpu.memory_space<vmem>>, %arg8: memref<8x5xbf16, #tpu.memory_space<vmem>>, %arg9: memref<8x1xf32, #tpu.memory_space<vmem>>, %arg10: memref<1x8x128xbf16, #tpu.memory_space<vmem>>) attributes {dimension_semantics = [#tpu.dimension_semantics<parallel>, #tpu.dimension_semantics<parallel>], iteration_bounds = array<i64: 2, 1>, scalar_prefetch = 0 : i64, scratch_operands = 0 : i64, tpu.core_type = #tpu.core_type<tc>, window_params = [{transform_indices = @transform_0, window_bounds = array<i64: 1, 2, 128>}, {transform_indices = @transform_1, window_bounds = array<i64: 1, 128, 2>}, {transform_indices = @transform_2, window_bounds = array<i64: 1, 2, 128>}, {pipeline_mode = #tpu.pipeline_mode<synchronous>, transform_indices = @transform_3, window_bounds = array<i64: 5, 2>}, {pipeline_mode = #tpu.pipeline_mode<synchronous>, transform_indices = @transform_4, window_bounds = array<i64: 5, 2>}, {pipeline_mode = #tpu.pipeline_mode<synchronous>, transform_indices = @transform_5, window_bounds = array<i64: 5, 1>}, {pipeline_mode = #tpu.pipeline_mode<synchronous>, transform_indices = @transform_6, window_bounds = array<i64: 8, 5>}, {pipeline_mode = #tpu.pipeline_mode<synchronous>, transform_indices = @transform_7, window_bounds = array<i64: 8, 1>}, {transform_indices = @transform_8, window_bounds = array<i64: 1, 8, 128>}]} {
    %c0 = arith.constant 0 : index
    %c0_0 = arith.constant 0 : index
    %c0_1 = arith.constant 0 : index
    %0 = vector.load %arg2[%c0, %c0_0, %c0_1] : memref<1x2x128xf32, #tpu.memory_space<vmem>>, vector<1x2x128xf32>
    %1 = vector.shape_cast %0 : vector<1x2x128xf32> to vector<2x128xf32>
    %c0_2 = arith.constant 0 : index
    %c0_3 = arith.constant 0 : index
    %c0_4 = arith.constant 0 : index
    %2 = vector.load %arg3[%c0_2, %c0_3, %c0_4] : memref<1x128x2xf32, #tpu.memory_space<vmem>>, vector<1x128x2xf32>
    %3 = vector.shape_cast %2 : vector<1x128x2xf32> to vector<128x2xf32>
    %c0_5 = arith.constant 0 : index
    %c0_6 = arith.constant 0 : index
    %c0_7 = arith.constant 0 : index
    %4 = vector.load %arg4[%c0_5, %c0_6, %c0_7] : memref<1x2x128xf32, #tpu.memory_space<vmem>>, vector<1x2x128xf32>
    %5 = vector.shape_cast %4 : vector<1x2x128xf32> to vector<2x128xf32>
    %cst = arith.constant dense<0.000000e+00> : vector<128x128xf32>
    %6 = tpu.matmul %3, %1, %cst {dimension_numbers = #tpu.dot_dimension_numbers<[1], [0], [0], [1], [0, 0, 1, 1], [], []>} : vector<128x2xf32>, vector<2x128xf32>, vector<128x128xf32> -> vector<128x128xf32>
    %7 = arith.mulf %3, %3 : vector<128x2xf32>
    %cst_8 = arith.constant dense<0.000000e+00> : vector<128xf32>
    %8 = vector.multi_reduction <add>, %7, %cst_8 [1] : vector<128x2xf32> to vector<128xf32>
    %9 = vector.shape_cast %8 : vector<128xf32> to vector<128x1xf32>
    %cst_9 = arith.constant 2.000000e+00 : f32
    %10 = vector.broadcast %cst_9 : f32 to vector<128x128xf32>
    %11 = arith.mulf %10, %6 : vector<128x128xf32>
    %12 = vector.broadcast %9 : vector<128x1xf32> to vector<128x128xf32>
    %13 = arith.subf %11, %12 : vector<128x128xf32>
    %14 = tpu.iota {dimensions = array<i32: 0>} : vector<128x128xi32>
    %15 = arith.sitofp %14 : vector<128x128xi32> to vector<128x128xf32>
    %c0_10 = arith.constant 0 : index
    %c0_11 = arith.constant 0 : index
    %16 = vector.load %arg5[%c0_10, %c0_11] : memref<5x2xbf16, #tpu.memory_space<vmem>>, vector<5x2xbf16>
    %c0_12 = arith.constant 0 : index
    %c0_13 = arith.constant 0 : index
    %17 = vector.load %arg6[%c0_12, %c0_13] : memref<5x2xbf16, #tpu.memory_space<vmem>>, vector<5x2xbf16>
    %c0_14 = arith.constant 0 : index
    %c0_15 = arith.constant 0 : index
    %18 = vector.load %arg8[%c0_14, %c0_15] : memref<8x5xbf16, #tpu.memory_space<vmem>>, vector<8x5xbf16>
    %c0_16 = arith.constant 0 : index
    %c0_17 = arith.constant 0 : index
    %19 = vector.load %arg9[%c0_16, %c0_17] : memref<8x1xf32, #tpu.memory_space<vmem>>, vector<8x1xf32>
    %20 = arith.truncf %1 : vector<2x128xf32> to vector<2x128xbf16>
    %cst_18 = arith.constant dense<0.000000e+00> : vector<5x128xf32>
    %21 = tpu.matmul %17, %20, %cst_18 {dimension_numbers = #tpu.dot_dimension_numbers<[1], [0], [0], [1], [0, 0, 1, 1], [], []>} : vector<5x2xbf16>, vector<2x128xbf16>, vector<5x128xf32> -> vector<5x128xf32>
    %c0_19 = arith.constant 0 : index
    %c0_20 = arith.constant 0 : index
    %22 = vector.load %arg7[%c0_19, %c0_20] : memref<5x1xf32, #tpu.memory_space<vmem>>, vector<5x1xf32>
    %23 = vector.broadcast %22 : vector<5x1xf32> to vector<5x128xf32>
    %24 = arith.addf %21, %23 : vector<5x128xf32>
    %cst_21 = arith.constant 0xFF800000 : f32
    %25 = vector.broadcast %cst_21 : f32 to vector<8x128xf32>
    %cst_22 = arith.constant dense<0xFF800000> : vector<128xf32>
    %26 = vector.multi_reduction <maximumf>, %13, %cst_22 [0] : vector<128x128xf32> to vector<128xf32>
    %27 = vector.shape_cast %26 : vector<128xf32> to vector<1x128xf32>
    %28 = vector.broadcast %27 : vector<1x128xf32> to vector<128x128xf32>
    %29 = arith.cmpf oeq, %13, %28 : vector<128x128xf32>
    %cst_23 = arith.constant 1.280000e+02 : f32
    %30 = vector.broadcast %cst_23 : f32 to vector<128x128xf32>
    %31 = arith.select %29, %15, %30 : vector<128x128xi1>, vector<128x128xf32>
    %cst_24 = arith.constant dense<0x7F800000> : vector<128xf32>
    %32 = vector.multi_reduction <minimumf>, %31, %cst_24 [0] : vector<128x128xf32> to vector<128xf32>
    %33 = vector.shape_cast %32 : vector<128xf32> to vector<1x128xf32>
    %34 = vector.broadcast %33 : vector<1x128xf32> to vector<128x128xf32>
    %35 = arith.cmpf oeq, %15, %34 : vector<128x128xf32>
    %cst_25 = arith.constant -1.000000e+30 : f32
    %36 = vector.broadcast %cst_25 : f32 to vector<128x128xf32>
    %37 = arith.select %35, %36, %13 : vector<128x128xi1>, vector<128x128xf32>
    %cst_26 = arith.constant 1.000000e+00 : f32
    %cst_27 = arith.constant 0.000000e+00 : f32
    %38 = vector.broadcast %cst_26 : f32 to vector<128x128xf32>
    %39 = vector.broadcast %cst_27 : f32 to vector<128x128xf32>
    %40 = arith.select %35, %38, %39 : vector<128x128xi1>, vector<128x128xf32>
    %cst_28 = arith.constant dense<0.000000e+00> : vector<2x128xf32>
    %41 = tpu.matmul %5, %40, %cst_28 {dimension_numbers = #tpu.dot_dimension_numbers<[1], [0], [0], [1], [0, 0, 1, 1], [], []>} : vector<2x128xf32>, vector<128x128xf32>, vector<2x128xf32> -> vector<2x128xf32>
    %42 = arith.subf %41, %1 : vector<2x128xf32>
    %43 = arith.truncf %42 : vector<2x128xf32> to vector<2x128xbf16>
    %cst_29 = arith.constant dense<0.000000e+00> : vector<5x128xf32>
    %44 = tpu.matmul %16, %43, %cst_29 {dimension_numbers = #tpu.dot_dimension_numbers<[1], [0], [0], [1], [0, 0, 1, 1], [], []>} : vector<5x2xbf16>, vector<2x128xbf16>, vector<5x128xf32> -> vector<5x128xf32>
    %45 = arith.addf %44, %24 : vector<5x128xf32>
    %46 = arith.mulf %45, %45 : vector<5x128xf32>
    %47 = arith.mulf %45, %46 : vector<5x128xf32>
    %cst_30 = arith.constant 4.471500e-02 : f32
    %48 = vector.broadcast %cst_30 : f32 to vector<5x128xf32>
    %49 = arith.mulf %48, %47 : vector<5x128xf32>
    %50 = arith.addf %45, %49 : vector<5x128xf32>
    %cst_31 = arith.constant 0.797884583 : f32
    %51 = vector.broadcast %cst_31 : f32 to vector<5x128xf32>
    %52 = arith.mulf %51, %50 : vector<5x128xf32>
    %53 = math.tanh %52 : vector<5x128xf32>
    %cst_32 = arith.constant 1.000000e+00 : f32
    %54 = vector.broadcast %cst_32 : f32 to vector<5x128xf32>
    %55 = arith.addf %54, %53 : vector<5x128xf32>
    %cst_33 = arith.constant 5.000000e-01 : f32
    %56 = vector.broadcast %cst_33 : f32 to vector<5x128xf32>
    %57 = arith.mulf %56, %55 : vector<5x128xf32>
    %58 = arith.mulf %45, %57 : vector<5x128xf32>
    %59 = arith.truncf %58 : vector<5x128xf32> to vector<5x128xbf16>
    %cst_34 = arith.constant dense<0.000000e+00> : vector<8x128xf32>
    %60 = tpu.matmul %18, %59, %cst_34 {dimension_numbers = #tpu.dot_dimension_numbers<[1], [0], [0], [1], [0, 0, 1, 1], [], []>} : vector<8x5xbf16>, vector<5x128xbf16>, vector<8x128xf32> -> vector<8x128xf32>
    %61 = vector.broadcast %19 : vector<8x1xf32> to vector<8x128xf32>
    %62 = arith.addf %60, %61 : vector<8x128xf32>
    %63 = arith.mulf %62, %62 : vector<8x128xf32>
    %64 = arith.mulf %62, %63 : vector<8x128xf32>
    %cst_35 = arith.constant 4.471500e-02 : f32
    %65 = vector.broadcast %cst_35 : f32 to vector<8x128xf32>
    %66 = arith.mulf %65, %64 : vector<8x128xf32>
    %67 = arith.addf %62, %66 : vector<8x128xf32>
    %cst_36 = arith.constant 0.797884583 : f32
    %68 = vector.broadcast %cst_36 : f32 to vector<8x128xf32>
    %69 = arith.mulf %68, %67 : vector<8x128xf32>
    %70 = math.tanh %69 : vector<8x128xf32>
    %cst_37 = arith.constant 1.000000e+00 : f32
    %71 = vector.broadcast %cst_37 : f32 to vector<8x128xf32>
    %72 = arith.addf %71, %70 : vector<8x128xf32>
    %cst_38 = arith.constant 5.000000e-01 : f32
    %73 = vector.broadcast %cst_38 : f32 to vector<8x128xf32>
    %74 = arith.mulf %73, %72 : vector<8x128xf32>
    %75 = arith.mulf %62, %74 : vector<8x128xf32>
    %76 = arith.maximumf %25, %75 : vector<8x128xf32>
    %cst_39 = arith.constant dense<0xFF800000> : vector<128xf32>
    %77 = vector.multi_reduction <maximumf>, %37, %cst_39 [0] : vector<128x128xf32> to vector<128xf32>
    %78 = vector.shape_cast %77 : vector<128xf32> to vector<1x128xf32>
    %79 = vector.broadcast %78 : vector<1x128xf32> to vector<128x128xf32>
    %80 = arith.cmpf oeq, %37, %79 : vector<128x128xf32>
    %cst_40 = arith.constant 1.280000e+02 : f32
    %81 = vector.broadcast %cst_40 : f32 to vector<128x128xf32>
    %82 = arith.select %80, %15, %81 : vector<128x128xi1>, vector<128x128xf32>
    %cst_41 = arith.constant dense<0x7F800000> : vector<128xf32>
    %83 = vector.multi_reduction <minimumf>, %82, %cst_41 [0] : vector<128x128xf32> to vector<128xf32>
    %84 = vector.shape_cast %83 : vector<128xf32> to vector<1x128xf32>
    %85 = vector.broadcast %84 : vector<1x128xf32> to vector<128x128xf32>
    %86 = arith.cmpf oeq, %15, %85 : vector<128x128xf32>
    %cst_42 = arith.constant -1.000000e+30 : f32
    %87 = vector.broadcast %cst_42 : f32 to vector<128x128xf32>
    %88 = arith.select %86, %87, %37 : vector<128x128xi1>, vector<128x128xf32>
    %cst_43 = arith.constant 1.000000e+00 : f32
    %cst_44 = arith.constant 0.000000e+00 : f32
    %89 = vector.broadcast %cst_43 : f32 to vector<128x128xf32>
    %90 = vector.broadcast %cst_44 : f32 to vector<128x128xf32>
    %91 = arith.select %86, %89, %90 : vector<128x128xi1>, vector<128x128xf32>
    %cst_45 = arith.constant dense<0.000000e+00> : vector<2x128xf32>
    %92 = tpu.matmul %5, %91, %cst_45 {dimension_numbers = #tpu.dot_dimension_numbers<[1], [0], [0], [1], [0, 0, 1, 1], [], []>} : vector<2x128xf32>, vector<128x128xf32>, vector<2x128xf32> -> vector<2x128xf32>
    %93 = arith.subf %92, %1 : vector<2x128xf32>
    %94 = arith.truncf %93 : vector<2x128xf32> to vector<2x128xbf16>
    %cst_46 = arith.constant dense<0.000000e+00> : vector<5x128xf32>
    %95 = tpu.matmul %16, %94, %cst_46 {dimension_numbers = #tpu.dot_dimension_numbers<[1], [0], [0], [1], [0, 0, 1, 1], [], []>} : vector<5x2xbf16>, vector<2x128xbf16>, vector<5x128xf32> -> vector<5x128xf32>
    %96 = arith.addf %95, %24 : vector<5x128xf32>
    %97 = arith.mulf %96, %96 : vector<5x128xf32>
    %98 = arith.mulf %96, %97 : vector<5x128xf32>
    %cst_47 = arith.constant 4.471500e-02 : f32
    %99 = vector.broadcast %cst_47 : f32 to vector<5x128xf32>
    %100 = arith.mulf %99, %98 : vector<5x128xf32>
    %101 = arith.addf %96, %100 : vector<5x128xf32>
    %cst_48 = arith.constant 0.797884583 : f32
    %102 = vector.broadcast %cst_48 : f32 to vector<5x128xf32>
    %103 = arith.mulf %102, %101 : vector<5x128xf32>
    %104 = math.tanh %103 : vector<5x128xf32>
    %cst_49 = arith.constant 1.000000e+00 : f32
    %105 = vector.broadcast %cst_49 : f32 to vector<5x128xf32>
    %106 = arith.addf %105, %104 : vector<5x128xf32>
    %cst_50 = arith.constant 5.000000e-01 : f32
    %107 = vector.broadcast %cst_50 : f32 to vector<5x128xf32>
    %108 = arith.mulf %107, %106 : vector<5x128xf32>
    %109 = arith.mulf %96, %108 : vector<5x128xf32>
    %110 = arith.truncf %109 : vector<5x128xf32> to vector<5x128xbf16>
    %cst_51 = arith.constant dense<0.000000e+00> : vector<8x128xf32>
    %111 = tpu.matmul %18, %110, %cst_51 {dimension_numbers = #tpu.dot_dimension_numbers<[1], [0], [0], [1], [0, 0, 1, 1], [], []>} : vector<8x5xbf16>, vector<5x128xbf16>, vector<8x128xf32> -> vector<8x128xf32>
    %112 = vector.broadcast %19 : vector<8x1xf32> to vector<8x128xf32>
    %113 = arith.addf %111, %112 : vector<8x128xf32>
    %114 = arith.mulf %113, %113 : vector<8x128xf32>
    %115 = arith.mulf %113, %114 : vector<8x128xf32>
    %cst_52 = arith.constant 4.471500e-02 : f32
    %116 = vector.broadcast %cst_52 : f32 to vector<8x128xf32>
    %117 = arith.mulf %116, %115 : vector<8x128xf32>
    %118 = arith.addf %113, %117 : vector<8x128xf32>
    %cst_53 = arith.constant 0.797884583 : f32
    %119 = vector.broadcast %cst_53 : f32 to vector<8x128xf32>
    %120 = arith.mulf %119, %118 : vector<8x128xf32>
    %121 = math.tanh %120 : vector<8x128xf32>
    %cst_54 = arith.constant 1.000000e+00 : f32
    %122 = vector.broadcast %cst_54 : f32 to vector<8x128xf32>
    %123 = arith.addf %122, %121 : vector<8x128xf32>
    %cst_55 = arith.constant 5.000000e-01 : f32
    %124 = vector.broadcast %cst_55 : f32 to vector<8x128xf32>
    %125 = arith.mulf %124, %123 : vector<8x128xf32>
    %126 = arith.mulf %113, %125 : vector<8x128xf32>
    %127 = arith.maximumf %76, %126 : vector<8x128xf32>
    %cst_56 = arith.constant dense<0xFF800000> : vector<128xf32>
    %128 = vector.multi_reduction <maximumf>, %88, %cst_56 [0] : vector<128x128xf32> to vector<128xf32>
    %129 = vector.shape_cast %128 : vector<128xf32> to vector<1x128xf32>
    %130 = vector.broadcast %129 : vector<1x128xf32> to vector<128x128xf32>
    %131 = arith.cmpf oeq, %88, %130 : vector<128x128xf32>
    %cst_57 = arith.constant 1.280000e+02 : f32
    %132 = vector.broadcast %cst_57 : f32 to vector<128x128xf32>
    %133 = arith.select %131, %15, %132 : vector<128x128xi1>, vector<128x128xf32>
    %cst_58 = arith.constant dense<0x7F800000> : vector<128xf32>
    %134 = vector.multi_reduction <minimumf>, %133, %cst_58 [0] : vector<128x128xf32> to vector<128xf32>
    %135 = vector.shape_cast %134 : vector<128xf32> to vector<1x128xf32>
    %136 = vector.broadcast %135 : vector<1x128xf32> to vector<128x128xf32>
    %137 = arith.cmpf oeq, %15, %136 : vector<128x128xf32>
    %cst_59 = arith.constant -1.000000e+30 : f32
    %138 = vector.broadcast %cst_59 : f32 to vector<128x128xf32>
    %139 = arith.select %137, %138, %88 : vector<128x128xi1>, vector<128x128xf32>
    %cst_60 = arith.constant 1.000000e+00 : f32
    %cst_61 = arith.constant 0.000000e+00 : f32
    %140 = vector.broadcast %cst_60 : f32 to vector<128x128xf32>
    %141 = vector.broadcast %cst_61 : f32 to vector<128x128xf32>
    %142 = arith.select %137, %140, %141 : vector<128x128xi1>, vector<128x128xf32>
    %cst_62 = arith.constant dense<0.000000e+00> : vector<2x128xf32>
    %143 = tpu.matmul %5, %142, %cst_62 {dimension_numbers = #tpu.dot_dimension_numbers<[1], [0], [0], [1], [0, 0, 1, 1], [], []>} : vector<2x128xf32>, vector<128x128xf32>, vector<2x128xf32> -> vector<2x128xf32>
    %144 = arith.subf %143, %1 : vector<2x128xf32>
    %145 = arith.truncf %144 : vector<2x128xf32> to vector<2x128xbf16>
    %cst_63 = arith.constant dense<0.000000e+00> : vector<5x128xf32>
    %146 = tpu.matmul %16, %145, %cst_63 {dimension_numbers = #tpu.dot_dimension_numbers<[1], [0], [0], [1], [0, 0, 1, 1], [], []>} : vector<5x2xbf16>, vector<2x128xbf16>, vector<5x128xf32> -> vector<5x128xf32>
    %147 = arith.addf %146, %24 : vector<5x128xf32>
    %148 = arith.mulf %147, %147 : vector<5x128xf32>
    %149 = arith.mulf %147, %148 : vector<5x128xf32>
    %cst_64 = arith.constant 4.471500e-02 : f32
    %150 = vector.broadcast %cst_64 : f32 to vector<5x128xf32>
    %151 = arith.mulf %150, %149 : vector<5x128xf32>
    %152 = arith.addf %147, %151 : vector<5x128xf32>
    %cst_65 = arith.constant 0.797884583 : f32
    %153 = vector.broadcast %cst_65 : f32 to vector<5x128xf32>
    %154 = arith.mulf %153, %152 : vector<5x128xf32>
    %155 = math.tanh %154 : vector<5x128xf32>
    %cst_66 = arith.constant 1.000000e+00 : f32
    %156 = vector.broadcast %cst_66 : f32 to vector<5x128xf32>
    %157 = arith.addf %156, %155 : vector<5x128xf32>
    %cst_67 = arith.constant 5.000000e-01 : f32
    %158 = vector.broadcast %cst_67 : f32 to vector<5x128xf32>
    %159 = arith.mulf %158, %157 : vector<5x128xf32>
    %160 = arith.mulf %147, %159 : vector<5x128xf32>
    %161 = arith.truncf %160 : vector<5x128xf32> to vector<5x128xbf16>
    %cst_68 = arith.constant dense<0.000000e+00> : vector<8x128xf32>
    %162 = tpu.matmul %18, %161, %cst_68 {dimension_numbers = #tpu.dot_dimension_numbers<[1], [0], [0], [1], [0, 0, 1, 1], [], []>} : vector<8x5xbf16>, vector<5x128xbf16>, vector<8x128xf32> -> vector<8x128xf32>
    %163 = vector.broadcast %19 : vector<8x1xf32> to vector<8x128xf32>
    %164 = arith.addf %162, %163 : vector<8x128xf32>
    %165 = arith.mulf %164, %164 : vector<8x128xf32>
    %166 = arith.mulf %164, %165 : vector<8x128xf32>
    %cst_69 = arith.constant 4.471500e-02 : f32
    %167 = vector.broadcast %cst_69 : f32 to vector<8x128xf32>
    %168 = arith.mulf %167, %166 : vector<8x128xf32>
    %169 = arith.addf %164, %168 : vector<8x128xf32>
    %cst_70 = arith.constant 0.797884583 : f32
    %170 = vector.broadcast %cst_70 : f32 to vector<8x128xf32>
    %171 = arith.mulf %170, %169 : vector<8x128xf32>
    %172 = math.tanh %171 : vector<8x128xf32>
    %cst_71 = arith.constant 1.000000e+00 : f32
    %173 = vector.broadcast %cst_71 : f32 to vector<8x128xf32>
    %174 = arith.addf %173, %172 : vector<8x128xf32>
    %cst_72 = arith.constant 5.000000e-01 : f32
    %175 = vector.broadcast %cst_72 : f32 to vector<8x128xf32>
    %176 = arith.mulf %175, %174 : vector<8x128xf32>
    %177 = arith.mulf %164, %176 : vector<8x128xf32>
    %178 = arith.maximumf %127, %177 : vector<8x128xf32>
    %cst_73 = arith.constant dense<0xFF800000> : vector<128xf32>
    %179 = vector.multi_reduction <maximumf>, %139, %cst_73 [0] : vector<128x128xf32> to vector<128xf32>
    %180 = vector.shape_cast %179 : vector<128xf32> to vector<1x128xf32>
    %181 = vector.broadcast %180 : vector<1x128xf32> to vector<128x128xf32>
    %182 = arith.cmpf oeq, %139, %181 : vector<128x128xf32>
    %cst_74 = arith.constant 1.280000e+02 : f32
    %183 = vector.broadcast %cst_74 : f32 to vector<128x128xf32>
    %184 = arith.select %182, %15, %183 : vector<128x128xi1>, vector<128x128xf32>
    %cst_75 = arith.constant dense<0x7F800000> : vector<128xf32>
    %185 = vector.multi_reduction <minimumf>, %184, %cst_75 [0] : vector<128x128xf32> to vector<128xf32>
    %186 = vector.shape_cast %185 : vector<128xf32> to vector<1x128xf32>
    %187 = vector.broadcast %186 : vector<1x128xf32> to vector<128x128xf32>
    %188 = arith.cmpf oeq, %15, %187 : vector<128x128xf32>
    %cst_76 = arith.constant -1.000000e+30 : f32
    %189 = vector.broadcast %cst_76 : f32 to vector<128x128xf32>
    %190 = arith.select %188, %189, %139 : vector<128x128xi1>, vector<128x128xf32>
    %cst_77 = arith.constant 1.000000e+00 : f32
    %cst_78 = arith.constant 0.000000e+00 : f32
    %191 = vector.broadcast %cst_77 : f32 to vector<128x128xf32>
    %192 = vector.broadcast %cst_78 : f32 to vector<128x128xf32>
    %193 = arith.select %188, %191, %192 : vector<128x128xi1>, vector<128x128xf32>
    %cst_79 = arith.constant dense<0.000000e+00> : vector<2x128xf32>
    %194 = tpu.matmul %5, %193, %cst_79 {dimension_numbers = #tpu.dot_dimension_numbers<[1], [0], [0], [1], [0, 0, 1, 1], [], []>} : vector<2x128xf32>, vector<128x128xf32>, vector<2x128xf32> -> vector<2x128xf32>
    %195 = arith.subf %194, %1 : vector<2x128xf32>
    %196 = arith.truncf %195 : vector<2x128xf32> to vector<2x128xbf16>
    %cst_80 = arith.constant dense<0.000000e+00> : vector<5x128xf32>
    %197 = tpu.matmul %16, %196, %cst_80 {dimension_numbers = #tpu.dot_dimension_numbers<[1], [0], [0], [1], [0, 0, 1, 1], [], []>} : vector<5x2xbf16>, vector<2x128xbf16>, vector<5x128xf32> -> vector<5x128xf32>
    %198 = arith.addf %197, %24 : vector<5x128xf32>
    %199 = arith.mulf %198, %198 : vector<5x128xf32>
    %200 = arith.mulf %198, %199 : vector<5x128xf32>
    %cst_81 = arith.constant 4.471500e-02 : f32
    %201 = vector.broadcast %cst_81 : f32 to vector<5x128xf32>
    %202 = arith.mulf %201, %200 : vector<5x128xf32>
    %203 = arith.addf %198, %202 : vector<5x128xf32>
    %cst_82 = arith.constant 0.797884583 : f32
    %204 = vector.broadcast %cst_82 : f32 to vector<5x128xf32>
    %205 = arith.mulf %204, %203 : vector<5x128xf32>
    %206 = math.tanh %205 : vector<5x128xf32>
    %cst_83 = arith.constant 1.000000e+00 : f32
    %207 = vector.broadcast %cst_83 : f32 to vector<5x128xf32>
    %208 = arith.addf %207, %206 : vector<5x128xf32>
    %cst_84 = arith.constant 5.000000e-01 : f32
    %209 = vector.broadcast %cst_84 : f32 to vector<5x128xf32>
    %210 = arith.mulf %209, %208 : vector<5x128xf32>
    %211 = arith.mulf %198, %210 : vector<5x128xf32>
    %212 = arith.truncf %211 : vector<5x128xf32> to vector<5x128xbf16>
    %cst_85 = arith.constant dense<0.000000e+00> : vector<8x128xf32>
    %213 = tpu.matmul %18, %212, %cst_85 {dimension_numbers = #tpu.dot_dimension_numbers<[1], [0], [0], [1], [0, 0, 1, 1], [], []>} : vector<8x5xbf16>, vector<5x128xbf16>, vector<8x128xf32> -> vector<8x128xf32>
    %214 = vector.broadcast %19 : vector<8x1xf32> to vector<8x128xf32>
    %215 = arith.addf %213, %214 : vector<8x128xf32>
    %216 = arith.mulf %215, %215 : vector<8x128xf32>
    %217 = arith.mulf %215, %216 : vector<8x128xf32>
    %cst_86 = arith.constant 4.471500e-02 : f32
    %218 = vector.broadcast %cst_86 : f32 to vector<8x128xf32>
    %219 = arith.mulf %218, %217 : vector<8x128xf32>
    %220 = arith.addf %215, %219 : vector<8x128xf32>
    %cst_87 = arith.constant 0.797884583 : f32
    %221 = vector.broadcast %cst_87 : f32 to vector<8x128xf32>
    %222 = arith.mulf %221, %220 : vector<8x128xf32>
    %223 = math.tanh %222 : vector<8x128xf32>
    %cst_88 = arith.constant 1.000000e+00 : f32
    %224 = vector.broadcast %cst_88 : f32 to vector<8x128xf32>
    %225 = arith.addf %224, %223 : vector<8x128xf32>
    %cst_89 = arith.constant 5.000000e-01 : f32
    %226 = vector.broadcast %cst_89 : f32 to vector<8x128xf32>
    %227 = arith.mulf %226, %225 : vector<8x128xf32>
    %228 = arith.mulf %215, %227 : vector<8x128xf32>
    %229 = arith.maximumf %178, %228 : vector<8x128xf32>
    %cst_90 = arith.constant dense<0xFF800000> : vector<128xf32>
    %230 = vector.multi_reduction <maximumf>, %190, %cst_90 [0] : vector<128x128xf32> to vector<128xf32>
    %231 = vector.shape_cast %230 : vector<128xf32> to vector<1x128xf32>
    %232 = vector.broadcast %231 : vector<1x128xf32> to vector<128x128xf32>
    %233 = arith.cmpf oeq, %190, %232 : vector<128x128xf32>
    %cst_91 = arith.constant 1.280000e+02 : f32
    %234 = vector.broadcast %cst_91 : f32 to vector<128x128xf32>
    %235 = arith.select %233, %15, %234 : vector<128x128xi1>, vector<128x128xf32>
    %cst_92 = arith.constant dense<0x7F800000> : vector<128xf32>
    %236 = vector.multi_reduction <minimumf>, %235, %cst_92 [0] : vector<128x128xf32> to vector<128xf32>
    %237 = vector.shape_cast %236 : vector<128xf32> to vector<1x128xf32>
    %238 = vector.broadcast %237 : vector<1x128xf32> to vector<128x128xf32>
    %239 = arith.cmpf oeq, %15, %238 : vector<128x128xf32>
    %cst_93 = arith.constant -1.000000e+30 : f32
    %240 = vector.broadcast %cst_93 : f32 to vector<128x128xf32>
    %241 = arith.select %239, %240, %190 : vector<128x128xi1>, vector<128x128xf32>
    %cst_94 = arith.constant 1.000000e+00 : f32
    %cst_95 = arith.constant 0.000000e+00 : f32
    %242 = vector.broadcast %cst_94 : f32 to vector<128x128xf32>
    %243 = vector.broadcast %cst_95 : f32 to vector<128x128xf32>
    %244 = arith.select %239, %242, %243 : vector<128x128xi1>, vector<128x128xf32>
    %cst_96 = arith.constant dense<0.000000e+00> : vector<2x128xf32>
    %245 = tpu.matmul %5, %244, %cst_96 {dimension_numbers = #tpu.dot_dimension_numbers<[1], [0], [0], [1], [0, 0, 1, 1], [], []>} : vector<2x128xf32>, vector<128x128xf32>, vector<2x128xf32> -> vector<2x128xf32>
    %246 = arith.subf %245, %1 : vector<2x128xf32>
    %247 = arith.truncf %246 : vector<2x128xf32> to vector<2x128xbf16>
    %cst_97 = arith.constant dense<0.000000e+00> : vector<5x128xf32>
    %248 = tpu.matmul %16, %247, %cst_97 {dimension_numbers = #tpu.dot_dimension_numbers<[1], [0], [0], [1], [0, 0, 1, 1], [], []>} : vector<5x2xbf16>, vector<2x128xbf16>, vector<5x128xf32> -> vector<5x128xf32>
    %249 = arith.addf %248, %24 : vector<5x128xf32>
    %250 = arith.mulf %249, %249 : vector<5x128xf32>
    %251 = arith.mulf %249, %250 : vector<5x128xf32>
    %cst_98 = arith.constant 4.471500e-02 : f32
    %252 = vector.broadcast %cst_98 : f32 to vector<5x128xf32>
    %253 = arith.mulf %252, %251 : vector<5x128xf32>
    %254 = arith.addf %249, %253 : vector<5x128xf32>
    %cst_99 = arith.constant 0.797884583 : f32
    %255 = vector.broadcast %cst_99 : f32 to vector<5x128xf32>
    %256 = arith.mulf %255, %254 : vector<5x128xf32>
    %257 = math.tanh %256 : vector<5x128xf32>
    %cst_100 = arith.constant 1.000000e+00 : f32
    %258 = vector.broadcast %cst_100 : f32 to vector<5x128xf32>
    %259 = arith.addf %258, %257 : vector<5x128xf32>
    %cst_101 = arith.constant 5.000000e-01 : f32
    %260 = vector.broadcast %cst_101 : f32 to vector<5x128xf32>
    %261 = arith.mulf %260, %259 : vector<5x128xf32>
    %262 = arith.mulf %249, %261 : vector<5x128xf32>
    %263 = arith.truncf %262 : vector<5x128xf32> to vector<5x128xbf16>
    %cst_102 = arith.constant dense<0.000000e+00> : vector<8x128xf32>
    %264 = tpu.matmul %18, %263, %cst_102 {dimension_numbers = #tpu.dot_dimension_numbers<[1], [0], [0], [1], [0, 0, 1, 1], [], []>} : vector<8x5xbf16>, vector<5x128xbf16>, vector<8x128xf32> -> vector<8x128xf32>
    %265 = vector.broadcast %19 : vector<8x1xf32> to vector<8x128xf32>
    %266 = arith.addf %264, %265 : vector<8x128xf32>
    %267 = arith.mulf %266, %266 : vector<8x128xf32>
    %268 = arith.mulf %266, %267 : vector<8x128xf32>
    %cst_103 = arith.constant 4.471500e-02 : f32
    %269 = vector.broadcast %cst_103 : f32 to vector<8x128xf32>
    %270 = arith.mulf %269, %268 : vector<8x128xf32>
    %271 = arith.addf %266, %270 : vector<8x128xf32>
    %cst_104 = arith.constant 0.797884583 : f32
    %272 = vector.broadcast %cst_104 : f32 to vector<8x128xf32>
    %273 = arith.mulf %272, %271 : vector<8x128xf32>
    %274 = math.tanh %273 : vector<8x128xf32>
    %cst_105 = arith.constant 1.000000e+00 : f32
    %275 = vector.broadcast %cst_105 : f32 to vector<8x128xf32>
    %276 = arith.addf %275, %274 : vector<8x128xf32>
    %cst_106 = arith.constant 5.000000e-01 : f32
    %277 = vector.broadcast %cst_106 : f32 to vector<8x128xf32>
    %278 = arith.mulf %277, %276 : vector<8x128xf32>
    %279 = arith.mulf %266, %278 : vector<8x128xf32>
    %280 = arith.maximumf %229, %279 : vector<8x128xf32>
    %cst_107 = arith.constant dense<0xFF800000> : vector<128xf32>
    %281 = vector.multi_reduction <maximumf>, %241, %cst_107 [0] : vector<128x128xf32> to vector<128xf32>
    %282 = vector.shape_cast %281 : vector<128xf32> to vector<1x128xf32>
    %283 = vector.broadcast %282 : vector<1x128xf32> to vector<128x128xf32>
    %284 = arith.cmpf oeq, %241, %283 : vector<128x128xf32>
    %cst_108 = arith.constant 1.280000e+02 : f32
    %285 = vector.broadcast %cst_108 : f32 to vector<128x128xf32>
    %286 = arith.select %284, %15, %285 : vector<128x128xi1>, vector<128x128xf32>
    %cst_109 = arith.constant dense<0x7F800000> : vector<128xf32>
    %287 = vector.multi_reduction <minimumf>, %286, %cst_109 [0] : vector<128x128xf32> to vector<128xf32>
    %288 = vector.shape_cast %287 : vector<128xf32> to vector<1x128xf32>
    %289 = vector.broadcast %288 : vector<1x128xf32> to vector<128x128xf32>
    %290 = arith.cmpf oeq, %15, %289 : vector<128x128xf32>
    %cst_110 = arith.constant -1.000000e+30 : f32
    %291 = vector.broadcast %cst_110 : f32 to vector<128x128xf32>
    %292 = arith.select %290, %291, %241 : vector<128x128xi1>, vector<128x128xf32>
    %cst_111 = arith.constant 1.000000e+00 : f32
    %cst_112 = arith.constant 0.000000e+00 : f32
    %293 = vector.broadcast %cst_111 : f32 to vector<128x128xf32>
    %294 = vector.broadcast %cst_112 : f32 to vector<128x128xf32>
    %295 = arith.select %290, %293, %294 : vector<128x128xi1>, vector<128x128xf32>
    %cst_113 = arith.constant dense<0.000000e+00> : vector<2x128xf32>
    %296 = tpu.matmul %5, %295, %cst_113 {dimension_numbers = #tpu.dot_dimension_numbers<[1], [0], [0], [1], [0, 0, 1, 1], [], []>} : vector<2x128xf32>, vector<128x128xf32>, vector<2x128xf32> -> vector<2x128xf32>
    %297 = arith.subf %296, %1 : vector<2x128xf32>
    %298 = arith.truncf %297 : vector<2x128xf32> to vector<2x128xbf16>
    %cst_114 = arith.constant dense<0.000000e+00> : vector<5x128xf32>
    %299 = tpu.matmul %16, %298, %cst_114 {dimension_numbers = #tpu.dot_dimension_numbers<[1], [0], [0], [1], [0, 0, 1, 1], [], []>} : vector<5x2xbf16>, vector<2x128xbf16>, vector<5x128xf32> -> vector<5x128xf32>
    %300 = arith.addf %299, %24 : vector<5x128xf32>
    %301 = arith.mulf %300, %300 : vector<5x128xf32>
    %302 = arith.mulf %300, %301 : vector<5x128xf32>
    %cst_115 = arith.constant 4.471500e-02 : f32
    %303 = vector.broadcast %cst_115 : f32 to vector<5x128xf32>
    %304 = arith.mulf %303, %302 : vector<5x128xf32>
    %305 = arith.addf %300, %304 : vector<5x128xf32>
    %cst_116 = arith.constant 0.797884583 : f32
    %306 = vector.broadcast %cst_116 : f32 to vector<5x128xf32>
    %307 = arith.mulf %306, %305 : vector<5x128xf32>
    %308 = math.tanh %307 : vector<5x128xf32>
    %cst_117 = arith.constant 1.000000e+00 : f32
    %309 = vector.broadcast %cst_117 : f32 to vector<5x128xf32>
    %310 = arith.addf %309, %308 : vector<5x128xf32>
    %cst_118 = arith.constant 5.000000e-01 : f32
    %311 = vector.broadcast %cst_118 : f32 to vector<5x128xf32>
    %312 = arith.mulf %311, %310 : vector<5x128xf32>
    %313 = arith.mulf %300, %312 : vector<5x128xf32>
    %314 = arith.truncf %313 : vector<5x128xf32> to vector<5x128xbf16>
    %cst_119 = arith.constant dense<0.000000e+00> : vector<8x128xf32>
    %315 = tpu.matmul %18, %314, %cst_119 {dimension_numbers = #tpu.dot_dimension_numbers<[1], [0], [0], [1], [0, 0, 1, 1], [], []>} : vector<8x5xbf16>, vector<5x128xbf16>, vector<8x128xf32> -> vector<8x128xf32>
    %316 = vector.broadcast %19 : vector<8x1xf32> to vector<8x128xf32>
    %317 = arith.addf %315, %316 : vector<8x128xf32>
    %318 = arith.mulf %317, %317 : vector<8x128xf32>
    %319 = arith.mulf %317, %318 : vector<8x128xf32>
    %cst_120 = arith.constant 4.471500e-02 : f32
    %320 = vector.broadcast %cst_120 : f32 to vector<8x128xf32>
    %321 = arith.mulf %320, %319 : vector<8x128xf32>
    %322 = arith.addf %317, %321 : vector<8x128xf32>
    %cst_121 = arith.constant 0.797884583 : f32
    %323 = vector.broadcast %cst_121 : f32 to vector<8x128xf32>
    %324 = arith.mulf %323, %322 : vector<8x128xf32>
    %325 = math.tanh %324 : vector<8x128xf32>
    %cst_122 = arith.constant 1.000000e+00 : f32
    %326 = vector.broadcast %cst_122 : f32 to vector<8x128xf32>
    %327 = arith.addf %326, %325 : vector<8x128xf32>
    %cst_123 = arith.constant 5.000000e-01 : f32
    %328 = vector.broadcast %cst_123 : f32 to vector<8x128xf32>
    %329 = arith.mulf %328, %327 : vector<8x128xf32>
    %330 = arith.mulf %317, %329 : vector<8x128xf32>
    %331 = arith.maximumf %280, %330 : vector<8x128xf32>
    %cst_124 = arith.constant dense<0xFF800000> : vector<128xf32>
    %332 = vector.multi_reduction <maximumf>, %292, %cst_124 [0] : vector<128x128xf32> to vector<128xf32>
    %333 = vector.shape_cast %332 : vector<128xf32> to vector<1x128xf32>
    %334 = vector.broadcast %333 : vector<1x128xf32> to vector<128x128xf32>
    %335 = arith.cmpf oeq, %292, %334 : vector<128x128xf32>
    %cst_125 = arith.constant 1.280000e+02 : f32
    %336 = vector.broadcast %cst_125 : f32 to vector<128x128xf32>
    %337 = arith.select %335, %15, %336 : vector<128x128xi1>, vector<128x128xf32>
    %cst_126 = arith.constant dense<0x7F800000> : vector<128xf32>
    %338 = vector.multi_reduction <minimumf>, %337, %cst_126 [0] : vector<128x128xf32> to vector<128xf32>
    %339 = vector.shape_cast %338 : vector<128xf32> to vector<1x128xf32>
    %340 = vector.broadcast %339 : vector<1x128xf32> to vector<128x128xf32>
    %341 = arith.cmpf oeq, %15, %340 : vector<128x128xf32>
    %cst_127 = arith.constant -1.000000e+30 : f32
    %342 = vector.broadcast %cst_127 : f32 to vector<128x128xf32>
    %343 = arith.select %341, %342, %292 : vector<128x128xi1>, vector<128x128xf32>
    %cst_128 = arith.constant 1.000000e+00 : f32
    %cst_129 = arith.constant 0.000000e+00 : f32
    %344 = vector.broadcast %cst_128 : f32 to vector<128x128xf32>
    %345 = vector.broadcast %cst_129 : f32 to vector<128x128xf32>
    %346 = arith.select %341, %344, %345 : vector<128x128xi1>, vector<128x128xf32>
    %cst_130 = arith.constant dense<0.000000e+00> : vector<2x128xf32>
    %347 = tpu.matmul %5, %346, %cst_130 {dimension_numbers = #tpu.dot_dimension_numbers<[1], [0], [0], [1], [0, 0, 1, 1], [], []>} : vector<2x128xf32>, vector<128x128xf32>, vector<2x128xf32> -> vector<2x128xf32>
    %348 = arith.subf %347, %1 : vector<2x128xf32>
    %349 = arith.truncf %348 : vector<2x128xf32> to vector<2x128xbf16>
    %cst_131 = arith.constant dense<0.000000e+00> : vector<5x128xf32>
    %350 = tpu.matmul %16, %349, %cst_131 {dimension_numbers = #tpu.dot_dimension_numbers<[1], [0], [0], [1], [0, 0, 1, 1], [], []>} : vector<5x2xbf16>, vector<2x128xbf16>, vector<5x128xf32> -> vector<5x128xf32>
    %351 = arith.addf %350, %24 : vector<5x128xf32>
    %352 = arith.mulf %351, %351 : vector<5x128xf32>
    %353 = arith.mulf %351, %352 : vector<5x128xf32>
    %cst_132 = arith.constant 4.471500e-02 : f32
    %354 = vector.broadcast %cst_132 : f32 to vector<5x128xf32>
    %355 = arith.mulf %354, %353 : vector<5x128xf32>
    %356 = arith.addf %351, %355 : vector<5x128xf32>
    %cst_133 = arith.constant 0.797884583 : f32
    %357 = vector.broadcast %cst_133 : f32 to vector<5x128xf32>
    %358 = arith.mulf %357, %356 : vector<5x128xf32>
    %359 = math.tanh %358 : vector<5x128xf32>
    %cst_134 = arith.constant 1.000000e+00 : f32
    %360 = vector.broadcast %cst_134 : f32 to vector<5x128xf32>
    %361 = arith.addf %360, %359 : vector<5x128xf32>
    %cst_135 = arith.constant 5.000000e-01 : f32
    %362 = vector.broadcast %cst_135 : f32 to vector<5x128xf32>
    %363 = arith.mulf %362, %361 : vector<5x128xf32>
    %364 = arith.mulf %351, %363 : vector<5x128xf32>
    %365 = arith.truncf %364 : vector<5x128xf32> to vector<5x128xbf16>
    %cst_136 = arith.constant dense<0.000000e+00> : vector<8x128xf32>
    %366 = tpu.matmul %18, %365, %cst_136 {dimension_numbers = #tpu.dot_dimension_numbers<[1], [0], [0], [1], [0, 0, 1, 1], [], []>} : vector<8x5xbf16>, vector<5x128xbf16>, vector<8x128xf32> -> vector<8x128xf32>
    %367 = vector.broadcast %19 : vector<8x1xf32> to vector<8x128xf32>
    %368 = arith.addf %366, %367 : vector<8x128xf32>
    %369 = arith.mulf %368, %368 : vector<8x128xf32>
    %370 = arith.mulf %368, %369 : vector<8x128xf32>
    %cst_137 = arith.constant 4.471500e-02 : f32
    %371 = vector.broadcast %cst_137 : f32 to vector<8x128xf32>
    %372 = arith.mulf %371, %370 : vector<8x128xf32>
    %373 = arith.addf %368, %372 : vector<8x128xf32>
    %cst_138 = arith.constant 0.797884583 : f32
    %374 = vector.broadcast %cst_138 : f32 to vector<8x128xf32>
    %375 = arith.mulf %374, %373 : vector<8x128xf32>
    %376 = math.tanh %375 : vector<8x128xf32>
    %cst_139 = arith.constant 1.000000e+00 : f32
    %377 = vector.broadcast %cst_139 : f32 to vector<8x128xf32>
    %378 = arith.addf %377, %376 : vector<8x128xf32>
    %cst_140 = arith.constant 5.000000e-01 : f32
    %379 = vector.broadcast %cst_140 : f32 to vector<8x128xf32>
    %380 = arith.mulf %379, %378 : vector<8x128xf32>
    %381 = arith.mulf %368, %380 : vector<8x128xf32>
    %382 = arith.maximumf %331, %381 : vector<8x128xf32>
    %cst_141 = arith.constant dense<0xFF800000> : vector<128xf32>
    %383 = vector.multi_reduction <maximumf>, %343, %cst_141 [0] : vector<128x128xf32> to vector<128xf32>
    %384 = vector.shape_cast %383 : vector<128xf32> to vector<1x128xf32>
    %385 = vector.broadcast %384 : vector<1x128xf32> to vector<128x128xf32>
    %386 = arith.cmpf oeq, %343, %385 : vector<128x128xf32>
    %cst_142 = arith.constant 1.280000e+02 : f32
    %387 = vector.broadcast %cst_142 : f32 to vector<128x128xf32>
    %388 = arith.select %386, %15, %387 : vector<128x128xi1>, vector<128x128xf32>
    %cst_143 = arith.constant dense<0x7F800000> : vector<128xf32>
    %389 = vector.multi_reduction <minimumf>, %388, %cst_143 [0] : vector<128x128xf32> to vector<128xf32>
    %390 = vector.shape_cast %389 : vector<128xf32> to vector<1x128xf32>
    %391 = vector.broadcast %390 : vector<1x128xf32> to vector<128x128xf32>
    %392 = arith.cmpf oeq, %15, %391 : vector<128x128xf32>
    %cst_144 = arith.constant 1.000000e+00 : f32
    %cst_145 = arith.constant 0.000000e+00 : f32
    %393 = vector.broadcast %cst_144 : f32 to vector<128x128xf32>
    %394 = vector.broadcast %cst_145 : f32 to vector<128x128xf32>
    %395 = arith.select %392, %393, %394 : vector<128x128xi1>, vector<128x128xf32>
    %cst_146 = arith.constant dense<0.000000e+00> : vector<2x128xf32>
    %396 = tpu.matmul %5, %395, %cst_146 {dimension_numbers = #tpu.dot_dimension_numbers<[1], [0], [0], [1], [0, 0, 1, 1], [], []>} : vector<2x128xf32>, vector<128x128xf32>, vector<2x128xf32> -> vector<2x128xf32>
    %397 = arith.subf %396, %1 : vector<2x128xf32>
    %398 = arith.truncf %397 : vector<2x128xf32> to vector<2x128xbf16>
    %cst_147 = arith.constant dense<0.000000e+00> : vector<5x128xf32>
    %399 = tpu.matmul %16, %398, %cst_147 {dimension_numbers = #tpu.dot_dimension_numbers<[1], [0], [0], [1], [0, 0, 1, 1], [], []>} : vector<5x2xbf16>, vector<2x128xbf16>, vector<5x128xf32> -> vector<5x128xf32>
    %400 = arith.addf %399, %24 : vector<5x128xf32>
    %401 = arith.mulf %400, %400 : vector<5x128xf32>
    %402 = arith.mulf %400, %401 : vector<5x128xf32>
    %cst_148 = arith.constant 4.471500e-02 : f32
    %403 = vector.broadcast %cst_148 : f32 to vector<5x128xf32>
    %404 = arith.mulf %403, %402 : vector<5x128xf32>
    %405 = arith.addf %400, %404 : vector<5x128xf32>
    %cst_149 = arith.constant 0.797884583 : f32
    %406 = vector.broadcast %cst_149 : f32 to vector<5x128xf32>
    %407 = arith.mulf %406, %405 : vector<5x128xf32>
    %408 = math.tanh %407 : vector<5x128xf32>
    %cst_150 = arith.constant 1.000000e+00 : f32
    %409 = vector.broadcast %cst_150 : f32 to vector<5x128xf32>
    %410 = arith.addf %409, %408 : vector<5x128xf32>
    %cst_151 = arith.constant 5.000000e-01 : f32
    %411 = vector.broadcast %cst_151 : f32 to vector<5x128xf32>
    %412 = arith.mulf %411, %410 : vector<5x128xf32>
    %413 = arith.mulf %400, %412 : vector<5x128xf32>
    %414 = arith.truncf %413 : vector<5x128xf32> to vector<5x128xbf16>
    %cst_152 = arith.constant dense<0.000000e+00> : vector<8x128xf32>
    %415 = tpu.matmul %18, %414, %cst_152 {dimension_numbers = #tpu.dot_dimension_numbers<[1], [0], [0], [1], [0, 0, 1, 1], [], []>} : vector<8x5xbf16>, vector<5x128xbf16>, vector<8x128xf32> -> vector<8x128xf32>
    %416 = vector.broadcast %19 : vector<8x1xf32> to vector<8x128xf32>
    %417 = arith.addf %415, %416 : vector<8x128xf32>
    %418 = arith.mulf %417, %417 : vector<8x128xf32>
    %419 = arith.mulf %417, %418 : vector<8x128xf32>
    %cst_153 = arith.constant 4.471500e-02 : f32
    %420 = vector.broadcast %cst_153 : f32 to vector<8x128xf32>
    %421 = arith.mulf %420, %419 : vector<8x128xf32>
    %422 = arith.addf %417, %421 : vector<8x128xf32>
    %cst_154 = arith.constant 0.797884583 : f32
    %423 = vector.broadcast %cst_154 : f32 to vector<8x128xf32>
    %424 = arith.mulf %423, %422 : vector<8x128xf32>
    %425 = math.tanh %424 : vector<8x128xf32>
    %cst_155 = arith.constant 1.000000e+00 : f32
    %426 = vector.broadcast %cst_155 : f32 to vector<8x128xf32>
    %427 = arith.addf %426, %425 : vector<8x128xf32>
    %cst_156 = arith.constant 5.000000e-01 : f32
    %428 = vector.broadcast %cst_156 : f32 to vector<8x128xf32>
    %429 = arith.mulf %428, %427 : vector<8x128xf32>
    %430 = arith.mulf %417, %429 : vector<8x128xf32>
    %431 = arith.maximumf %382, %430 : vector<8x128xf32>
    %432 = arith.truncf %431 : vector<8x128xf32> to vector<8x128xbf16>
    %c0_157 = arith.constant 0 : index
    %c0_158 = arith.constant 0 : index
    %c0_159 = arith.constant 0 : index
    %433 = vector.load %arg10[%c0_157, %c0_158, %c0_159] : memref<1x8x128xbf16, #tpu.memory_space<vmem>>, vector<1x8x128xbf16>
    %434 = vector.shape_cast %433 : vector<1x8x128xbf16> to vector<8x128xbf16>
    %435 = vector.shape_cast %432 : vector<8x128xbf16> to vector<1x8x128xbf16>
    tpu.vector_store %arg10[%c0_157, %c0_158, %c0_159], %435 {strides = array<i32>} : memref<1x8x128xbf16, #tpu.memory_space<vmem>>, vector<1x8x128xbf16>,
    return
  }
  func.func @transform_0(%arg0: i32, %arg1: i32) -> (i32, i32, i32) {
    %c0_i32 = arith.constant 0 : i32
    %c0_i32_0 = arith.constant 0 : i32
    return %arg0, %c0_i32, %arg1 : i32, i32, i32
  }
  func.func @transform_1(%arg0: i32, %arg1: i32) -> (i32, i32, i32) {
    %c0_i32 = arith.constant 0 : i32
    %c0_i32_0 = arith.constant 0 : i32
    %c0_i32_1 = arith.constant 0 : i32
    return %arg0, %c0_i32, %c0_i32_0 : i32, i32, i32
  }
  func.func @transform_2(%arg0: i32, %arg1: i32) -> (i32, i32, i32) {
    %c0_i32 = arith.constant 0 : i32
    %c0_i32_0 = arith.constant 0 : i32
    %c0_i32_1 = arith.constant 0 : i32
    return %arg0, %c0_i32, %c0_i32_0 : i32, i32, i32
  }
  func.func @transform_3(%arg0: i32, %arg1: i32) -> (i32, i32) {
    %c0_i32 = arith.constant 0 : i32
    %c0_i32_0 = arith.constant 0 : i32
    %c0_i32_1 = arith.constant 0 : i32
    return %c0_i32, %c0_i32_0 : i32, i32
  }
  func.func @transform_4(%arg0: i32, %arg1: i32) -> (i32, i32) {
    %c0_i32 = arith.constant 0 : i32
    %c0_i32_0 = arith.constant 0 : i32
    %c0_i32_1 = arith.constant 0 : i32
    return %c0_i32, %c0_i32_0 : i32, i32
  }
  func.func @transform_5(%arg0: i32, %arg1: i32) -> (i32, i32) {
    %c0_i32 = arith.constant 0 : i32
    %c0_i32_0 = arith.constant 0 : i32
    %c0_i32_1 = arith.constant 0 : i32
    return %c0_i32, %c0_i32_0 : i32, i32
  }
  func.func @transform_6(%arg0: i32, %arg1: i32) -> (i32, i32) {
    %c0_i32 = arith.constant 0 : i32
    %c0_i32_0 = arith.constant 0 : i32
    %c0_i32_1 = arith.constant 0 : i32
    return %c0_i32, %c0_i32_0 : i32, i32
  }
  func.func @transform_7(%arg0: i32, %arg1: i32) -> (i32, i32) {
    %c0_i32 = arith.constant 0 : i32
    %c0_i32_0 = arith.constant 0 : i32
    %c0_i32_1 = arith.constant 0 : i32
    return %c0_i32, %c0_i32_0 : i32, i32
  }
  func.func @transform_8(%arg0: i32, %arg1: i32) -> (i32, i32, i32) {
    %c0_i32 = arith.constant 0 : i32
    %c0_i32_0 = arith.constant 0 : i32
    return %arg0, %c0_i32, %arg1 : i32, i32, i32
  }
}

module attributes {stable_mosaic.version = 11 : i64} {
  func.func @_edge_layer_kernel(%arg0: i32, %arg1: i32, %arg2: memref<1x8x128xbf16, #tpu.memory_space<vmem>>, %arg3: memref<1x128x8xbf16, #tpu.memory_space<vmem>>, %arg4: memref<1x8x128xbf16, #tpu.memory_space<vmem>>, %arg5: memref<22x8xbf16, #tpu.memory_space<vmem>>, %arg6: memref<22x8xbf16, #tpu.memory_space<vmem>>, %arg7: memref<22x1xf32, #tpu.memory_space<vmem>>, %arg8: memref<32x22xbf16, #tpu.memory_space<vmem>>, %arg9: memref<32x1xf32, #tpu.memory_space<vmem>>, %arg10: memref<1x32x128xbf16, #tpu.memory_space<vmem>>) attributes {dimension_semantics = [#tpu.dimension_semantics<parallel>, #tpu.dimension_semantics<parallel>], iteration_bounds = array<i64: 2, 1>, scalar_prefetch = 0 : i64, scratch_operands = 0 : i64, tpu.core_type = #tpu.core_type<tc>, window_params = [{transform_indices = @transform_0, window_bounds = array<i64: 1, 8, 128>}, {transform_indices = @transform_1, window_bounds = array<i64: 1, 128, 8>}, {transform_indices = @transform_2, window_bounds = array<i64: 1, 8, 128>}, {pipeline_mode = #tpu.pipeline_mode<synchronous>, transform_indices = @transform_3, window_bounds = array<i64: 22, 8>}, {pipeline_mode = #tpu.pipeline_mode<synchronous>, transform_indices = @transform_4, window_bounds = array<i64: 22, 8>}, {pipeline_mode = #tpu.pipeline_mode<synchronous>, transform_indices = @transform_5, window_bounds = array<i64: 22, 1>}, {pipeline_mode = #tpu.pipeline_mode<synchronous>, transform_indices = @transform_6, window_bounds = array<i64: 32, 22>}, {pipeline_mode = #tpu.pipeline_mode<synchronous>, transform_indices = @transform_7, window_bounds = array<i64: 32, 1>}, {transform_indices = @transform_8, window_bounds = array<i64: 1, 32, 128>}]} {
    %c0 = arith.constant 0 : index
    %c0_0 = arith.constant 0 : index
    %c0_1 = arith.constant 0 : index
    %0 = vector.load %arg2[%c0, %c0_0, %c0_1] : memref<1x8x128xbf16, #tpu.memory_space<vmem>>, vector<1x8x128xbf16>
    %1 = vector.shape_cast %0 : vector<1x8x128xbf16> to vector<8x128xbf16>
    %c0_2 = arith.constant 0 : index
    %c0_3 = arith.constant 0 : index
    %c0_4 = arith.constant 0 : index
    %2 = vector.load %arg3[%c0_2, %c0_3, %c0_4] : memref<1x128x8xbf16, #tpu.memory_space<vmem>>, vector<1x128x8xbf16>
    %3 = vector.shape_cast %2 : vector<1x128x8xbf16> to vector<128x8xbf16>
    %c0_5 = arith.constant 0 : index
    %c0_6 = arith.constant 0 : index
    %c0_7 = arith.constant 0 : index
    %4 = vector.load %arg4[%c0_5, %c0_6, %c0_7] : memref<1x8x128xbf16, #tpu.memory_space<vmem>>, vector<1x8x128xbf16>
    %5 = vector.shape_cast %4 : vector<1x8x128xbf16> to vector<8x128xbf16>
    %cst = arith.constant dense<0.000000e+00> : vector<128x128xf32>
    %6 = tpu.matmul %3, %1, %cst {dimension_numbers = #tpu.dot_dimension_numbers<[1], [0], [0], [1], [0, 0, 1, 1], [], []>} : vector<128x8xbf16>, vector<8x128xbf16>, vector<128x128xf32> -> vector<128x128xf32>
    %7 = arith.extf %3 : vector<128x8xbf16> to vector<128x8xf32>
    %8 = arith.extf %3 : vector<128x8xbf16> to vector<128x8xf32>
    %9 = arith.mulf %7, %8 : vector<128x8xf32>
    %cst_8 = arith.constant dense<0.000000e+00> : vector<128xf32>
    %10 = vector.multi_reduction <add>, %9, %cst_8 [1] : vector<128x8xf32> to vector<128xf32>
    %11 = vector.shape_cast %10 : vector<128xf32> to vector<128x1xf32>
    %cst_9 = arith.constant 2.000000e+00 : f32
    %12 = vector.broadcast %cst_9 : f32 to vector<128x128xf32>
    %13 = arith.mulf %12, %6 : vector<128x128xf32>
    %14 = vector.broadcast %11 : vector<128x1xf32> to vector<128x128xf32>
    %15 = arith.subf %13, %14 : vector<128x128xf32>
    %16 = tpu.iota {dimensions = array<i32: 0>} : vector<128x128xi32>
    %17 = arith.sitofp %16 : vector<128x128xi32> to vector<128x128xf32>
    %c0_10 = arith.constant 0 : index
    %c0_11 = arith.constant 0 : index
    %18 = vector.load %arg5[%c0_10, %c0_11] : memref<22x8xbf16, #tpu.memory_space<vmem>>, vector<22x8xbf16>
    %c0_12 = arith.constant 0 : index
    %c0_13 = arith.constant 0 : index
    %19 = vector.load %arg6[%c0_12, %c0_13] : memref<22x8xbf16, #tpu.memory_space<vmem>>, vector<22x8xbf16>
    %c0_14 = arith.constant 0 : index
    %c0_15 = arith.constant 0 : index
    %20 = vector.load %arg8[%c0_14, %c0_15] : memref<32x22xbf16, #tpu.memory_space<vmem>>, vector<32x22xbf16>
    %c0_16 = arith.constant 0 : index
    %c0_17 = arith.constant 0 : index
    %21 = vector.load %arg9[%c0_16, %c0_17] : memref<32x1xf32, #tpu.memory_space<vmem>>, vector<32x1xf32>
    %22 = arith.extf %1 : vector<8x128xbf16> to vector<8x128xf32>
    %cst_18 = arith.constant dense<0.000000e+00> : vector<22x128xf32>
    %23 = tpu.matmul %19, %1, %cst_18 {dimension_numbers = #tpu.dot_dimension_numbers<[1], [0], [0], [1], [0, 0, 1, 1], [], []>} : vector<22x8xbf16>, vector<8x128xbf16>, vector<22x128xf32> -> vector<22x128xf32>
    %c0_19 = arith.constant 0 : index
    %c0_20 = arith.constant 0 : index
    %24 = vector.load %arg7[%c0_19, %c0_20] : memref<22x1xf32, #tpu.memory_space<vmem>>, vector<22x1xf32>
    %25 = vector.broadcast %24 : vector<22x1xf32> to vector<22x128xf32>
    %26 = arith.addf %23, %25 : vector<22x128xf32>
    %cst_21 = arith.constant 0xFF800000 : f32
    %27 = vector.broadcast %cst_21 : f32 to vector<32x128xf32>
    %cst_22 = arith.constant dense<0xFF800000> : vector<128xf32>
    %28 = vector.multi_reduction <maximumf>, %15, %cst_22 [0] : vector<128x128xf32> to vector<128xf32>
    %29 = vector.shape_cast %28 : vector<128xf32> to vector<1x128xf32>
    %30 = vector.broadcast %29 : vector<1x128xf32> to vector<128x128xf32>
    %31 = arith.cmpf oeq, %15, %30 : vector<128x128xf32>
    %cst_23 = arith.constant 1.280000e+02 : f32
    %32 = vector.broadcast %cst_23 : f32 to vector<128x128xf32>
    %33 = arith.select %31, %17, %32 : vector<128x128xi1>, vector<128x128xf32>
    %cst_24 = arith.constant dense<0x7F800000> : vector<128xf32>
    %34 = vector.multi_reduction <minimumf>, %33, %cst_24 [0] : vector<128x128xf32> to vector<128xf32>
    %35 = vector.shape_cast %34 : vector<128xf32> to vector<1x128xf32>
    %36 = vector.broadcast %35 : vector<1x128xf32> to vector<128x128xf32>
    %37 = arith.cmpf oeq, %17, %36 : vector<128x128xf32>
    %cst_25 = arith.constant -1.000000e+30 : f32
    %38 = vector.broadcast %cst_25 : f32 to vector<128x128xf32>
    %39 = arith.select %37, %38, %15 : vector<128x128xi1>, vector<128x128xf32>
    %cst_26 = arith.constant 1.000000e+00 : f32
    %cst_27 = arith.constant 0.000000e+00 : f32
    %40 = vector.broadcast %cst_26 : f32 to vector<128x128xf32>
    %41 = vector.broadcast %cst_27 : f32 to vector<128x128xf32>
    %42 = arith.select %37, %40, %41 : vector<128x128xi1>, vector<128x128xf32>
    %43 = arith.truncf %42 : vector<128x128xf32> to vector<128x128xbf16>
    %cst_28 = arith.constant dense<0.000000e+00> : vector<8x128xf32>
    %44 = tpu.matmul %5, %43, %cst_28 {dimension_numbers = #tpu.dot_dimension_numbers<[1], [0], [0], [1], [0, 0, 1, 1], [], []>} : vector<8x128xbf16>, vector<128x128xbf16>, vector<8x128xf32> -> vector<8x128xf32>
    %45 = arith.subf %44, %22 : vector<8x128xf32>
    %46 = arith.truncf %45 : vector<8x128xf32> to vector<8x128xbf16>
    %cst_29 = arith.constant dense<0.000000e+00> : vector<22x128xf32>
    %47 = tpu.matmul %18, %46, %cst_29 {dimension_numbers = #tpu.dot_dimension_numbers<[1], [0], [0], [1], [0, 0, 1, 1], [], []>} : vector<22x8xbf16>, vector<8x128xbf16>, vector<22x128xf32> -> vector<22x128xf32>
    %48 = arith.addf %47, %26 : vector<22x128xf32>
    %49 = arith.mulf %48, %48 : vector<22x128xf32>
    %50 = arith.mulf %48, %49 : vector<22x128xf32>
    %cst_30 = arith.constant 4.471500e-02 : f32
    %51 = vector.broadcast %cst_30 : f32 to vector<22x128xf32>
    %52 = arith.mulf %51, %50 : vector<22x128xf32>
    %53 = arith.addf %48, %52 : vector<22x128xf32>
    %cst_31 = arith.constant 0.797884583 : f32
    %54 = vector.broadcast %cst_31 : f32 to vector<22x128xf32>
    %55 = arith.mulf %54, %53 : vector<22x128xf32>
    %56 = math.tanh %55 : vector<22x128xf32>
    %cst_32 = arith.constant 1.000000e+00 : f32
    %57 = vector.broadcast %cst_32 : f32 to vector<22x128xf32>
    %58 = arith.addf %57, %56 : vector<22x128xf32>
    %cst_33 = arith.constant 5.000000e-01 : f32
    %59 = vector.broadcast %cst_33 : f32 to vector<22x128xf32>
    %60 = arith.mulf %59, %58 : vector<22x128xf32>
    %61 = arith.mulf %48, %60 : vector<22x128xf32>
    %62 = arith.truncf %61 : vector<22x128xf32> to vector<22x128xbf16>
    %cst_34 = arith.constant dense<0.000000e+00> : vector<32x128xf32>
    %63 = tpu.matmul %20, %62, %cst_34 {dimension_numbers = #tpu.dot_dimension_numbers<[1], [0], [0], [1], [0, 0, 1, 1], [], []>} : vector<32x22xbf16>, vector<22x128xbf16>, vector<32x128xf32> -> vector<32x128xf32>
    %64 = vector.broadcast %21 : vector<32x1xf32> to vector<32x128xf32>
    %65 = arith.addf %63, %64 : vector<32x128xf32>
    %66 = arith.mulf %65, %65 : vector<32x128xf32>
    %67 = arith.mulf %65, %66 : vector<32x128xf32>
    %cst_35 = arith.constant 4.471500e-02 : f32
    %68 = vector.broadcast %cst_35 : f32 to vector<32x128xf32>
    %69 = arith.mulf %68, %67 : vector<32x128xf32>
    %70 = arith.addf %65, %69 : vector<32x128xf32>
    %cst_36 = arith.constant 0.797884583 : f32
    %71 = vector.broadcast %cst_36 : f32 to vector<32x128xf32>
    %72 = arith.mulf %71, %70 : vector<32x128xf32>
    %73 = math.tanh %72 : vector<32x128xf32>
    %cst_37 = arith.constant 1.000000e+00 : f32
    %74 = vector.broadcast %cst_37 : f32 to vector<32x128xf32>
    %75 = arith.addf %74, %73 : vector<32x128xf32>
    %cst_38 = arith.constant 5.000000e-01 : f32
    %76 = vector.broadcast %cst_38 : f32 to vector<32x128xf32>
    %77 = arith.mulf %76, %75 : vector<32x128xf32>
    %78 = arith.mulf %65, %77 : vector<32x128xf32>
    %79 = arith.maximumf %27, %78 : vector<32x128xf32>
    %cst_39 = arith.constant dense<0xFF800000> : vector<128xf32>
    %80 = vector.multi_reduction <maximumf>, %39, %cst_39 [0] : vector<128x128xf32> to vector<128xf32>
    %81 = vector.shape_cast %80 : vector<128xf32> to vector<1x128xf32>
    %82 = vector.broadcast %81 : vector<1x128xf32> to vector<128x128xf32>
    %83 = arith.cmpf oeq, %39, %82 : vector<128x128xf32>
    %cst_40 = arith.constant 1.280000e+02 : f32
    %84 = vector.broadcast %cst_40 : f32 to vector<128x128xf32>
    %85 = arith.select %83, %17, %84 : vector<128x128xi1>, vector<128x128xf32>
    %cst_41 = arith.constant dense<0x7F800000> : vector<128xf32>
    %86 = vector.multi_reduction <minimumf>, %85, %cst_41 [0] : vector<128x128xf32> to vector<128xf32>
    %87 = vector.shape_cast %86 : vector<128xf32> to vector<1x128xf32>
    %88 = vector.broadcast %87 : vector<1x128xf32> to vector<128x128xf32>
    %89 = arith.cmpf oeq, %17, %88 : vector<128x128xf32>
    %cst_42 = arith.constant -1.000000e+30 : f32
    %90 = vector.broadcast %cst_42 : f32 to vector<128x128xf32>
    %91 = arith.select %89, %90, %39 : vector<128x128xi1>, vector<128x128xf32>
    %cst_43 = arith.constant 1.000000e+00 : f32
    %cst_44 = arith.constant 0.000000e+00 : f32
    %92 = vector.broadcast %cst_43 : f32 to vector<128x128xf32>
    %93 = vector.broadcast %cst_44 : f32 to vector<128x128xf32>
    %94 = arith.select %89, %92, %93 : vector<128x128xi1>, vector<128x128xf32>
    %95 = arith.truncf %94 : vector<128x128xf32> to vector<128x128xbf16>
    %cst_45 = arith.constant dense<0.000000e+00> : vector<8x128xf32>
    %96 = tpu.matmul %5, %95, %cst_45 {dimension_numbers = #tpu.dot_dimension_numbers<[1], [0], [0], [1], [0, 0, 1, 1], [], []>} : vector<8x128xbf16>, vector<128x128xbf16>, vector<8x128xf32> -> vector<8x128xf32>
    %97 = arith.subf %96, %22 : vector<8x128xf32>
    %98 = arith.truncf %97 : vector<8x128xf32> to vector<8x128xbf16>
    %cst_46 = arith.constant dense<0.000000e+00> : vector<22x128xf32>
    %99 = tpu.matmul %18, %98, %cst_46 {dimension_numbers = #tpu.dot_dimension_numbers<[1], [0], [0], [1], [0, 0, 1, 1], [], []>} : vector<22x8xbf16>, vector<8x128xbf16>, vector<22x128xf32> -> vector<22x128xf32>
    %100 = arith.addf %99, %26 : vector<22x128xf32>
    %101 = arith.mulf %100, %100 : vector<22x128xf32>
    %102 = arith.mulf %100, %101 : vector<22x128xf32>
    %cst_47 = arith.constant 4.471500e-02 : f32
    %103 = vector.broadcast %cst_47 : f32 to vector<22x128xf32>
    %104 = arith.mulf %103, %102 : vector<22x128xf32>
    %105 = arith.addf %100, %104 : vector<22x128xf32>
    %cst_48 = arith.constant 0.797884583 : f32
    %106 = vector.broadcast %cst_48 : f32 to vector<22x128xf32>
    %107 = arith.mulf %106, %105 : vector<22x128xf32>
    %108 = math.tanh %107 : vector<22x128xf32>
    %cst_49 = arith.constant 1.000000e+00 : f32
    %109 = vector.broadcast %cst_49 : f32 to vector<22x128xf32>
    %110 = arith.addf %109, %108 : vector<22x128xf32>
    %cst_50 = arith.constant 5.000000e-01 : f32
    %111 = vector.broadcast %cst_50 : f32 to vector<22x128xf32>
    %112 = arith.mulf %111, %110 : vector<22x128xf32>
    %113 = arith.mulf %100, %112 : vector<22x128xf32>
    %114 = arith.truncf %113 : vector<22x128xf32> to vector<22x128xbf16>
    %cst_51 = arith.constant dense<0.000000e+00> : vector<32x128xf32>
    %115 = tpu.matmul %20, %114, %cst_51 {dimension_numbers = #tpu.dot_dimension_numbers<[1], [0], [0], [1], [0, 0, 1, 1], [], []>} : vector<32x22xbf16>, vector<22x128xbf16>, vector<32x128xf32> -> vector<32x128xf32>
    %116 = vector.broadcast %21 : vector<32x1xf32> to vector<32x128xf32>
    %117 = arith.addf %115, %116 : vector<32x128xf32>
    %118 = arith.mulf %117, %117 : vector<32x128xf32>
    %119 = arith.mulf %117, %118 : vector<32x128xf32>
    %cst_52 = arith.constant 4.471500e-02 : f32
    %120 = vector.broadcast %cst_52 : f32 to vector<32x128xf32>
    %121 = arith.mulf %120, %119 : vector<32x128xf32>
    %122 = arith.addf %117, %121 : vector<32x128xf32>
    %cst_53 = arith.constant 0.797884583 : f32
    %123 = vector.broadcast %cst_53 : f32 to vector<32x128xf32>
    %124 = arith.mulf %123, %122 : vector<32x128xf32>
    %125 = math.tanh %124 : vector<32x128xf32>
    %cst_54 = arith.constant 1.000000e+00 : f32
    %126 = vector.broadcast %cst_54 : f32 to vector<32x128xf32>
    %127 = arith.addf %126, %125 : vector<32x128xf32>
    %cst_55 = arith.constant 5.000000e-01 : f32
    %128 = vector.broadcast %cst_55 : f32 to vector<32x128xf32>
    %129 = arith.mulf %128, %127 : vector<32x128xf32>
    %130 = arith.mulf %117, %129 : vector<32x128xf32>
    %131 = arith.maximumf %79, %130 : vector<32x128xf32>
    %cst_56 = arith.constant dense<0xFF800000> : vector<128xf32>
    %132 = vector.multi_reduction <maximumf>, %91, %cst_56 [0] : vector<128x128xf32> to vector<128xf32>
    %133 = vector.shape_cast %132 : vector<128xf32> to vector<1x128xf32>
    %134 = vector.broadcast %133 : vector<1x128xf32> to vector<128x128xf32>
    %135 = arith.cmpf oeq, %91, %134 : vector<128x128xf32>
    %cst_57 = arith.constant 1.280000e+02 : f32
    %136 = vector.broadcast %cst_57 : f32 to vector<128x128xf32>
    %137 = arith.select %135, %17, %136 : vector<128x128xi1>, vector<128x128xf32>
    %cst_58 = arith.constant dense<0x7F800000> : vector<128xf32>
    %138 = vector.multi_reduction <minimumf>, %137, %cst_58 [0] : vector<128x128xf32> to vector<128xf32>
    %139 = vector.shape_cast %138 : vector<128xf32> to vector<1x128xf32>
    %140 = vector.broadcast %139 : vector<1x128xf32> to vector<128x128xf32>
    %141 = arith.cmpf oeq, %17, %140 : vector<128x128xf32>
    %cst_59 = arith.constant -1.000000e+30 : f32
    %142 = vector.broadcast %cst_59 : f32 to vector<128x128xf32>
    %143 = arith.select %141, %142, %91 : vector<128x128xi1>, vector<128x128xf32>
    %cst_60 = arith.constant 1.000000e+00 : f32
    %cst_61 = arith.constant 0.000000e+00 : f32
    %144 = vector.broadcast %cst_60 : f32 to vector<128x128xf32>
    %145 = vector.broadcast %cst_61 : f32 to vector<128x128xf32>
    %146 = arith.select %141, %144, %145 : vector<128x128xi1>, vector<128x128xf32>
    %147 = arith.truncf %146 : vector<128x128xf32> to vector<128x128xbf16>
    %cst_62 = arith.constant dense<0.000000e+00> : vector<8x128xf32>
    %148 = tpu.matmul %5, %147, %cst_62 {dimension_numbers = #tpu.dot_dimension_numbers<[1], [0], [0], [1], [0, 0, 1, 1], [], []>} : vector<8x128xbf16>, vector<128x128xbf16>, vector<8x128xf32> -> vector<8x128xf32>
    %149 = arith.subf %148, %22 : vector<8x128xf32>
    %150 = arith.truncf %149 : vector<8x128xf32> to vector<8x128xbf16>
    %cst_63 = arith.constant dense<0.000000e+00> : vector<22x128xf32>
    %151 = tpu.matmul %18, %150, %cst_63 {dimension_numbers = #tpu.dot_dimension_numbers<[1], [0], [0], [1], [0, 0, 1, 1], [], []>} : vector<22x8xbf16>, vector<8x128xbf16>, vector<22x128xf32> -> vector<22x128xf32>
    %152 = arith.addf %151, %26 : vector<22x128xf32>
    %153 = arith.mulf %152, %152 : vector<22x128xf32>
    %154 = arith.mulf %152, %153 : vector<22x128xf32>
    %cst_64 = arith.constant 4.471500e-02 : f32
    %155 = vector.broadcast %cst_64 : f32 to vector<22x128xf32>
    %156 = arith.mulf %155, %154 : vector<22x128xf32>
    %157 = arith.addf %152, %156 : vector<22x128xf32>
    %cst_65 = arith.constant 0.797884583 : f32
    %158 = vector.broadcast %cst_65 : f32 to vector<22x128xf32>
    %159 = arith.mulf %158, %157 : vector<22x128xf32>
    %160 = math.tanh %159 : vector<22x128xf32>
    %cst_66 = arith.constant 1.000000e+00 : f32
    %161 = vector.broadcast %cst_66 : f32 to vector<22x128xf32>
    %162 = arith.addf %161, %160 : vector<22x128xf32>
    %cst_67 = arith.constant 5.000000e-01 : f32
    %163 = vector.broadcast %cst_67 : f32 to vector<22x128xf32>
    %164 = arith.mulf %163, %162 : vector<22x128xf32>
    %165 = arith.mulf %152, %164 : vector<22x128xf32>
    %166 = arith.truncf %165 : vector<22x128xf32> to vector<22x128xbf16>
    %cst_68 = arith.constant dense<0.000000e+00> : vector<32x128xf32>
    %167 = tpu.matmul %20, %166, %cst_68 {dimension_numbers = #tpu.dot_dimension_numbers<[1], [0], [0], [1], [0, 0, 1, 1], [], []>} : vector<32x22xbf16>, vector<22x128xbf16>, vector<32x128xf32> -> vector<32x128xf32>
    %168 = vector.broadcast %21 : vector<32x1xf32> to vector<32x128xf32>
    %169 = arith.addf %167, %168 : vector<32x128xf32>
    %170 = arith.mulf %169, %169 : vector<32x128xf32>
    %171 = arith.mulf %169, %170 : vector<32x128xf32>
    %cst_69 = arith.constant 4.471500e-02 : f32
    %172 = vector.broadcast %cst_69 : f32 to vector<32x128xf32>
    %173 = arith.mulf %172, %171 : vector<32x128xf32>
    %174 = arith.addf %169, %173 : vector<32x128xf32>
    %cst_70 = arith.constant 0.797884583 : f32
    %175 = vector.broadcast %cst_70 : f32 to vector<32x128xf32>
    %176 = arith.mulf %175, %174 : vector<32x128xf32>
    %177 = math.tanh %176 : vector<32x128xf32>
    %cst_71 = arith.constant 1.000000e+00 : f32
    %178 = vector.broadcast %cst_71 : f32 to vector<32x128xf32>
    %179 = arith.addf %178, %177 : vector<32x128xf32>
    %cst_72 = arith.constant 5.000000e-01 : f32
    %180 = vector.broadcast %cst_72 : f32 to vector<32x128xf32>
    %181 = arith.mulf %180, %179 : vector<32x128xf32>
    %182 = arith.mulf %169, %181 : vector<32x128xf32>
    %183 = arith.maximumf %131, %182 : vector<32x128xf32>
    %cst_73 = arith.constant dense<0xFF800000> : vector<128xf32>
    %184 = vector.multi_reduction <maximumf>, %143, %cst_73 [0] : vector<128x128xf32> to vector<128xf32>
    %185 = vector.shape_cast %184 : vector<128xf32> to vector<1x128xf32>
    %186 = vector.broadcast %185 : vector<1x128xf32> to vector<128x128xf32>
    %187 = arith.cmpf oeq, %143, %186 : vector<128x128xf32>
    %cst_74 = arith.constant 1.280000e+02 : f32
    %188 = vector.broadcast %cst_74 : f32 to vector<128x128xf32>
    %189 = arith.select %187, %17, %188 : vector<128x128xi1>, vector<128x128xf32>
    %cst_75 = arith.constant dense<0x7F800000> : vector<128xf32>
    %190 = vector.multi_reduction <minimumf>, %189, %cst_75 [0] : vector<128x128xf32> to vector<128xf32>
    %191 = vector.shape_cast %190 : vector<128xf32> to vector<1x128xf32>
    %192 = vector.broadcast %191 : vector<1x128xf32> to vector<128x128xf32>
    %193 = arith.cmpf oeq, %17, %192 : vector<128x128xf32>
    %cst_76 = arith.constant -1.000000e+30 : f32
    %194 = vector.broadcast %cst_76 : f32 to vector<128x128xf32>
    %195 = arith.select %193, %194, %143 : vector<128x128xi1>, vector<128x128xf32>
    %cst_77 = arith.constant 1.000000e+00 : f32
    %cst_78 = arith.constant 0.000000e+00 : f32
    %196 = vector.broadcast %cst_77 : f32 to vector<128x128xf32>
    %197 = vector.broadcast %cst_78 : f32 to vector<128x128xf32>
    %198 = arith.select %193, %196, %197 : vector<128x128xi1>, vector<128x128xf32>
    %199 = arith.truncf %198 : vector<128x128xf32> to vector<128x128xbf16>
    %cst_79 = arith.constant dense<0.000000e+00> : vector<8x128xf32>
    %200 = tpu.matmul %5, %199, %cst_79 {dimension_numbers = #tpu.dot_dimension_numbers<[1], [0], [0], [1], [0, 0, 1, 1], [], []>} : vector<8x128xbf16>, vector<128x128xbf16>, vector<8x128xf32> -> vector<8x128xf32>
    %201 = arith.subf %200, %22 : vector<8x128xf32>
    %202 = arith.truncf %201 : vector<8x128xf32> to vector<8x128xbf16>
    %cst_80 = arith.constant dense<0.000000e+00> : vector<22x128xf32>
    %203 = tpu.matmul %18, %202, %cst_80 {dimension_numbers = #tpu.dot_dimension_numbers<[1], [0], [0], [1], [0, 0, 1, 1], [], []>} : vector<22x8xbf16>, vector<8x128xbf16>, vector<22x128xf32> -> vector<22x128xf32>
    %204 = arith.addf %203, %26 : vector<22x128xf32>
    %205 = arith.mulf %204, %204 : vector<22x128xf32>
    %206 = arith.mulf %204, %205 : vector<22x128xf32>
    %cst_81 = arith.constant 4.471500e-02 : f32
    %207 = vector.broadcast %cst_81 : f32 to vector<22x128xf32>
    %208 = arith.mulf %207, %206 : vector<22x128xf32>
    %209 = arith.addf %204, %208 : vector<22x128xf32>
    %cst_82 = arith.constant 0.797884583 : f32
    %210 = vector.broadcast %cst_82 : f32 to vector<22x128xf32>
    %211 = arith.mulf %210, %209 : vector<22x128xf32>
    %212 = math.tanh %211 : vector<22x128xf32>
    %cst_83 = arith.constant 1.000000e+00 : f32
    %213 = vector.broadcast %cst_83 : f32 to vector<22x128xf32>
    %214 = arith.addf %213, %212 : vector<22x128xf32>
    %cst_84 = arith.constant 5.000000e-01 : f32
    %215 = vector.broadcast %cst_84 : f32 to vector<22x128xf32>
    %216 = arith.mulf %215, %214 : vector<22x128xf32>
    %217 = arith.mulf %204, %216 : vector<22x128xf32>
    %218 = arith.truncf %217 : vector<22x128xf32> to vector<22x128xbf16>
    %cst_85 = arith.constant dense<0.000000e+00> : vector<32x128xf32>
    %219 = tpu.matmul %20, %218, %cst_85 {dimension_numbers = #tpu.dot_dimension_numbers<[1], [0], [0], [1], [0, 0, 1, 1], [], []>} : vector<32x22xbf16>, vector<22x128xbf16>, vector<32x128xf32> -> vector<32x128xf32>
    %220 = vector.broadcast %21 : vector<32x1xf32> to vector<32x128xf32>
    %221 = arith.addf %219, %220 : vector<32x128xf32>
    %222 = arith.mulf %221, %221 : vector<32x128xf32>
    %223 = arith.mulf %221, %222 : vector<32x128xf32>
    %cst_86 = arith.constant 4.471500e-02 : f32
    %224 = vector.broadcast %cst_86 : f32 to vector<32x128xf32>
    %225 = arith.mulf %224, %223 : vector<32x128xf32>
    %226 = arith.addf %221, %225 : vector<32x128xf32>
    %cst_87 = arith.constant 0.797884583 : f32
    %227 = vector.broadcast %cst_87 : f32 to vector<32x128xf32>
    %228 = arith.mulf %227, %226 : vector<32x128xf32>
    %229 = math.tanh %228 : vector<32x128xf32>
    %cst_88 = arith.constant 1.000000e+00 : f32
    %230 = vector.broadcast %cst_88 : f32 to vector<32x128xf32>
    %231 = arith.addf %230, %229 : vector<32x128xf32>
    %cst_89 = arith.constant 5.000000e-01 : f32
    %232 = vector.broadcast %cst_89 : f32 to vector<32x128xf32>
    %233 = arith.mulf %232, %231 : vector<32x128xf32>
    %234 = arith.mulf %221, %233 : vector<32x128xf32>
    %235 = arith.maximumf %183, %234 : vector<32x128xf32>
    %cst_90 = arith.constant dense<0xFF800000> : vector<128xf32>
    %236 = vector.multi_reduction <maximumf>, %195, %cst_90 [0] : vector<128x128xf32> to vector<128xf32>
    %237 = vector.shape_cast %236 : vector<128xf32> to vector<1x128xf32>
    %238 = vector.broadcast %237 : vector<1x128xf32> to vector<128x128xf32>
    %239 = arith.cmpf oeq, %195, %238 : vector<128x128xf32>
    %cst_91 = arith.constant 1.280000e+02 : f32
    %240 = vector.broadcast %cst_91 : f32 to vector<128x128xf32>
    %241 = arith.select %239, %17, %240 : vector<128x128xi1>, vector<128x128xf32>
    %cst_92 = arith.constant dense<0x7F800000> : vector<128xf32>
    %242 = vector.multi_reduction <minimumf>, %241, %cst_92 [0] : vector<128x128xf32> to vector<128xf32>
    %243 = vector.shape_cast %242 : vector<128xf32> to vector<1x128xf32>
    %244 = vector.broadcast %243 : vector<1x128xf32> to vector<128x128xf32>
    %245 = arith.cmpf oeq, %17, %244 : vector<128x128xf32>
    %cst_93 = arith.constant -1.000000e+30 : f32
    %246 = vector.broadcast %cst_93 : f32 to vector<128x128xf32>
    %247 = arith.select %245, %246, %195 : vector<128x128xi1>, vector<128x128xf32>
    %cst_94 = arith.constant 1.000000e+00 : f32
    %cst_95 = arith.constant 0.000000e+00 : f32
    %248 = vector.broadcast %cst_94 : f32 to vector<128x128xf32>
    %249 = vector.broadcast %cst_95 : f32 to vector<128x128xf32>
    %250 = arith.select %245, %248, %249 : vector<128x128xi1>, vector<128x128xf32>
    %251 = arith.truncf %250 : vector<128x128xf32> to vector<128x128xbf16>
    %cst_96 = arith.constant dense<0.000000e+00> : vector<8x128xf32>
    %252 = tpu.matmul %5, %251, %cst_96 {dimension_numbers = #tpu.dot_dimension_numbers<[1], [0], [0], [1], [0, 0, 1, 1], [], []>} : vector<8x128xbf16>, vector<128x128xbf16>, vector<8x128xf32> -> vector<8x128xf32>
    %253 = arith.subf %252, %22 : vector<8x128xf32>
    %254 = arith.truncf %253 : vector<8x128xf32> to vector<8x128xbf16>
    %cst_97 = arith.constant dense<0.000000e+00> : vector<22x128xf32>
    %255 = tpu.matmul %18, %254, %cst_97 {dimension_numbers = #tpu.dot_dimension_numbers<[1], [0], [0], [1], [0, 0, 1, 1], [], []>} : vector<22x8xbf16>, vector<8x128xbf16>, vector<22x128xf32> -> vector<22x128xf32>
    %256 = arith.addf %255, %26 : vector<22x128xf32>
    %257 = arith.mulf %256, %256 : vector<22x128xf32>
    %258 = arith.mulf %256, %257 : vector<22x128xf32>
    %cst_98 = arith.constant 4.471500e-02 : f32
    %259 = vector.broadcast %cst_98 : f32 to vector<22x128xf32>
    %260 = arith.mulf %259, %258 : vector<22x128xf32>
    %261 = arith.addf %256, %260 : vector<22x128xf32>
    %cst_99 = arith.constant 0.797884583 : f32
    %262 = vector.broadcast %cst_99 : f32 to vector<22x128xf32>
    %263 = arith.mulf %262, %261 : vector<22x128xf32>
    %264 = math.tanh %263 : vector<22x128xf32>
    %cst_100 = arith.constant 1.000000e+00 : f32
    %265 = vector.broadcast %cst_100 : f32 to vector<22x128xf32>
    %266 = arith.addf %265, %264 : vector<22x128xf32>
    %cst_101 = arith.constant 5.000000e-01 : f32
    %267 = vector.broadcast %cst_101 : f32 to vector<22x128xf32>
    %268 = arith.mulf %267, %266 : vector<22x128xf32>
    %269 = arith.mulf %256, %268 : vector<22x128xf32>
    %270 = arith.truncf %269 : vector<22x128xf32> to vector<22x128xbf16>
    %cst_102 = arith.constant dense<0.000000e+00> : vector<32x128xf32>
    %271 = tpu.matmul %20, %270, %cst_102 {dimension_numbers = #tpu.dot_dimension_numbers<[1], [0], [0], [1], [0, 0, 1, 1], [], []>} : vector<32x22xbf16>, vector<22x128xbf16>, vector<32x128xf32> -> vector<32x128xf32>
    %272 = vector.broadcast %21 : vector<32x1xf32> to vector<32x128xf32>
    %273 = arith.addf %271, %272 : vector<32x128xf32>
    %274 = arith.mulf %273, %273 : vector<32x128xf32>
    %275 = arith.mulf %273, %274 : vector<32x128xf32>
    %cst_103 = arith.constant 4.471500e-02 : f32
    %276 = vector.broadcast %cst_103 : f32 to vector<32x128xf32>
    %277 = arith.mulf %276, %275 : vector<32x128xf32>
    %278 = arith.addf %273, %277 : vector<32x128xf32>
    %cst_104 = arith.constant 0.797884583 : f32
    %279 = vector.broadcast %cst_104 : f32 to vector<32x128xf32>
    %280 = arith.mulf %279, %278 : vector<32x128xf32>
    %281 = math.tanh %280 : vector<32x128xf32>
    %cst_105 = arith.constant 1.000000e+00 : f32
    %282 = vector.broadcast %cst_105 : f32 to vector<32x128xf32>
    %283 = arith.addf %282, %281 : vector<32x128xf32>
    %cst_106 = arith.constant 5.000000e-01 : f32
    %284 = vector.broadcast %cst_106 : f32 to vector<32x128xf32>
    %285 = arith.mulf %284, %283 : vector<32x128xf32>
    %286 = arith.mulf %273, %285 : vector<32x128xf32>
    %287 = arith.maximumf %235, %286 : vector<32x128xf32>
    %cst_107 = arith.constant dense<0xFF800000> : vector<128xf32>
    %288 = vector.multi_reduction <maximumf>, %247, %cst_107 [0] : vector<128x128xf32> to vector<128xf32>
    %289 = vector.shape_cast %288 : vector<128xf32> to vector<1x128xf32>
    %290 = vector.broadcast %289 : vector<1x128xf32> to vector<128x128xf32>
    %291 = arith.cmpf oeq, %247, %290 : vector<128x128xf32>
    %cst_108 = arith.constant 1.280000e+02 : f32
    %292 = vector.broadcast %cst_108 : f32 to vector<128x128xf32>
    %293 = arith.select %291, %17, %292 : vector<128x128xi1>, vector<128x128xf32>
    %cst_109 = arith.constant dense<0x7F800000> : vector<128xf32>
    %294 = vector.multi_reduction <minimumf>, %293, %cst_109 [0] : vector<128x128xf32> to vector<128xf32>
    %295 = vector.shape_cast %294 : vector<128xf32> to vector<1x128xf32>
    %296 = vector.broadcast %295 : vector<1x128xf32> to vector<128x128xf32>
    %297 = arith.cmpf oeq, %17, %296 : vector<128x128xf32>
    %cst_110 = arith.constant -1.000000e+30 : f32
    %298 = vector.broadcast %cst_110 : f32 to vector<128x128xf32>
    %299 = arith.select %297, %298, %247 : vector<128x128xi1>, vector<128x128xf32>
    %cst_111 = arith.constant 1.000000e+00 : f32
    %cst_112 = arith.constant 0.000000e+00 : f32
    %300 = vector.broadcast %cst_111 : f32 to vector<128x128xf32>
    %301 = vector.broadcast %cst_112 : f32 to vector<128x128xf32>
    %302 = arith.select %297, %300, %301 : vector<128x128xi1>, vector<128x128xf32>
    %303 = arith.truncf %302 : vector<128x128xf32> to vector<128x128xbf16>
    %cst_113 = arith.constant dense<0.000000e+00> : vector<8x128xf32>
    %304 = tpu.matmul %5, %303, %cst_113 {dimension_numbers = #tpu.dot_dimension_numbers<[1], [0], [0], [1], [0, 0, 1, 1], [], []>} : vector<8x128xbf16>, vector<128x128xbf16>, vector<8x128xf32> -> vector<8x128xf32>
    %305 = arith.subf %304, %22 : vector<8x128xf32>
    %306 = arith.truncf %305 : vector<8x128xf32> to vector<8x128xbf16>
    %cst_114 = arith.constant dense<0.000000e+00> : vector<22x128xf32>
    %307 = tpu.matmul %18, %306, %cst_114 {dimension_numbers = #tpu.dot_dimension_numbers<[1], [0], [0], [1], [0, 0, 1, 1], [], []>} : vector<22x8xbf16>, vector<8x128xbf16>, vector<22x128xf32> -> vector<22x128xf32>
    %308 = arith.addf %307, %26 : vector<22x128xf32>
    %309 = arith.mulf %308, %308 : vector<22x128xf32>
    %310 = arith.mulf %308, %309 : vector<22x128xf32>
    %cst_115 = arith.constant 4.471500e-02 : f32
    %311 = vector.broadcast %cst_115 : f32 to vector<22x128xf32>
    %312 = arith.mulf %311, %310 : vector<22x128xf32>
    %313 = arith.addf %308, %312 : vector<22x128xf32>
    %cst_116 = arith.constant 0.797884583 : f32
    %314 = vector.broadcast %cst_116 : f32 to vector<22x128xf32>
    %315 = arith.mulf %314, %313 : vector<22x128xf32>
    %316 = math.tanh %315 : vector<22x128xf32>
    %cst_117 = arith.constant 1.000000e+00 : f32
    %317 = vector.broadcast %cst_117 : f32 to vector<22x128xf32>
    %318 = arith.addf %317, %316 : vector<22x128xf32>
    %cst_118 = arith.constant 5.000000e-01 : f32
    %319 = vector.broadcast %cst_118 : f32 to vector<22x128xf32>
    %320 = arith.mulf %319, %318 : vector<22x128xf32>
    %321 = arith.mulf %308, %320 : vector<22x128xf32>
    %322 = arith.truncf %321 : vector<22x128xf32> to vector<22x128xbf16>
    %cst_119 = arith.constant dense<0.000000e+00> : vector<32x128xf32>
    %323 = tpu.matmul %20, %322, %cst_119 {dimension_numbers = #tpu.dot_dimension_numbers<[1], [0], [0], [1], [0, 0, 1, 1], [], []>} : vector<32x22xbf16>, vector<22x128xbf16>, vector<32x128xf32> -> vector<32x128xf32>
    %324 = vector.broadcast %21 : vector<32x1xf32> to vector<32x128xf32>
    %325 = arith.addf %323, %324 : vector<32x128xf32>
    %326 = arith.mulf %325, %325 : vector<32x128xf32>
    %327 = arith.mulf %325, %326 : vector<32x128xf32>
    %cst_120 = arith.constant 4.471500e-02 : f32
    %328 = vector.broadcast %cst_120 : f32 to vector<32x128xf32>
    %329 = arith.mulf %328, %327 : vector<32x128xf32>
    %330 = arith.addf %325, %329 : vector<32x128xf32>
    %cst_121 = arith.constant 0.797884583 : f32
    %331 = vector.broadcast %cst_121 : f32 to vector<32x128xf32>
    %332 = arith.mulf %331, %330 : vector<32x128xf32>
    %333 = math.tanh %332 : vector<32x128xf32>
    %cst_122 = arith.constant 1.000000e+00 : f32
    %334 = vector.broadcast %cst_122 : f32 to vector<32x128xf32>
    %335 = arith.addf %334, %333 : vector<32x128xf32>
    %cst_123 = arith.constant 5.000000e-01 : f32
    %336 = vector.broadcast %cst_123 : f32 to vector<32x128xf32>
    %337 = arith.mulf %336, %335 : vector<32x128xf32>
    %338 = arith.mulf %325, %337 : vector<32x128xf32>
    %339 = arith.maximumf %287, %338 : vector<32x128xf32>
    %cst_124 = arith.constant dense<0xFF800000> : vector<128xf32>
    %340 = vector.multi_reduction <maximumf>, %299, %cst_124 [0] : vector<128x128xf32> to vector<128xf32>
    %341 = vector.shape_cast %340 : vector<128xf32> to vector<1x128xf32>
    %342 = vector.broadcast %341 : vector<1x128xf32> to vector<128x128xf32>
    %343 = arith.cmpf oeq, %299, %342 : vector<128x128xf32>
    %cst_125 = arith.constant 1.280000e+02 : f32
    %344 = vector.broadcast %cst_125 : f32 to vector<128x128xf32>
    %345 = arith.select %343, %17, %344 : vector<128x128xi1>, vector<128x128xf32>
    %cst_126 = arith.constant dense<0x7F800000> : vector<128xf32>
    %346 = vector.multi_reduction <minimumf>, %345, %cst_126 [0] : vector<128x128xf32> to vector<128xf32>
    %347 = vector.shape_cast %346 : vector<128xf32> to vector<1x128xf32>
    %348 = vector.broadcast %347 : vector<1x128xf32> to vector<128x128xf32>
    %349 = arith.cmpf oeq, %17, %348 : vector<128x128xf32>
    %cst_127 = arith.constant -1.000000e+30 : f32
    %350 = vector.broadcast %cst_127 : f32 to vector<128x128xf32>
    %351 = arith.select %349, %350, %299 : vector<128x128xi1>, vector<128x128xf32>
    %cst_128 = arith.constant 1.000000e+00 : f32
    %cst_129 = arith.constant 0.000000e+00 : f32
    %352 = vector.broadcast %cst_128 : f32 to vector<128x128xf32>
    %353 = vector.broadcast %cst_129 : f32 to vector<128x128xf32>
    %354 = arith.select %349, %352, %353 : vector<128x128xi1>, vector<128x128xf32>
    %355 = arith.truncf %354 : vector<128x128xf32> to vector<128x128xbf16>
    %cst_130 = arith.constant dense<0.000000e+00> : vector<8x128xf32>
    %356 = tpu.matmul %5, %355, %cst_130 {dimension_numbers = #tpu.dot_dimension_numbers<[1], [0], [0], [1], [0, 0, 1, 1], [], []>} : vector<8x128xbf16>, vector<128x128xbf16>, vector<8x128xf32> -> vector<8x128xf32>
    %357 = arith.subf %356, %22 : vector<8x128xf32>
    %358 = arith.truncf %357 : vector<8x128xf32> to vector<8x128xbf16>
    %cst_131 = arith.constant dense<0.000000e+00> : vector<22x128xf32>
    %359 = tpu.matmul %18, %358, %cst_131 {dimension_numbers = #tpu.dot_dimension_numbers<[1], [0], [0], [1], [0, 0, 1, 1], [], []>} : vector<22x8xbf16>, vector<8x128xbf16>, vector<22x128xf32> -> vector<22x128xf32>
    %360 = arith.addf %359, %26 : vector<22x128xf32>
    %361 = arith.mulf %360, %360 : vector<22x128xf32>
    %362 = arith.mulf %360, %361 : vector<22x128xf32>
    %cst_132 = arith.constant 4.471500e-02 : f32
    %363 = vector.broadcast %cst_132 : f32 to vector<22x128xf32>
    %364 = arith.mulf %363, %362 : vector<22x128xf32>
    %365 = arith.addf %360, %364 : vector<22x128xf32>
    %cst_133 = arith.constant 0.797884583 : f32
    %366 = vector.broadcast %cst_133 : f32 to vector<22x128xf32>
    %367 = arith.mulf %366, %365 : vector<22x128xf32>
    %368 = math.tanh %367 : vector<22x128xf32>
    %cst_134 = arith.constant 1.000000e+00 : f32
    %369 = vector.broadcast %cst_134 : f32 to vector<22x128xf32>
    %370 = arith.addf %369, %368 : vector<22x128xf32>
    %cst_135 = arith.constant 5.000000e-01 : f32
    %371 = vector.broadcast %cst_135 : f32 to vector<22x128xf32>
    %372 = arith.mulf %371, %370 : vector<22x128xf32>
    %373 = arith.mulf %360, %372 : vector<22x128xf32>
    %374 = arith.truncf %373 : vector<22x128xf32> to vector<22x128xbf16>
    %cst_136 = arith.constant dense<0.000000e+00> : vector<32x128xf32>
    %375 = tpu.matmul %20, %374, %cst_136 {dimension_numbers = #tpu.dot_dimension_numbers<[1], [0], [0], [1], [0, 0, 1, 1], [], []>} : vector<32x22xbf16>, vector<22x128xbf16>, vector<32x128xf32> -> vector<32x128xf32>
    %376 = vector.broadcast %21 : vector<32x1xf32> to vector<32x128xf32>
    %377 = arith.addf %375, %376 : vector<32x128xf32>
    %378 = arith.mulf %377, %377 : vector<32x128xf32>
    %379 = arith.mulf %377, %378 : vector<32x128xf32>
    %cst_137 = arith.constant 4.471500e-02 : f32
    %380 = vector.broadcast %cst_137 : f32 to vector<32x128xf32>
    %381 = arith.mulf %380, %379 : vector<32x128xf32>
    %382 = arith.addf %377, %381 : vector<32x128xf32>
    %cst_138 = arith.constant 0.797884583 : f32
    %383 = vector.broadcast %cst_138 : f32 to vector<32x128xf32>
    %384 = arith.mulf %383, %382 : vector<32x128xf32>
    %385 = math.tanh %384 : vector<32x128xf32>
    %cst_139 = arith.constant 1.000000e+00 : f32
    %386 = vector.broadcast %cst_139 : f32 to vector<32x128xf32>
    %387 = arith.addf %386, %385 : vector<32x128xf32>
    %cst_140 = arith.constant 5.000000e-01 : f32
    %388 = vector.broadcast %cst_140 : f32 to vector<32x128xf32>
    %389 = arith.mulf %388, %387 : vector<32x128xf32>
    %390 = arith.mulf %377, %389 : vector<32x128xf32>
    %391 = arith.maximumf %339, %390 : vector<32x128xf32>
    %cst_141 = arith.constant dense<0xFF800000> : vector<128xf32>
    %392 = vector.multi_reduction <maximumf>, %351, %cst_141 [0] : vector<128x128xf32> to vector<128xf32>
    %393 = vector.shape_cast %392 : vector<128xf32> to vector<1x128xf32>
    %394 = vector.broadcast %393 : vector<1x128xf32> to vector<128x128xf32>
    %395 = arith.cmpf oeq, %351, %394 : vector<128x128xf32>
    %cst_142 = arith.constant 1.280000e+02 : f32
    %396 = vector.broadcast %cst_142 : f32 to vector<128x128xf32>
    %397 = arith.select %395, %17, %396 : vector<128x128xi1>, vector<128x128xf32>
    %cst_143 = arith.constant dense<0x7F800000> : vector<128xf32>
    %398 = vector.multi_reduction <minimumf>, %397, %cst_143 [0] : vector<128x128xf32> to vector<128xf32>
    %399 = vector.shape_cast %398 : vector<128xf32> to vector<1x128xf32>
    %400 = vector.broadcast %399 : vector<1x128xf32> to vector<128x128xf32>
    %401 = arith.cmpf oeq, %17, %400 : vector<128x128xf32>
    %cst_144 = arith.constant 1.000000e+00 : f32
    %cst_145 = arith.constant 0.000000e+00 : f32
    %402 = vector.broadcast %cst_144 : f32 to vector<128x128xf32>
    %403 = vector.broadcast %cst_145 : f32 to vector<128x128xf32>
    %404 = arith.select %401, %402, %403 : vector<128x128xi1>, vector<128x128xf32>
    %405 = arith.truncf %404 : vector<128x128xf32> to vector<128x128xbf16>
    %cst_146 = arith.constant dense<0.000000e+00> : vector<8x128xf32>
    %406 = tpu.matmul %5, %405, %cst_146 {dimension_numbers = #tpu.dot_dimension_numbers<[1], [0], [0], [1], [0, 0, 1, 1], [], []>} : vector<8x128xbf16>, vector<128x128xbf16>, vector<8x128xf32> -> vector<8x128xf32>
    %407 = arith.subf %406, %22 : vector<8x128xf32>
    %408 = arith.truncf %407 : vector<8x128xf32> to vector<8x128xbf16>
    %cst_147 = arith.constant dense<0.000000e+00> : vector<22x128xf32>
    %409 = tpu.matmul %18, %408, %cst_147 {dimension_numbers = #tpu.dot_dimension_numbers<[1], [0], [0], [1], [0, 0, 1, 1], [], []>} : vector<22x8xbf16>, vector<8x128xbf16>, vector<22x128xf32> -> vector<22x128xf32>
    %410 = arith.addf %409, %26 : vector<22x128xf32>
    %411 = arith.mulf %410, %410 : vector<22x128xf32>
    %412 = arith.mulf %410, %411 : vector<22x128xf32>
    %cst_148 = arith.constant 4.471500e-02 : f32
    %413 = vector.broadcast %cst_148 : f32 to vector<22x128xf32>
    %414 = arith.mulf %413, %412 : vector<22x128xf32>
    %415 = arith.addf %410, %414 : vector<22x128xf32>
    %cst_149 = arith.constant 0.797884583 : f32
    %416 = vector.broadcast %cst_149 : f32 to vector<22x128xf32>
    %417 = arith.mulf %416, %415 : vector<22x128xf32>
    %418 = math.tanh %417 : vector<22x128xf32>
    %cst_150 = arith.constant 1.000000e+00 : f32
    %419 = vector.broadcast %cst_150 : f32 to vector<22x128xf32>
    %420 = arith.addf %419, %418 : vector<22x128xf32>
    %cst_151 = arith.constant 5.000000e-01 : f32
    %421 = vector.broadcast %cst_151 : f32 to vector<22x128xf32>
    %422 = arith.mulf %421, %420 : vector<22x128xf32>
    %423 = arith.mulf %410, %422 : vector<22x128xf32>
    %424 = arith.truncf %423 : vector<22x128xf32> to vector<22x128xbf16>
    %cst_152 = arith.constant dense<0.000000e+00> : vector<32x128xf32>
    %425 = tpu.matmul %20, %424, %cst_152 {dimension_numbers = #tpu.dot_dimension_numbers<[1], [0], [0], [1], [0, 0, 1, 1], [], []>} : vector<32x22xbf16>, vector<22x128xbf16>, vector<32x128xf32> -> vector<32x128xf32>
    %426 = vector.broadcast %21 : vector<32x1xf32> to vector<32x128xf32>
    %427 = arith.addf %425, %426 : vector<32x128xf32>
    %428 = arith.mulf %427, %427 : vector<32x128xf32>
    %429 = arith.mulf %427, %428 : vector<32x128xf32>
    %cst_153 = arith.constant 4.471500e-02 : f32
    %430 = vector.broadcast %cst_153 : f32 to vector<32x128xf32>
    %431 = arith.mulf %430, %429 : vector<32x128xf32>
    %432 = arith.addf %427, %431 : vector<32x128xf32>
    %cst_154 = arith.constant 0.797884583 : f32
    %433 = vector.broadcast %cst_154 : f32 to vector<32x128xf32>
    %434 = arith.mulf %433, %432 : vector<32x128xf32>
    %435 = math.tanh %434 : vector<32x128xf32>
    %cst_155 = arith.constant 1.000000e+00 : f32
    %436 = vector.broadcast %cst_155 : f32 to vector<32x128xf32>
    %437 = arith.addf %436, %435 : vector<32x128xf32>
    %cst_156 = arith.constant 5.000000e-01 : f32
    %438 = vector.broadcast %cst_156 : f32 to vector<32x128xf32>
    %439 = arith.mulf %438, %437 : vector<32x128xf32>
    %440 = arith.mulf %427, %439 : vector<32x128xf32>
    %441 = arith.maximumf %391, %440 : vector<32x128xf32>
    %442 = arith.truncf %441 : vector<32x128xf32> to vector<32x128xbf16>
    %c0_157 = arith.constant 0 : index
    %c0_158 = arith.constant 0 : index
    %c0_159 = arith.constant 0 : index
    %443 = vector.load %arg10[%c0_157, %c0_158, %c0_159] : memref<1x32x128xbf16, #tpu.memory_space<vmem>>, vector<1x32x128xbf16>
    %444 = vector.shape_cast %443 : vector<1x32x128xbf16> to vector<32x128xbf16>
    %445 = vector.shape_cast %442 : vector<32x128xbf16> to vector<1x32x128xbf16>
    tpu.vector_store %arg10[%c0_157, %c0_158, %c0_159], %445 {strides = array<i32>} : memref<1x32x128xbf16, #tpu.memory_space<vmem>>, vector<1x32x128xbf16>,
    return
  }
  func.func @transform_0(%arg0: i32, %arg1: i32) -> (i32, i32, i32) {
    %c0_i32 = arith.constant 0 : i32
    %c0_i32_0 = arith.constant 0 : i32
    return %arg0, %c0_i32, %arg1 : i32, i32, i32
  }
  func.func @transform_1(%arg0: i32, %arg1: i32) -> (i32, i32, i32) {
    %c0_i32 = arith.constant 0 : i32
    %c0_i32_0 = arith.constant 0 : i32
    %c0_i32_1 = arith.constant 0 : i32
    return %arg0, %c0_i32, %c0_i32_0 : i32, i32, i32
  }
  func.func @transform_2(%arg0: i32, %arg1: i32) -> (i32, i32, i32) {
    %c0_i32 = arith.constant 0 : i32
    %c0_i32_0 = arith.constant 0 : i32
    %c0_i32_1 = arith.constant 0 : i32
    return %arg0, %c0_i32, %c0_i32_0 : i32, i32, i32
  }
  func.func @transform_3(%arg0: i32, %arg1: i32) -> (i32, i32) {
    %c0_i32 = arith.constant 0 : i32
    %c0_i32_0 = arith.constant 0 : i32
    %c0_i32_1 = arith.constant 0 : i32
    return %c0_i32, %c0_i32_0 : i32, i32
  }
  func.func @transform_4(%arg0: i32, %arg1: i32) -> (i32, i32) {
    %c0_i32 = arith.constant 0 : i32
    %c0_i32_0 = arith.constant 0 : i32
    %c0_i32_1 = arith.constant 0 : i32
    return %c0_i32, %c0_i32_0 : i32, i32
  }
  func.func @transform_5(%arg0: i32, %arg1: i32) -> (i32, i32) {
    %c0_i32 = arith.constant 0 : i32
    %c0_i32_0 = arith.constant 0 : i32
    %c0_i32_1 = arith.constant 0 : i32
    return %c0_i32, %c0_i32_0 : i32, i32
  }
  func.func @transform_6(%arg0: i32, %arg1: i32) -> (i32, i32) {
    %c0_i32 = arith.constant 0 : i32
    %c0_i32_0 = arith.constant 0 : i32
    %c0_i32_1 = arith.constant 0 : i32
    return %c0_i32, %c0_i32_0 : i32, i32
  }
  func.func @transform_7(%arg0: i32, %arg1: i32) -> (i32, i32) {
    %c0_i32 = arith.constant 0 : i32
    %c0_i32_0 = arith.constant 0 : i32
    %c0_i32_1 = arith.constant 0 : i32
    return %c0_i32, %c0_i32_0 : i32, i32
  }
  func.func @transform_8(%arg0: i32, %arg1: i32) -> (i32, i32, i32) {
    %c0_i32 = arith.constant 0 : i32
    %c0_i32_0 = arith.constant 0 : i32
    return %arg0, %c0_i32, %arg1 : i32, i32, i32
  }
}

module attributes {stable_mosaic.version = 11 : i64} {
  func.func @_mlp1d_kernel(%arg0: i32, %arg1: i32, %arg2: memref<1x8x128xbf16, #tpu.memory_space<vmem>>, %arg3: memref<1x32x128xbf16, #tpu.memory_space<vmem>>, %arg4: memref<35x8xbf16, #tpu.memory_space<vmem>>, %arg5: memref<35x32xbf16, #tpu.memory_space<vmem>>, %arg6: memref<35x1xf32, #tpu.memory_space<vmem>>, %arg7: memref<32x35xbf16, #tpu.memory_space<vmem>>, %arg8: memref<32x1xf32, #tpu.memory_space<vmem>>, %arg9: memref<1x32x128xf32, #tpu.memory_space<vmem>>) attributes {dimension_semantics = [#tpu.dimension_semantics<parallel>, #tpu.dimension_semantics<parallel>], iteration_bounds = array<i64: 2, 1>, scalar_prefetch = 0 : i64, scratch_operands = 0 : i64, tpu.core_type = #tpu.core_type<tc>, window_params = [{transform_indices = @transform_0, window_bounds = array<i64: 1, 8, 128>}, {transform_indices = @transform_1, window_bounds = array<i64: 1, 32, 128>}, {pipeline_mode = #tpu.pipeline_mode<synchronous>, transform_indices = @transform_2, window_bounds = array<i64: 35, 8>}, {pipeline_mode = #tpu.pipeline_mode<synchronous>, transform_indices = @transform_3, window_bounds = array<i64: 35, 32>}, {pipeline_mode = #tpu.pipeline_mode<synchronous>, transform_indices = @transform_4, window_bounds = array<i64: 35, 1>}, {pipeline_mode = #tpu.pipeline_mode<synchronous>, transform_indices = @transform_5, window_bounds = array<i64: 32, 35>}, {pipeline_mode = #tpu.pipeline_mode<synchronous>, transform_indices = @transform_6, window_bounds = array<i64: 32, 1>}, {transform_indices = @transform_7, window_bounds = array<i64: 1, 32, 128>}]} {
    %c0 = arith.constant 0 : index
    %c0_0 = arith.constant 0 : index
    %c0_1 = arith.constant 0 : index
    %0 = vector.load %arg2[%c0, %c0_0, %c0_1] : memref<1x8x128xbf16, #tpu.memory_space<vmem>>, vector<1x8x128xbf16>
    %1 = vector.shape_cast %0 : vector<1x8x128xbf16> to vector<8x128xbf16>
    %c0_2 = arith.constant 0 : index
    %c0_3 = arith.constant 0 : index
    %c0_4 = arith.constant 0 : index
    %2 = vector.load %arg3[%c0_2, %c0_3, %c0_4] : memref<1x32x128xbf16, #tpu.memory_space<vmem>>, vector<1x32x128xbf16>
    %3 = vector.shape_cast %2 : vector<1x32x128xbf16> to vector<32x128xbf16>
    %c0_5 = arith.constant 0 : index
    %c0_6 = arith.constant 0 : index
    %4 = vector.load %arg4[%c0_5, %c0_6] : memref<35x8xbf16, #tpu.memory_space<vmem>>, vector<35x8xbf16>
    %cst = arith.constant dense<0.000000e+00> : vector<35x128xf32>
    %5 = tpu.matmul %4, %1, %cst {dimension_numbers = #tpu.dot_dimension_numbers<[1], [0], [0], [1], [0, 0, 1, 1], [], []>} : vector<35x8xbf16>, vector<8x128xbf16>, vector<35x128xf32> -> vector<35x128xf32>
    %c0_7 = arith.constant 0 : index
    %c0_8 = arith.constant 0 : index
    %6 = vector.load %arg5[%c0_7, %c0_8] : memref<35x32xbf16, #tpu.memory_space<vmem>>, vector<35x32xbf16>
    %cst_9 = arith.constant dense<0.000000e+00> : vector<35x128xf32>
    %7 = tpu.matmul %6, %3, %cst_9 {dimension_numbers = #tpu.dot_dimension_numbers<[1], [0], [0], [1], [0, 0, 1, 1], [], []>} : vector<35x32xbf16>, vector<32x128xbf16>, vector<35x128xf32> -> vector<35x128xf32>
    %8 = arith.addf %5, %7 : vector<35x128xf32>
    %c0_10 = arith.constant 0 : index
    %c0_11 = arith.constant 0 : index
    %9 = vector.load %arg6[%c0_10, %c0_11] : memref<35x1xf32, #tpu.memory_space<vmem>>, vector<35x1xf32>
    %10 = vector.broadcast %9 : vector<35x1xf32> to vector<35x128xf32>
    %11 = arith.addf %8, %10 : vector<35x128xf32>
    %12 = arith.mulf %11, %11 : vector<35x128xf32>
    %13 = arith.mulf %11, %12 : vector<35x128xf32>
    %cst_12 = arith.constant 4.471500e-02 : f32
    %14 = vector.broadcast %cst_12 : f32 to vector<35x128xf32>
    %15 = arith.mulf %14, %13 : vector<35x128xf32>
    %16 = arith.addf %11, %15 : vector<35x128xf32>
    %cst_13 = arith.constant 0.797884583 : f32
    %17 = vector.broadcast %cst_13 : f32 to vector<35x128xf32>
    %18 = arith.mulf %17, %16 : vector<35x128xf32>
    %19 = math.tanh %18 : vector<35x128xf32>
    %cst_14 = arith.constant 1.000000e+00 : f32
    %20 = vector.broadcast %cst_14 : f32 to vector<35x128xf32>
    %21 = arith.addf %20, %19 : vector<35x128xf32>
    %cst_15 = arith.constant 5.000000e-01 : f32
    %22 = vector.broadcast %cst_15 : f32 to vector<35x128xf32>
    %23 = arith.mulf %22, %21 : vector<35x128xf32>
    %24 = arith.mulf %11, %23 : vector<35x128xf32>
    %c0_16 = arith.constant 0 : index
    %c0_17 = arith.constant 0 : index
    %25 = vector.load %arg7[%c0_16, %c0_17] : memref<32x35xbf16, #tpu.memory_space<vmem>>, vector<32x35xbf16>
    %26 = arith.truncf %24 : vector<35x128xf32> to vector<35x128xbf16>
    %cst_18 = arith.constant dense<0.000000e+00> : vector<32x128xf32>
    %27 = tpu.matmul %25, %26, %cst_18 {dimension_numbers = #tpu.dot_dimension_numbers<[1], [0], [0], [1], [0, 0, 1, 1], [], []>} : vector<32x35xbf16>, vector<35x128xbf16>, vector<32x128xf32> -> vector<32x128xf32>
    %c0_19 = arith.constant 0 : index
    %c0_20 = arith.constant 0 : index
    %28 = vector.load %arg8[%c0_19, %c0_20] : memref<32x1xf32, #tpu.memory_space<vmem>>, vector<32x1xf32>
    %29 = vector.broadcast %28 : vector<32x1xf32> to vector<32x128xf32>
    %30 = arith.addf %27, %29 : vector<32x128xf32>
    %31 = arith.mulf %30, %30 : vector<32x128xf32>
    %32 = arith.mulf %30, %31 : vector<32x128xf32>
    %cst_21 = arith.constant 4.471500e-02 : f32
    %33 = vector.broadcast %cst_21 : f32 to vector<32x128xf32>
    %34 = arith.mulf %33, %32 : vector<32x128xf32>
    %35 = arith.addf %30, %34 : vector<32x128xf32>
    %cst_22 = arith.constant 0.797884583 : f32
    %36 = vector.broadcast %cst_22 : f32 to vector<32x128xf32>
    %37 = arith.mulf %36, %35 : vector<32x128xf32>
    %38 = math.tanh %37 : vector<32x128xf32>
    %cst_23 = arith.constant 1.000000e+00 : f32
    %39 = vector.broadcast %cst_23 : f32 to vector<32x128xf32>
    %40 = arith.addf %39, %38 : vector<32x128xf32>
    %cst_24 = arith.constant 5.000000e-01 : f32
    %41 = vector.broadcast %cst_24 : f32 to vector<32x128xf32>
    %42 = arith.mulf %41, %40 : vector<32x128xf32>
    %43 = arith.mulf %30, %42 : vector<32x128xf32>
    %c0_25 = arith.constant 0 : index
    %c0_26 = arith.constant 0 : index
    %c0_27 = arith.constant 0 : index
    %44 = vector.load %arg9[%c0_25, %c0_26, %c0_27] : memref<1x32x128xf32, #tpu.memory_space<vmem>>, vector<1x32x128xf32>
    %45 = vector.shape_cast %44 : vector<1x32x128xf32> to vector<32x128xf32>
    %46 = vector.shape_cast %43 : vector<32x128xf32> to vector<1x32x128xf32>
    tpu.vector_store %arg9[%c0_25, %c0_26, %c0_27], %46 {strides = array<i32>} : memref<1x32x128xf32, #tpu.memory_space<vmem>>, vector<1x32x128xf32>,
    return
  }
  func.func @transform_0(%arg0: i32, %arg1: i32) -> (i32, i32, i32) {
    %c0_i32 = arith.constant 0 : i32
    %c0_i32_0 = arith.constant 0 : i32
    return %arg0, %c0_i32, %arg1 : i32, i32, i32
  }
  func.func @transform_1(%arg0: i32, %arg1: i32) -> (i32, i32, i32) {
    %c0_i32 = arith.constant 0 : i32
    %c0_i32_0 = arith.constant 0 : i32
    return %arg0, %c0_i32, %arg1 : i32, i32, i32
  }
  func.func @transform_2(%arg0: i32, %arg1: i32) -> (i32, i32) {
    %c0_i32 = arith.constant 0 : i32
    %c0_i32_0 = arith.constant 0 : i32
    %c0_i32_1 = arith.constant 0 : i32
    return %c0_i32, %c0_i32_0 : i32, i32
  }
  func.func @transform_3(%arg0: i32, %arg1: i32) -> (i32, i32) {
    %c0_i32 = arith.constant 0 : i32
    %c0_i32_0 = arith.constant 0 : i32
    %c0_i32_1 = arith.constant 0 : i32
    return %c0_i32, %c0_i32_0 : i32, i32
  }
  func.func @transform_4(%arg0: i32, %arg1: i32) -> (i32, i32) {
    %c0_i32 = arith.constant 0 : i32
    %c0_i32_0 = arith.constant 0 : i32
    %c0_i32_1 = arith.constant 0 : i32
    return %c0_i32, %c0_i32_0 : i32, i32
  }
  func.func @transform_5(%arg0: i32, %arg1: i32) -> (i32, i32) {
    %c0_i32 = arith.constant 0 : i32
    %c0_i32_0 = arith.constant 0 : i32
    %c0_i32_1 = arith.constant 0 : i32
    return %c0_i32, %c0_i32_0 : i32, i32
  }
  func.func @transform_6(%arg0: i32, %arg1: i32) -> (i32, i32) {
    %c0_i32 = arith.constant 0 : i32
    %c0_i32_0 = arith.constant 0 : i32
    %c0_i32_1 = arith.constant 0 : i32
    return %c0_i32, %c0_i32_0 : i32, i32
  }
  func.func @transform_7(%arg0: i32, %arg1: i32) -> (i32, i32, i32) {
    %c0_i32 = arith.constant 0 : i32
    %c0_i32_0 = arith.constant 0 : i32
    return %arg0, %c0_i32, %arg1 : i32, i32, i32
  }
}

</mosaic_0001>

<bundles_post_ra>
// kernel: gcn_encoder_forward.5
= control target key start
LH: loop header
LB: loop body
LE: loop exit
PB: predicated region body
PF: predicated region fallthrough
CT: control target
= control target key end

     0   :  { %s2028_s0 = inlined_call_operand.hbm [shape: bf16[2,8,128], index: 0, kind: input, shape index: {}]   ;;  %s2029_s1 = inlined_call_operand.hbm [shape: bf16[2,32,128], index: 1, kind: input, shape index: {}]   ;;  %s2030_s2 = inlined_call_operand.hbm [shape: bf16[35,8], index: 2, kind: input, shape index: {}]   ;;  %s2031_s3 = inlined_call_operand.hbm [shape: bf16[35,32], index: 3, kind: input, shape index: {}]   ;;  %s2032_s4 = inlined_call_operand.hbm [shape: f32[35,1], index: 4, kind: input, shape index: {}]   ;;  %s2033_s5 = inlined_call_operand.hbm [shape: bf16[32,35], index: 5, kind: input, shape index: {}]   ;;  %s2034_s6 = inlined_call_operand.hbm [shape: f32[32,1], index: 6, kind: input, shape index: {}]   ;;  %s2035_s7 = inlined_call_operand.hbm [shape: f32[2,32,128], index: 7, kind: output, shape index: {}]  }
   0x1   :  { %2042 = sst [smem:[#allocation21_spill]] %s2028_s0 }
   0x2   :  { %2043 = sst [smem:[#allocation22_spill]] %s2030_s2 }
   0x3   :  { %2044 = sst [smem:[#allocation23_spill]] %s2031_s3 }
   0x4   :  { %2045 = sst [smem:[#allocation24_spill]] %s2032_s4 }
   0x5   :  { %2046 = sst [smem:[#allocation25_spill]] %s2035_s7 }
   0x6   :  { %12 = vsyncpa [#allocation3], 0 }
   0x7   :  { %14 = vsyncpa [#allocation3 + $0x1], 0 }
   0x8   :  { %15 = vsyncpa [#allocation6], 0 }
   0x9   :  { %17 = vsyncpa [#allocation6 + $0x1], 0 }
   0xa   :  { %18 = vsyncpa [#allocation9], 0 }
   0xb   :  { %19 = vsyncpa [#allocation12], 0 }
   0xc   :  { %20 = vsyncpa [#allocation4], 0 }
   0xd   :  { %22 = vsyncpa [#allocation4 + $0x1], 0  ;;  %s1629_s24 = smov 0   ;;  %s1631_s25 = smov 0  }
   0xe   :  { %s1633_s26 = smov 0   ;;  %s1635_s27 = smov 0  }
   0xf   :  { %s1637_s28 = smov 0   ;;  %s1639_s29 = smov 0  }
  0x10 LB: > { %s1660_s30 = sadd.s32 4294967295, %s1569_s29   ;;  %p1013_p0 = scmp.ge.s32.totalorder %s1569_s29, 1  ;;  %s1569_s29 = sphi %s1639_s29, %s28_s29   ;;  %s1565_s28 = sphi %s1637_s28, %s2078_s28   ;;  %s1561_s27 = sphi %s1635_s27, %s2077_s27   ;;  %s1557_s26 = sphi %s1633_s26, %s2076_s26   ;;  %s1553_s25 = sphi %s1631_s25, %s2075_s25   ;;  %s1549_s24 = sphi %s1629_s24, %s2074_s24  }
  0x11   : > { %p2037_p1 = scmp.eq.s32.totalorder %s1660_s30, 0  ;;  %p234_p2 = scmp.lt.s32.totalorder %s1569_s29, 3 }
  0x12   : > { %s1571_s9 = smov [#allocation7]   ;;  %s1572_s12 = smov [#allocation8]  }
  0x13   : > { %p1665_p3 = pnand %p1013_p0, %p234_p2  ;;  %s246_s10 = sshll.u32 %s1571_s9, 4  ;;  %s1669_s10 = int_to_ptr.vmem [resolvable:$true] %s246_s10 }
  0x14   : > { %s259_s13 = sshll.u32 %s1572_s12, 4  ;;  %s1573_s14 = smov [#allocation11]   ;;  %s1680_s13 = int_to_ptr.vmem [resolvable:$true] %s259_s13 }
  0x15   : > { %s2047_s8 = scalar_select %p1665_p3, 1, 0 }
  0x16   : > { %p1139_p4 = pneg %p1665_p3  ;;  %s1682_s15 = sshll.u32 %s1573_s14, 4  ;;  %s286_s15 = int_to_ptr.vmem [resolvable:$true] %s1682_s15 }
  0x17   : > { %s2049_s2 = sld [smem:[#allocation22_spill]] }
  0x18   : > { %p1676_p6 = pnand %p1139_p4, %p2037_p1 }
  0x1a   : > { %p1692_p8 = pneg %p1676_p6 }
  0x1d   : > { %s1271_s18 = scalar_lea.hbm %s2049_s2, 320 }
  0x1e   : > { %p1272_p7 = scmp.ne.s32.totalorder %s2049_s2, %s1271_s18  ;;  %p1278_p11 = scmp.lt.u32.totalorder %s1271_s18, %s2049_s2 }
  0x20   : > { %p1274_p9 = pnand %p1692_p8, %p1272_p7 }
  0x22   : > { %p1275_p10 = pneg %p1274_p9 }
  0x24   : > { %p1280_p12 = pnand %p1278_p11, %p1275_p10 }
  0x26   : > { %1283 = shalt.err (!%p1280_p12)
}
  0x27   : > { %s1284_s9 = scalar_lea.vmem %s1669_s10, 320  ;;  %p1292_p4 = scmp.lt.s32.totalorder %s1669_s10, %s1669_s10 }
  0x28   : > { %p1285_p13 = scmp.ne.s32.totalorder %s1669_s10, %s1284_s9  ;;  %p1293_p5 = scmp.lt.s32.totalorder %s1284_s9, %s1284_s9 }
  0x2a   : > { %p1287_p0 = pnand %p1285_p13, %p1692_p8  ;;  %p1294_p7 = por %p1293_p5, %p1292_p4 }
  0x2c   : > { %p1288_p2 = pneg %p1287_p0 }
  0x2e   : > { %p1295_p9 = pnand %p1294_p7, %p1288_p2 }
  0x30   : > { %1298 = shalt.err (!%p1295_p9)
}
  0x31   : > { %s2039_s12 = smov 64   ;;  %s2040_s14 = smov 4  }
  0x32   : > { %1142 = dma.hbm_to_vmem [thread:$0]  (!%p1676_p6), %s2049_s2, 320, %s1669_s10, [#allocation6], %s2039_s12, %s2039_s12, %s2040_s14  }
  0x33   : > { %s2051_s3 = sld [smem:[#allocation23_spill]] }
  0x39   : > { %s1299_s20 = scalar_lea.hbm %s2051_s3, 320 }
  0x3a   : > { %p1300_p5 = scmp.ne.s32.totalorder %s2051_s3, %s1299_s20  ;;  %p1306_p12 = scmp.lt.u32.totalorder %s1299_s20, %s2051_s3 }
  0x3c   : > { %p1302_p10 = pnand %p1300_p5, %p1692_p8 }
  0x3e   : > { %p1303_p11 = pneg %p1302_p10 }
  0x40   : > { %p1308_p13 = pnand %p1306_p12, %p1303_p11 }
  0x42   : > { %1311 = shalt.err (!%p1308_p13)
}
  0x43   : > { %s1312_s10 = scalar_lea.vmem %s1680_s13, 320  ;;  %p1320_p7 = scmp.lt.s32.totalorder %s1680_s13, %s1680_s13 }
  0x44   : > { %p1313_p0 = scmp.ne.s32.totalorder %s1680_s13, %s1312_s10  ;;  %p1321_p9 = scmp.lt.s32.totalorder %s1312_s10, %s1312_s10 }
  0x46   : > { %p1315_p2 = pnand %p1313_p0, %p1692_p8  ;;  %p1322_p5 = por %p1321_p9, %p1320_p7 }
  0x48   : > { %p1316_p4 = pneg %p1315_p2 }
  0x4a   : > { %p1323_p10 = pnand %p1322_p5, %p1316_p4 }
  0x4c   : > { %1326 = shalt.err (!%p1323_p10)
}
  0x4d   : > { %1145 = dma.hbm_to_vmem [thread:$0]  (!%p1676_p6), %s2051_s3, 320, %s1680_s13, [#allocation9], %s2039_s12, %s2039_s12, %s2040_s14  }
  0x4e   : > { %s1327_s19 = scalar_lea.hbm %s2033_s5, 256 }
  0x4f   : > { %p1328_p11 = scmp.ne.s32.totalorder %s2033_s5, %s1327_s19  ;;  %p1334_p0 = scmp.lt.u32.totalorder %s1327_s19, %s2033_s5 }
  0x51   : > { %p1330_p12 = pnand %p1328_p11, %p1692_p8 }
  0x53   : > { %p1331_p13 = pneg %p1330_p12 }
  0x55   : > { %p1336_p2 = pnand %p1334_p0, %p1331_p13 }
  0x57   : > { %1339 = shalt.err (!%p1336_p2)
}
  0x58   : > { %s1340_s10 = scalar_lea.vmem %s286_s15, 256  ;;  %p1348_p5 = scmp.lt.s32.totalorder %s286_s15, %s286_s15 }
  0x59   : > { %p1341_p4 = scmp.ne.s32.totalorder %s286_s15, %s1340_s10  ;;  %p1349_p10 = scmp.lt.s32.totalorder %s1340_s10, %s1340_s10 }
  0x5b   : > { %p1343_p7 = pnand %p1341_p4, %p1692_p8  ;;  %p1350_p1 = por %p1349_p10, %p1348_p5 }
  0x5d   : > { %p1344_p9 = pneg %p1343_p7 }
  0x5f   : > { %p1351_p3 = pnand %p1350_p1, %p1344_p9 }
  0x61   : > { %1354 = shalt.err (!%p1351_p3)
}
  0x62   : > { %1151 = dma.hbm_to_vmem [thread:$0]  (!%p1676_p6), %s2033_s5, 256, %s286_s15, [#allocation12], %s2039_s12, %s2039_s12, %s2040_s14  }
  0x63   : > { %s1576_s16 = smov [#allocation10]   ;;  %s2052_s4 = sld [smem:[#allocation24_spill]] }
  0x64   : > { %s272_s17 = sshll.u32 %s1576_s16, 4  ;;  %s273_s17 = int_to_ptr.vmem [resolvable:$true] %s272_s17 }
  0x69   : > { %s1355_s20 = scalar_lea.hbm %s2052_s4, 640 }
  0x6a   : > { %p1356_p1 = scmp.ne.s32.totalorder %s2052_s4, %s1355_s20  ;;  %p1362_p12 = scmp.lt.u32.totalorder %s1355_s20, %s2052_s4 }
  0x6c   : > { %p1358_p3 = pnand %p1356_p1, %p1692_p8 }
  0x6e   : > { %p1359_p11 = pneg %p1358_p3 }
  0x70   : > { %p1364_p13 = pnand %p1362_p12, %p1359_p11 }
  0x72   : > { %1367 = shalt.err (!%p1364_p13)
}
  0x73   : > { %s1368_s15 = scalar_lea.vmem %s273_s17, 640  ;;  %p1376_p7 = scmp.lt.s32.totalorder %s273_s17, %s273_s17 }
  0x74   : > { %p1369_p0 = scmp.ne.s32.totalorder %s273_s17, %s1368_s15  ;;  %p1377_p9 = scmp.lt.s32.totalorder %s1368_s15, %s1368_s15 }
  0x76   : > { %p1371_p2 = pnand %p1369_p0, %p1692_p8  ;;  %p1378_p5 = por %p1377_p9, %p1376_p7 }
  0x78   : > { %p1372_p4 = pneg %p1371_p2 }
  0x7a   : > { %p1379_p10 = pnand %p1378_p5, %p1372_p4 }
  0x7c   : > { %1382 = shalt.err (!%p1379_p10)
}
  0x7d   : > { %s1577_s13 = smov 128   ;;  %s1578_s7 = smov 8  }
  0x7e   : > { %1148 = dma.hbm_to_vmem [thread:$0]  (!%p1676_p6), %s2052_s4, 640, %s273_s17, [#allocation9], %s1577_s13, %s1577_s13, %s1578_s7  }
  0x7f   : > { %s1579_s19 = smov [#allocation13]   ;;  %s1383_s9 = scalar_lea.hbm %s2034_s6, 512 }
  0x80   : > { %s298_s20 = sshll.u32 %s1579_s19, 4  ;;  %p1384_p1 = scmp.ne.s32.totalorder %s2034_s6, %s1383_s9  ;;  %s299_s20 = int_to_ptr.vmem [resolvable:$true] %s298_s20 }
  0x81   : > { %p1390_p12 = scmp.lt.u32.totalorder %s1383_s9, %s2034_s6 }
  0x82   : > { %p1386_p3 = pnand %p1384_p1, %p1692_p8 }
  0x84   : > { %p1387_p11 = pneg %p1386_p3 }
  0x86   : > { %p1392_p13 = pnand %p1390_p12, %p1387_p11 }
  0x88   : > { %1395 = shalt.err (!%p1392_p13)
}
  0x89   : > { %s1396_s17 = scalar_lea.vmem %s299_s20, 512  ;;  %p1404_p7 = scmp.lt.s32.totalorder %s299_s20, %s299_s20 }
  0x8a   : > { %p1397_p0 = scmp.ne.s32.totalorder %s299_s20, %s1396_s17  ;;  %p1405_p9 = scmp.lt.s32.totalorder %s1396_s17, %s1396_s17 }
  0x8c   : > { %p1399_p2 = pnand %p1397_p0, %p1692_p8  ;;  %p1406_p5 = por %p1405_p9, %p1404_p7 }
  0x8e   : > { %p1400_p4 = pneg %p1399_p2 }
  0x90   : > { %p1407_p10 = pnand %p1406_p5, %p1400_p4 }
  0x92   : > { %1410 = shalt.err (!%p1407_p10)
}
  0x93   : > { %1154 = dma.hbm_to_vmem [thread:$0]  (!%p1676_p6), %s2034_s6, 512, %s299_s20, [#allocation12], %s1577_s13, %s1577_s13, %s1578_s7  }
  0x94   : > { %s1012_s21 = sadd.s32 4294967294, %s1569_s29   ;;  %s40_s12 = sadd.s32 1, %s1565_s28 }
  0x95   : > { %s49_s11 = sadd.s32 1, %s1557_s26  ;;  %p42_p8 = scmp.ge.s32.totalorder %s40_s12, 2 }
  0x96   : > { %p56_p1 = scmp.ne.s32.totalorder %s1557_s26, %s1553_s25  ;;  %p57_p3 = scmp.eq.s32.totalorder %s1569_s29, 0 }
  0x97   : > { %p62_p11 = scmp.ne.s32.totalorder %s1553_s25, %s1549_s24  ;;  %s2080_s12 = smov (%p42_p8, %s40_s12), 0 }
  0x98   : > { %p1810_p12 = por %p57_p3, %p56_p1  ;;  %p2054_p13 = scmp.eq.s32.totalorder %s1660_s30, 0 }
  0x99   : > { %s44_s7 = ssub.s32 %s1565_s28, %s2080_s12  ;;  %p221_p0 = scmp.eq.s32.totalorder %s1660_s30, 1 }
  0x9a   : > { %p1816_p6 = por %p2054_p13, %p62_p11  ;;  %p47_p2 = scmp.eq.s32.totalorder %s44_s7, 0 }
  0x9b   : > { %p227_p4 = scmp.eq.s32.totalorder %s1012_s21, 1  ;;  %p1823_p7 = por %p221_p0, %p56_p1 }
  0x9c   : > { %p1171_p9 = scmp.lt.s32.totalorder %s1569_s29, 2  ;;  %s1836_s23 = sand.u32 1, %s1557_s26  }
  0x9d   : > { %s2056_s19 = scalar_select %p1823_p7, 1, 0 }
  0x9e   : > { %s1829_s20 = scalar_select %p47_p2, %s1557_s26, %s49_s11  }
  0x9f   : > { %p1831_p5 = por %p227_p4, %p62_p11  ;;  %s1020_s9 = sshll.u32 %s1836_s23, 2 }
  0xa0   : > { %s1021_s10 = sshll.u32 %s1565_s28, 6  ;;  %s2058_s0 = sld [smem:[#allocation21_spill]] }
  0xa1   : > { %s2057_s22 = scalar_select %p1831_p5, 1, 0 }
  0xa2   : > { %s316_s18 = scalar_lea.vmem [#allocation2], %s1020_s9  ;;  %p1849_p10 = pnand %p1171_p9, %p1810_p12 }
  0xa3   : > { %s324_s21 = sshll.u32 %s316_s18, 4  ;;  %s1022_s7 = sshll.u32 %s1836_s23, 4  ;;  %s1845_s21 = int_to_ptr.vmem [resolvable:$true] %s324_s21 }
  0xa4   : > { %s313_s15 = scalar_lea.sflag [#allocation3], %s1836_s23  ;;  %p1413_p1 = pneg %p1849_p10 }
  0xa6   : > { %s1843_s16 = scalar_lea.hbm %s2058_s0, %s1021_s10  ;;  %s1416_s14 = scalar_lea.hbm %s2058_s0, 128 }
  0xa7   : > { %s1411_s10 = scalar_lea.hbm %s1843_s16, 64  ;;  %p1417_p12 = scmp.lt.u32.totalorder %s1843_s16, %s2058_s0 }
  0xa8   : > { %p1412_p8 = scmp.ne.s32.totalorder %s1843_s16, %s1411_s10  ;;  %p1418_p13 = scmp.lt.u32.totalorder %s1416_s14, %s1411_s10 }
  0xa9   : > { %p1420_p2 = scmp.lt.u32.totalorder %s1411_s10, %s1843_s16 }
  0xaa   : > { %p1414_p3 = pnand %p1413_p1, %p1412_p8  ;;  %p1419_p0 = por %p1418_p13, %p1417_p12 }
  0xac   : > { %p1415_p11 = pneg %p1414_p3  ;;  %p1421_p4 = por %p1420_p2, %p1419_p0 }
  0xae   : > { %p1422_p9 = pnand %p1421_p4, %p1415_p11 }
  0xb0   : > { %1425 = shalt.err (!%p1422_p9)
}
  0xb1   : > { %s1426_s2 = scalar_lea.vmem %s1845_s21, 64  ;;  %s1580_s9 = smov [#allocation2]  }
  0xb2   : > { %p1427_p8 = scmp.ne.s32.totalorder %s1845_s21, %s1426_s2  ;;  %s1431_s17 = sshll.u32 %s1580_s9, 4  ;;  %s1432_s17 = int_to_ptr.vmem [resolvable:$false] %s1431_s17 }
  0xb3   : > { %s1433_s3 = scalar_lea.vmem %s1432_s17, 128  ;;  %p1434_p7 = scmp.lt.s32.totalorder %s1845_s21, %s1432_s17 }
  0xb4   : > { %p1429_p3 = pnand %p1427_p8, %p1413_p1  ;;  %p1435_p12 = scmp.lt.s32.totalorder %s1433_s3, %s1426_s2 }
  0xb6   : > { %p1430_p5 = pneg %p1429_p3  ;;  %p1436_p13 = por %p1435_p12, %p1434_p7 }
  0xb8   : > { %p1437_p0 = pnand %p1436_p13, %p1430_p5 }
  0xba   : > { %1440 = shalt.err (!%p1437_p0)
}
  0xbb   : > { %1158 = dma.hbm_to_vmem [thread:$0]  (!%p1849_p10), %s1843_s16, 64, %s1845_s21, %s313_s15  }
  0xbc   : > { %s335_s10 = scalar_lea.vmem [#allocation5], %s1022_s7  ;;  %s331_s18 = sand.u32 1, %s1569_s29  }
  0xbd   : > { %s343_s14 = sshll.u32 %s335_s10, 4  ;;  %s2060_s9 = sshll.u32 %s1565_s28, 8  ;;  %s1884_s14 = int_to_ptr.vmem [resolvable:$true] %s343_s14 }
  0xbe   : > { %s1891_s3 = scalar_lea.hbm %s2029_s1, %s2060_s9  ;;  %s1893_s0 = scalar_lea.sflag [#allocation6], %s331_s18 }
  0xbf   : > { %s1441_s4 = scalar_lea.hbm %s1891_s3, 256  ;;  %s1446_s21 = scalar_lea.hbm %s2029_s1, 512 }
  0xc0   : > { %p1442_p7 = scmp.ne.s32.totalorder %s1891_s3, %s1441_s4  ;;  %p1447_p2 = scmp.lt.u32.totalorder %s1891_s3, %s2029_s1 }
  0xc1   : > { %p1448_p4 = scmp.lt.u32.totalorder %s1446_s21, %s1441_s4  ;;  %p1450_p8 = scmp.lt.u32.totalorder %s1441_s4, %s1891_s3 }
  0xc2   : > { %p1444_p5 = pnand %p1442_p7, %p1413_p1 }
  0xc3   : > { %p1449_p9 = por %p1448_p4, %p1447_p2 }
  0xc4   : > { %p1445_p11 = pneg %p1444_p5 }
  0xc5   : > { %p1451_p3 = por %p1450_p8, %p1449_p9 }
  0xc7   : > { %p1452_p12 = pnand %p1451_p3, %p1445_p11 }
  0xc9   : > { %1455 = shalt.err (!%p1452_p12)
}
  0xca   : > { %s1456_s10 = scalar_lea.vmem %s1884_s14, 256  ;;  %s1581_s18 = smov [#allocation5]  }
  0xcb   : > { %p1457_p13 = scmp.ne.s32.totalorder %s1884_s14, %s1456_s10  ;;  %s1461_s9 = sshll.u32 %s1581_s18, 4  ;;  %s1462_s9 = int_to_ptr.vmem [resolvable:$false] %s1461_s9 }
  0xcc   : > { %s1463_s2 = scalar_lea.vmem %s1462_s9, 512  ;;  %p1464_p5 = scmp.lt.s32.totalorder %s1884_s14, %s1462_s9 }
  0xcd   : > { %p1459_p0 = pnand %p1457_p13, %p1413_p1  ;;  %p1465_p2 = scmp.lt.s32.totalorder %s1463_s2, %s1456_s10 }
  0xcf   : > { %p1460_p7 = pneg %p1459_p0  ;;  %p1466_p4 = por %p1465_p2, %p1464_p5 }
  0xd1   : > { %p1467_p9 = pnand %p1466_p4, %p1460_p7 }
  0xd3   : > { %1470 = shalt.err (!%p1467_p9)
}
  0xd4   : > { %s2061_s4 = smov 4   ;;  %s2062_s17 = smov 64  }
  0xd5   : > { %1161 = dma.hbm_to_vmem [thread:$0]  (!%p1849_p10), %s1891_s3, 256, %s1884_s14, %s1893_s0, %s2062_s17, %s2062_s17, %s2061_s4  }
  0xd6   : > { %p2063_p1 = scmp.ne.s32.totalorder %s2047_s8, 0 }
  0xd7   : > { %s1925_s23 = sand.u32 (!%p2063_p1), 1, %s1553_s25  }
  0xd8   : > { %355 = sbr.rel (%p2063_p1) target bundleno = 774 (0x306), region = 48  ;;  %s1026_s16 = sshll.u32 (!%p2063_p1), %s1925_s23, 2 }
  0xd9   : > { %s358_s21 = scalar_lea.sflag (!%p2063_p1), [#allocation3], %s1925_s23  ;;  %s361_s7 = scalar_lea.vmem (!%p2063_p1), [#allocation2], %s1026_s16 }
  0xdf   : > { %1524 = dma.done.wait (%p1816_p6), %s358_s21, 64  }
  0xe0   : > { %1526 = vsyncadd (%p1816_p6), %s358_s21, 4294967232  ;;  %s366_s0 = sand.u32 1, %s1660_s30   ;;  %s1027_s8 = sshll.u32 %s1925_s23, 4 }
  0xe1   : > { %s367_s11 = scalar_lea.sflag [#allocation6], %s366_s0  ;;  %s370_s14 = scalar_lea.vmem [#allocation5], %s1027_s8 }
  0xe2   : > { %1528 = dma.done.wait (%p1816_p6), %s367_s11, 256  }
  0xe3   : > { %1530 = vsyncadd (%p1816_p6), %s367_s11, 4294967040  ;;  %p2064_p10 = scmp.eq.s32.totalorder %s1660_s30, 0 }
  0xe5   : > { %1532 = dma.done.wait (%p2064_p10), [#allocation6], 320   ;;  %p2065_p11 = pmov %p2064_p10 }
  0xe6   : > { %p2066_p8 = pmov %p2064_p10 }
  0xe7   : > { %1534 = vsyncadd (%p2065_p11), [#allocation6], 4294966976 }
  0xe8   : > { %1536 = dma.done.wait (%p2066_p8), [#allocation9], 960   ;;  %p2067_p3 = pmov %p2066_p8 }
  0xea   : > { %1538 = vsyncadd (%p2067_p3), [#allocation9], 4294966336  ;;  %p2068_p12 = pmov %p2067_p3 }
  0xeb   : > { %p2069_p13 = pmov %p2067_p3 }
  0xec   : > { %1540 = dma.done.wait (%p2068_p12), [#allocation12], 768  }
  0xed   : > { %1542 = vsyncadd (%p2069_p13), [#allocation12], 4294966528  ;;  %v1582_v0 = vmov 0.0   ;;  %vm1583_vm0 = vmmov 0   ;;  %v1584_v1 = vmov 0   ;;  %vm556_vm1 = vcmask 1043456  }
  0xee   : > { %1073 = vmatprep.subr.bf16.mxu0 %v1582_v0  ;;  %1089 = vmatprep.subr.bf16.mxu1 %v1582_v0  ;;  %v1243_v2 = vld [vmem:[%s370_s14] sm:$0xff]   ;;  %v427_v3 = vld [vmem:[%s361_s7] sm:$0xf]  ;;  %vm546_vm2 = vcmask 64512   ;;  %vm467_vm3 = vcmask 261120   ;;  %v616_v8 = vld [vmem:[#allocation10] sm:$0xff] }
  0xef   : > { %1091 = vmatprep.mubr.msk.bf16.mxu1 %vm1583_vm0, %v1582_v0  ;;  %1077 = vmatprep.mubr.msk.bf16.mxu0 %vm1583_vm0, %v1582_v0  ;;  %v558_v4 = vsel %vm556_vm1, %v427_v3, 0  ;;  %v1244_v5 = vld [vmem:[%s370_s14 + $0x8] sm:$0xff]   ;;  %v1245_v6 = vld [vmem:[#allocation7] sm:$0xff]   ;;  %v617_v10 = vld [vmem:[#allocation10 + $0x8] sm:$0xff]  ;;  %vm737_vm4 = vcmask 285696   ;;  %vm744_vm5 = vcmask 1040384  }
  0xf0   : > { %1241 = vset.pattern.permute.xlu0 %v1584_v1  ;;  %1242 = vset.pattern.permute.xlu1 %v1584_v1  ;;  %v1246_v7 = vld [vmem:[#allocation8] sm:$0xff]   ;;  %v1247_v11 = vld [vmem:[#allocation7 + $0x8] sm:$0xff]   ;;  %v619_v12 = vld [vmem:[#allocation10 + $0x18] sm:$0xff]  ;;  %vm745_vm6 = vcmask 1041408   ;;  %s1033_s30 = sshll.u32 %s1925_s23, 5  ;;  %s1058_s13 = sshll.u32 %s1561_s27, 9 }
  0xf1   : > { %1074 = vmatpush3.bf16.msra.mxu0 %v1243_v2  ;;  %1090 = vmatpush3.bf16.msra.mxu1 %v558_v4  ;;  %v618_v9 = vld [vmem:[#allocation10 + $0x10] sm:$0xff]  ;;  %v620_v14 = vld [vmem:[#allocation10 + $0x20] sm:$0x7]  ;;  %v703_v15 = vld [vmem:[#allocation13] sm:$0xff]  ;;  %s425_s3 = scalar_lea.vmem [#allocation14], %s1033_s30  ;;  %s2070_s9 = sld [smem:[#allocation25_spill]] }
  0xf2   : > { %1075 = vmatprep.subr.bf16.mxu0 %v1582_v0  ;;  %623 = vperm.xlu0 %1241, %v616_v8   ;;  %v1248_v13 = vld [vmem:[#allocation8 + $0x8] sm:$0xff]   ;;  %v704_v16 = vld [vmem:[#allocation13 + $0x8] sm:$0xff]  ;;  %v1249_v17 = vld [vmem:[#allocation7 + $0x10] ss:$0 sps:$4 sm:$0x33]   ;;  %s855_s15 = sshll.u32 %s425_s3, 4  ;;  %s1979_s15 = int_to_ptr.vmem [resolvable:$true] %s855_s15 }
  0xf3   : > { %633 = vperm.xlu1 %1242, %v618_v9   ;;  %v705_v18 = vld [vmem:[#allocation13 + $0x10] sm:$0xff]  ;;  %v1250_v19 = vld [vmem:[#allocation8 + $0x10] ss:$0 sps:$4 sm:$0x33]   ;;  %v706_v20 = vld [vmem:[#allocation13 + $0x18] sm:$0xff]  ;;  %s841_s27 = scalar_lea.sflag [#allocation4], %s1925_s23 }
  0xf4   : > { %1092 = vmatmul.mubr.msk.bf16.vlgmr.msra.gmra.mrb[0].mxu1 %vm546_vm2, %v1245_v6  ;;  %v1251_v21 = vld [vmem:[#allocation11] sm:$0xff]   ;;  %s1471_s4 = scalar_lea.vmem %s1979_s15, 512  ;;  %p2071_p0 = scmp.ne.s32.totalorder %s2056_s19, 0 }
  0xf5   : > { %1076 = vmatpush3.bf16.msra.mxu0 %v1244_v5  ;;  %1095 = vmatprep.mubr.msk.bf16.mxu1 %vm1583_vm0, %v1582_v0  ;;  %p1472_p6 = scmp.ne.s32.totalorder %s1979_s15, %s1471_s4  ;;  %s1586_s17 = smov [#allocation14]  }
  0xf6   : > { %628 = vperm.xlu0 %1241, %v617_v10   ;;  %s1475_s16 = sshll.u32 %s1586_s17, 4  ;;  %s1476_s16 = int_to_ptr.vmem [resolvable:$false] %s1475_s16 }
  0xf7   : > { %638 = vperm.xlu1 %1242, %v619_v12   ;;  %s1977_s2 = scalar_lea.hbm %s2070_s9, %s1058_s13  ;;  %p1473_p7 = pnand %p1472_p6, %p2071_p0 }
  0xf8   : > { %1078 = vmatmul.mubr.msk.bf16.vlgmr.msra.gmra.mrb[0].mxu0 %vm467_vm3, %v1246_v7  ;;  %s1477_s21 = scalar_lea.vmem %s1476_s16, 1024  ;;  %p1478_p2 = scmp.lt.s32.totalorder %s1979_s15, %s1476_s16 }
  0xf9   : > { %1081 = vmatprep.mubr.msk.bf16.mxu0 %vm1583_vm0, %v1582_v0  ;;  %p1474_p5 = pneg %p1473_p7  ;;  %p1479_p4 = scmp.lt.s32.totalorder %s1477_s21, %s1471_s4 }
  0xfa   : > { %643 = vperm.xlu0 %1241, %v620_v14  }
  0xfb   : > { %709 = vperm.xlu1 %1242, %v703_v15   ;;  %p1480_p9 = por %p1479_p4, %p1478_p2 }
  0xfc   : > { %1096 = vmatmul.mubr.msk.bf16.gmra.mrb[4].mxu1 %vm546_vm2, %v1247_v11 }
  0xfd   : > { %1099 = vmatprep.mubr.msk.bf16.mxu1 %vm1583_vm0, %v1582_v0  ;;  %p1481_p1 = pnand %p1480_p9, %p1474_p5 }
  0xfe   : > { %714 = vperm.xlu0 %1241, %v704_v16  }
  0xff   : > { %719 = vperm.xlu1 %1242, %v705_v18  }
 0x100   : > { %1082 = vmatmul.mubr.msk.bf16.gmra.mrb[4].mxu0 %vm467_vm3, %v1248_v13 }
 0x101   : > { %1085 = vmatprep.mubr.msk.bf16.mxu0 %vm1583_vm0, %v1582_v0 }
 0x102   : > { %724 = vperm.xlu0 %1241, %v706_v20  }
 0x104   : > { %1100 = vmatmul.mubr.msk.bf16.gmra.mrb[8].mxu1 %vm546_vm2, %v1249_v17 }
 0x105   : > { %1109 = vmatprep.mubr.msk.bf16.mxu1 %vm737_vm4, %v1251_v21 }
 0x108   : > { %1086 = vmatmul.mubr.msk.bf16.gmra.mrb[8].mxu0 %vm467_vm3, %v1250_v19 }
 0x171   : > { %v624_v23 = vpop.permute.xlu0 %623 }
 0x172   : > { %v634_v38 = vpop.permute.xlu1 %633 }
 0x175   : > { %v629_v34 = vpop.permute.xlu0 %628 }
 0x176   : > { %v639_v55 = vpop.permute.xlu1 %638 }
 0x179   : > { %v644_v8 = vpop.permute.xlu0 %643 }
 0x1c7   : > { %v594_v22 = vpop.f32.mrb[0].mxu1 }
 0x1c8   : > { %v1093_v24 = vpop.f32.mrb[1].mxu1 }
 0x1c9   : > { %v597_v25 = vpop.f32.mrb[2].mxu1 }
 0x1ca   : > { %v1094_v27 = vpop.f32.mrb[3].mxu1 }
 0x1cb   : > { %v511_v26 = vpop.f32.mrb[0].mxu0 }
 0x1cc   : > { %v595_v28 = vadd.f32 %v594_v22, %v511_v26  ;;  %v1079_v29 = vpop.f32.mrb[1].mxu0 }
 0x1cd   : > { %v514_v30 = vpop.f32.mrb[2].mxu0 }
 0x1ce   : > { %v1964_v31 = vadd.f32 %v624_v23, %v595_v28  ;;  %v598_v32 = vadd.f32 %v597_v25, %v514_v30  ;;  %v1080_v33 = vpop.f32.mrb[3].mxu0 }
 0x1cf   : > { %v602_v37 = vpop.f32.mrb[4].mxu1 }
 0x1d0   : > { %v651_v35 = vmul.f32 %v1964_v31, %v1964_v31  ;;  %v647_v36 = vadd.f32 %v629_v34, %v598_v32  ;;  %v1097_v39 = vpop.f32.mrb[5].mxu1 }
 0x1d1   : > { %v605_v42 = vpop.f32.mrb[6].mxu1 }
 0x1d2   : > { %v656_v40 = vmul.f32 %v651_v35, %v1964_v31  ;;  %v652_v41 = vmul.f32 %v647_v36, %v647_v36  ;;  %v1098_v44 = vpop.f32.mrb[7].mxu1 }
 0x1d3   : > { %v519_v43 = vpop.f32.mrb[4].mxu0 }
 0x1d4   : > { %v661_v45 = vmul.f32 0.044715, %v656_v40  ;;  %v657_v46 = vmul.f32 %v652_v41, %v647_v36  ;;  %v603_v47 = vadd.f32 %v602_v37, %v519_v43  ;;  %v1083_v48 = vpop.f32.mrb[5].mxu0 }
 0x1d5   : > { %v522_v49 = vpop.f32.mrb[6].mxu0 }
 0x1d6   : > { %v666_v50 = vadd.f32 %v661_v45, %v1964_v31  ;;  %v662_v51 = vmul.f32 0.044715, %v657_v46  ;;  %v648_v52 = vadd.f32 %v634_v38, %v603_v47  ;;  %v606_v53 = vadd.f32 %v605_v42, %v522_v49  ;;  %v1084_v54 = vpop.f32.mrb[7].mxu0  ;;  %v1252_v49 = vld [vmem:[#allocation11 + $0x8] sm:$0xff]  }
 0x1d7   : > { %v610_v60 = vpop.f32.mrb[8].mxu1 }
 0x1d8   : > { %v671_v56 = vmul.f32 0.7978846, %v666_v50  ;;  %v667_v57 = vadd.f32 %v662_v51, %v647_v36  ;;  %v653_v58 = vmul.f32 %v648_v52, %v648_v52  ;;  %v649_v59 = vadd.f32 %v639_v55, %v606_v53  ;;  %v1101_v61 = vpop.f32.mrb[9].mxu1  ;;  %v710_v50 = vpop.permute.xlu1 %709 }
 0x1d9   : > { %v613_v1 = vpop.f32.mrb[10].mxu1  ;;  %v715_v51 = vpop.permute.xlu0 %714 }
 0x1da   : > { %v672_v62 = vmul.f32 0.7978846, %v667_v57  ;;  %v658_v63 = vmul.f32 %v653_v58, %v648_v52  ;;  %v654_v0 = vmul.f32 %v649_v59, %v649_v59  ;;  %1253 = vtanh.f32 %v671_v56  ;;  %v1102_v3 = vpop.f32.mrb[11].mxu1 }
 0x1db   : > { %v527_v2 = vpop.f32.mrb[8].mxu0 }
 0x1dc   : > { %v663_v4 = vmul.f32 0.044715, %v658_v63  ;;  %v659_v5 = vmul.f32 %v654_v0, %v649_v59  ;;  %v611_v6 = vadd.f32 %v610_v60, %v527_v2  ;;  %v1087_v7 = vpop.f32.mrb[9].mxu0  ;;  %1255 = vtanh.f32 %v672_v62 }
 0x1dd   : > { %v530_v9 = vpop.f32.mrb[10].mxu0  ;;  %v725_v56 = vpop.permute.xlu0 %724 }
 0x1de   : > { %v668_v10 = vadd.f32 %v663_v4, %v648_v52  ;;  %v664_v11 = vmul.f32 0.044715, %v659_v5  ;;  %v650_v12 = vadd.f32 %v644_v8, %v611_v6  ;;  %v1088_v13 = vpop.f32.mrb[11].mxu0 }
 0x1e0   : > { %v673_v14 = vmul.f32 0.7978846, %v668_v10  ;;  %v669_v15 = vadd.f32 %v664_v11, %v649_v59  ;;  %v655_v16 = vmul.f32 %v650_v12, %v650_v12 }
 0x1e2   : > { %v674_v17 = vmul.f32 0.7978846, %v669_v15  ;;  %v660_v18 = vmul.f32 %v655_v16, %v650_v12  ;;  %1257 = vtanh.f32 %v673_v14 }
 0x1e4   : > { %v1254_v19 = vpop.eup %1253  ;;  %v665_v20 = vmul.f32 0.044715, %v660_v18  ;;  %1259 = vtanh.f32 %v674_v17 }
 0x1e5   : > { %v681_v21 = vadd.f32 1.0, %v1254_v19 }
 0x1e6   : > { %v1256_v22 = vpop.eup %1255  ;;  %v670_v23 = vadd.f32 %v665_v20, %v650_v12 }
 0x1e7   : > { %v682_v24 = vadd.f32 1.0, %v1256_v22  ;;  %v686_v25 = vmul.f32 0.5, %v681_v21 }
 0x1e8   : > { %v675_v26 = vmul.f32 0.7978846, %v670_v23 }
 0x1e9   : > { %v687_v27 = vmul.f32 0.5, %v682_v24  ;;  %v691_v28 = vmul.f32 %v686_v25, %v1964_v31  ;;  %v1585_v31 = vmov 65535  }
 0x1ea   : > { %1261 = vtanh.f32 %v675_v26 }
 0x1eb   : > { %v692_v29 = vmul.f32 %v687_v27, %v647_v36  ;;  %v746_v36 = vsel %vm744_vm5, 4294967295, %v1585_v31 }
 0x1ec   : > { %v1258_v30 = vpop.eup %1257  ;;  %v747_v46 = vsel %vm745_vm6, %v746_v36, 0 }
 0x1ed   : > { %v700_v32 = vpack.c.bf16 %v692_v29, %v691_v28  ;;  %v683_v33 = vadd.f32 1.0, %v1258_v30 }
 0x1ee   : > { %v1260_v34 = vpop.eup %1259 }
 0x1ef   : > { %1103 = vmatprep.subr.bf16.mxu1 %v700_v32  ;;  %v684_v35 = vadd.f32 1.0, %v1260_v34  ;;  %v688_v37 = vmul.f32 0.5, %v683_v33 }
 0x1f0   : > { %1104 = vmatpush3.bf16.msra.mxu1 %v700_v32 }
 0x1f1   : > { %v689_v38 = vmul.f32 0.5, %v684_v35  ;;  %v693_v39 = vmul.f32 %v688_v37, %v648_v52  ;;  %v720_v52 = vpop.permute.xlu1 %719 }
 0x1f3   : > { %v694_v40 = vmul.f32 %v689_v38, %v649_v59 }
 0x1f4   : > { %v1262_v41 = vpop.eup %1261 }
 0x1f5   : > { %v701_v42 = vpack.c.bf16 %v694_v40, %v693_v39  ;;  %v685_v43 = vadd.f32 1.0, %v1262_v41 }
 0x1f7   : > { %1105 = vmatprep.subr.bf16.mxu1 %v701_v42  ;;  %v690_v44 = vmul.f32 0.5, %v685_v43 }
 0x1f8   : > { %1106 = vmatpush3.bf16.msra.mxu1 %v701_v42 }
 0x1f9   : > { %v695_v45 = vmul.f32 %v690_v44, %v650_v12 }
 0x1fb   : > { %v702_v47 = vpack.c.bf16 %v695_v45, %v695_v45 }
 0x1fd   : > { %v749_v48 = vand.u32 %v747_v46, %v702_v47 }
 0x1ff   : > { %1107 = vmatprep.subr.bf16.mxu1 %v749_v48 }
 0x200   : > { %1108 = vmatpush3.bf16.msra.mxu1 %v749_v48 }
 0x203   : > { %1110 = vmatmul.mubr.msk.bf16.vlgmr.msra.gmra.mrb[12].mxu1 %vm737_vm4, %v1252_v49 }
 0x2d6   : > { %v1111_v53 = vpop.f32.mrb[12].mxu1 }
 0x2d7   : > { %v794_v54 = vadd.f32 %v1111_v53, %v720_v52  ;;  %v785_v55 = vpop.f32.mrb[13].mxu1 }
 0x2d8   : > { %v786_v57 = vadd.f32 %v785_v55, %v710_v50  ;;  %v1112_v58 = vpop.f32.mrb[14].mxu1 }
 0x2d9   : > { %v802_v59 = vmul.f32 %v794_v54, %v794_v54  ;;  %v797_v60 = vadd.f32 %v1112_v58, %v725_v56  ;;  %v788_v61 = vpop.f32.mrb[15].mxu1 }
 0x2da   : > { %v800_v62 = vmul.f32 %v786_v57, %v786_v57  ;;  %v789_v63 = vadd.f32 %v788_v61, %v715_v51 }
 0x2db   : > { %v806_v0 = vmul.f32 %v802_v59, %v794_v54  ;;  %v803_v1 = vmul.f32 %v797_v60, %v797_v60 }
 0x2dc   : > { %v804_v2 = vmul.f32 %v800_v62, %v786_v57  ;;  %v801_v3 = vmul.f32 %v789_v63, %v789_v63 }
 0x2dd   : > { %v810_v4 = vmul.f32 0.044715, %v806_v0  ;;  %v807_v5 = vmul.f32 %v803_v1, %v797_v60 }
 0x2de   : > { %v808_v6 = vmul.f32 0.044715, %v804_v2  ;;  %v805_v7 = vmul.f32 %v801_v3, %v789_v63 }
 0x2df   : > { %v814_v8 = vadd.f32 %v810_v4, %v794_v54  ;;  %v811_v9 = vmul.f32 0.044715, %v807_v5 }
 0x2e0   : > { %v812_v10 = vadd.f32 %v808_v6, %v786_v57  ;;  %v809_v11 = vmul.f32 0.044715, %v805_v7 }
 0x2e1   : > { %v818_v12 = vmul.f32 0.7978846, %v814_v8  ;;  %v815_v13 = vadd.f32 %v811_v9, %v797_v60 }
 0x2e2   : > { %v816_v14 = vmul.f32 0.7978846, %v812_v10  ;;  %v813_v15 = vadd.f32 %v809_v11, %v789_v63 }
 0x2e3   : > { %1263 = vtanh.f32 %v818_v12  ;;  %v819_v16 = vmul.f32 0.7978846, %v815_v13 }
 0x2e4   : > { %1265 = vtanh.f32 %v816_v14  ;;  %v817_v17 = vmul.f32 0.7978846, %v813_v15 }
 0x2e5   : > { %1267 = vtanh.f32 %v819_v16 }
 0x2e6   : > { %1269 = vtanh.f32 %v817_v17 }
 0x2ed   : > { %v1264_v18 = vpop.eup %1263 }
 0x2ee   : > { %v1266_v19 = vpop.eup %1265  ;;  %v826_v20 = vadd.f32 1.0, %v1264_v18 }
 0x2ef   : > { %v1268_v21 = vpop.eup %1267  ;;  %v824_v22 = vadd.f32 1.0, %v1266_v19 }
 0x2f0   : > { %v1270_v23 = vpop.eup %1269  ;;  %v830_v24 = vmul.f32 0.5, %v826_v20  ;;  %v827_v25 = vadd.f32 1.0, %v1268_v21 }
 0x2f1   : > { %v828_v26 = vmul.f32 0.5, %v824_v22  ;;  %v825_v27 = vadd.f32 1.0, %v1270_v23 }
 0x2f2   : > { %v834_v28 = vmul.f32 %v830_v24, %v794_v54  ;;  %v831_v29 = vmul.f32 0.5, %v827_v25 }
 0x2f3   : > { %v832_v30 = vmul.f32 %v828_v26, %v786_v57  ;;  %v829_v32 = vmul.f32 0.5, %v825_v27 }
 0x2f4   : > { %838 = vst [vmem:[%s425_s3 + $0x10] sm:$0xff] %v834_v28  ;;  %v835_v33 = vmul.f32 %v831_v29, %v797_v60 }
 0x2f5   : > { %836 = vst [vmem:[%s425_s3] sm:$0xff] %v832_v30  ;;  %v833_v34 = vmul.f32 %v829_v32, %v789_v63 }
 0x2f6   : > { %839 = vst [vmem:[%s425_s3 + $0x18] sm:$0xff] %v835_v33 }
 0x2f7   : > { %837 = vst [vmem:[%s425_s3 + $0x8] sm:$0xff] %v833_v34 }
 0x2f8   : > { %1484 = shalt.err (!%p1481_p1)
}
 0x2f9   : > { %s1485_s7 = scalar_lea.hbm %s1977_s2, 512  ;;  %s1489_s11 = scalar_lea.hbm %s2070_s9, 1024 }
 0x2fa   : > { %p1486_p10 = scmp.ne.s32.totalorder %s1977_s2, %s1485_s7  ;;  %p1490_p3 = scmp.lt.u32.totalorder %s1977_s2, %s2070_s9 }
 0x2fb   : > { %p1491_p12 = scmp.lt.u32.totalorder %s1489_s11, %s1485_s7  ;;  %p1493_p6 = scmp.lt.u32.totalorder %s1485_s7, %s1977_s2 }
 0x2fc   : > { %p1487_p11 = pnand %p1486_p10, %p2071_p0 }
 0x2fd   : > { %p1492_p13 = por %p1491_p12, %p1490_p3 }
 0x2fe   : > { %p1488_p8 = pneg %p1487_p11 }
 0x2ff   : > { %p1494_p7 = por %p1493_p6, %p1492_p13 }
 0x301   : > { %p1495_p5 = pnand %p1494_p7, %p1488_p8 }
 0x303   : > { %1498 = shalt.err (!%p1495_p5)
}
 0x304   : > { %s1587_s13 = smov 128   ;;  %s1588_s3 = smov 8  }
 0x305   : > { %1137 = dma.vmem_to_hbm [thread:$0]  (%p2071_p0), %s1979_s15, 512, %s1977_s2, %s841_s27, %s1587_s13, %s1587_s13, %s1588_s3  }
 0x306 PF: > { %s870_s10 = sand.u32 1, %s1549_s24   ;;  %p2072_p2 = scmp.ne.s32.totalorder %s2057_s22, 0 }
 0x307   : > { %p2073_p4 = scmp.ge.s32.totalorder %s1569_s29, 2  ;;  %s871_s18 = scalar_lea.sflag [#allocation4], %s870_s10 }
 0x309   : > { %p1163_p9 = pnand %p2073_p4, %p2072_p2 }
 0x30b   : > { %1544 = dma.done.wait (!%p1163_p9), %s871_s18, 512  }
 0x30c   : > { %1546 = vsyncadd (!%p1163_p9), %s871_s18, 4294966784  ;;  %s28_s29 = sadd.s32 1, %s1569_s29   ;;  %s2074_s24 = smov %s1553_s25 }
 0x30d   : > { %p25_p1 = scmp.ge.s32.totalorder %s28_s29, 4   ;;  %s2075_s25 = smov %s1557_s26 }
 0x30e   : > { %s2076_s26 = smov %s1829_s20  ;;  %s2077_s27 = smov %s1565_s28 }
 0x30f   : > { %s2078_s28 = smov %s2080_s12  ;;  %27 = sbr.rel (!%p25_p1) target bundleno = 16 (0x10), region = 126 }
 0x316   :  { %876 = vsyncpa [#allocation3], 1 }
 0x317   :  { %878 = vsyncpa [#allocation3 + $0x1], 1 }
 0x318   :  { %879 = vsyncpa [#allocation6], 1 }
 0x319   :  { %881 = vsyncpa [#allocation6 + $0x1], 1 }
 0x31a   :  { %882 = vsyncpa [#allocation9], 1 }
 0x31b   :  { %883 = vsyncpa [#allocation12], 1 }
 0x31c   :  { %884 = vsyncpa [#allocation4], 1 }
 0x31d   :  { %886 = vsyncpa [#allocation4 + $0x1], 1 }

// kernel: gcn_encoder_forward.3
= control target key start
LH: loop header
LB: loop body
LE: loop exit
PB: predicated region body
PF: predicated region fallthrough
CT: control target
= control target key end

     0   :  { %s7663_s0 = inlined_call_operand.hbm [shape: f32[2,2,128], index: 0, kind: input, shape index: {}, may-alias: {0,2}]   ;;  %s7664_s1 = inlined_call_operand.hbm [shape: f32[2,128,2], index: 1, kind: input, shape index: {}]   ;;  %s7665_s2 = inlined_call_operand.hbm [shape: f32[2,2,128], index: 2, kind: input, shape index: {}, may-alias: {0,2}]   ;;  %s7666_s3 = inlined_call_operand.hbm [shape: bf16[5,2], index: 3, kind: input, shape index: {}]   ;;  %s7667_s4 = inlined_call_operand.hbm [shape: bf16[5,2], index: 4, kind: input, shape index: {}]   ;;  %s7668_s5 = inlined_call_operand.hbm [shape: f32[5,1], index: 5, kind: input, shape index: {}]   ;;  %s7669_s6 = inlined_call_operand.hbm [shape: bf16[8,5], index: 6, kind: input, shape index: {}]   ;;  %s7670_s7 = inlined_call_operand.hbm [shape: f32[8,1], index: 7, kind: input, shape index: {}]   ;;  %s7671_s8 = inlined_call_operand.hbm [shape: bf16[2,8,128], index: 8, kind: output, shape index: {}]  }
   0x1   :  { %7796 = sst [smem:[#allocation31_spill]] %s7664_s1 }
   0x2   :  { %7797 = sst [smem:[#allocation32_spill]] %s7666_s3 }
   0x3   :  { %7798 = sst [smem:[#allocation33_spill]] %s7668_s5 }
   0x4   :  { %7799 = sst [smem:[#allocation34_spill]] %s7671_s8 }
   0x5   :  { %13 = vsyncpa [#allocation3], 0 }
   0x6   :  { %15 = vsyncpa [#allocation3 + $0x1], 0 }
   0x7   :  { %16 = vsyncpa [#allocation6], 0 }
   0x8   :  { %18 = vsyncpa [#allocation6 + $0x1], 0 }
   0x9   :  { %19 = vsyncpa [#allocation9], 0 }
   0xa   :  { %20 = vsyncpa [#allocation12], 0 }
   0xb   :  { %21 = vsyncpa [#allocation15], 0 }
   0xc   :  { %22 = vsyncpa [#allocation4], 0 }
   0xd   :  { %24 = vsyncpa [#allocation4 + $0x1], 0  ;;  %s5007_s27 = smov 0   ;;  %s5009_s28 = smov 0  }
   0xe   :  { %s5011_s29 = smov 0   ;;  %s5013_s30 = smov 0  }
   0xf   :  { %s5015_s9 = smov 0   ;;  %s5017_s10 = smov 0  }
  0x10 LB: > { %7800 = sst [smem:[#allocation23_spill]] %s4923_s27  ;;  %s5038_s11 = sadd.s32 4294967295, %s4943_s10   ;;  %s4943_s10 = sphi %s5017_s10, %s30_s10   ;;  %s4939_s9 = sphi %s5015_s9, %s7979_s9   ;;  %s4935_s30 = sphi %s5013_s30, %s7978_s30   ;;  %s4931_s29 = sphi %s5011_s29, %s7974_s29   ;;  %s4927_s28 = sphi %s5009_s28, %s7977_s28   ;;  %s4923_s27 = sphi %s5007_s27, %s7976_s27  }
  0x11   : > { %7801 = sst [smem:[#allocation24_spill]] %s4931_s29  ;;  %p3467_p0 = scmp.ge.s32.totalorder %s4943_s10, 1 }
  0x12   : > { %7802 = sst [smem:[#allocation25_spill]] %s4935_s30  ;;  %p7672_p1 = scmp.eq.s32.totalorder %s5038_s11, 0 }
  0x13   : > { %7803 = sst [smem:[#allocation26_spill]] %s4943_s10  ;;  %p260_p2 = scmp.lt.s32.totalorder %s4943_s10, 3 }
  0x14   : > { %s4945_s13 = smov [#allocation8]   ;;  %s4946_s15 = smov [#allocation11]  }
  0x15   : > { %p5043_p3 = pnand %p3467_p0, %p260_p2  ;;  %s273_s14 = sshll.u32 %s4945_s13, 4  ;;  %s274_s14 = int_to_ptr.vmem [resolvable:$true] %s273_s14 }
  0x16   : > { %s295_s16 = sshll.u32 %s4946_s15, 4  ;;  %s7806_s3 = sld [smem:[#allocation32_spill]]  ;;  %s5056_s16 = int_to_ptr.vmem [resolvable:$true] %s295_s16 }
  0x17   : > { %s7804_s12 = scalar_select %p5043_p3, 1, 0 }
  0x18   : > { %p4473_p5 = pneg %p5043_p3 }
  0x1a   : > { %p5052_p6 = pnand %p4473_p5, %p7672_p1 }
  0x1c   : > { %s7805_s17 = scalar_select %p5052_p6, 1, 0 }
  0x1d   : > { %s4615_s20 = scalar_lea.hbm %s7806_s3, 64  ;;  %p5066_p8 = pneg %p5052_p6 }
  0x1e   : > { %p4616_p7 = scmp.ne.s32.totalorder %s7806_s3, %s4615_s20  ;;  %p4622_p11 = scmp.lt.u32.totalorder %s4615_s20, %s7806_s3 }
  0x1f   : > { %s7807_s23 = scalar_select %p5066_p8, 1, 0 }
  0x20   : > { %p4618_p9 = pnand %p5066_p8, %p4616_p7 }
  0x22   : > { %p4619_p10 = pneg %p4618_p9 }
  0x24   : > { %p4624_p12 = pnand %p4622_p11, %p4619_p10 }
  0x26   : > { %4627 = shalt.err (!%p4624_p12)
}
  0x27   : > { %s4628_s26 = scalar_lea.vmem %s274_s14, 64  ;;  %p4636_p5 = scmp.lt.s32.totalorder %s274_s14, %s274_s14 }
  0x28   : > { %p4629_p13 = scmp.ne.s32.totalorder %s274_s14, %s4628_s26  ;;  %p4637_p4 = scmp.lt.s32.totalorder %s4628_s26, %s4628_s26 }
  0x2a   : > { %p4631_p0 = pnand %p4629_p13, %p5066_p8  ;;  %p4638_p1 = por %p4637_p4, %p4636_p5 }
  0x2c   : > { %p4632_p2 = pneg %p4631_p0 }
  0x2e   : > { %p4639_p3 = pnand %p4638_p1, %p4632_p2 }
  0x30   : > { %4642 = shalt.err (!%p4639_p3)
}
  0x31   : > { %4476 = dma.hbm_to_vmem [thread:$0]  (!%p5052_p6), %s7806_s3, 64, %s274_s14, [#allocation9]  }
  0x32   : > { %s7808_s5 = sld [smem:[#allocation33_spill]] }
  0x38   : > { %s4643_s20 = scalar_lea.hbm %s7808_s5, 128 }
  0x39   : > { %p4644_p7 = scmp.ne.s32.totalorder %s7808_s5, %s4643_s20  ;;  %p4650_p1 = scmp.lt.u32.totalorder %s4643_s20, %s7808_s5 }
  0x3b   : > { %p4646_p9 = pnand %p4644_p7, %p5066_p8 }
  0x3d   : > { %p4647_p4 = pneg %p4646_p9 }
  0x3f   : > { %p4652_p3 = pnand %p4650_p1, %p4647_p4 }
  0x41   : > { %4655 = shalt.err (!%p4652_p3)
}
  0x42   : > { %s4656_s14 = scalar_lea.vmem %s5056_s16, 128  ;;  %p4664_p13 = scmp.lt.s32.totalorder %s5056_s16, %s5056_s16 }
  0x43   : > { %p4657_p10 = scmp.ne.s32.totalorder %s5056_s16, %s4656_s14  ;;  %p4665_p0 = scmp.lt.s32.totalorder %s4656_s14, %s4656_s14 }
  0x45   : > { %p4659_p11 = pnand %p4657_p10, %p5066_p8  ;;  %p4666_p2 = por %p4665_p0, %p4664_p13 }
  0x47   : > { %p4660_p12 = pneg %p4659_p11 }
  0x49   : > { %p4667_p5 = pnand %p4666_p2, %p4660_p12 }
  0x4b   : > { %4670 = shalt.err (!%p4667_p5)
}
  0x4c   : > { %4482 = dma.hbm_to_vmem [thread:$0]  (!%p5052_p6), %s7808_s5, 128, %s5056_s16, [#allocation12]  }
  0x4d   : > { %s3466_s15 = sadd.s32 4294967294, %s4943_s10   ;;  %s42_s18 = sadd.s32 1, %s4939_s9 }
  0x4e   : > { %p44_p7 = scmp.ge.s32.totalorder %s42_s18, 2  ;;  %s51_s19 = sadd.s32 1, %s4931_s29 }
  0x4f   : > { %p58_p9 = scmp.ne.s32.totalorder %s4931_s29, %s4927_s28  ;;  %p59_p4 = scmp.eq.s32.totalorder %s4943_s10, 0 }
  0x50   : > { %s7981_s18 = smov (%p44_p7, %s42_s18), 0  ;;  %p64_p3 = scmp.ne.s32.totalorder %s4927_s28, %s4923_s27 }
  0x51   : > { %7809 = sst [smem:[#allocation27_spill]] %s7981_s18  ;;  %p5113_p1 = por %p59_p4, %p58_p9 }
  0x52   : > { %s46_s16 = ssub.s32 %s4939_s9, %s7981_s18  ;;  %p247_p10 = scmp.eq.s32.totalorder %s5038_s11, 1 }
  0x53   : > { %p49_p11 = scmp.eq.s32.totalorder %s46_s16, 0  ;;  %p7811_p12 = scmp.eq.s32.totalorder %s5038_s11, 0 }
  0x54   : > { %p5128_p0 = por %p247_p10, %p58_p9  ;;  %p253_p2 = scmp.eq.s32.totalorder %s3466_s15, 1 }
  0x55   : > { %p5124_p13 = por %p7811_p12, %p64_p3  ;;  %p4508_p7 = scmp.lt.s32.totalorder %s4943_s10, 2 }
  0x56   : > { %s7813_s22 = scalar_select %p5128_p0, 1, 0 }
  0x57   : > { %s7812_s21 = scalar_select %p5124_p13, 1, 0 }
  0x58   : > { %7814 = sst [smem:[#allocation28_spill]] %s7813_s22  ;;  %p5135_p5 = por %p253_p2, %p64_p3 }
  0x59   : > { %s5133_s24 = scalar_select %p49_p11, %s4931_s29, %s51_s19  }
  0x5a   : > { %s7816_s25 = scalar_select %p5135_p5, 1, 0 }
  0x5b   : > { %7815 = sst [smem:[#allocation29_spill]] %s5133_s24  ;;  %s5141_s14 = sand.u32 1, %s4931_s29  }
  0x5c   : > { %7817 = sst [smem:[#allocation30_spill]] %s7816_s25  ;;  %s347_s26 = sand.u32 1, %s4943_s10  }
  0x5d   : > { %p5146_p4 = pnand %p4508_p7, %p5113_p1  ;;  %s3476_s16 = sshll.u32 %s5141_s14, 7 }
  0x5e   : > { %s3657_s3 = sshll.u32 %s4939_s9, 11  ;;  %s7819_s1 = sld [smem:[#allocation31_spill]] }
  0x5f   : > { %s7818_s13 = scalar_select %p5146_p4, 1, 0 }
  0x60   : > { %s351_s18 = scalar_lea.vmem [#allocation5], %s3476_s16  ;;  %s5159_s20 = scalar_lea.sflag [#allocation6], %s347_s26 }
  0x61   : > { %s358_s24 = sshll.u32 %s351_s18, 4  ;;  %p5165_p1 = pneg %p5146_p4  ;;  %s5157_s24 = int_to_ptr.vmem [resolvable:$true] %s358_s24 }
  0x63   : > { %s7820_s10 = scalar_select %p5165_p1, 1, 0 }
  0x64   : > { %s5155_s5 = scalar_lea.hbm %s7819_s1, %s3657_s3  ;;  %s4676_s16 = scalar_lea.hbm %s7819_s1, 4096 }
  0x65   : > { %s4671_s29 = scalar_lea.hbm %s5155_s5, 2048  ;;  %p4677_p11 = scmp.lt.u32.totalorder %s5155_s5, %s7819_s1 }
  0x66   : > { %p4672_p9 = scmp.ne.s32.totalorder %s5155_s5, %s4671_s29  ;;  %p4678_p12 = scmp.lt.u32.totalorder %s4676_s16, %s4671_s29 }
  0x67   : > { %p4680_p7 = scmp.lt.u32.totalorder %s4671_s29, %s5155_s5 }
  0x68   : > { %p4674_p3 = pnand %p5165_p1, %p4672_p9  ;;  %p4679_p2 = por %p4678_p12, %p4677_p11 }
  0x6a   : > { %p4675_p10 = pneg %p4674_p3  ;;  %p4681_p5 = por %p4680_p7, %p4679_p2 }
  0x6c   : > { %p4682_p0 = pnand %p4681_p5, %p4675_p10 }
  0x6e   : > { %4685 = shalt.err (!%p4682_p0)
}
  0x6f   : > { %s4686_s26 = scalar_lea.vmem %s5157_s24, 2048  ;;  %s4947_s3 = smov [#allocation5]  }
  0x70   : > { %p4687_p9 = scmp.ne.s32.totalorder %s5157_s24, %s4686_s26  ;;  %s4691_s15 = sshll.u32 %s4947_s3, 4  ;;  %s4692_s15 = int_to_ptr.vmem [resolvable:$false] %s4691_s15 }
  0x71   : > { %s4693_s18 = scalar_lea.vmem %s4692_s15, 4096  ;;  %p4694_p6 = scmp.lt.s32.totalorder %s5157_s24, %s4692_s15 }
  0x72   : > { %p4689_p3 = pnand %p4687_p9, %p5165_p1  ;;  %p4695_p8 = scmp.lt.s32.totalorder %s4693_s18, %s4686_s26 }
  0x74   : > { %p4690_p13 = pneg %p4689_p3  ;;  %p4696_p11 = por %p4695_p8, %p4694_p6 }
  0x76   : > { %p4697_p12 = pnand %p4696_p11, %p4690_p13 }
  0x78   : > { %4700 = shalt.err (!%p4697_p12)
}
  0x79   : > { %s4948_s29 = smov 128   ;;  %s4949_s16 = smov 8  }
  0x7a   : > { %4495 = dma.hbm_to_vmem [thread:$0]  (!%p5146_p4), %s5155_s5, 2048, %s5157_s24, %s5159_s20, %s4948_s29, %s4948_s29, %s4949_s16  }
  0x7b   : > { %s4950_s19 = smov [#allocation10]   ;;  %s4951_s3 = smov [#allocation13]  }
  0x7c   : > { %s284_s1 = sshll.u32 %s4950_s19, 4  ;;  %s306_s25 = sshll.u32 %s4951_s3, 4  ;;  %s285_s1 = int_to_ptr.vmem [resolvable:$true] %s284_s1  ;;  %s307_s25 = int_to_ptr.vmem [resolvable:$true] %s306_s25 }
  0x7d   : > { %s4701_s26 = scalar_lea.hbm %s7667_s4, 64  ;;  %p7821_p8 = scmp.ne.s32.totalorder %s7807_s23, 0 }
  0x7e   : > { %p4702_p6 = scmp.ne.s32.totalorder %s7667_s4, %s4701_s26  ;;  %p4708_p5 = scmp.lt.u32.totalorder %s4701_s26, %s7667_s4 }
  0x80   : > { %p4704_p13 = pnand %p4702_p6, %p7821_p8 }
  0x82   : > { %p4705_p0 = pneg %p4704_p13 }
  0x84   : > { %p4710_p10 = pnand %p4708_p5, %p4705_p0 }
  0x86   : > { %4713 = shalt.err (!%p4710_p10)
}
  0x87   : > { %s4714_s5 = scalar_lea.vmem %s285_s1, 64  ;;  %p4722_p3 = scmp.lt.s32.totalorder %s285_s1, %s285_s1 }
  0x88   : > { %p4715_p2 = scmp.ne.s32.totalorder %s285_s1, %s4714_s5  ;;  %p4723_p11 = scmp.lt.s32.totalorder %s4714_s5, %s4714_s5 }
  0x8a   : > { %p4717_p7 = pnand %p4715_p2, %p7821_p8  ;;  %p4724_p12 = por %p4723_p11, %p4722_p3 }
  0x8c   : > { %p4718_p9 = pneg %p4717_p7 }
  0x8e   : > { %p4725_p4 = pnand %p4724_p12, %p4718_p9 }
  0x90   : > { %4728 = shalt.err (!%p4725_p4)
}
  0x91   : > { %p7822_p6 = scmp.ne.s32.totalorder %s7805_s17, 0  ;;  %s4729_s24 = scalar_lea.hbm %s7669_s6, 64 }
  0x92   : > { %p4730_p13 = scmp.ne.s32.totalorder %s7669_s6, %s4729_s24  ;;  %p4736_p4 = scmp.lt.u32.totalorder %s4729_s24, %s7669_s6 }
  0x93   : > { %4479 = dma.hbm_to_vmem [thread:$0]  (!%p7822_p6), %s7667_s4, 64, %s285_s1, [#allocation9]  }
  0x94   : > { %p4732_p0 = pnand %p4730_p13, %p7821_p8 }
  0x96   : > { %p4733_p5 = pneg %p4732_p0 }
  0x98   : > { %p4738_p10 = pnand %p4736_p4, %p4733_p5 }
  0x9a   : > { %4741 = shalt.err (!%p4738_p10)
}
  0x9b   : > { %s4742_s15 = scalar_lea.vmem %s307_s25, 64  ;;  %p4750_p3 = scmp.lt.s32.totalorder %s307_s25, %s307_s25 }
  0x9c   : > { %p4743_p2 = scmp.ne.s32.totalorder %s307_s25, %s4742_s15  ;;  %p4751_p11 = scmp.lt.s32.totalorder %s4742_s15, %s4742_s15 }
  0x9e   : > { %p4745_p7 = pnand %p4743_p2, %p7821_p8  ;;  %p4752_p12 = por %p4751_p11, %p4750_p3 }
  0xa0   : > { %p4746_p9 = pneg %p4745_p7 }
  0xa2   : > { %p4753_p1 = pnand %p4752_p12, %p4746_p9 }
  0xa4   : > { %4756 = shalt.err (!%p4753_p1)
}
  0xa5   : > { %4485 = dma.hbm_to_vmem [thread:$0]  (!%p7822_p6), %s7669_s6, 64, %s307_s25, [#allocation12]  }
  0xa6   : > { %s4952_s18 = smov [#allocation14]   ;;  %s3474_s8 = sshll.u32 %s5141_s14, 1 }
  0xa7   : > { %s317_s5 = sshll.u32 %s4952_s18, 4  ;;  %s4757_s22 = scalar_lea.hbm %s7670_s7, 128  ;;  %s318_s5 = int_to_ptr.vmem [resolvable:$true] %s317_s5 }
  0xa8   : > { %p4758_p1 = scmp.ne.s32.totalorder %s7670_s7, %s4757_s22  ;;  %p4764_p5 = scmp.lt.u32.totalorder %s4757_s22, %s7670_s7 }
  0xaa   : > { %p4760_p13 = pnand %p4758_p1, %p7821_p8 }
  0xac   : > { %p4761_p0 = pneg %p4760_p13 }
  0xae   : > { %p4766_p4 = pnand %p4764_p5, %p4761_p0 }
  0xb0   : > { %4769 = shalt.err (!%p4766_p4)
}
  0xb1   : > { %s4770_s25 = scalar_lea.vmem %s318_s5, 128  ;;  %p4778_p9 = scmp.lt.s32.totalorder %s318_s5, %s318_s5 }
  0xb2   : > { %p4771_p10 = scmp.ne.s32.totalorder %s318_s5, %s4770_s25  ;;  %p4779_p3 = scmp.lt.s32.totalorder %s4770_s25, %s4770_s25 }
  0xb4   : > { %p4773_p2 = pnand %p4771_p10, %p7821_p8  ;;  %p4780_p11 = por %p4779_p3, %p4778_p9 }
  0xb6   : > { %p4774_p7 = pneg %p4773_p2 }
  0xb8   : > { %p4781_p12 = pnand %p4780_p11, %p4774_p7 }
  0xba   : > { %4784 = shalt.err (!%p4781_p12)
}
  0xbb   : > { %4488 = dma.hbm_to_vmem [thread:$0]  (!%p7822_p6), %s7670_s7, 128, %s318_s5, [#allocation15]  }
  0xbc   : > { %s3475_s1 = sshll.u32 %s4939_s9, 5  ;;  %s332_s17 = scalar_lea.vmem [#allocation2], %s3474_s8 }
  0xbd   : > { %s5250_s18 = scalar_lea.hbm %s7663_s0, %s3475_s1  ;;  %s340_s27 = sshll.u32 %s332_s17, 4  ;;  %s341_s27 = int_to_ptr.vmem [resolvable:$true] %s340_s27 }
  0xbe   : > { %s329_s30 = scalar_lea.sflag [#allocation3], %s5141_s14  ;;  %s4785_s22 = scalar_lea.hbm %s5250_s18, 32 }
  0xbf   : > { %p4786_p8 = scmp.ne.s32.totalorder %s5250_s18, %s4785_s22  ;;  %p7823_p1 = scmp.ne.s32.totalorder %s7820_s10, 0 }
  0xc0   : > { %s4790_s29 = scalar_lea.hbm %s7663_s0, 64  ;;  %p4791_p0 = scmp.lt.u32.totalorder %s5250_s18, %s7663_s0 }
  0xc1   : > { %p4788_p6 = pnand %p4786_p8, %p7823_p1  ;;  %p4792_p5 = scmp.lt.u32.totalorder %s4790_s29, %s4785_s22 }
  0xc2   : > { %p4794_p10 = scmp.lt.u32.totalorder %s4785_s22, %s5250_s18 }
  0xc3   : > { %p4789_p13 = pneg %p4788_p6  ;;  %p4793_p4 = por %p4792_p5, %p4791_p0 }
  0xc5   : > { %p4795_p2 = por %p4794_p10, %p4793_p4 }
  0xc7   : > { %p4796_p7 = pnand %p4795_p2, %p4789_p13 }
  0xc9   : > { %4799 = shalt.err (!%p4796_p7)
}
  0xca   : > { %s4800_s25 = scalar_lea.vmem %s341_s27, 32  ;;  %s4953_s3 = smov [#allocation2]  }
  0xcb   : > { %p4801_p9 = scmp.ne.s32.totalorder %s341_s27, %s4800_s25  ;;  %s4805_s15 = sshll.u32 %s4953_s3, 4  ;;  %s4806_s15 = int_to_ptr.vmem [resolvable:$false] %s4805_s15 }
  0xcc   : > { %s4807_s23 = scalar_lea.vmem %s4806_s15, 64  ;;  %p4808_p12 = scmp.lt.s32.totalorder %s341_s27, %s4806_s15 }
  0xcd   : > { %p4803_p3 = pnand %p4801_p9, %p7823_p1  ;;  %p4809_p8 = scmp.lt.s32.totalorder %s4807_s23, %s4800_s25 }
  0xcf   : > { %p4804_p11 = pneg %p4803_p3  ;;  %p4810_p6 = por %p4809_p8, %p4808_p12 }
  0xd1   : > { %p4811_p0 = pnand %p4810_p6, %p4804_p11 }
  0xd3   : > { %4814 = shalt.err (!%p4811_p0)
}
  0xd4   : > { %p7824_p5 = scmp.ne.s32.totalorder %s7818_s13, 0  ;;  %s5277_s22 = scalar_lea.hbm %s7665_s2, %s3475_s1 }
  0xd5   : > { %s372_s5 = scalar_lea.vmem [#allocation7], %s3474_s8  ;;  %s4815_s29 = scalar_lea.hbm %s5277_s22, 32 }
  0xd6   : > { %4492 = dma.hbm_to_vmem [thread:$0]  (!%p7824_p5), %s5250_s18, 32, %s341_s27, %s329_s30  }
  0xd7   : > { %s379_s24 = sshll.u32 %s372_s5, 4  ;;  %p4816_p13 = scmp.ne.s32.totalorder %s5277_s22, %s4815_s29  ;;  %s380_s24 = int_to_ptr.vmem [resolvable:$true] %s379_s24 }
  0xd8   : > { %s4820_s30 = scalar_lea.hbm %s7665_s2, 64  ;;  %p4821_p2 = scmp.lt.u32.totalorder %s5277_s22, %s7665_s2 }
  0xd9   : > { %p4818_p4 = pnand %p4816_p13, %p7823_p1  ;;  %p4822_p7 = scmp.lt.u32.totalorder %s4820_s30, %s4815_s29 }
  0xda   : > { %p4824_p3 = scmp.lt.u32.totalorder %s4815_s29, %s5277_s22 }
  0xdb   : > { %p4819_p10 = pneg %p4818_p4  ;;  %p4823_p9 = por %p4822_p7, %p4821_p2 }
  0xdd   : > { %p4825_p11 = por %p4824_p3, %p4823_p9 }
  0xdf   : > { %p4826_p12 = pnand %p4825_p11, %p4819_p10 }
  0xe1   : > { %4829 = shalt.err (!%p4826_p12)
}
  0xe2   : > { %s4830_s14 = scalar_lea.vmem %s380_s24, 32  ;;  %s4954_s8 = smov [#allocation7]  }
  0xe3   : > { %p4831_p8 = scmp.ne.s32.totalorder %s380_s24, %s4830_s14  ;;  %s4835_s19 = sshll.u32 %s4954_s8, 4  ;;  %s4836_s19 = int_to_ptr.vmem [resolvable:$false] %s4835_s19 }
  0xe4   : > { %s4837_s25 = scalar_lea.vmem %s4836_s19, 64  ;;  %p4838_p13 = scmp.lt.s32.totalorder %s380_s24, %s4836_s19 }
  0xe5   : > { %p4833_p6 = pnand %p4831_p8, %p7823_p1  ;;  %p4839_p4 = scmp.lt.s32.totalorder %s4837_s25, %s4830_s14 }
  0xe7   : > { %p4834_p0 = pneg %p4833_p6  ;;  %p4840_p5 = por %p4839_p4, %p4838_p13 }
  0xe9   : > { %p4841_p2 = pnand %p4840_p5, %p4834_p0 }
  0xeb   : > { %4844 = shalt.err (!%p4841_p2)
}
  0xec   : > { %p7825_p7 = scmp.ne.s32.totalorder %s7818_s13, 0  ;;  %p7826_p10 = scmp.ne.s32.totalorder %s7804_s12, 0 }
  0xed   : > { %s5302_s10 = sand.u32 (!%p7826_p10), 1, %s4927_s28   ;;  %p7827_p1 = scmp.ne.s32.totalorder (!%p7826_p10), %s7812_s21, 0 }
  0xee   : > { %4498 = dma.hbm_to_vmem [thread:$0]  (!%p7825_p7), %s5277_s22, 32, %s380_s24, %s5159_s20  }
  0xef   : > { %388 = sbr.rel (%p7826_p10) target bundleno = 4813 (0x12cd), region = 52  ;;  %s3482_s3 = sshll.u32 (!%p7826_p10), %s5302_s10, 1 }
  0xf0   : > { %s391_s15 = scalar_lea.sflag (!%p7826_p10), [#allocation3], %s5302_s10  ;;  %s5306_s23 = scalar_lea.vmem (!%p7826_p10), [#allocation2], %s3482_s3 }
  0xf6   : > { %4898 = dma.done.wait (%p7827_p1), %s391_s15, 32  }
  0xf7   : > { %4900 = vsyncadd (%p7827_p1), %s391_s15, 4294967264  ;;  %s399_s12 = sand.u32 1, %s5038_s11   ;;  %s3483_s13 = sshll.u32 %s5302_s10, 7 }
  0xf8   : > { %s400_s20 = scalar_lea.sflag [#allocation6], %s399_s12  ;;  %s5314_s26 = scalar_lea.vmem [#allocation5], %s3483_s13 }
  0xf9   : > { %4902 = dma.done.wait (%p7827_p1), %s400_s20, 2080  }
  0xfa   : > { %4904 = vsyncadd (%p7827_p1), %s400_s20, 4294965216  ;;  %s5320_s17 = scalar_lea.vmem [#allocation7], %s3482_s3  ;;  %p7828_p5 = scmp.eq.s32.totalorder %s5038_s11, 0 }
  0xfc   : > { %4906 = dma.done.wait (%p7828_p5), [#allocation9], 128   ;;  %p7829_p9 = pmov %p7828_p5 }
  0xfd   : > { %p7830_p3 = pmov %p7828_p5 }
  0xfe   : > { %4908 = vsyncadd (%p7829_p9), [#allocation9], 4294967168 }
  0xff   : > { %4910 = dma.done.wait (%p7830_p3), [#allocation12], 192   ;;  %p7831_p11 = pmov %p7830_p3 }
 0x100   : > { %p7832_p12 = pmov %p7830_p3 }
 0x101   : > { %4912 = vsyncadd (%p7831_p11), [#allocation12], 4294967104 }
 0x102   : > { %4914 = dma.done.wait (%p7832_p12), [#allocation15], 128   ;;  %p7833_p8 = pmov %p7830_p3 }
 0x103   : > { %vm7693_vm0 = vcmask 1041408   ;;  %vm7694_vm1 = vcmask 15360   ;;  %v5335_v0 = vld [vmem:[%s5306_s23] sm:$0x3]  ;;  %v477_v1 = vld [vmem:[%s5314_s26] sm:$0xff]  ;;  %v478_v2 = vld [vmem:[%s5314_s26 + $0x8] sm:$0xff] }
 0x104   : > { %4916 = vsyncadd (%p7833_p8), [#allocation15], 4294967168  ;;  %3845 = vmatprep.subr.msk.mxu0 %vm7693_vm0, %v5335_v0  ;;  %3847 = vmatprep.mubr.msk.f32.mxu0 %vm7694_vm1, %v477_v1  ;;  %v692_v3 = vmul.f32 %v477_v1, %v477_v1  ;;  %v479_v4 = vld [vmem:[%s5314_s26 + $0x10] sm:$0xff]  ;;  %v480_v5 = vld [vmem:[%s5314_s26 + $0x18] sm:$0xff]  ;;  %v693_v6 = vmul.f32 %v478_v2, %v478_v2  ;;  %v4955_v49 = vmov 0.0|0.0   ;;  %v825_v53 = vpack.c.bf16 %v5335_v0, %v5335_v0  ;;  %s7963_s11 = sld [smem:[#allocation25_spill]] }
 0x105   : > { %3846 = vmatpush3.msk.msra.mxu0 %vm7693_vm0, %v5335_v0  ;;  %v694_v7 = vmul.f32 %v479_v4, %v479_v4  ;;  %v695_v8 = vmul.f32 %v480_v5, %v480_v5  ;;  %v481_v10 = vld [vmem:[%s5314_s26 + $0x20] sm:$0xff]  ;;  %v482_v12 = vld [vmem:[%s5314_s26 + $0x28] sm:$0xff]  ;;  %v483_v17 = vld [vmem:[%s5314_s26 + $0x30] sm:$0xff]  ;;  %vm7695_vm2 = vcmask 1040384   ;;  %vm7696_vm3 = vmmov 0   ;;  %s7964_s21 = sld [smem:[#allocation28_spill]] }
 0x106   : > { %3848 = vmatmul.mubr.msk.f32.vlgmr.msra.gmra.mrb[0].mxu0 %vm7694_vm1, %v478_v2  ;;  %v708_v9 = vsel %vm7694_vm1, %v692_v3, 0.0  ;;  %v711_v13 = vsel %vm7694_vm1, %v693_v6, 0.0  ;;  %v696_v14 = vmul.f32 %v481_v10, %v481_v10  ;;  %v697_v16 = vmul.f32 %v482_v12, %v482_v12  ;;  %v484_v18 = vld [vmem:[%s5314_s26 + $0x38] sm:$0xff]  ;;  %v485_v23 = vld [vmem:[%s5314_s26 + $0x40] sm:$0xff]  ;;  %v486_v24 = vld [vmem:[%s5314_s26 + $0x48] sm:$0xff]  ;;  %4253 = vmatprep.subr.bf16.mxu0 %v4955_v49  ;;  %s3490_s22 = sshll.u32 %s5302_s10, 2 }
 0x107   : > { %3850 = vmatprep.mubr.msk.f32.mxu0 %vm7694_vm1, %v479_v4  ;;  %709 = vadd.xlane.f32.xlu0 %v708_v9  ;;  %v714_v11 = vsel %vm7694_vm1, %v694_v7, 0.0  ;;  %v717_v15 = vsel %vm7694_vm1, %v695_v8, 0.0  ;;  %v698_v20 = vmul.f32 %v483_v17, %v483_v17  ;;  %v699_v22 = vmul.f32 %v484_v18, %v484_v18  ;;  %v487_v29 = vld [vmem:[%s5314_s26 + $0x50] sm:$0xff]  ;;  %v488_v30 = vld [vmem:[%s5314_s26 + $0x58] sm:$0xff]  ;;  %v489_v35 = vld [vmem:[%s5314_s26 + $0x60] sm:$0xff]  ;;  %s474_s24 = scalar_lea.vmem [#allocation16], %s3490_s22 }
 0x108   : > { %715 = vadd.xlane.f32.xlu1 %v714_v11  ;;  %v720_v19 = vsel %vm7694_vm1, %v696_v14, 0.0  ;;  %v723_v21 = vsel %vm7694_vm1, %v697_v16, 0.0  ;;  %v700_v26 = vmul.f32 %v485_v23, %v485_v23  ;;  %v701_v28 = vmul.f32 %v486_v24, %v486_v24  ;;  %v490_v36 = vld [vmem:[%s5314_s26 + $0x68] sm:$0xff]  ;;  %v491_v41 = vld [vmem:[%s5314_s26 + $0x70] sm:$0xff]  ;;  %v492_v42 = vld [vmem:[%s5314_s26 + $0x78] sm:$0xff]  ;;  %s3294_s29 = sshll.u32 %s474_s24, 4  ;;  %s7616_s29 = int_to_ptr.vmem [resolvable:$true] %s3294_s29 }
 0x109   : > { %v726_v25 = vsel %vm7694_vm1, %v698_v20, 0.0  ;;  %v729_v27 = vsel %vm7694_vm1, %v699_v22, 0.0  ;;  %v702_v32 = vmul.f32 %v487_v29, %v487_v29  ;;  %v703_v34 = vmul.f32 %v488_v30, %v488_v30  ;;  %v822_v57 = vld [vmem:[#allocation10] sm:$0x7]  ;;  %s7965_s30 = sld [smem:[#allocation34_spill]]  ;;  %s3280_s14 = scalar_lea.sflag [#allocation4], %s5302_s10 }
 0x10a   : > { %3851 = vmatmul.mubr.msk.f32.gmra.mrb[2].mxu0 %vm7694_vm1, %v480_v5  ;;  %v732_v31 = vsel %vm7694_vm1, %v700_v26, 0.0  ;;  %v735_v33 = vsel %vm7694_vm1, %v701_v28, 0.0  ;;  %v704_v38 = vmul.f32 %v489_v35, %v489_v35  ;;  %v705_v40 = vmul.f32 %v490_v36, %v490_v36  ;;  %s3654_s5 = sshll.u32 %s7963_s11, 6  ;;  %s4845_s8 = scalar_lea.vmem %s7616_s29, 64 }
 0x10b   : > { %3853 = vmatprep.mubr.msk.f32.mxu0 %vm7694_vm1, %v481_v10  ;;  %712 = vadd.xlane.f32.xlu0 %v711_v13  ;;  %v738_v37 = vsel %vm7694_vm1, %v702_v32, 0.0  ;;  %v741_v39 = vsel %vm7694_vm1, %v703_v34, 0.0  ;;  %v706_v44 = vmul.f32 %v491_v41, %v491_v41  ;;  %v707_v46 = vmul.f32 %v492_v42, %v492_v42  ;;  %p4846_p6 = scmp.ne.s32.totalorder %s7616_s29, %s4845_s8  ;;  %p7967_p0 = scmp.ne.s32.totalorder %s7964_s21, 0 }
 0x10c   : > { %718 = vadd.xlane.f32.xlu1 %v717_v15  ;;  %v744_v43 = vsel %vm7694_vm1, %v704_v38, 0.0  ;;  %v747_v45 = vsel %vm7694_vm1, %v705_v40, 0.0  ;;  %v7778_v54 = vmov 0.0   ;;  %v837_v56 = vsel %vm7695_vm2, %v825_v53, 0  ;;  %s4961_s19 = smov [#allocation16]  }
 0x10d   : > { %v750_v47 = vsel %vm7694_vm1, %v706_v44, 0.0  ;;  %v753_v48 = vsel %vm7694_vm1, %v707_v46, 0.0  ;;  %3871 = vmatprep.subr.bf16.mxu1 %v7778_v54  ;;  %3873 = vmatprep.mubr.msk.bf16.mxu1 %vm7696_vm3, %v7778_v54  ;;  %p4847_p13 = pnand %p4846_p6, %p7967_p0  ;;  %s4849_s25 = sshll.u32 %s4961_s19, 4  ;;  %s4850_s25 = int_to_ptr.vmem [resolvable:$false] %s4849_s25 }
 0x10e   : > { %3854 = vmatmul.mubr.msk.f32.gmra.mrb[4].mxu0 %vm7694_vm1, %v482_v12  ;;  %3872 = vmatpush3.bf16.msra.mxu1 %v837_v56  ;;  %s4851_s3 = scalar_lea.vmem %s4850_s25, 128  ;;  %p4852_p2 = scmp.lt.s32.totalorder %s7616_s29, %s4850_s25 }
 0x10f   : > { %3856 = vmatprep.mubr.msk.f32.mxu0 %vm7694_vm1, %v483_v17  ;;  %721 = vadd.xlane.f32.xlu0 %v720_v19  ;;  %s7966_s16 = smov %s7965_s30  ;;  %s7614_s1 = scalar_lea.hbm %s7965_s30, %s3654_s5 }
 0x110   : > { %724 = vadd.xlane.f32.xlu1 %v723_v21  ;;  %3912 = vmatprep.subr.bf16.mxu1 %v7778_v54  ;;  %p4848_p4 = pneg %p4847_p13  ;;  %p4853_p7 = scmp.lt.s32.totalorder %s4851_s3, %s4845_s8 }
 0x111   : > { %3874 = vmatmul.mubr.msk.bf16.vlgmr.msra.gmra.mrb[0].mxu1 %vm7694_vm1, %v822_v57 }
 0x112   : > { %3857 = vmatmul.mubr.msk.f32.gmra.mrb[6].mxu0 %vm7694_vm1, %v484_v18  ;;  %3914 = vmatprep.mubr.msk.bf16.mxu1 %vm7696_vm3, %v7778_v54  ;;  %p4854_p10 = por %p4853_p7, %p4852_p2 }
 0x113   : > { %3859 = vmatprep.mubr.msk.f32.mxu0 %vm7694_vm1, %v485_v23  ;;  %727 = vadd.xlane.f32.xlu0 %v726_v25 }
 0x114   : > { %730 = vadd.xlane.f32.xlu1 %v729_v27  ;;  %p4855_p1 = pnand %p4854_p10, %p4848_p4 }
 0x116   : > { %3860 = vmatmul.mubr.msk.f32.gmra.mrb[8].mxu0 %vm7694_vm1, %v486_v24 }
 0x117   : > { %3862 = vmatprep.mubr.msk.f32.mxu0 %vm7694_vm1, %v487_v29  ;;  %733 = vadd.xlane.f32.xlu0 %v732_v31 }
 0x118   : > { %736 = vadd.xlane.f32.xlu1 %v735_v33 }
 0x11a   : > { %3863 = vmatmul.mubr.msk.f32.gmra.mrb[10].mxu0 %vm7694_vm1, %v488_v30 }
 0x11b   : > { %3865 = vmatprep.mubr.msk.f32.mxu0 %vm7694_vm1, %v489_v35  ;;  %739 = vadd.xlane.f32.xlu0 %v738_v37 }
 0x11c   : > { %742 = vadd.xlane.f32.xlu1 %v741_v39 }
 0x11e   : > { %3866 = vmatmul.mubr.msk.f32.gmra.mrb[12].mxu0 %vm7694_vm1, %v490_v36 }
 0x11f   : > { %3868 = vmatprep.mubr.msk.f32.mxu0 %vm7694_vm1, %v491_v41  ;;  %745 = vadd.xlane.f32.xlu0 %v744_v43 }
 0x120   : > { %748 = vadd.xlane.f32.xlu1 %v747_v45 }
 0x122   : > { %3869 = vmatmul.mubr.msk.f32.gmra.mrb[14].mxu0 %vm7694_vm1, %v492_v42 }
 0x123   : > { %751 = vadd.xlane.f32.xlu0 %v750_v47  ;;  %3909 = vmatprep.mubr.msk.f32.mxu0 %vm7696_vm3, %v7778_v54 }
 0x124   : > { %754 = vadd.xlane.f32.xlu1 %v753_v48 }
 0x194   : > { %v710_v51 = vpop.xlane.xlu0 %709 }
 0x195   : > { %v5390_v50 = vpop.xlane.xlu1 %715 }
 0x198   : > { %v713_v55 = vpop.xlane.xlu0 %712 }
 0x199   : > { %v5392_v52 = vpop.xlane.xlu1 %718 }
 0x19c   : > { %v722_v59 = vpop.xlane.xlu0 %721 }
 0x19d   : > { %v725_v58 = vpop.xlane.xlu1 %724 }
 0x1a0   : > { %v728_v1 = vpop.xlane.xlu0 %727 }
 0x1a1   : > { %v731_v63 = vpop.xlane.xlu1 %730 }
 0x1a4   : > { %v734_v5 = vpop.xlane.xlu0 %733 }
 0x1a5   : > { %v737_v4 = vpop.xlane.xlu1 %736 }
 0x1a8   : > { %v740_v12 = vpop.xlane.xlu0 %739 }
 0x1a9   : > { %v743_v9 = vpop.xlane.xlu1 %742 }
 0x1ac   : > { %v746_v29 = vpop.xlane.xlu0 %745 }
 0x1ad   : > { %v749_v24 = vpop.xlane.xlu1 %748 }
 0x1d9   : > { %v3849_v60 = vpop.f32.mrb[0].mxu0 }
 0x1da   : > { %v613_v61 = vpop.f32.mrb[1].mxu0  ;;  %v757_v14 = vmul.f32 2.0, %v3849_v60 }
 0x1db   : > { %v756_v16 = vmul.f32 2.0, %v613_v61 }
 0x1dc   : > { %v5410_v25 = vsub.f32 %v757_v14, %v713_v55  ;;  %v755_v55 = vpop.xlane.xlu1 %754 }
 0x1dd   : > { %v3852_v62 = vpop.f32.mrb[2].mxu0  ;;  %v5414_v30 = vsub.f32 %v756_v16, %v710_v51 }
 0x1de   : > { %v623_v0 = vpop.f32.mrb[3].mxu0  ;;  %v759_v26 = vmul.f32 2.0, %v3852_v62 }
 0x1df   : > { %v758_v31 = vmul.f32 2.0, %v623_v0 }
 0x1e0   : > { %v5427_v42 = vsub.f32 %v759_v26, %v5392_v52 }
 0x1e1   : > { %v3855_v2 = vpop.f32.mrb[4].mxu0  ;;  %v5435_v46 = vsub.f32 %v758_v31, %v5390_v50 }
 0x1e2   : > { %v633_v3 = vpop.f32.mrb[5].mxu0  ;;  %v761_v10 = vmul.f32 2.0, %v3855_v2 }
 0x1e3   : > { %v760_v13 = vmul.f32 2.0, %v633_v3 }
 0x1e4   : > { %v5406_v19 = vsub.f32 %v761_v10, %v725_v58 }
 0x1e5   : > { %v3858_v6 = vpop.f32.mrb[6].mxu0  ;;  %v5408_v22 = vsub.f32 %v760_v13, %v722_v59  ;;  %v752_v59 = vpop.xlane.xlu0 %751 }
 0x1e6   : > { %v643_v7 = vpop.f32.mrb[7].mxu0  ;;  %v763_v20 = vmul.f32 2.0, %v3858_v6  ;;  %v880_v35 = vmax.f32 %v5410_v25, %v5406_v19  ;;  %v788_v6 = vlaneseq }
 0x1e7   : > { %v762_v23 = vmul.f32 2.0, %v643_v7  ;;  %v879_v39 = vmax.f32 %v5414_v30, %v5408_v22 }
 0x1e8   : > { %v5420_v36 = vsub.f32 %v763_v20, %v731_v63 }
 0x1e9   : > { %v3861_v8 = vpop.f32.mrb[8].mxu0  ;;  %v5424_v40 = vsub.f32 %v762_v23, %v728_v1 }
 0x1ea   : > { %v653_v11 = vpop.f32.mrb[9].mxu0  ;;  %v765_v15 = vmul.f32 2.0, %v3861_v8  ;;  %v882_v52 = vmax.f32 %v5427_v42, %v5420_v36 }
 0x1eb   : > { %v764_v17 = vmul.f32 2.0, %v653_v11  ;;  %v881_v50 = vmax.f32 %v5435_v46, %v5424_v40 }
 0x1ec   : > { %v5412_v27 = vsub.f32 %v765_v15, %v737_v4 }
 0x1ed   : > { %v3864_v18 = vpop.f32.mrb[10].mxu0  ;;  %v5416_v32 = vsub.f32 %v764_v17, %v734_v5 }
 0x1ee   : > { %v663_v21 = vpop.f32.mrb[11].mxu0  ;;  %v767_v28 = vmul.f32 2.0, %v3864_v18  ;;  %v884_v43 = vmax.f32 %v880_v35, %v5412_v27 }
 0x1ef   : > { %v766_v33 = vmul.f32 2.0, %v663_v21  ;;  %v883_v47 = vmax.f32 %v879_v39, %v5416_v32 }
 0x1f0   : > { %v5430_v44 = vsub.f32 %v767_v28, %v743_v9  ;;  %v789_v9 = vshrl.u32 %v788_v6, 7 }
 0x1f1   : > { %v3867_v34 = vpop.f32.mrb[12].mxu0  ;;  %v5438_v48 = vsub.f32 %v766_v33, %v740_v12 }
 0x1f2   : > { %v769_v37 = vmul.f32 2.0, %v3867_v34  ;;  %v673_v38 = vpop.f32.mrb[13].mxu0  ;;  %v886_v62 = vmax.f32 %v882_v52, %v5430_v44  ;;  %v790_v12 = vadd.s32 8, %v789_v9  ;;  %v791_v13 = vadd.s32 16, %v789_v9 }
 0x1f3   : > { %v768_v41 = vmul.f32 2.0, %v673_v38  ;;  %v885_v0 = vmax.f32 %v881_v50, %v5438_v48  ;;  %v792_v14 = vadd.s32 24, %v789_v9  ;;  %v793_v15 = vadd.s32 32, %v789_v9 }
 0x1f4   : > { %v5432_v45 = vsub.f32 %v769_v37, %v749_v24  ;;  %v794_v16 = vadd.s32 40, %v789_v9  ;;  %v795_v17 = vadd.s32 48, %v789_v9  ;;  %v796_v18 = vadd.s32 56, %v789_v9 }
 0x1f5   : > { %v5440_v51 = vsub.f32 %v768_v41, %v746_v29  ;;  %v3870_v53 = vpop.f32.mrb[14].mxu0  ;;  %v797_v21 = vadd.s32 64, %v789_v9  ;;  %v798_v23 = vadd.s32 72, %v789_v9  ;;  %v799_v24 = vadd.s32 80, %v789_v9 }
 0x1f6   : > { %v888_v56 = vmax.f32 %v884_v43, %v5432_v45  ;;  %v771_v57 = vmul.f32 2.0, %v3870_v53  ;;  %v683_v58 = vpop.f32.mrb[15].mxu0  ;;  %v800_v26 = vadd.s32 88, %v789_v9  ;;  %v801_v28 = vadd.s32 96, %v789_v9 }
 0x1f7   : > { %v887_v60 = vmax.f32 %v883_v47, %v5440_v51  ;;  %v770_v61 = vmul.f32 2.0, %v683_v58  ;;  %v802_v29 = vadd.s32 104, %v789_v9  ;;  %v803_v31 = vadd.s32 112, %v789_v9 }
 0x1f8   : > { %v5449_v63 = vsub.f32 %v771_v57, %v755_v55  ;;  %v804_v34 = vadd.s32 120, %v789_v9  ;;  %v5456_v35 = vcvt.s32.f32 %v789_v9  ;;  %v5458_v37 = vcvt.s32.f32 %v790_v12 }
 0x1f9   : > { %v891_v1 = vmax.f32 %v887_v60, %v888_v56  ;;  %v5452_v2 = vsub.f32 %v770_v61, %v752_v59  ;;  %v5460_v38 = vcvt.s32.f32 %v791_v13  ;;  %v5462_v39 = vcvt.s32.f32 %v792_v14 }
 0x1fa   : > { %v890_v3 = vmax.f32 %v886_v62, %v5449_v63  ;;  %v5464_v41 = vcvt.s32.f32 %v793_v15  ;;  %v5466_v43 = vcvt.s32.f32 %v794_v16  ;;  %v5468_v53 = vcvt.s32.f32 %v795_v17 }
 0x1fb   : > { %v889_v4 = vmax.f32 %v885_v0, %v5452_v2  ;;  %v5470_v55 = vcvt.s32.f32 %v796_v18  ;;  %v5472_v52 = vcvt.s32.f32 %v797_v21  ;;  %v5474_v56 = vcvt.s32.f32 %v798_v23 }
 0x1fc   : > { %v5476_v57 = vcvt.s32.f32 %v799_v24  ;;  %v5478_v58 = vcvt.s32.f32 %v800_v26  ;;  %v5508_v6 = vcvt.s32.f32 %v803_v31 }
 0x1fd   : > { %v892_v5 = vmax.f32 %v889_v4, %v890_v3  ;;  %v5504_v4 = vcvt.s32.f32 %v801_v28 }
 0x1ff   : > { %v893_v7 = vmax.f32 %v891_v1, %v892_v5  ;;  %v5506_v5 = vcvt.s32.f32 %v802_v29 }
 0x201   : > { %v894_v8 = vrot.slane %v893_v7, 4 }
 0x203   : > { %v895_v10 = vmax.f32 %v893_v7, %v894_v8  ;;  %v5510_v7 = vcvt.s32.f32 %v804_v34 }
 0x205   : > { %v896_v11 = vrot.slane %v895_v10, 2 }
 0x207   : > { %v897_v20 = vmax.f32 %v895_v10, %v896_v11 }
 0x209   : > { %v898_v33 = vrot.slane %v897_v20, 1 }
 0x20b   : > { %v899_v47 = vmax.f32 %v897_v20, %v898_v33 }
 0x20d   : > { %vm900_vm4 = vcmp.eq.f32.partialorder %v5414_v30, %v899_v47  ;;  %vm901_vm5 = vcmp.eq.f32.partialorder %v5410_v25, %v899_v47  ;;  %vm902_vm6 = vcmp.eq.f32.partialorder %v5435_v46, %v899_v47  ;;  %vm903_vm7 = vcmp.eq.f32.partialorder %v5427_v42, %v899_v47 }
 0x20e   : > { %vm904_vm8 = vcmp.eq.f32.partialorder %v5408_v22, %v899_v47  ;;  %vm905_vm9 = vcmp.eq.f32.partialorder %v5406_v19, %v899_v47  ;;  %vm906_vm10 = vcmp.eq.f32.partialorder %v5424_v40, %v899_v47  ;;  %vm907_vm11 = vcmp.eq.f32.partialorder %v5420_v36, %v899_v47 }
 0x20f   : > { %vm910_vm12 = vcmp.eq.f32.partialorder %v5438_v48, %v899_v47  ;;  %vm911_vm13 = vcmp.eq.f32.partialorder %v5430_v44, %v899_v47  ;;  %vm912_vm14 = vcmp.eq.f32.partialorder %v5440_v51, %v899_v47  ;;  %vm913_vm15 = vcmp.eq.f32.partialorder %v5432_v45, %v899_v47 }
 0x210   : > { %vm914_vm0 = vcmp.eq.f32.partialorder %v5452_v2, %v899_v47  ;;  %vm915_vm1 = vcmp.eq.f32.partialorder %v5449_v63, %v899_v47  ;;  %v916_v59 = vsel %vm900_vm4, %v5456_v35, 128.0  ;;  %v917_v50 = vsel %vm901_vm5, %v5458_v37, 128.0 }
 0x211   : > { %v918_v60 = vsel %vm902_vm6, %v5460_v38, 128.0  ;;  %v919_v61 = vsel %vm903_vm7, %v5462_v39, 128.0  ;;  %v920_v62 = vsel %vm904_vm8, %v5464_v41, 128.0  ;;  %v921_v0 = vsel %vm905_vm9, %v5466_v43, 128.0 }
 0x212   : > { %v922_v1 = vsel %vm906_vm10, %v5468_v53, 128.0  ;;  %v923_v3 = vsel %vm907_vm11, %v5470_v55, 128.0  ;;  %vm908_vm2 = vcmp.eq.f32.partialorder %v5416_v32, %v899_v47  ;;  %vm909_vm3 = vcmp.eq.f32.partialorder %v5412_v27, %v899_v47 }
 0x213   : > { %v932_v8 = vmin.f32 %v916_v59, %v920_v62  ;;  %v933_v9 = vmin.f32 %v917_v50, %v921_v0  ;;  %v934_v10 = vmin.f32 %v918_v60, %v922_v1  ;;  %v935_v11 = vmin.f32 %v919_v61, %v923_v3 }
 0x214   : > { %v924_v12 = vsel %vm908_vm2, %v5472_v52, 128.0  ;;  %v925_v13 = vsel %vm909_vm3, %v5474_v56, 128.0  ;;  %v926_v14 = vsel %vm910_vm12, %v5476_v57, 128.0  ;;  %v927_v15 = vsel %vm911_vm13, %v5478_v58, 128.0 }
 0x215   : > { %v936_v16 = vmin.f32 %v932_v8, %v924_v12  ;;  %v937_v17 = vmin.f32 %v933_v9, %v925_v13  ;;  %v938_v18 = vmin.f32 %v934_v10, %v926_v14  ;;  %v939_v20 = vmin.f32 %v935_v11, %v927_v15 }
 0x216   : > { %v928_v21 = vsel %vm912_vm14, %v5504_v4, 128.0  ;;  %v929_v23 = vsel %vm913_vm15, %v5506_v5, 128.0  ;;  %v930_v24 = vsel %vm914_vm0, %v5508_v6, 128.0  ;;  %v931_v26 = vsel %vm915_vm1, %v5510_v7, 128.0 }
 0x217   : > { %v940_v28 = vmin.f32 %v936_v16, %v928_v21  ;;  %v941_v29 = vmin.f32 %v937_v17, %v929_v23  ;;  %v942_v31 = vmin.f32 %v938_v18, %v930_v24  ;;  %v943_v33 = vmin.f32 %v939_v20, %v931_v26 }
 0x218   : > { %v4958_v10 = vmov 1.0|1.0  }
 0x219   : > { %v944_v34 = vmin.f32 %v940_v28, %v941_v29  ;;  %v945_v59 = vmin.f32 %v942_v31, %v943_v33 }
 0x21b   : > { %v946_v50 = vmin.f32 %v944_v34, %v945_v59  ;;  %v493_v59 = vld [vmem:[%s5320_s17] sm:$0x3] }
 0x21d   : > { %v947_v60 = vrot.slane %v946_v50, 4 }
 0x21f   : > { %v948_v61 = vmin.f32 %v946_v50, %v947_v60 }
 0x221   : > { %v949_v62 = vrot.slane %v948_v61, 2 }
 0x223   : > { %v950_v0 = vmin.f32 %v948_v61, %v949_v62 }
 0x225   : > { %v951_v1 = vrot.slane %v950_v0, 1 }
 0x227   : > { %v5532_v3 = vmin.f32 %v950_v0, %v951_v1 }
 0x229   : > { %vm967_vm0 = vcmp.eq.f32.partialorder %v5508_v6, %v5532_v3  ;;  %vm953_vm1 = vcmp.eq.f32.partialorder %v5456_v35, %v5532_v3  ;;  %vm954_vm2 = vcmp.eq.f32.partialorder %v5458_v37, %v5532_v3  ;;  %vm955_vm3 = vcmp.eq.f32.partialorder %v5460_v38, %v5532_v3 }
 0x22a   : > { %v5546_v47 = vsel %vm967_vm0, -1e+30, %v5452_v2  ;;  %v5549_v8 = vsel %vm953_vm1, -1e+30, %v5414_v30  ;;  %v5552_v9 = vsel %vm954_vm2, -1e+30, %v5410_v25  ;;  %vm4254_vm4 = vmpackc.low %vm954_vm2, %vm953_vm1  ;;  %vm956_vm5 = vcmp.eq.f32.partialorder %v5462_v39, %v5532_v3 }
 0x22b   : > { %4255 = vmatpush3.bf16.msk.msra.mxu0 %vm4254_vm4, %v4958_v10  ;;  %v5561_v11 = vsel %vm955_vm3, -1e+30, %v5435_v46  ;;  %v5567_v30 = vsel %vm956_vm5, -1e+30, %v5427_v42  ;;  %vm957_vm6 = vcmp.eq.f32.partialorder %v5464_v41, %v5532_v3  ;;  %vm958_vm7 = vcmp.eq.f32.partialorder %v5466_v43, %v5532_v3  ;;  %vm4257_vm10 = vmpackc.low %vm956_vm5, %vm955_vm3 }
 0x22c   : > { %4256 = vmatprep.subr.bf16.mxu0 %v4955_v49  ;;  %v5578_v25 = vsel %vm957_vm6, -1e+30, %v5408_v22  ;;  %v5584_v42 = vsel %vm958_vm7, -1e+30, %v5406_v19  ;;  %vm959_vm8 = vcmp.eq.f32.partialorder %v5468_v53, %v5532_v3  ;;  %vm960_vm9 = vcmp.eq.f32.partialorder %v5470_v55, %v5532_v3  ;;  %vm4260_vm2 = vmpackc.low %vm958_vm7, %vm957_vm6 }
 0x22d   : > { %v1193_v46 = vmax.f32 %v5549_v8, %v5578_v25  ;;  %v1194_v2 = vmax.f32 %v5552_v9, %v5584_v42  ;;  %v5598_v22 = vsel %vm959_vm8, -1e+30, %v5424_v40  ;;  %v5604_v19 = vsel %vm960_vm9, -1e+30, %v5420_v36  ;;  %vm4263_vm4 = vmpackc.low %vm960_vm9, %vm959_vm8 }
 0x22e   : > { %v1195_v12 = vmax.f32 %v5561_v11, %v5598_v22  ;;  %v1196_v40 = vmax.f32 %v5567_v30, %v5604_v19  ;;  %vm961_vm11 = vcmp.eq.f32.partialorder %v5472_v52, %v5532_v3  ;;  %vm962_vm12 = vcmp.eq.f32.partialorder %v5474_v56, %v5532_v3 }
 0x22f   : > { %4258 = vmatpush3.bf16.msk.msra.mxu0 %vm4257_vm10, %v4958_v10  ;;  %v5625_v36 = vsel %vm961_vm11, -1e+30, %v5416_v32  ;;  %v5631_v13 = vsel %vm962_vm12, -1e+30, %v5412_v27  ;;  %vm963_vm13 = vcmp.eq.f32.partialorder %v5476_v57, %v5532_v3  ;;  %vm964_vm14 = vcmp.eq.f32.partialorder %v5478_v58, %v5532_v3  ;;  %vm4266_vm5 = vmpackc.low %vm962_vm12, %vm961_vm11 }
 0x230   : > { %4259 = vmatprep.subr.bf16.mxu0 %v4955_v49  ;;  %v1197_v14 = vmax.f32 %v1193_v46, %v5625_v36  ;;  %v1198_v15 = vmax.f32 %v1194_v2, %v5631_v13  ;;  %v5644_v32 = vsel %vm963_vm13, -1e+30, %v5438_v48  ;;  %v5650_v27 = vsel %vm964_vm14, -1e+30, %v5430_v44  ;;  %vm4269_vm6 = vmpackc.low %vm964_vm14, %vm963_vm13 }
 0x231   : > { %v1199_v16 = vmax.f32 %v1195_v12, %v5644_v32  ;;  %v1200_v17 = vmax.f32 %v1196_v40, %v5650_v27  ;;  %vm965_vm15 = vcmp.eq.f32.partialorder %v5504_v4, %v5532_v3  ;;  %vm966_vm1 = vcmp.eq.f32.partialorder %v5506_v5, %v5532_v3 }
 0x232   : > { %v5668_v44 = vsel %vm965_vm15, -1e+30, %v5440_v51  ;;  %v5674_v48 = vsel %vm966_vm1, -1e+30, %v5432_v45  ;;  %vm968_vm3 = vcmp.eq.f32.partialorder %v5510_v7, %v5532_v3  ;;  %vm4272_vm7 = vmpackc.low %vm966_vm1, %vm965_vm15 }
 0x233   : > { %4261 = vmatpush3.bf16.msk.msra.mxu0 %vm4260_vm2, %v4958_v10  ;;  %v1203_v18 = vmax.f32 %v1199_v16, %v5546_v47  ;;  %v1201_v20 = vmax.f32 %v1197_v14, %v5668_v44  ;;  %v1202_v21 = vmax.f32 %v1198_v15, %v5674_v48  ;;  %v5686_v51 = vsel %vm968_vm3, -1e+30, %v5449_v63  ;;  %vm4275_vm8 = vmpackc.low %vm968_vm3, %vm967_vm0 }
 0x234   : > { %4262 = vmatprep.subr.bf16.mxu0 %v4955_v49  ;;  %v1204_v45 = vmax.f32 %v1200_v17, %v5686_v51 }
 0x235   : > { %v1205_v23 = vmax.f32 %v1201_v20, %v1202_v21 }
 0x236   : > { %v1206_v24 = vmax.f32 %v1203_v18, %v1204_v45 }
 0x237   : > { %4264 = vmatpush3.bf16.msk.msra.mxu0 %vm4263_vm4, %v4958_v10 }
 0x238   : > { %4265 = vmatprep.subr.bf16.mxu0 %v4955_v49  ;;  %v1207_v26 = vmax.f32 %v1205_v23, %v1206_v24 }
 0x23a   : > { %v1208_v63 = vrot.slane %v1207_v26, 4 }
 0x23b   : > { %4267 = vmatpush3.bf16.msk.msra.mxu0 %vm4266_vm5, %v4958_v10 }
 0x23c   : > { %4268 = vmatprep.subr.bf16.mxu0 %v4955_v49  ;;  %v1209_v28 = vmax.f32 %v1207_v26, %v1208_v63 }
 0x23e   : > { %v1210_v29 = vrot.slane %v1209_v28, 2 }
 0x23f   : > { %4270 = vmatpush3.bf16.msk.msra.mxu0 %vm4269_vm6, %v4958_v10 }
 0x240   : > { %4271 = vmatprep.subr.bf16.mxu0 %v4955_v49  ;;  %v1211_v31 = vmax.f32 %v1209_v28, %v1210_v29 }
 0x242   : > { %v1212_v33 = vrot.slane %v1211_v31, 1 }
 0x243   : > { %4273 = vmatpush3.bf16.msk.msra.mxu0 %vm4272_vm7, %v4958_v10  ;;  %vm7834_vm7 = vmmov 0  }
 0x244   : > { %4274 = vmatprep.subr.bf16.mxu0 %v4955_v49  ;;  %v1213_v34 = vmax.f32 %v1211_v31, %v1212_v33 }
 0x246   : > { %vm1214_vm9 = vcmp.eq.f32.partialorder %v5549_v8, %v1213_v34  ;;  %vm1215_vm10 = vcmp.eq.f32.partialorder %v5552_v9, %v1213_v34  ;;  %vm1216_vm11 = vcmp.eq.f32.partialorder %v5561_v11, %v1213_v34  ;;  %vm1217_vm12 = vcmp.eq.f32.partialorder %v5567_v30, %v1213_v34 }
 0x247   : > { %4276 = vmatpush3.bf16.msk.msra.mxu0 %vm4275_vm8, %v4958_v10  ;;  %vm1218_vm13 = vcmp.eq.f32.partialorder %v5578_v25, %v1213_v34  ;;  %vm1219_vm14 = vcmp.eq.f32.partialorder %v5584_v42, %v1213_v34  ;;  %vm1220_vm15 = vcmp.eq.f32.partialorder %v5598_v22, %v1213_v34  ;;  %vm1221_vm1 = vcmp.eq.f32.partialorder %v5604_v19, %v1213_v34 }
 0x248   : > { %vm1222_vm0 = vcmp.eq.f32.partialorder %v5625_v36, %v1213_v34  ;;  %vm1223_vm2 = vcmp.eq.f32.partialorder %v5631_v13, %v1213_v34  ;;  %vm1224_vm3 = vcmp.eq.f32.partialorder %v5644_v32, %v1213_v34  ;;  %vm1225_vm4 = vcmp.eq.f32.partialorder %v5650_v27, %v1213_v34  ;;  %3959 = vmatprep.subr.bf16.mxu0 %v7778_v54 }
 0x249   : > { %vm1229_vm5 = vcmp.eq.f32.partialorder %v5686_v51, %v1213_v34  ;;  %v1230_v50 = vsel %vm1214_vm9, %v5456_v35, 128.0  ;;  %v1231_v60 = vsel %vm1215_vm10, %v5458_v37, 128.0  ;;  %v1232_v61 = vsel %vm1216_vm11, %v5460_v38, 128.0 }
 0x24a   : > { %v1233_v62 = vsel %vm1217_vm12, %v5462_v39, 128.0  ;;  %3910 = vmatmul.mubr.f32.vlgmr.msra.gmra.mrb[16].mxu0 %v493_v59  ;;  %v1234_v0 = vsel %vm1218_vm13, %v5464_v41, 128.0  ;;  %v1235_v1 = vsel %vm1219_vm14, %v5466_v43, 128.0  ;;  %v1237_v3 = vsel %vm1221_vm1, %v5470_v55, 128.0 }
 0x24b   : > { %vm1226_vm6 = vcmp.eq.f32.partialorder %v5668_v44, %v1213_v34  ;;  %3961 = vmatprep.mubr.msk.bf16.mxu0 %vm7834_vm7, %v7778_v54  ;;  %v1236_v46 = vsel %vm1220_vm15, %v5468_v53, 128.0  ;;  %v1249_v2 = vmin.f32 %v1233_v62, %v1237_v3  ;;  %vm1227_vm8 = vcmp.eq.f32.partialorder %v5674_v48, %v1213_v34 }
 0x24c   : > { %vm1228_vm9 = vcmp.eq.f32.partialorder %v5546_v47, %v1213_v34  ;;  %v1241_v12 = vsel %vm1225_vm4, %v5478_v58, 128.0  ;;  %v1246_v14 = vmin.f32 %v1230_v50, %v1234_v0  ;;  %v1247_v15 = vmin.f32 %v1231_v60, %v1235_v1 }
 0x24d   : > { %v1253_v40 = vmin.f32 %v1249_v2, %v1241_v12  ;;  %v1245_v16 = vsel %vm1229_vm5, %v5510_v7, 128.0  ;;  %v1238_v17 = vsel %vm1222_vm0, %v5472_v52, 128.0  ;;  %v1239_v18 = vsel %vm1223_vm2, %v5474_v56, 128.0 }
 0x24e   : > { %v1248_v20 = vmin.f32 %v1232_v61, %v1236_v46  ;;  %v1240_v45 = vsel %vm1224_vm3, %v5476_v57, 128.0  ;;  %v1250_v23 = vmin.f32 %v1246_v14, %v1238_v17  ;;  %v1251_v24 = vmin.f32 %v1247_v15, %v1239_v18 }
 0x24f   : > { %v1257_v21 = vmin.f32 %v1253_v40, %v1245_v16  ;;  %v1242_v26 = vsel %vm1226_vm6, %v5504_v4, 128.0  ;;  %v1243_v63 = vsel %vm1227_vm8, %v5506_v5, 128.0  ;;  %v1244_v29 = vsel %vm1228_vm9, %v5508_v6, 128.0 }
 0x250   : > { %v1252_v28 = vmin.f32 %v1248_v20, %v1240_v45  ;;  %v1254_v31 = vmin.f32 %v1250_v23, %v1242_v26  ;;  %v1255_v33 = vmin.f32 %v1251_v24, %v1243_v63 }
 0x252   : > { %v1256_v59 = vmin.f32 %v1252_v28, %v1244_v29  ;;  %v1258_v50 = vmin.f32 %v1254_v31, %v1255_v33 }
 0x254   : > { %v1259_v60 = vmin.f32 %v1256_v59, %v1257_v21 }
 0x256   : > { %v1260_v61 = vmin.f32 %v1258_v50, %v1259_v60 }
 0x258   : > { %v1261_v62 = vrot.slane %v1260_v61, 4 }
 0x25a   : > { %v1262_v0 = vmin.f32 %v1260_v61, %v1261_v62 }
 0x25c   : > { %v1263_v1 = vrot.slane %v1262_v0, 2 }
 0x25e   : > { %v1264_v3 = vmin.f32 %v1262_v0, %v1263_v1 }
 0x260   : > { %v1265_v46 = vrot.slane %v1264_v3, 1 }
 0x262   : > { %v5793_v2 = vmin.f32 %v1264_v3, %v1265_v46 }
 0x264   : > { %vm7713_vm10 = vcmp.eq.f32.partialorder %v5456_v35, %v5793_v2  ;;  %vm7712_vm11 = vcmp.eq.f32.partialorder %v5458_v37, %v5793_v2  ;;  %vm7711_vm12 = vcmp.eq.f32.partialorder %v5460_v38, %v5793_v2  ;;  %vm7710_vm13 = vcmp.eq.f32.partialorder %v5462_v39, %v5793_v2 }
 0x265   : > { %v5807_v34 = vsel %vm7713_vm10, -1e+30, %v5549_v8  ;;  %v5813_v12 = vsel %vm7712_vm11, -1e+30, %v5552_v9  ;;  %v5819_v40 = vsel %vm7711_vm12, -1e+30, %v5561_v11  ;;  %vm7709_vm14 = vcmp.eq.f32.partialorder %v5464_v41, %v5793_v2 }
 0x266   : > { %v5827_v8 = vsel %vm7710_vm13, -1e+30, %v5567_v30  ;;  %vm7708_vm15 = vcmp.eq.f32.partialorder %v5466_v43, %v5793_v2  ;;  %v5835_v9 = vsel %vm7709_vm14, -1e+30, %v5578_v25  ;;  %vm7707_vm1 = vcmp.eq.f32.partialorder %v5468_v53, %v5793_v2 }
 0x267   : > { %v5843_v11 = vsel %vm7708_vm15, -1e+30, %v5584_v42  ;;  %v1493_v30 = vmax.f32 %v5807_v34, %v5835_v9  ;;  %vm7706_vm0 = vcmp.eq.f32.partialorder %v5470_v55, %v5793_v2  ;;  %v5853_v25 = vsel %vm7707_vm1, -1e+30, %v5598_v22 }
 0x268   : > { %v1494_v14 = vmax.f32 %v5813_v12, %v5843_v11  ;;  %v5861_v42 = vsel %vm7706_vm0, -1e+30, %v5604_v19  ;;  %v1495_v15 = vmax.f32 %v5819_v40, %v5853_v25  ;;  %vm7705_vm2 = vcmp.eq.f32.partialorder %v5472_v52, %v5793_v2 }
 0x269   : > { %v1496_v16 = vmax.f32 %v5827_v8, %v5861_v42  ;;  %vm7704_vm3 = vcmp.eq.f32.partialorder %v5474_v56, %v5793_v2  ;;  %v5875_v22 = vsel %vm7705_vm2, -1e+30, %v5625_v36  ;;  %vm7703_vm4 = vcmp.eq.f32.partialorder %v5476_v57, %v5793_v2 }
 0x26a   : > { %v5883_v19 = vsel %vm7704_vm3, -1e+30, %v5631_v13  ;;  %v1497_v17 = vmax.f32 %v1493_v30, %v5875_v22  ;;  %vm7698_vm5 = vcmp.eq.f32.partialorder %v5478_v58, %v5793_v2  ;;  %v5892_v36 = vsel %vm7703_vm4, -1e+30, %v5644_v32 }
 0x26b   : > { %v1498_v18 = vmax.f32 %v1494_v14, %v5883_v19  ;;  %v5899_v20 = vsel %vm7698_vm5, -1e+30, %v5650_v27  ;;  %v1499_v13 = vmax.f32 %v1495_v15, %v5892_v36  ;;  %vm7702_vm6 = vcmp.eq.f32.partialorder %v5504_v4, %v5793_v2 }
 0x26c   : > { %v1500_v21 = vmax.f32 %v1496_v16, %v5899_v20  ;;  %vm7700_vm8 = vcmp.eq.f32.partialorder %v5506_v5, %v5793_v2  ;;  %v5911_v32 = vsel %vm7702_vm6, -1e+30, %v5668_v44  ;;  %vm7699_vm9 = vcmp.eq.f32.partialorder %v5508_v6, %v5793_v2 }
 0x26d   : > { %v5919_v27 = vsel %vm7700_vm8, -1e+30, %v5674_v48  ;;  %v1501_v45 = vmax.f32 %v1497_v17, %v5911_v32  ;;  %vm7701_vm5 = vcmp.eq.f32.partialorder %v5510_v7, %v5793_v2  ;;  %v5928_v44 = vsel %vm7699_vm9, -1e+30, %v5546_v47 }
 0x26e   : > { %v1502_v23 = vmax.f32 %v1498_v18, %v5919_v27  ;;  %v5935_v24 = vsel %vm7701_vm5, -1e+30, %v5686_v51  ;;  %v1503_v48 = vmax.f32 %v1499_v13, %v5928_v44 }
 0x26f   : > { %v1504_v26 = vmax.f32 %v1500_v21, %v5935_v24 }
 0x270   : > { %v1505_v63 = vmax.f32 %v1501_v45, %v1502_v23 }
 0x271   : > { %v1506_v28 = vmax.f32 %v1503_v48, %v1504_v26 }
 0x273   : > { %v1507_v29 = vmax.f32 %v1505_v63, %v1506_v28 }
 0x275   : > { %v1508_v31 = vrot.slane %v1507_v29, 4 }
 0x277   : > { %v1509_v33 = vmax.f32 %v1507_v29, %v1508_v31 }
 0x279   : > { %v1510_v59 = vrot.slane %v1509_v33, 2 }
 0x27b   : > { %v1511_v47 = vmax.f32 %v1509_v33, %v1510_v59 }
 0x27d   : > { %v1512_v50 = vrot.slane %v1511_v47, 1 }
 0x27f   : > { %v1513_v60 = vmax.f32 %v1511_v47, %v1512_v50 }
 0x281   : > { %vm1514_vm9 = vcmp.eq.f32.partialorder %v5807_v34, %v1513_v60  ;;  %vm1515_vm8 = vcmp.eq.f32.partialorder %v5813_v12, %v1513_v60  ;;  %vm1516_vm5 = vcmp.eq.f32.partialorder %v5819_v40, %v1513_v60  ;;  %vm1517_vm6 = vcmp.eq.f32.partialorder %v5827_v8, %v1513_v60 }
 0x282   : > { %vm1518_vm4 = vcmp.eq.f32.partialorder %v5835_v9, %v1513_v60  ;;  %vm1520_vm2 = vcmp.eq.f32.partialorder %v5853_v25, %v1513_v60  ;;  %vm1521_vm0 = vcmp.eq.f32.partialorder %v5861_v42, %v1513_v60  ;;  %vm1522_vm1 = vcmp.eq.f32.partialorder %v5875_v22, %v1513_v60 }
 0x283   : > { %vm1523_vm15 = vcmp.eq.f32.partialorder %v5883_v19, %v1513_v60  ;;  %vm1524_vm14 = vcmp.eq.f32.partialorder %v5892_v36, %v1513_v60  ;;  %vm1525_vm13 = vcmp.eq.f32.partialorder %v5899_v20, %v1513_v60  ;;  %vm1526_vm12 = vcmp.eq.f32.partialorder %v5911_v32, %v1513_v60 }
 0x284   : > { %vm1527_vm11 = vcmp.eq.f32.partialorder %v5919_v27, %v1513_v60  ;;  %vm1528_vm10 = vcmp.eq.f32.partialorder %v5928_v44, %v1513_v60  ;;  %v1530_v51 = vsel %vm1514_vm9, %v5456_v35, 128.0  ;;  %v1531_v61 = vsel %vm1515_vm8, %v5458_v37, 128.0 }
 0x285   : > { %v1532_v62 = vsel %vm1516_vm5, %v5460_v38, 128.0  ;;  %v1533_v0 = vsel %vm1517_vm6, %v5462_v39, 128.0  ;;  %v1534_v1 = vsel %vm1518_vm4, %v5464_v41, 128.0  ;;  %vm7835_vm3 = vcmp.eq.f32.partialorder %v5843_v11, %v1513_v60 }
 0x286   : > { %v1535_v3 = vsel %vm7835_vm3, %v5466_v43, 128.0  ;;  %v1536_v46 = vsel %vm1520_vm2, %v5468_v53, 128.0  ;;  %v1537_v30 = vsel %vm1521_vm0, %v5470_v55, 128.0  ;;  %v1546_v14 = vmin.f32 %v1530_v51, %v1534_v1 }
 0x287   : > { %v1547_v15 = vmin.f32 %v1531_v61, %v1535_v3  ;;  %v1548_v16 = vmin.f32 %v1532_v62, %v1536_v46  ;;  %v1549_v17 = vmin.f32 %v1533_v0, %v1537_v30  ;;  %v1538_v18 = vsel %vm1522_vm1, %v5472_v52, 128.0 }
 0x288   : > { %v1539_v13 = vsel %vm1523_vm15, %v5474_v56, 128.0  ;;  %v1540_v21 = vsel %vm1524_vm14, %v5476_v57, 128.0  ;;  %v1541_v45 = vsel %vm1525_vm13, %v5478_v58, 128.0  ;;  %v1550_v23 = vmin.f32 %v1546_v14, %v1538_v18 }
 0x289   : > { %v1551_v48 = vmin.f32 %v1547_v15, %v1539_v13  ;;  %v1552_v26 = vmin.f32 %v1548_v16, %v1540_v21  ;;  %v1553_v63 = vmin.f32 %v1549_v17, %v1541_v45  ;;  %v1542_v28 = vsel %vm1526_vm12, %v5504_v4, 128.0 }
 0x28a   : > { %v1543_v29 = vsel %vm1527_vm11, %v5506_v5, 128.0  ;;  %v1544_v31 = vsel %vm1528_vm10, %v5508_v6, 128.0  ;;  %vm7836_vm14 = vcmp.eq.f32.partialorder %v5935_v24, %v1513_v60  ;;  %v1554_v59 = vmin.f32 %v1550_v23, %v1542_v28 }
 0x28b   : > { %v1545_v33 = vsel %vm7836_vm14, %v5510_v7, 128.0  ;;  %v1555_v47 = vmin.f32 %v1551_v48, %v1543_v29  ;;  %v1556_v50 = vmin.f32 %v1552_v26, %v1544_v31  ;;  %v4959_v48 = vmov 0   ;;  %v6123_v29 = vpop.f32.mrb[0].mxu1 }
 0x28c   : > { %v1557_v51 = vmin.f32 %v1553_v63, %v1545_v33  ;;  %4576 = vset.pattern.permute.xlu0 %v4959_v48  ;;  %4577 = vset.pattern.permute.xlu1 %v4959_v48  ;;  %v3875_v33 = vpop.f32.mrb[1].mxu1 }
 0x28d   : > { %v1558_v61 = vmin.f32 %v1554_v59, %v1555_v47  ;;  %v876_v47 = vpop.f32.mrb[2].mxu1 }
 0x28e   : > { %v1559_v62 = vmin.f32 %v1556_v50, %v1557_v51 }
 0x290   : > { %v1560_v0 = vmin.f32 %v1558_v61, %v1559_v62  ;;  %v3876_v61 = vpop.f32.mrb[3].mxu1 }
 0x292   : > { %v1561_v1 = vrot.slane %v1560_v0, 4 }
 0x294   : > { %v1562_v3 = vmin.f32 %v1560_v0, %v1561_v1 }
 0x296   : > { %v1563_v46 = vrot.slane %v1562_v3, 2 }
 0x298   : > { %v1564_v30 = vmin.f32 %v1562_v3, %v1563_v46 }
 0x29a   : > { %v1565_v14 = vrot.slane %v1564_v30, 1 }
 0x29c   : > { %v6003_v15 = vmin.f32 %v1564_v30, %v1565_v14 }
 0x29e   : > { %vm7729_vm10 = vcmp.eq.f32.partialorder %v5456_v35, %v6003_v15  ;;  %vm7728_vm11 = vcmp.eq.f32.partialorder %v5458_v37, %v6003_v15  ;;  %vm7727_vm12 = vcmp.eq.f32.partialorder %v5460_v38, %v6003_v15  ;;  %vm7726_vm13 = vcmp.eq.f32.partialorder %v5462_v39, %v6003_v15 }
 0x29f   : > { %v6017_v60 = vsel %vm7729_vm10, -1e+30, %v5807_v34  ;;  %v6023_v16 = vsel %vm7728_vm11, -1e+30, %v5813_v12  ;;  %v6029_v17 = vsel %vm7727_vm12, -1e+30, %v5819_v40  ;;  %vm7725_vm15 = vcmp.eq.f32.partialorder %v5464_v41, %v6003_v15 }
 0x2a0   : > { %v6037_v34 = vsel %vm7726_vm13, -1e+30, %v5827_v8  ;;  %vm7724_vm1 = vcmp.eq.f32.partialorder %v5466_v43, %v6003_v15  ;;  %v6045_v12 = vsel %vm7725_vm15, -1e+30, %v5835_v9  ;;  %vm7723_vm0 = vcmp.eq.f32.partialorder %v5468_v53, %v6003_v15 }
 0x2a1   : > { %v6053_v40 = vsel %vm7724_vm1, -1e+30, %v5843_v11  ;;  %v1793_v8 = vmax.f32 %v6017_v60, %v6045_v12  ;;  %vm7722_vm2 = vcmp.eq.f32.partialorder %v5470_v55, %v6003_v15  ;;  %v6063_v9 = vsel %vm7723_vm0, -1e+30, %v5853_v25 }
 0x2a2   : > { %v1794_v18 = vmax.f32 %v6023_v16, %v6053_v40  ;;  %v6071_v11 = vsel %vm7722_vm2, -1e+30, %v5861_v42  ;;  %v1795_v13 = vmax.f32 %v6029_v17, %v6063_v9  ;;  %vm7721_vm3 = vcmp.eq.f32.partialorder %v5472_v52, %v6003_v15  ;;  %v826_v42 = vld [vmem:[#allocation11] sm:$0x1f] }
 0x2a3   : > { %v1796_v21 = vmax.f32 %v6037_v34, %v6071_v11  ;;  %vm7720_vm4 = vcmp.eq.f32.partialorder %v5474_v56, %v6003_v15  ;;  %v6085_v25 = vsel %vm7721_vm3, -1e+30, %v5875_v22  ;;  %vm7719_vm5 = vcmp.eq.f32.partialorder %v5476_v57, %v6003_v15  ;;  %829 = vperm.xlu0 %4576, %v826_v42  }
 0x2a4   : > { %v6093_v45 = vsel %vm7720_vm4, -1e+30, %v5883_v19  ;;  %v1797_v23 = vmax.f32 %v1793_v8, %v6085_v25  ;;  %vm7714_vm6 = vcmp.eq.f32.partialorder %v5478_v58, %v6003_v15  ;;  %v6103_v26 = vsel %vm7719_vm5, -1e+30, %v5892_v36 }
 0x2a5   : > { %v1798_v22 = vmax.f32 %v1794_v18, %v6093_v45  ;;  %v6109_v19 = vsel %vm7714_vm6, -1e+30, %v5899_v20  ;;  %vm7718_vm8 = vcmp.eq.f32.partialorder %v5504_v4, %v6003_v15  ;;  %v1799_v63 = vmax.f32 %v1795_v13, %v6103_v26 }
 0x2a6   : > { %v1800_v28 = vmax.f32 %v1796_v21, %v6109_v19  ;;  %vm7717_vm9 = vcmp.eq.f32.partialorder %v5506_v5, %v6003_v15  ;;  %v6121_v36 = vsel %vm7718_vm8, -1e+30, %v5911_v32  ;;  %vm7715_vm14 = vcmp.eq.f32.partialorder %v5508_v6, %v6003_v15 }
 0x2a7   : > { %v6129_v20 = vsel %vm7717_vm9, -1e+30, %v5919_v27  ;;  %v1801_v31 = vmax.f32 %v1797_v23, %v6121_v36  ;;  %vm7716_vm6 = vcmp.eq.f32.partialorder %v5510_v7, %v6003_v15  ;;  %v6141_v59 = vsel %vm7715_vm14, -1e+30, %v5928_v44 }
 0x2a8   : > { %v1802_v32 = vmax.f32 %v1798_v22, %v6129_v20  ;;  %v6147_v27 = vsel %vm7716_vm6, -1e+30, %v5935_v24  ;;  %v1803_v50 = vmax.f32 %v1799_v63, %v6141_v59 }
 0x2a9   : > { %v1804_v51 = vmax.f32 %v1800_v28, %v6147_v27 }
 0x2aa   : > { %v1805_v62 = vmax.f32 %v1801_v31, %v1802_v32 }
 0x2ab   : > { %v1806_v0 = vmax.f32 %v1803_v50, %v1804_v51 }
 0x2ad   : > { %v1807_v1 = vmax.f32 %v1805_v62, %v1806_v0 }
 0x2af   : > { %v1808_v3 = vrot.slane %v1807_v1, 4 }
 0x2b1   : > { %v1809_v46 = vmax.f32 %v1807_v1, %v1808_v3 }
 0x2b3   : > { %v1810_v30 = vrot.slane %v1809_v46, 2 }
 0x2b5   : > { %v1811_v44 = vmax.f32 %v1809_v46, %v1810_v30 }
 0x2b7   : > { %v1812_v14 = vrot.slane %v1811_v44, 1 }
 0x2b9   : > { %v1813_v8 = vmax.f32 %v1811_v44, %v1812_v14 }
 0x2bb   : > { %vm1814_vm14 = vcmp.eq.f32.partialorder %v6017_v60, %v1813_v8  ;;  %vm1815_vm6 = vcmp.eq.f32.partialorder %v6023_v16, %v1813_v8  ;;  %vm1816_vm9 = vcmp.eq.f32.partialorder %v6029_v17, %v1813_v8  ;;  %vm1817_vm8 = vcmp.eq.f32.partialorder %v6037_v34, %v1813_v8 }
 0x2bc   : > { %vm1818_vm5 = vcmp.eq.f32.partialorder %v6045_v12, %v1813_v8  ;;  %vm1820_vm3 = vcmp.eq.f32.partialorder %v6063_v9, %v1813_v8  ;;  %vm1821_vm2 = vcmp.eq.f32.partialorder %v6071_v11, %v1813_v8  ;;  %vm1822_vm0 = vcmp.eq.f32.partialorder %v6085_v25, %v1813_v8 }
 0x2bd   : > { %vm1823_vm1 = vcmp.eq.f32.partialorder %v6093_v45, %v1813_v8  ;;  %vm1824_vm15 = vcmp.eq.f32.partialorder %v6103_v26, %v1813_v8  ;;  %vm1825_vm13 = vcmp.eq.f32.partialorder %v6109_v19, %v1813_v8  ;;  %vm1826_vm12 = vcmp.eq.f32.partialorder %v6121_v36, %v1813_v8 }
 0x2be   : > { %vm1827_vm11 = vcmp.eq.f32.partialorder %v6129_v20, %v1813_v8  ;;  %vm1828_vm10 = vcmp.eq.f32.partialorder %v6141_v59, %v1813_v8  ;;  %v1830_v24 = vsel %vm1814_vm14, %v5456_v35, 128.0  ;;  %v1831_v18 = vsel %vm1815_vm6, %v5458_v37, 128.0 }
 0x2bf   : > { %v1832_v13 = vsel %vm1816_vm9, %v5460_v38, 128.0  ;;  %v1833_v21 = vsel %vm1817_vm8, %v5462_v39, 128.0  ;;  %v1834_v42 = vsel %vm1818_vm5, %v5464_v41, 128.0  ;;  %vm7837_vm4 = vcmp.eq.f32.partialorder %v6053_v40, %v1813_v8 }
 0x2c0   : > { %v1835_v23 = vsel %vm7837_vm4, %v5466_v43, 128.0  ;;  %v1836_v48 = vsel %vm1820_vm3, %v5468_v53, 128.0  ;;  %v1837_v22 = vsel %vm1821_vm2, %v5470_v55, 128.0  ;;  %v1846_v63 = vmin.f32 %v1830_v24, %v1834_v42 }
 0x2c1   : > { %v1847_v28 = vmin.f32 %v1831_v18, %v1835_v23  ;;  %v1848_v31 = vmin.f32 %v1832_v13, %v1836_v48  ;;  %v1849_v33 = vmin.f32 %v1833_v21, %v1837_v22  ;;  %v1838_v32 = vsel %vm1822_vm0, %v5472_v52, 128.0 }
 0x2c2   : > { %v1839_v47 = vsel %vm1823_vm1, %v5474_v56, 128.0  ;;  %v1840_v50 = vsel %vm1824_vm15, %v5476_v57, 128.0  ;;  %v1841_v51 = vsel %vm1825_vm13, %v5478_v58, 128.0  ;;  %v1850_v61 = vmin.f32 %v1846_v63, %v1838_v32 }
 0x2c3   : > { %v1851_v62 = vmin.f32 %v1847_v28, %v1839_v47  ;;  %v1852_v0 = vmin.f32 %v1848_v31, %v1840_v50  ;;  %v1853_v1 = vmin.f32 %v1849_v33, %v1841_v51  ;;  %v1842_v3 = vsel %vm1826_vm12, %v5504_v4, 128.0 }
 0x2c4   : > { %v1843_v46 = vsel %vm1827_vm11, %v5506_v5, 128.0  ;;  %v1844_v30 = vsel %vm1828_vm10, %v5508_v6, 128.0  ;;  %vm7838_vm15 = vcmp.eq.f32.partialorder %v6147_v27, %v1813_v8  ;;  %v1854_v14 = vmin.f32 %v1850_v61, %v1842_v3 }
 0x2c5   : > { %v1845_v44 = vsel %vm7838_vm15, %v5510_v7, 128.0  ;;  %v1855_v24 = vmin.f32 %v1851_v62, %v1843_v46  ;;  %v1856_v18 = vmin.f32 %v1852_v0, %v1844_v30 }
 0x2c6   : > { %v1857_v13 = vmin.f32 %v1853_v1, %v1845_v44 }
 0x2c7   : > { %v1858_v21 = vmin.f32 %v1854_v14, %v1855_v24 }
 0x2c8   : > { %v1859_v42 = vmin.f32 %v1856_v18, %v1857_v13 }
 0x2ca   : > { %v1860_v23 = vmin.f32 %v1858_v21, %v1859_v42 }
 0x2cc   : > { %v1861_v48 = vrot.slane %v1860_v23, 4 }
 0x2ce   : > { %v1862_v22 = vmin.f32 %v1860_v23, %v1861_v48 }
 0x2d0   : > { %v1863_v63 = vrot.slane %v1862_v22, 2 }
 0x2d2   : > { %v1864_v28 = vmin.f32 %v1862_v22, %v1863_v63 }
 0x2d4   : > { %v1865_v31 = vrot.slane %v1864_v28, 1 }
 0x2d6   : > { %v6215_v33 = vmin.f32 %v1864_v28, %v1865_v31 }
 0x2d8   : > { %vm7745_vm10 = vcmp.eq.f32.partialorder %v5456_v35, %v6215_v33  ;;  %vm7744_vm11 = vcmp.eq.f32.partialorder %v5458_v37, %v6215_v33  ;;  %vm7743_vm12 = vcmp.eq.f32.partialorder %v5460_v38, %v6215_v33  ;;  %vm7742_vm13 = vcmp.eq.f32.partialorder %v5462_v39, %v6215_v33 }
 0x2d9   : > { %v6229_v8 = vsel %vm7745_vm10, -1e+30, %v6017_v60  ;;  %v6235_v32 = vsel %vm7744_vm11, -1e+30, %v6023_v16  ;;  %v6241_v47 = vsel %vm7743_vm12, -1e+30, %v6029_v17  ;;  %vm7741_vm1 = vcmp.eq.f32.partialorder %v5464_v41, %v6215_v33 }
 0x2da   : > { %v6249_v60 = vsel %vm7742_vm13, -1e+30, %v6037_v34  ;;  %vm7740_vm0 = vcmp.eq.f32.partialorder %v5466_v43, %v6215_v33  ;;  %v6257_v16 = vsel %vm7741_vm1, -1e+30, %v6045_v12  ;;  %vm7739_vm2 = vcmp.eq.f32.partialorder %v5468_v53, %v6215_v33 }
 0x2db   : > { %v6265_v17 = vsel %vm7740_vm0, -1e+30, %v6053_v40  ;;  %v2093_v34 = vmax.f32 %v6229_v8, %v6257_v16  ;;  %vm7738_vm3 = vcmp.eq.f32.partialorder %v5470_v55, %v6215_v33  ;;  %v6275_v12 = vsel %vm7739_vm2, -1e+30, %v6063_v9 }
 0x2dc   : > { %v2094_v50 = vmax.f32 %v6235_v32, %v6265_v17  ;;  %v6283_v40 = vsel %vm7738_vm3, -1e+30, %v6071_v11  ;;  %v2095_v51 = vmax.f32 %v6241_v47, %v6275_v12  ;;  %vm7737_vm4 = vcmp.eq.f32.partialorder %v5472_v52, %v6215_v33 }
 0x2dd   : > { %v2096_v61 = vmax.f32 %v6249_v60, %v6283_v40  ;;  %vm7736_vm5 = vcmp.eq.f32.partialorder %v5474_v56, %v6215_v33  ;;  %v6297_v9 = vsel %vm7737_vm4, -1e+30, %v6085_v25  ;;  %vm7735_vm6 = vcmp.eq.f32.partialorder %v5476_v57, %v6215_v33 }
 0x2de   : > { %v6305_v11 = vsel %vm7736_vm5, -1e+30, %v6093_v45  ;;  %v2097_v62 = vmax.f32 %v2093_v34, %v6297_v9  ;;  %vm7730_vm8 = vcmp.eq.f32.partialorder %v5478_v58, %v6215_v33  ;;  %v6314_v25 = vsel %vm7735_vm6, -1e+30, %v6103_v26 }
 0x2df   : > { %v2098_v0 = vmax.f32 %v2094_v50, %v6305_v11  ;;  %v6321_v1 = vsel %vm7730_vm8, -1e+30, %v6109_v19  ;;  %v2099_v45 = vmax.f32 %v2095_v51, %v6314_v25  ;;  %vm7734_vm9 = vcmp.eq.f32.partialorder %v5504_v4, %v6215_v33 }
 0x2e0   : > { %v2100_v3 = vmax.f32 %v2096_v61, %v6321_v1  ;;  %vm7732_vm14 = vcmp.eq.f32.partialorder %v5506_v5, %v6215_v33  ;;  %v6333_v26 = vsel %vm7734_vm9, -1e+30, %v6121_v36  ;;  %vm7731_vm15 = vcmp.eq.f32.partialorder %v5508_v6, %v6215_v33 }
 0x2e1   : > { %v6341_v19 = vsel %vm7732_vm14, -1e+30, %v6129_v20  ;;  %v2101_v46 = vmax.f32 %v2097_v62, %v6333_v26  ;;  %vm7733_vm8 = vcmp.eq.f32.partialorder %v5510_v7, %v6215_v33  ;;  %v6350_v36 = vsel %vm7731_vm15, -1e+30, %v6141_v59 }
 0x2e2   : > { %v2102_v30 = vmax.f32 %v2098_v0, %v6341_v19  ;;  %v6357_v44 = vsel %vm7733_vm8, -1e+30, %v6147_v27  ;;  %v2103_v20 = vmax.f32 %v2099_v45, %v6350_v36 }
 0x2e3   : > { %v2104_v14 = vmax.f32 %v2100_v3, %v6357_v44 }
 0x2e4   : > { %v2105_v24 = vmax.f32 %v2101_v46, %v2102_v30 }
 0x2e5   : > { %v2106_v18 = vmax.f32 %v2103_v20, %v2104_v14 }
 0x2e7   : > { %v2107_v13 = vmax.f32 %v2105_v24, %v2106_v18 }
 0x2e9   : > { %v2108_v21 = vrot.slane %v2107_v13, 4 }
 0x2eb   : > { %v2109_v42 = vmax.f32 %v2107_v13, %v2108_v21 }
 0x2ed   : > { %v2110_v23 = vrot.slane %v2109_v42, 2 }
 0x2ef   : > { %v2111_v59 = vmax.f32 %v2109_v42, %v2110_v23 }
 0x2f1   : > { %v2112_v48 = vrot.slane %v2111_v59, 1 }
 0x2f3   : > { %v2113_v22 = vmax.f32 %v2111_v59, %v2112_v48 }
 0x2f5   : > { %vm2114_vm15 = vcmp.eq.f32.partialorder %v6229_v8, %v2113_v22  ;;  %vm2115_vm14 = vcmp.eq.f32.partialorder %v6235_v32, %v2113_v22  ;;  %vm2116_vm8 = vcmp.eq.f32.partialorder %v6241_v47, %v2113_v22  ;;  %vm2117_vm9 = vcmp.eq.f32.partialorder %v6249_v60, %v2113_v22 }
 0x2f6   : > { %vm2118_vm6 = vcmp.eq.f32.partialorder %v6257_v16, %v2113_v22  ;;  %vm2120_vm4 = vcmp.eq.f32.partialorder %v6275_v12, %v2113_v22  ;;  %vm2121_vm3 = vcmp.eq.f32.partialorder %v6283_v40, %v2113_v22  ;;  %vm2122_vm2 = vcmp.eq.f32.partialorder %v6297_v9, %v2113_v22 }
 0x2f7   : > { %vm2123_vm0 = vcmp.eq.f32.partialorder %v6305_v11, %v2113_v22  ;;  %vm2124_vm1 = vcmp.eq.f32.partialorder %v6314_v25, %v2113_v22  ;;  %vm2125_vm13 = vcmp.eq.f32.partialorder %v6321_v1, %v2113_v22  ;;  %vm2126_vm12 = vcmp.eq.f32.partialorder %v6333_v26, %v2113_v22 }
 0x2f8   : > { %vm2127_vm11 = vcmp.eq.f32.partialorder %v6341_v19, %v2113_v22  ;;  %vm2128_vm10 = vcmp.eq.f32.partialorder %v6350_v36, %v2113_v22  ;;  %v2130_v27 = vsel %vm2114_vm15, %v5456_v35, 128.0  ;;  %v2131_v63 = vsel %vm2115_vm14, %v5458_v37, 128.0 }
 0x2f9   : > { %v2132_v28 = vsel %vm2116_vm8, %v5460_v38, 128.0  ;;  %v2133_v31 = vsel %vm2117_vm9, %v5462_v39, 128.0  ;;  %v2134_v34 = vsel %vm2118_vm6, %v5464_v41, 128.0  ;;  %vm7839_vm5 = vcmp.eq.f32.partialorder %v6265_v17, %v2113_v22 }
 0x2fa   : > { %v2135_v50 = vsel %vm7839_vm5, %v5466_v43, 128.0  ;;  %v2136_v51 = vsel %vm2120_vm4, %v5468_v53, 128.0  ;;  %v2137_v61 = vsel %vm2121_vm3, %v5470_v55, 128.0  ;;  %v2146_v62 = vmin.f32 %v2130_v27, %v2134_v34 }
 0x2fb   : > { %v2147_v0 = vmin.f32 %v2131_v63, %v2135_v50  ;;  %v2148_v45 = vmin.f32 %v2132_v28, %v2136_v51  ;;  %v2149_v3 = vmin.f32 %v2133_v31, %v2137_v61  ;;  %v2138_v46 = vsel %vm2122_vm2, %v5472_v52, 128.0 }
 0x2fc   : > { %v2139_v30 = vsel %vm2123_vm0, %v5474_v56, 128.0  ;;  %v2140_v20 = vsel %vm2124_vm1, %v5476_v57, 128.0  ;;  %v2141_v14 = vsel %vm2125_vm13, %v5478_v58, 128.0  ;;  %v2150_v24 = vmin.f32 %v2146_v62, %v2138_v46 }
 0x2fd   : > { %v2151_v18 = vmin.f32 %v2147_v0, %v2139_v30  ;;  %v2152_v13 = vmin.f32 %v2148_v45, %v2140_v20  ;;  %v2153_v21 = vmin.f32 %v2149_v3, %v2141_v14  ;;  %v2142_v42 = vsel %vm2126_vm12, %v5504_v4, 128.0 }
 0x2fe   : > { %v2143_v23 = vsel %vm2127_vm11, %v5506_v5, 128.0  ;;  %v2144_v59 = vsel %vm2128_vm10, %v5508_v6, 128.0  ;;  %vm7840_vm1 = vcmp.eq.f32.partialorder %v6357_v44, %v2113_v22  ;;  %v2154_v27 = vmin.f32 %v2150_v24, %v2142_v42 }
 0x2ff   : > { %v2145_v48 = vsel %vm7840_vm1, %v5510_v7, 128.0  ;;  %v2155_v63 = vmin.f32 %v2151_v18, %v2143_v23  ;;  %v2156_v28 = vmin.f32 %v2152_v13, %v2144_v59  ;;  %v6537_v59 = vld [vmem:[%s5306_s23] sm:$0x3] }
 0x300   : > { %v2157_v31 = vmin.f32 %v2153_v21, %v2145_v48 }
 0x301   : > { %v2158_v34 = vmin.f32 %v2154_v27, %v2155_v63 }
 0x302   : > { %v2159_v50 = vmin.f32 %v2156_v28, %v2157_v31 }
 0x304   : > { %v2160_v51 = vmin.f32 %v2158_v34, %v2159_v50 }
 0x306   : > { %v2161_v61 = vrot.slane %v2160_v51, 4 }
 0x308   : > { %v2162_v62 = vmin.f32 %v2160_v51, %v2161_v61 }
 0x30a   : > { %v2163_v0 = vrot.slane %v2162_v62, 2 }
 0x30c   : > { %v2164_v45 = vmin.f32 %v2162_v62, %v2163_v0  ;;  %v6576_v0 = vld [vmem:[#allocation8] sm:$0x7] }
 0x30e   : > { %v2165_v3 = vrot.slane %v2164_v45, 1 }
 0x310   : > { %v6425_v46 = vmin.f32 %v2164_v45, %v2165_v3 }
 0x312   : > { %vm7761_vm10 = vcmp.eq.f32.partialorder %v5456_v35, %v6425_v46  ;;  %vm7760_vm11 = vcmp.eq.f32.partialorder %v5458_v37, %v6425_v46  ;;  %vm7759_vm12 = vcmp.eq.f32.partialorder %v5460_v38, %v6425_v46  ;;  %vm7758_vm13 = vcmp.eq.f32.partialorder %v5462_v39, %v6425_v46 }
 0x313   : > { %v6439_v22 = vsel %vm7761_vm10, -1e+30, %v6229_v8  ;;  %v6445_v30 = vsel %vm7760_vm11, -1e+30, %v6235_v32  ;;  %v6451_v20 = vsel %vm7759_vm12, -1e+30, %v6241_v47  ;;  %vm7757_vm0 = vcmp.eq.f32.partialorder %v5464_v41, %v6425_v46 }
 0x314   : > { %v6459_v8 = vsel %vm7758_vm13, -1e+30, %v6249_v60  ;;  %vm7756_vm2 = vcmp.eq.f32.partialorder %v5466_v43, %v6425_v46  ;;  %v6467_v32 = vsel %vm7757_vm0, -1e+30, %v6257_v16  ;;  %vm7755_vm3 = vcmp.eq.f32.partialorder %v5468_v53, %v6425_v46 }
 0x315   : > { %v6475_v47 = vsel %vm7756_vm2, -1e+30, %v6265_v17  ;;  %v2393_v60 = vmax.f32 %v6439_v22, %v6467_v32  ;;  %vm7754_vm4 = vcmp.eq.f32.partialorder %v5470_v55, %v6425_v46  ;;  %v6485_v16 = vsel %vm7755_vm3, -1e+30, %v6275_v12 }
 0x316   : > { %v2394_v14 = vmax.f32 %v6445_v30, %v6475_v47  ;;  %v6493_v17 = vsel %vm7754_vm4, -1e+30, %v6283_v40  ;;  %v2395_v24 = vmax.f32 %v6451_v20, %v6485_v16  ;;  %vm7753_vm5 = vcmp.eq.f32.partialorder %v5472_v52, %v6425_v46 }
 0x317   : > { %v2396_v12 = vmax.f32 %v6459_v8, %v6493_v17  ;;  %vm7752_vm6 = vcmp.eq.f32.partialorder %v5474_v56, %v6425_v46  ;;  %v6507_v18 = vsel %vm7753_vm5, -1e+30, %v6297_v9  ;;  %vm7751_vm8 = vcmp.eq.f32.partialorder %v5476_v57, %v6425_v46 }
 0x318   : > { %v6515_v40 = vsel %vm7752_vm6, -1e+30, %v6305_v11  ;;  %v2397_v13 = vmax.f32 %v2393_v60, %v6507_v18  ;;  %vm7746_vm9 = vcmp.eq.f32.partialorder %v5478_v58, %v6425_v46  ;;  %v6524_v9 = vsel %vm7751_vm8, -1e+30, %v6314_v25 }
 0x319   : > { %v2398_v42 = vmax.f32 %v2394_v14, %v6515_v40  ;;  %v6531_v11 = vsel %vm7746_vm9, -1e+30, %v6321_v1  ;;  %v2399_v23 = vmax.f32 %v2395_v24, %v6524_v9  ;;  %vm7750_vm14 = vcmp.eq.f32.partialorder %v5504_v4, %v6425_v46 }
 0x31a   : > { %v2400_v27 = vmax.f32 %v2396_v12, %v6531_v11  ;;  %vm7747_vm15 = vcmp.eq.f32.partialorder %v5506_v5, %v6425_v46  ;;  %v6547_v1 = vsel %vm7750_vm14, -1e+30, %v6333_v26  ;;  %vm7748_vm1 = vcmp.eq.f32.partialorder %v5508_v6, %v6425_v46 }
 0x31b   : > { %v6553_v63 = vsel %vm7747_vm15, -1e+30, %v6341_v19  ;;  %v2401_v28 = vmax.f32 %v2397_v13, %v6547_v1  ;;  %vm7749_vm9 = vcmp.eq.f32.partialorder %v5510_v7, %v6425_v46  ;;  %v6565_v26 = vsel %vm7748_vm1, -1e+30, %v6350_v36 }
 0x31c   : > { %v2402_v34 = vmax.f32 %v2398_v42, %v6553_v63  ;;  %v6571_v19 = vsel %vm7749_vm9, -1e+30, %v6357_v44  ;;  %v2403_v50 = vmax.f32 %v2399_v23, %v6565_v26  ;;  %vm7841_vm15 = vcmask 1040384  }
 0x31d   : > { %v1067_v21 = vpop.f32.mrb[16].mxu0  ;;  %v2404_v51 = vmax.f32 %v2400_v27, %v6571_v19  ;;  %vm7842_vm1 = vcmask 15360  }
 0x31e   : > { %v1071_v48 = vsub.f32 %v1067_v21, %v6537_v59  ;;  %v3911_v25 = vpop.f32.mrb[17].mxu0  ;;  %v2405_v62 = vmax.f32 %v2401_v28, %v2402_v34 }
 0x31f   : > { %v2406_v45 = vmax.f32 %v2403_v50, %v2404_v51 }
 0x320   : > { %v1072_v31 = vpack.c.bf16 %v1071_v48, %v1071_v48 }
 0x321   : > { %v2407_v36 = vmax.f32 %v2405_v62, %v2406_v45 }
 0x322   : > { %v1077_v61 = vsel %vm7841_vm15, %v1072_v31, 0 }
 0x323   : > { %3913 = vmatpush3.bf16.msra.mxu1 %v1077_v61  ;;  %v2408_v44 = vrot.slane %v2407_v36, 4 }
 0x324   : > { %3918 = vmatprep.subr.bf16.mxu1 %v7778_v54 }
 0x325   : > { %v2409_v3 = vmax.f32 %v2407_v36, %v2408_v44 }
 0x326   : > { %3915 = vmatmul.mubr.msk.bf16.vlgmr.msra.gmra.mrb[4].mxu1 %vm7842_vm1, %v6576_v0 }
 0x327   : > { %3920 = vmatprep.mubr.msk.bf16.mxu1 %vm7834_vm7, %v7778_v54  ;;  %v2410_v60 = vrot.slane %v2409_v3, 2 }
 0x329   : > { %v2411_v14 = vmax.f32 %v2409_v3, %v2410_v60 }
 0x32b   : > { %v2412_v24 = vrot.slane %v2411_v14, 1 }
 0x32d   : > { %v2413_v12 = vmax.f32 %v2411_v14, %v2412_v24 }
 0x32f   : > { %vm2414_vm15 = vcmp.eq.f32.partialorder %v6439_v22, %v2413_v12  ;;  %vm2415_vm9 = vcmp.eq.f32.partialorder %v6445_v30, %v2413_v12  ;;  %vm2416_vm14 = vcmp.eq.f32.partialorder %v6451_v20, %v2413_v12  ;;  %vm2417_vm8 = vcmp.eq.f32.partialorder %v6459_v8, %v2413_v12 }
 0x330   : > { %vm2418_vm6 = vcmp.eq.f32.partialorder %v6467_v32, %v2413_v12  ;;  %vm2420_vm5 = vcmp.eq.f32.partialorder %v6485_v16, %v2413_v12  ;;  %vm2421_vm4 = vcmp.eq.f32.partialorder %v6493_v17, %v2413_v12  ;;  %vm2422_vm3 = vcmp.eq.f32.partialorder %v6507_v18, %v2413_v12 }
 0x331   : > { %vm2423_vm2 = vcmp.eq.f32.partialorder %v6515_v40, %v2413_v12  ;;  %vm2424_vm0 = vcmp.eq.f32.partialorder %v6524_v9, %v2413_v12  ;;  %vm2425_vm13 = vcmp.eq.f32.partialorder %v6531_v11, %v2413_v12  ;;  %vm2426_vm12 = vcmp.eq.f32.partialorder %v6547_v1, %v2413_v12 }
 0x332   : > { %vm2427_vm11 = vcmp.eq.f32.partialorder %v6553_v63, %v2413_v12  ;;  %vm2428_vm10 = vcmp.eq.f32.partialorder %v6565_v26, %v2413_v12  ;;  %v2430_v13 = vsel %vm2414_vm15, %v5456_v35, 128.0  ;;  %v2431_v21 = vsel %vm2415_vm9, %v5458_v37, 128.0 }
 0x333   : > { %v2432_v42 = vsel %vm2416_vm14, %v5460_v38, 128.0  ;;  %v2433_v23 = vsel %vm2417_vm8, %v5462_v39, 128.0  ;;  %v2434_v48 = vsel %vm2418_vm6, %v5464_v41, 128.0  ;;  %vm7843_vm1 = vcmp.eq.f32.partialorder %v6475_v47, %v2413_v12 }
 0x334   : > { %v2435_v25 = vsel %vm7843_vm1, %v5466_v43, 128.0  ;;  %v2436_v27 = vsel %vm2420_vm5, %v5468_v53, 128.0  ;;  %v2437_v28 = vsel %vm2421_vm4, %v5470_v55, 128.0  ;;  %v2446_v31 = vmin.f32 %v2430_v13, %v2434_v48 }
 0x335   : > { %v2447_v34 = vmin.f32 %v2431_v21, %v2435_v25  ;;  %v2448_v50 = vmin.f32 %v2432_v42, %v2436_v27  ;;  %v2449_v51 = vmin.f32 %v2433_v23, %v2437_v28  ;;  %v2438_v61 = vsel %vm2422_vm3, %v5472_v52, 128.0 }
 0x336   : > { %v2439_v62 = vsel %vm2423_vm2, %v5474_v56, 128.0  ;;  %v2440_v45 = vsel %vm2424_vm0, %v5476_v57, 128.0  ;;  %v2441_v36 = vsel %vm2425_vm13, %v5478_v58, 128.0  ;;  %v2450_v44 = vmin.f32 %v2446_v31, %v2438_v61 }
 0x337   : > { %v2451_v3 = vmin.f32 %v2447_v34, %v2439_v62  ;;  %v2452_v60 = vmin.f32 %v2448_v50, %v2440_v45  ;;  %v2453_v14 = vmin.f32 %v2449_v51, %v2441_v36  ;;  %v2442_v24 = vsel %vm2426_vm12, %v5504_v4, 128.0 }
 0x338   : > { %v2443_v13 = vsel %vm2427_vm11, %v5506_v5, 128.0  ;;  %v2444_v21 = vsel %vm2428_vm10, %v5508_v6, 128.0  ;;  %vm7844_vm0 = vcmp.eq.f32.partialorder %v6571_v19, %v2413_v12  ;;  %v2454_v23 = vmin.f32 %v2450_v44, %v2442_v24 }
 0x339   : > { %v2445_v42 = vsel %vm7844_vm0, %v5510_v7, 128.0  ;;  %v2455_v48 = vmin.f32 %v2451_v3, %v2443_v13  ;;  %v2456_v25 = vmin.f32 %v2452_v60, %v2444_v21 }
 0x33a   : > { %v2457_v27 = vmin.f32 %v2453_v14, %v2445_v42 }
 0x33b   : > { %v2458_v28 = vmin.f32 %v2454_v23, %v2455_v48 }
 0x33c   : > { %v2459_v31 = vmin.f32 %v2456_v25, %v2457_v27 }
 0x33e   : > { %v2460_v34 = vmin.f32 %v2458_v28, %v2459_v31 }
 0x340   : > { %v2461_v50 = vrot.slane %v2460_v34, 4 }
 0x342   : > { %v2462_v51 = vmin.f32 %v2460_v34, %v2461_v50 }
 0x344   : > { %v2463_v61 = vrot.slane %v2462_v51, 2 }
 0x346   : > { %v2464_v62 = vmin.f32 %v2462_v51, %v2463_v61 }
 0x348   : > { %v2465_v45 = vrot.slane %v2464_v62, 1 }
 0x34a   : > { %v6647_v36 = vmin.f32 %v2464_v62, %v2465_v45 }
 0x34c   : > { %vm7777_vm10 = vcmp.eq.f32.partialorder %v5456_v35, %v6647_v36  ;;  %vm7776_vm11 = vcmp.eq.f32.partialorder %v5458_v37, %v6647_v36  ;;  %vm7775_vm12 = vcmp.eq.f32.partialorder %v5460_v38, %v6647_v36  ;;  %vm7774_vm13 = vcmp.eq.f32.partialorder %v5462_v39, %v6647_v36 }
 0x34d   : > { %v6661_v12 = vsel %vm7777_vm10, -1e+30, %v6439_v22  ;;  %v6667_v44 = vsel %vm7776_vm11, -1e+30, %v6445_v30  ;;  %v6673_v3 = vsel %vm7775_vm12, -1e+30, %v6451_v20  ;;  %vm7773_vm2 = vcmp.eq.f32.partialorder %v5464_v41, %v6647_v36 }
 0x34e   : > { %v6681_v22 = vsel %vm7774_vm13, -1e+30, %v6459_v8  ;;  %vm7772_vm3 = vcmp.eq.f32.partialorder %v5466_v43, %v6647_v36  ;;  %v6689_v30 = vsel %vm7773_vm2, -1e+30, %v6467_v32  ;;  %vm7771_vm4 = vcmp.eq.f32.partialorder %v5468_v53, %v6647_v36 }
 0x34f   : > { %v6697_v20 = vsel %vm7772_vm3, -1e+30, %v6475_v47  ;;  %v2693_v8 = vmax.f32 %v6661_v12, %v6689_v30  ;;  %vm7770_vm5 = vcmp.eq.f32.partialorder %v5470_v55, %v6647_v36  ;;  %v6707_v32 = vsel %vm7771_vm4, -1e+30, %v6485_v16 }
 0x350   : > { %v2694_v60 = vmax.f32 %v6667_v44, %v6697_v20  ;;  %v6715_v47 = vsel %vm7770_vm5, -1e+30, %v6493_v17  ;;  %v2695_v14 = vmax.f32 %v6673_v3, %v6707_v32  ;;  %vm7769_vm6 = vcmp.eq.f32.partialorder %v5472_v52, %v6647_v36 }
 0x351   : > { %v2696_v24 = vmax.f32 %v6681_v22, %v6715_v47  ;;  %vm7768_vm8 = vcmp.eq.f32.partialorder %v5474_v56, %v6647_v36  ;;  %v6729_v16 = vsel %vm7769_vm6, -1e+30, %v6507_v18  ;;  %vm7767_vm9 = vcmp.eq.f32.partialorder %v5476_v57, %v6647_v36 }
 0x352   : > { %v6737_v17 = vsel %vm7768_vm8, -1e+30, %v6515_v40  ;;  %v2697_v13 = vmax.f32 %v2693_v8, %v6729_v16  ;;  %vm7762_vm14 = vcmp.eq.f32.partialorder %v5478_v58, %v6647_v36  ;;  %v6746_v18 = vsel %vm7767_vm9, -1e+30, %v6524_v9 }
 0x353   : > { %v2698_v21 = vmax.f32 %v2694_v60, %v6737_v17  ;;  %v6753_v42 = vsel %vm7762_vm14, -1e+30, %v6531_v11  ;;  %v2699_v40 = vmax.f32 %v2695_v14, %v6746_v18  ;;  %vm7766_vm15 = vcmp.eq.f32.partialorder %v5504_v4, %v6647_v36 }
 0x354   : > { %v2700_v23 = vmax.f32 %v2696_v24, %v6753_v42  ;;  %vm7764_vm1 = vcmp.eq.f32.partialorder %v5506_v5, %v6647_v36  ;;  %v6765_v9 = vsel %vm7766_vm15, -1e+30, %v6547_v1  ;;  %vm7763_vm0 = vcmp.eq.f32.partialorder %v5508_v6, %v6647_v36 }
 0x355   : > { %v6773_v11 = vsel %vm7764_vm1, -1e+30, %v6553_v63  ;;  %v2701_v48 = vmax.f32 %v2697_v13, %v6765_v9  ;;  %vm7765_vm14 = vcmp.eq.f32.partialorder %v5510_v7, %v6647_v36  ;;  %v6782_v1 = vsel %vm7763_vm0, -1e+30, %v6565_v26 }
 0x356   : > { %v2702_v25 = vmax.f32 %v2698_v21, %v6773_v11  ;;  %v6789_v27 = vsel %vm7765_vm14, -1e+30, %v6571_v19  ;;  %v2703_v63 = vmax.f32 %v2699_v40, %v6782_v1 }
 0x357   : > { %v2704_v28 = vmax.f32 %v2700_v23, %v6789_v27 }
 0x358   : > { %v2705_v31 = vmax.f32 %v2701_v48, %v2702_v25 }
 0x359   : > { %v2706_v34 = vmax.f32 %v2703_v63, %v2704_v28 }
 0x35b   : > { %v2707_v50 = vmax.f32 %v2705_v31, %v2706_v34 }
 0x35d   : > { %v2708_v51 = vrot.slane %v2707_v50, 4 }
 0x35f   : > { %v2709_v61 = vmax.f32 %v2707_v50, %v2708_v51 }
 0x361   : > { %v2710_v62 = vrot.slane %v2709_v61, 2 }
 0x363   : > { %v2711_v26 = vmax.f32 %v2709_v61, %v2710_v62 }
 0x365   : > { %v2712_v45 = vrot.slane %v2711_v26, 1 }
 0x367   : > { %v2713_v8 = vmax.f32 %v2711_v26, %v2712_v45 }
 0x369   : > { %vm2714_vm0 = vcmp.eq.f32.partialorder %v6661_v12, %v2713_v8  ;;  %vm2715_vm1 = vcmp.eq.f32.partialorder %v6667_v44, %v2713_v8  ;;  %vm2716_vm14 = vcmp.eq.f32.partialorder %v6673_v3, %v2713_v8  ;;  %vm2717_vm15 = vcmp.eq.f32.partialorder %v6681_v22, %v2713_v8 }
 0x36a   : > { %vm2718_vm9 = vcmp.eq.f32.partialorder %v6689_v30, %v2713_v8  ;;  %vm2720_vm6 = vcmp.eq.f32.partialorder %v6707_v32, %v2713_v8  ;;  %vm2721_vm5 = vcmp.eq.f32.partialorder %v6715_v47, %v2713_v8  ;;  %vm2722_vm4 = vcmp.eq.f32.partialorder %v6729_v16, %v2713_v8 }
 0x36b   : > { %vm2723_vm3 = vcmp.eq.f32.partialorder %v6737_v17, %v2713_v8  ;;  %vm2724_vm2 = vcmp.eq.f32.partialorder %v6746_v18, %v2713_v8  ;;  %vm2725_vm13 = vcmp.eq.f32.partialorder %v6753_v42, %v2713_v8  ;;  %vm2726_vm12 = vcmp.eq.f32.partialorder %v6765_v9, %v2713_v8 }
 0x36c   : > { %vm2727_vm11 = vcmp.eq.f32.partialorder %v6773_v11, %v2713_v8  ;;  %vm2728_vm10 = vcmp.eq.f32.partialorder %v6782_v1, %v2713_v8  ;;  %v2730_v19 = vsel %vm2714_vm0, %v5456_v35, 128.0  ;;  %v2731_v60 = vsel %vm2715_vm1, %v5458_v37, 128.0 }
 0x36d   : > { %v2732_v14 = vsel %vm2716_vm14, %v5460_v38, 128.0  ;;  %v2733_v24 = vsel %vm2717_vm15, %v5462_v39, 128.0  ;;  %v2734_v13 = vsel %vm2718_vm9, %v5464_v41, 128.0  ;;  %vm7845_vm8 = vcmp.eq.f32.partialorder %v6697_v20, %v2713_v8 }
 0x36e   : > { %v2735_v21 = vsel %vm7845_vm8, %v5466_v43, 128.0  ;;  %v2736_v40 = vsel %vm2720_vm6, %v5468_v53, 128.0  ;;  %v2737_v23 = vsel %vm2721_vm5, %v5470_v55, 128.0  ;;  %v2746_v48 = vmin.f32 %v2730_v19, %v2734_v13 }
 0x36f   : > { %v2747_v25 = vmin.f32 %v2731_v60, %v2735_v21  ;;  %v2748_v63 = vmin.f32 %v2732_v14, %v2736_v40  ;;  %v2749_v28 = vmin.f32 %v2733_v24, %v2737_v23  ;;  %v2738_v31 = vsel %vm2722_vm4, %v5472_v52, 128.0 }
 0x370   : > { %v2739_v34 = vsel %vm2723_vm3, %v5474_v56, 128.0  ;;  %v2740_v50 = vsel %vm2724_vm2, %v5476_v57, 128.0  ;;  %v2741_v51 = vsel %vm2725_vm13, %v5478_v58, 128.0  ;;  %v2750_v61 = vmin.f32 %v2746_v48, %v2738_v31 }
 0x371   : > { %v2751_v62 = vmin.f32 %v2747_v25, %v2739_v34  ;;  %v2752_v26 = vmin.f32 %v2748_v63, %v2740_v50  ;;  %v2753_v45 = vmin.f32 %v2749_v28, %v2741_v51  ;;  %v2742_v19 = vsel %vm2726_vm12, %v5504_v4, 128.0 }
 0x372   : > { %v2743_v60 = vsel %vm2727_vm11, %v5506_v5, 128.0  ;;  %v2744_v14 = vsel %vm2728_vm10, %v5508_v6, 128.0  ;;  %vm7846_vm2 = vcmp.eq.f32.partialorder %v6789_v27, %v2713_v8  ;;  %v2754_v13 = vmin.f32 %v2750_v61, %v2742_v19 }
 0x373   : > { %v2745_v24 = vsel %vm7846_vm2, %v5510_v7, 128.0  ;;  %v2755_v21 = vmin.f32 %v2751_v62, %v2743_v60  ;;  %v2756_v40 = vmin.f32 %v2752_v26, %v2744_v14 }
 0x374   : > { %v2757_v23 = vmin.f32 %v2753_v45, %v2745_v24 }
 0x375   : > { %v2758_v48 = vmin.f32 %v2754_v13, %v2755_v21 }
 0x376   : > { %v2759_v25 = vmin.f32 %v2756_v40, %v2757_v23 }
 0x378   : > { %v2760_v63 = vmin.f32 %v2758_v48, %v2759_v25 }
 0x37a   : > { %v2761_v28 = vrot.slane %v2760_v63, 4 }
 0x37c   : > { %v2762_v31 = vmin.f32 %v2760_v63, %v2761_v28 }
 0x37e   : > { %v2763_v34 = vrot.slane %v2762_v31, 2 }
 0x380   : > { %v2764_v50 = vmin.f32 %v2762_v31, %v2763_v34 }
 0x382   : > { %v2765_v51 = vrot.slane %v2764_v50, 1 }
 0x384   : > { %v6857_v54 = vmin.f32 %v2764_v50, %v2765_v51 }
 0x386   : > { %vm7795_vm10 = vcmp.eq.f32.partialorder %v5456_v35, %v6857_v54  ;;  %vm7794_vm11 = vcmp.eq.f32.partialorder %v5458_v37, %v6857_v54  ;;  %vm7793_vm12 = vcmp.eq.f32.partialorder %v5460_v38, %v6857_v54  ;;  %vm7792_vm13 = vcmp.eq.f32.partialorder %v5462_v39, %v6857_v54 }
 0x387   : > { %v6871_v8 = vsel %vm7795_vm10, -1e+30, %v6661_v12  ;;  %v6877_v61 = vsel %vm7794_vm11, -1e+30, %v6667_v44  ;;  %v6883_v62 = vsel %vm7793_vm12, -1e+30, %v6673_v3  ;;  %vm7791_vm3 = vcmp.eq.f32.partialorder %v5464_v41, %v6857_v54 }
 0x388   : > { %v6891_v12 = vsel %vm7792_vm13, -1e+30, %v6681_v22  ;;  %vm7790_vm4 = vcmp.eq.f32.partialorder %v5466_v43, %v6857_v54  ;;  %v6899_v44 = vsel %vm7791_vm3, -1e+30, %v6689_v30  ;;  %vm7789_vm5 = vcmp.eq.f32.partialorder %v5468_v53, %v6857_v54 }
 0x389   : > { %v6907_v3 = vsel %vm7790_vm4, -1e+30, %v6697_v20  ;;  %v2993_v22 = vmax.f32 %v6871_v8, %v6899_v44  ;;  %vm7788_vm6 = vcmp.eq.f32.partialorder %v5470_v55, %v6857_v54  ;;  %v2789_v30 = vsel %vm7789_vm5, -1e+30, %v6707_v32 }
 0x38a   : > { %v2994_v26 = vmax.f32 %v6877_v61, %v6907_v3  ;;  %v2790_v20 = vsel %vm7788_vm6, -1e+30, %v6715_v47  ;;  %v2995_v45 = vmax.f32 %v6883_v62, %v2789_v30  ;;  %vm7787_vm8 = vcmp.eq.f32.partialorder %v5472_v52, %v6857_v54 }
 0x38b   : > { %v2996_v19 = vmax.f32 %v6891_v12, %v2790_v20  ;;  %vm7786_vm9 = vcmp.eq.f32.partialorder %v5474_v56, %v6857_v54  ;;  %v2791_v32 = vsel %vm7787_vm8, -1e+30, %v6729_v16  ;;  %vm7784_vm14 = vcmp.eq.f32.partialorder %v5476_v57, %v6857_v54 }
 0x38c   : > { %v2792_v47 = vsel %vm7786_vm9, -1e+30, %v6737_v17  ;;  %v2997_v60 = vmax.f32 %v2993_v22, %v2791_v32  ;;  %vm7780_vm15 = vcmp.eq.f32.partialorder %v5478_v58, %v6857_v54  ;;  %v2793_v14 = vsel %vm7784_vm14, -1e+30, %v6746_v18 }
 0x38d   : > { %v2998_v24 = vmax.f32 %v2994_v26, %v2792_v47  ;;  %v2794_v16 = vsel %vm7780_vm15, -1e+30, %v6753_v42  ;;  %v2999_v13 = vmax.f32 %v2995_v45, %v2793_v14  ;;  %vm7783_vm1 = vcmp.eq.f32.partialorder %v5504_v4, %v6857_v54 }
 0x38e   : > { %v3000_v17 = vmax.f32 %v2996_v19, %v2794_v16  ;;  %vm7781_vm0 = vcmp.eq.f32.partialorder %v5506_v5, %v6857_v54  ;;  %v2795_v21 = vsel %vm7783_vm1, -1e+30, %v6765_v9  ;;  %vm7782_vm2 = vcmp.eq.f32.partialorder %v5508_v6, %v6857_v54 }
 0x38f   : > { %v2796_v18 = vsel %vm7781_vm0, -1e+30, %v6773_v11  ;;  %v3001_v42 = vmax.f32 %v2997_v60, %v2795_v21  ;;  %vm7785_vm15 = vcmp.eq.f32.partialorder %v5510_v7, %v6857_v54  ;;  %v2797_v40 = vsel %vm7782_vm2, -1e+30, %v6782_v1 }
 0x390   : > { %v3002_v23 = vmax.f32 %v2998_v24, %v2796_v18  ;;  %v2798_v9 = vsel %vm7785_vm15, -1e+30, %v6789_v27  ;;  %v3003_v48 = vmax.f32 %v2999_v13, %v2797_v40 }
 0x391   : > { %v3004_v25 = vmax.f32 %v3000_v17, %v2798_v9 }
 0x392   : > { %v3005_v63 = vmax.f32 %v3001_v42, %v3002_v23 }
 0x393   : > { %v3006_v28 = vmax.f32 %v3003_v48, %v3004_v25 }
 0x395   : > { %v3007_v11 = vmax.f32 %v3005_v63, %v3006_v28 }
 0x397   : > { %v3008_v31 = vrot.slane %v3007_v11, 4 }
 0x399   : > { %v3009_v34 = vmax.f32 %v3007_v11, %v3008_v31 }
 0x39b   : > { %v3010_v50 = vrot.slane %v3009_v34, 2 }
 0x39d   : > { %v3011_v51 = vmax.f32 %v3009_v34, %v3010_v50 }
 0x39f   : > { %v3012_v22 = vrot.slane %v3011_v51, 1 }
 0x3a1   : > { %v3013_v26 = vmax.f32 %v3011_v51, %v3012_v22  ;;  %v824_v22 = vld [vmem:[#allocation14] sm:$0xff] }
 0x3a2   : > { %1131 = vperm.xlu1 %4577, %v824_v22  }
 0x3a3   : > { %vm3016_vm1 = vcmp.eq.f32.partialorder %v6883_v62, %v3013_v26  ;;  %vm3018_vm15 = vcmp.eq.f32.partialorder %v6899_v44, %v3013_v26  ;;  %vm3019_vm9 = vcmp.eq.f32.partialorder %v6907_v3, %v3013_v26  ;;  %vm3020_vm8 = vcmp.eq.f32.partialorder %v2789_v30, %v3013_v26 }
 0x3a4   : > { %vm3021_vm6 = vcmp.eq.f32.partialorder %v2790_v20, %v3013_v26  ;;  %vm3022_vm5 = vcmp.eq.f32.partialorder %v2791_v32, %v3013_v26  ;;  %vm3023_vm4 = vcmp.eq.f32.partialorder %v2792_v47, %v3013_v26  ;;  %vm3025_vm13 = vcmp.eq.f32.partialorder %v2794_v16, %v3013_v26 }
 0x3a5   : > { %vm3026_vm12 = vcmp.eq.f32.partialorder %v2795_v21, %v3013_v26  ;;  %vm3027_vm11 = vcmp.eq.f32.partialorder %v2796_v18, %v3013_v26  ;;  %vm3028_vm10 = vcmp.eq.f32.partialorder %v2797_v40, %v3013_v26  ;;  %vm3029_vm0 = vcmp.eq.f32.partialorder %v2798_v9, %v3013_v26  ;;  %v830_v21 = vpop.permute.xlu0 %829 }
 0x3a6   : > { %vm7847_vm2 = vcmp.eq.f32.partialorder %v6871_v8, %v3013_v26  ;;  %vm7848_vm14 = vcmp.eq.f32.partialorder %v6877_v61, %v3013_v26  ;;  %v3032_v45 = vsel %vm3016_vm1, %v5460_v38, 128.0  ;;  %vm7849_vm3 = vcmp.eq.f32.partialorder %v6891_v12, %v3013_v26 }
 0x3a7   : > { %v3030_v1 = vsel %vm7847_vm2, %v5456_v35, 128.0  ;;  %v3031_v27 = vsel %vm7848_vm14, %v5458_v37, 128.0  ;;  %v3033_v19 = vsel %vm7849_vm3, %v5462_v39, 128.0  ;;  %v3034_v60 = vsel %vm3018_vm15, %v5464_v41, 128.0 }
 0x3a8   : > { %v3035_v8 = vsel %vm3019_vm9, %v5466_v43, 128.0  ;;  %v3036_v61 = vsel %vm3020_vm8, %v5468_v53, 128.0  ;;  %v3037_v24 = vsel %vm3021_vm6, %v5470_v55, 128.0  ;;  %v3046_v62 = vmin.f32 %v3030_v1, %v3034_v60 }
 0x3a9   : > { %v3047_v13 = vmin.f32 %v3031_v27, %v3035_v8  ;;  %v3048_v17 = vmin.f32 %v3032_v45, %v3036_v61  ;;  %v3049_v42 = vmin.f32 %v3033_v19, %v3037_v24  ;;  %v3038_v12 = vsel %vm3022_vm5, %v5472_v52, 128.0 }
 0x3aa   : > { %v3039_v44 = vsel %vm3023_vm4, %v5474_v56, 128.0  ;;  %vm7850_vm3 = vcmp.eq.f32.partialorder %v2793_v14, %v3013_v26  ;;  %v3041_v30 = vsel %vm3025_vm13, %v5478_v58, 128.0  ;;  %v3050_v23 = vmin.f32 %v3046_v62, %v3038_v12 }
 0x3ab   : > { %v3040_v3 = vsel %vm7850_vm3, %v5476_v57, 128.0  ;;  %v3051_v48 = vmin.f32 %v3047_v13, %v3039_v44  ;;  %v3053_v25 = vmin.f32 %v3049_v42, %v3041_v30  ;;  %v3042_v63 = vsel %vm3026_vm12, %v5504_v4, 128.0  ;;  %v7027_v30 = vld [vmem:[#allocation13] sm:$0xf] }
 0x3ac   : > { %v3052_v20 = vmin.f32 %v3048_v17, %v3040_v3  ;;  %v3043_v32 = vsel %vm3027_vm11, %v5506_v5, 128.0  ;;  %v3044_v47 = vsel %vm3028_vm10, %v5508_v6, 128.0  ;;  %v3045_v14 = vsel %vm3029_vm0, %v5510_v7, 128.0 }
 0x3ad   : > { %v3054_v28 = vmin.f32 %v3050_v23, %v3042_v63  ;;  %v3055_v11 = vmin.f32 %v3051_v48, %v3043_v32  ;;  %v3057_v31 = vmin.f32 %v3053_v25, %v3045_v14  ;;  %v7020_v18 = vadd.f32 %v6123_v29, %v830_v21  ;;  %v7099_v48 = vld [vmem:[%s5320_s17] sm:$0x3] }
 0x3ae   : > { %v3056_v16 = vmin.f32 %v3052_v20, %v3044_v47  ;;  %vm1138_vm10 = vcmask 1042432   ;;  %v4960_v13 = vmov 65535   ;;  %vm7851_vm11 = vcmask 1041408  }
 0x3af   : > { %v3058_v34 = vmin.f32 %v3054_v28, %v3055_v11  ;;  %v1139_v17 = vsel %vm7851_vm11, 4294967295, %v4960_v13  ;;  %vm1134_vm12 = vcmask 39936   ;;  %vm7852_vm13 = vcmp.eq.f32.partialorder %v5456_v35, %v5793_v2 }
 0x3b0   : > { %v3059_v50 = vmin.f32 %v3056_v16, %v3057_v31  ;;  %v7024_v12 = vsel %vm1138_vm10, %v1139_v17, 0  ;;  %vm7853_vm4 = vcmp.eq.f32.partialorder %v5458_v37, %v5793_v2  ;;  %v7854_v23 = vmov 0.0  }
 0x3b1   : > { %vm4278_vm5 = vmpackc.low %vm7853_vm4, %vm7852_vm13  ;;  %vm7855_vm6 = vcmp.eq.f32.partialorder %v5460_v38, %v5793_v2  ;;  %vm7856_vm8 = vcmp.eq.f32.partialorder %v5462_v39, %v5793_v2  ;;  %vm7857_vm14 = vcmp.eq.f32.partialorder %v5464_v41, %v5793_v2  ;;  %vm7858_vm15 = vcmp.eq.f32.partialorder %v5466_v43, %v5793_v2 }
 0x3b2   : > { %v7017_v51 = vmin.f32 %v3058_v34, %v3059_v50  ;;  %vm4281_vm9 = vmpackc.low %vm7856_vm8, %vm7855_vm6  ;;  %vm7859_vm0 = vcmp.eq.f32.partialorder %v5468_v53, %v5793_v2  ;;  %vm7860_vm2 = vcmp.eq.f32.partialorder %v5470_v55, %v5793_v2  ;;  %vm7861_vm10 = vcmp.eq.f32.partialorder %v5472_v52, %v5793_v2 }
 0x3b3   : > { %vm4284_vm1 = vmpackc.low %vm7858_vm15, %vm7857_vm14  ;;  %vm7862_vm11 = vcmp.eq.f32.partialorder %v5474_v56, %v5793_v2  ;;  %vm7863_vm4 = vcmp.eq.f32.partialorder %v5476_v57, %v5793_v2  ;;  %vm7865_vm8 = vcmp.eq.f32.partialorder %v5504_v4, %v5793_v2  ;;  %vm7867_vm15 = vcmp.eq.f32.partialorder %v5508_v6, %v5793_v2 }
 0x3b4   : > { %vm4287_vm3 = vmpackc.low %vm7860_vm2, %vm7859_vm0  ;;  %vm7869_vm2 = vcmask 1040384  }
 0x3b5   : > { %vm4290_vm13 = vmpackc.low %vm7862_vm11, %vm7861_vm10  ;;  %vm7871_vm10 = vcmp.eq.f32.partialorder %v5456_v35, %v6003_v15  ;;  %vm7872_vm11 = vcmp.eq.f32.partialorder %v5458_v37, %v6003_v15 }
 0x3f9   : > { %v1113_v1 = vpop.f32.mrb[4].mxu1 }
 0x3fa   : > { %v1114_v40 = vadd.f32 %v1113_v1, %v7020_v18  ;;  %v3916_v27 = vpop.f32.mrb[5].mxu1 }
 0x3fb   : > { %v1116_v9 = vpop.f32.mrb[6].mxu1 }
 0x3fc   : > { %v1119_v26 = vmul.f32 %v1114_v40, %v1114_v40  ;;  %v3917_v45 = vpop.f32.mrb[7].mxu1 }
 0x3fe   : > { %v1120_v19 = vmul.f32 %v1119_v26, %v1114_v40 }
 0x400   : > { %v1121_v60 = vmul.f32 0.044715, %v1120_v19 }
 0x402   : > { %v1122_v8 = vadd.f32 %v1121_v60, %v1114_v40 }
 0x404   : > { %v1123_v61 = vmul.f32 0.7978846, %v1122_v8 }
 0x406   : > { %4578 = vtanh.f32 %v1123_v61 }
 0x410   : > { %v4579_v24 = vpop.eup %4578 }
 0x411   : > { %v1125_v62 = vadd.f32 1.0, %v4579_v24 }
 0x413   : > { %v1126_v29 = vmul.f32 0.5, %v1125_v62 }
 0x415   : > { %v1127_v42 = vmul.f32 %v1126_v29, %v1114_v40 }
 0x417   : > { %v1128_v44 = vpack.c.bf16 %v1127_v42, %v1127_v42 }
 0x419   : > { %v1142_v3 = vand.u32 %v7024_v12, %v1128_v44 }
 0x41b   : > { %3919 = vmatpush3.bf16.msra.mxu1 %v1142_v3 }
 0x41c   : > { %4277 = vmatprep.subr.bf16.mxu1 %v4955_v49 }
 0x41e   : > { %3921 = vmatmul.mubr.msk.bf16.vlgmr.msra.gmra.mrb[8].mxu1 %vm1134_vm12, %v7027_v30 }
 0x41f   : > { %4279 = vmatpush3.bf16.msk.msra.mxu1 %vm4278_vm5, %v4958_v10  ;;  %3956 = vmatprep.mubr.msk.f32.mxu1 %vm7834_vm7, %v7854_v23  ;;  %vm7864_vm5 = vcmp.eq.f32.partialorder %v5478_v58, %v5793_v2 }
 0x420   : > { %4280 = vmatprep.subr.bf16.mxu1 %v4955_v49  ;;  %vm4293_vm6 = vmpackc.low %vm7864_vm5, %vm7863_vm4  ;;  %vm7873_vm4 = vcmp.eq.f32.partialorder %v5460_v38, %v6003_v15  ;;  %vm7874_vm5 = vcmp.eq.f32.partialorder %v5462_v39, %v6003_v15 }
 0x421   : > { %v7185_v24 = vpop.permute.xlu1 %1131 }
 0x423   : > { %4282 = vmatpush3.bf16.msk.msra.mxu1 %vm4281_vm9, %v4958_v10  ;;  %vm7866_vm9 = vcmp.eq.f32.partialorder %v5506_v5, %v5793_v2 }
 0x424   : > { %4283 = vmatprep.subr.bf16.mxu1 %v4955_v49  ;;  %vm4296_vm14 = vmpackc.low %vm7866_vm9, %vm7865_vm8  ;;  %vm7875_vm8 = vcmp.eq.f32.partialorder %v5464_v41, %v6003_v15  ;;  %vm7876_vm9 = vcmp.eq.f32.partialorder %v5466_v43, %v6003_v15 }
 0x427   : > { %4285 = vmatpush3.bf16.msk.msra.mxu1 %vm4284_vm1, %v4958_v10  ;;  %vm7868_vm1 = vcmp.eq.f32.partialorder %v5510_v7, %v5793_v2 }
 0x428   : > { %4286 = vmatprep.subr.bf16.mxu1 %v4955_v49  ;;  %vm4299_vm0 = vmpackc.low %vm7868_vm1, %vm7867_vm15  ;;  %vm7877_vm15 = vcmp.eq.f32.partialorder %v5468_v53, %v6003_v15  ;;  %vm7878_vm1 = vcmp.eq.f32.partialorder %v5470_v55, %v6003_v15 }
 0x42b   : > { %4288 = vmatpush3.bf16.msk.msra.mxu1 %vm4287_vm3, %v4958_v10  ;;  %vm7870_vm3 = vcmask 15360  }
 0x42c   : > { %4289 = vmatprep.subr.bf16.mxu1 %v4955_v49 }
 0x42f   : > { %4291 = vmatpush3.bf16.msk.msra.mxu1 %vm4290_vm13, %v4958_v10  ;;  %vm4302_vm13 = vmpackc.low %vm7872_vm11, %vm7871_vm10  ;;  %vm7881_vm11 = vcmp.eq.f32.partialorder %v5476_v57, %v6003_v15 }
 0x430   : > { %4292 = vmatprep.subr.bf16.mxu1 %v4955_v49 }
 0x433   : > { %4294 = vmatpush3.bf16.msk.msra.mxu1 %vm4293_vm6, %v4958_v10  ;;  %vm4305_vm6 = vmpackc.low %vm7874_vm5, %vm7873_vm4  ;;  %vm7883_vm5 = vcmp.eq.f32.partialorder %v5504_v4, %v6003_v15 }
 0x434   : > { %4295 = vmatprep.subr.bf16.mxu1 %v4955_v49 }
 0x437   : > { %4297 = vmatpush3.bf16.msk.msra.mxu1 %vm4296_vm14, %v4958_v10  ;;  %vm4308_vm14 = vmpackc.low %vm7876_vm9, %vm7875_vm8  ;;  %vm7885_vm9 = vcmp.eq.f32.partialorder %v5508_v6, %v6003_v15 }
 0x438   : > { %4298 = vmatprep.subr.bf16.mxu1 %v4955_v49 }
 0x43b   : > { %4300 = vmatpush3.bf16.msk.msra.mxu1 %vm4299_vm0, %v4958_v10  ;;  %vm4311_vm0 = vmpackc.low %vm7878_vm1, %vm7877_vm15  ;;  %vm7887_vm1 = vcmask 1040384  }
 0x43c   : > { %4006 = vmatprep.subr.bf16.mxu1 %v7854_v23 }
 0x43e   : > { %3957 = vmatmul.mubr.f32.vlgmr.msra.gmra.mrb[12].mxu1 %v7099_v48 }
 0x43f   : > { %4008 = vmatprep.mubr.msk.bf16.mxu1 %vm7834_vm7, %v7854_v23 }
 0x4f1   : > { %v1178_v20 = vpop.f32.mrb[8].mxu1 }
 0x4f2   : > { %v3922_v25 = vpop.f32.mrb[9].mxu1  ;;  %v1179_v62 = vadd.f32 %v1178_v20, %v7185_v24 }
 0x4f3   : > { %v1181_v63 = vpop.f32.mrb[10].mxu1 }
 0x4f4   : > { %v3923_v32 = vpop.f32.mrb[11].mxu1  ;;  %v1184_v13 = vmul.f32 %v1179_v62, %v1179_v62 }
 0x4f6   : > { %v1185_v17 = vmul.f32 %v1184_v13, %v1179_v62 }
 0x4f8   : > { %v1186_v29 = vmul.f32 0.044715, %v1185_v17 }
 0x4fa   : > { %v1187_v42 = vadd.f32 %v1186_v29, %v1179_v62 }
 0x4fc   : > { %v1188_v63 = vmul.f32 0.7978846, %v1187_v42 }
 0x511   : > { %v1381_v47 = vpop.f32.mrb[12].mxu1 }
 0x512   : > { %v1385_v14 = vsub.f32 %v1381_v47, %v6537_v59  ;;  %v3958_v2 = vpop.f32.mrb[13].mxu1 }
 0x514   : > { %v1386_v28 = vpack.c.bf16 %v1385_v14, %v1385_v14 }
 0x516   : > { %v1388_v11 = vsel %vm7869_vm2, %v1386_v28, 0  ;;  %vm7879_vm2 = vcmp.eq.f32.partialorder %v5472_v52, %v6003_v15 }
 0x517   : > { %3960 = vmatpush3.bf16.msra.mxu0 %v1388_v11 }
 0x518   : > { %3965 = vmatprep.subr.bf16.mxu0 %v7854_v23 }
 0x51a   : > { %3962 = vmatmul.mubr.msk.bf16.vlgmr.msra.gmra.mrb[20].mxu0 %vm7870_vm3, %v6576_v0  ;;  %vm7880_vm3 = vcmp.eq.f32.partialorder %v5474_v56, %v6003_v15 }
 0x51b   : > { %3967 = vmatprep.mubr.msk.bf16.mxu0 %vm7834_vm7, %v7854_v23  ;;  %vm4314_vm10 = vmpackc.low %vm7880_vm3, %vm7879_vm2  ;;  %vm7889_vm2 = vcmp.eq.f32.partialorder %v5456_v35, %v6215_v33  ;;  %vm7890_vm3 = vcmp.eq.f32.partialorder %v5458_v37, %v6215_v33 }
 0x5ed   : > { %v1424_v16 = vpop.f32.mrb[20].mxu0 }
 0x5ee   : > { %v1425_v31 = vadd.f32 %v1424_v16, %v7020_v18  ;;  %v3963_v34 = vpop.f32.mrb[21].mxu0 }
 0x5ef   : > { %v1427_v50 = vpop.f32.mrb[22].mxu0 }
 0x5f0   : > { %v1430_v22 = vmul.f32 %v1425_v31, %v1425_v31  ;;  %v3964_v21 = vpop.f32.mrb[23].mxu0 }
 0x5f2   : > { %v1431_v1 = vmul.f32 %v1430_v22, %v1425_v31 }
 0x5f4   : > { %v1432_v40 = vmul.f32 0.044715, %v1431_v1 }
 0x5f6   : > { %v1433_v27 = vadd.f32 %v1432_v40, %v1425_v31 }
 0x5f8   : > { %v1434_v9 = vmul.f32 0.7978846, %v1433_v27 }
 0x5fa   : > { %4580 = vtanh.f32 %v1434_v9 }
 0x5fb   : > { %4582 = vtanh.f32 %v1188_v63 }
 0x604   : > { %v4581_v26 = vpop.eup %4580 }
 0x605   : > { %v1436_v45 = vadd.f32 1.0, %v4581_v26  ;;  %v4583_v16 = vpop.eup %4582 }
 0x606   : > { %v1190_v20 = vadd.f32 1.0, %v4583_v16 }
 0x607   : > { %v1437_v19 = vmul.f32 0.5, %v1436_v45 }
 0x608   : > { %v1191_v34 = vmul.f32 0.5, %v1190_v20 }
 0x609   : > { %v1438_v60 = vmul.f32 %v1437_v19, %v1425_v31 }
 0x60a   : > { %v7189_v21 = vmul.f32 %v1191_v34, %v1179_v62 }
 0x60b   : > { %v1439_v8 = vpack.c.bf16 %v1438_v60, %v1438_v60 }
 0x60d   : > { %v1441_v61 = vand.u32 %v1439_v8, %v7024_v12 }
 0x60f   : > { %3966 = vmatpush3.bf16.msra.mxu0 %v1441_v61 }
 0x610   : > { %4301 = vmatprep.subr.bf16.mxu0 %v4955_v49 }
 0x612   : > { %3968 = vmatmul.mubr.msk.bf16.vlgmr.msra.gmra.mrb[24].mxu0 %vm1134_vm12, %v7027_v30 }
 0x613   : > { %4303 = vmatpush3.bf16.msk.msra.mxu0 %vm4302_vm13, %v4958_v10  ;;  %4003 = vmatprep.mubr.msk.f32.mxu0 %vm7834_vm7, %v7854_v23  ;;  %vm7882_vm13 = vcmp.eq.f32.partialorder %v5478_v58, %v6003_v15 }
 0x614   : > { %4304 = vmatprep.subr.bf16.mxu0 %v4955_v49  ;;  %vm4317_vm4 = vmpackc.low %vm7882_vm13, %vm7881_vm11  ;;  %vm7891_vm11 = vcmp.eq.f32.partialorder %v5460_v38, %v6215_v33  ;;  %vm7892_vm13 = vcmp.eq.f32.partialorder %v5462_v39, %v6215_v33 }
 0x617   : > { %4306 = vmatpush3.bf16.msk.msra.mxu0 %vm4305_vm6, %v4958_v10  ;;  %vm7884_vm6 = vcmp.eq.f32.partialorder %v5506_v5, %v6003_v15 }
 0x618   : > { %4307 = vmatprep.subr.bf16.mxu0 %v4955_v49  ;;  %vm4320_vm8 = vmpackc.low %vm7884_vm6, %vm7883_vm5  ;;  %vm7893_vm5 = vcmp.eq.f32.partialorder %v5464_v41, %v6215_v33  ;;  %vm7894_vm6 = vcmp.eq.f32.partialorder %v5466_v43, %v6215_v33 }
 0x61b   : > { %4309 = vmatpush3.bf16.msk.msra.mxu0 %vm4308_vm14, %v4958_v10  ;;  %vm7886_vm14 = vcmp.eq.f32.partialorder %v5510_v7, %v6003_v15 }
 0x61c   : > { %4310 = vmatprep.subr.bf16.mxu0 %v4955_v49  ;;  %vm4323_vm15 = vmpackc.low %vm7886_vm14, %vm7885_vm9  ;;  %vm7895_vm9 = vcmp.eq.f32.partialorder %v5468_v53, %v6215_v33  ;;  %vm7896_vm14 = vcmp.eq.f32.partialorder %v5470_v55, %v6215_v33 }
 0x61f   : > { %4312 = vmatpush3.bf16.msk.msra.mxu0 %vm4311_vm0, %v4958_v10  ;;  %vm7888_vm0 = vcmask 15360  }
 0x620   : > { %4313 = vmatprep.subr.bf16.mxu0 %v4955_v49 }
 0x623   : > { %4315 = vmatpush3.bf16.msk.msra.mxu0 %vm4314_vm10, %v4958_v10  ;;  %vm4326_vm10 = vmpackc.low %vm7890_vm3, %vm7889_vm2  ;;  %vm7899_vm3 = vcmp.eq.f32.partialorder %v5476_v57, %v6215_v33 }
 0x624   : > { %4316 = vmatprep.subr.bf16.mxu0 %v4955_v49 }
 0x627   : > { %4318 = vmatpush3.bf16.msk.msra.mxu0 %vm4317_vm4, %v4958_v10  ;;  %vm4329_vm4 = vmpackc.low %vm7892_vm13, %vm7891_vm11  ;;  %vm7901_vm13 = vcmp.eq.f32.partialorder %v5504_v4, %v6215_v33 }
 0x628   : > { %4319 = vmatprep.subr.bf16.mxu0 %v4955_v49 }
 0x62b   : > { %4321 = vmatpush3.bf16.msk.msra.mxu0 %vm4320_vm8, %v4958_v10  ;;  %vm4332_vm8 = vmpackc.low %vm7894_vm6, %vm7893_vm5  ;;  %vm7903_vm6 = vcmp.eq.f32.partialorder %v5508_v6, %v6215_v33 }
 0x62c   : > { %4322 = vmatprep.subr.bf16.mxu0 %v4955_v49 }
 0x62f   : > { %4324 = vmatpush3.bf16.msk.msra.mxu0 %vm4323_vm15, %v4958_v10  ;;  %vm4335_vm15 = vmpackc.low %vm7896_vm14, %vm7895_vm9  ;;  %vm7905_vm14 = vcmask 1040384  }
 0x630   : > { %4053 = vmatprep.subr.bf16.mxu0 %v7854_v23 }
 0x632   : > { %4004 = vmatmul.mubr.f32.vlgmr.msra.gmra.mrb[18].mxu0 %v7099_v48 }
 0x633   : > { %4055 = vmatprep.mubr.msk.bf16.mxu0 %vm7834_vm7, %v7854_v23 }
 0x6e5   : > { %v1477_v44 = vpop.f32.mrb[24].mxu0 }
 0x6e6   : > { %v1478_v15 = vadd.f32 %v1477_v44, %v7185_v24  ;;  %v3969_v3 = vpop.f32.mrb[25].mxu0 }
 0x6e7   : > { %v1480_v25 = vpop.f32.mrb[26].mxu0 }
 0x6e8   : > { %v1483_v32 = vmul.f32 %v1478_v15, %v1478_v15  ;;  %v3970_v47 = vpop.f32.mrb[27].mxu0 }
 0x6ea   : > { %v1484_v14 = vmul.f32 %v1483_v32, %v1478_v15 }
 0x6ec   : > { %v1485_v2 = vmul.f32 0.044715, %v1484_v14 }
 0x6ee   : > { %v1486_v28 = vadd.f32 %v1485_v2, %v1478_v15 }
 0x6f0   : > { %v1487_v11 = vmul.f32 0.7978846, %v1486_v28 }
 0x6f2   : > { %4584 = vtanh.f32 %v1487_v11 }
 0x6fc   : > { %v4585_v31 = vpop.eup %4584 }
 0x6fd   : > { %v1489_v50 = vadd.f32 1.0, %v4585_v31 }
 0x6ff   : > { %v1490_v22 = vmul.f32 0.5, %v1489_v50 }
 0x701   : > { %v7191_v1 = vmul.f32 %v1490_v22, %v1478_v15 }
 0x703   : > { %v1492_v40 = vmax.f32 %v7189_v21, %v7191_v1 }
 0x705   : > { %v1681_v27 = vpop.f32.mrb[18].mxu0 }
 0x706   : > { %v1685_v9 = vsub.f32 %v1681_v27, %v6537_v59  ;;  %v4005_v26 = vpop.f32.mrb[19].mxu0 }
 0x708   : > { %v1686_v45 = vpack.c.bf16 %v1685_v9, %v1685_v9 }
 0x70a   : > { %v1688_v19 = vsel %vm7887_vm1, %v1686_v45, 0  ;;  %vm7897_vm1 = vcmp.eq.f32.partialorder %v5472_v52, %v6215_v33 }
 0x70b   : > { %4007 = vmatpush3.bf16.msra.mxu1 %v1688_v19 }
 0x70c   : > { %4012 = vmatprep.subr.bf16.mxu1 %v7854_v23 }
 0x70e   : > { %4009 = vmatmul.mubr.msk.bf16.vlgmr.msra.gmra.mrb[16].mxu1 %vm7888_vm0, %v6576_v0  ;;  %vm7898_vm0 = vcmp.eq.f32.partialorder %v5474_v56, %v6215_v33 }
 0x70f   : > { %4014 = vmatprep.mubr.msk.bf16.mxu1 %vm7834_vm7, %v7854_v23  ;;  %vm4338_vm2 = vmpackc.low %vm7898_vm0, %vm7897_vm1  ;;  %vm7907_vm1 = vcmp.eq.f32.partialorder %v5456_v35, %v6425_v46  ;;  %vm7908_vm0 = vcmp.eq.f32.partialorder %v5458_v37, %v6425_v46 }
 0x7e1   : > { %v1724_v60 = vpop.f32.mrb[16].mxu1 }
 0x7e2   : > { %v1725_v8 = vadd.f32 %v1724_v60, %v7020_v18  ;;  %v4010_v61 = vpop.f32.mrb[17].mxu1 }
 0x7e3   : > { %v1727_v62 = vpop.f32.mrb[18].mxu1 }
 0x7e4   : > { %v1730_v13 = vmul.f32 %v1725_v8, %v1725_v8  ;;  %v4011_v17 = vpop.f32.mrb[19].mxu1 }
 0x7e6   : > { %v1731_v29 = vmul.f32 %v1730_v13, %v1725_v8 }
 0x7e8   : > { %v1732_v42 = vmul.f32 0.044715, %v1731_v29 }
 0x7ea   : > { %v1733_v44 = vadd.f32 %v1732_v42, %v1725_v8 }
 0x7ec   : > { %v1734_v15 = vmul.f32 0.7978846, %v1733_v44 }
 0x7ee   : > { %4586 = vtanh.f32 %v1734_v15 }
 0x7f8   : > { %v4587_v3 = vpop.eup %4586 }
 0x7f9   : > { %v1736_v25 = vadd.f32 1.0, %v4587_v3 }
 0x7fb   : > { %v1737_v63 = vmul.f32 0.5, %v1736_v25 }
 0x7fd   : > { %v1738_v32 = vmul.f32 %v1737_v63, %v1725_v8 }
 0x7ff   : > { %v1739_v47 = vpack.c.bf16 %v1738_v32, %v1738_v32 }
 0x801   : > { %v1741_v14 = vand.u32 %v1739_v47, %v7024_v12 }
 0x803   : > { %4013 = vmatpush3.bf16.msra.mxu1 %v1741_v14 }
 0x804   : > { %4325 = vmatprep.subr.bf16.mxu1 %v4955_v49 }
 0x806   : > { %4015 = vmatmul.mubr.msk.bf16.vlgmr.msra.gmra.mrb[20].mxu1 %vm1134_vm12, %v7027_v30 }
 0x807   : > { %4327 = vmatpush3.bf16.msk.msra.mxu1 %vm4326_vm10, %v4958_v10  ;;  %4050 = vmatprep.mubr.msk.f32.mxu1 %vm7834_vm7, %v7854_v23  ;;  %vm7900_vm10 = vcmp.eq.f32.partialorder %v5478_v58, %v6215_v33 }
 0x808   : > { %4328 = vmatprep.subr.bf16.mxu1 %v4955_v49  ;;  %vm4341_vm11 = vmpackc.low %vm7900_vm10, %vm7899_vm3  ;;  %vm7909_vm3 = vcmp.eq.f32.partialorder %v5460_v38, %v6425_v46  ;;  %vm7910_vm10 = vcmp.eq.f32.partialorder %v5462_v39, %v6425_v46 }
 0x80b   : > { %4330 = vmatpush3.bf16.msk.msra.mxu1 %vm4329_vm4, %v4958_v10  ;;  %vm7902_vm4 = vcmp.eq.f32.partialorder %v5506_v5, %v6215_v33 }
 0x80c   : > { %4331 = vmatprep.subr.bf16.mxu1 %v4955_v49  ;;  %vm4344_vm5 = vmpackc.low %vm7902_vm4, %vm7901_vm13  ;;  %vm7911_vm13 = vcmp.eq.f32.partialorder %v5464_v41, %v6425_v46  ;;  %vm7912_vm4 = vcmp.eq.f32.partialorder %v5466_v43, %v6425_v46 }
 0x80f   : > { %4333 = vmatpush3.bf16.msk.msra.mxu1 %vm4332_vm8, %v4958_v10  ;;  %vm7904_vm8 = vcmp.eq.f32.partialorder %v5510_v7, %v6215_v33 }
 0x810   : > { %4334 = vmatprep.subr.bf16.mxu1 %v4955_v49  ;;  %vm4347_vm9 = vmpackc.low %vm7904_vm8, %vm7903_vm6  ;;  %vm7913_vm6 = vcmp.eq.f32.partialorder %v5468_v53, %v6425_v46  ;;  %vm7914_vm8 = vcmp.eq.f32.partialorder %v5470_v55, %v6425_v46 }
 0x813   : > { %4336 = vmatpush3.bf16.msk.msra.mxu1 %vm4335_vm15, %v4958_v10  ;;  %vm7906_vm15 = vcmask 15360  }
 0x814   : > { %4337 = vmatprep.subr.bf16.mxu1 %v4955_v49 }
 0x817   : > { %4339 = vmatpush3.bf16.msk.msra.mxu1 %vm4338_vm2, %v4958_v10  ;;  %vm4350_vm2 = vmpackc.low %vm7908_vm0, %vm7907_vm1  ;;  %vm7917_vm0 = vcmp.eq.f32.partialorder %v5476_v57, %v6425_v46 }
 0x818   : > { %4340 = vmatprep.subr.bf16.mxu1 %v4955_v49 }
 0x81b   : > { %4342 = vmatpush3.bf16.msk.msra.mxu1 %vm4341_vm11, %v4958_v10  ;;  %vm4353_vm11 = vmpackc.low %vm7910_vm10, %vm7909_vm3  ;;  %vm7919_vm10 = vcmp.eq.f32.partialorder %v5504_v4, %v6425_v46 }
 0x81c   : > { %4343 = vmatprep.subr.bf16.mxu1 %v4955_v49 }
 0x81f   : > { %4345 = vmatpush3.bf16.msk.msra.mxu1 %vm4344_vm5, %v4958_v10  ;;  %vm4356_vm5 = vmpackc.low %vm7912_vm4, %vm7911_vm13  ;;  %vm7921_vm4 = vcmp.eq.f32.partialorder %v5508_v6, %v6425_v46 }
 0x820   : > { %4346 = vmatprep.subr.bf16.mxu1 %v4955_v49 }
 0x823   : > { %4348 = vmatpush3.bf16.msk.msra.mxu1 %vm4347_vm9, %v4958_v10  ;;  %vm4359_vm9 = vmpackc.low %vm7914_vm8, %vm7913_vm6  ;;  %vm7923_vm8 = vcmask 1040384  }
 0x824   : > { %4100 = vmatprep.subr.bf16.mxu1 %v7854_v23 }
 0x826   : > { %4051 = vmatmul.mubr.f32.vlgmr.msra.gmra.mrb[14].mxu1 %v7099_v48 }
 0x827   : > { %4102 = vmatprep.mubr.msk.bf16.mxu1 %vm7834_vm7, %v7854_v23 }
 0x8d9   : > { %v1777_v2 = vpop.f32.mrb[20].mxu1 }
 0x8da   : > { %v1778_v28 = vadd.f32 %v1777_v2, %v7185_v24  ;;  %v4016_v11 = vpop.f32.mrb[21].mxu1 }
 0x8db   : > { %v1780_v16 = vpop.f32.mrb[22].mxu1 }
 0x8dc   : > { %v1783_v20 = vmul.f32 %v1778_v28, %v1778_v28  ;;  %v4017_v31 = vpop.f32.mrb[23].mxu1 }
 0x8de   : > { %v1784_v34 = vmul.f32 %v1783_v20, %v1778_v28 }
 0x8e0   : > { %v1785_v50 = vmul.f32 0.044715, %v1784_v34 }
 0x8e2   : > { %v1786_v33 = vadd.f32 %v1785_v50, %v1778_v28 }
 0x8e4   : > { %v1787_v22 = vmul.f32 0.7978846, %v1786_v33 }
 0x8e6   : > { %4588 = vtanh.f32 %v1787_v22 }
 0x8f0   : > { %v4589_v27 = vpop.eup %4588 }
 0x8f1   : > { %v1789_v9 = vadd.f32 1.0, %v4589_v27 }
 0x8f3   : > { %v1790_v26 = vmul.f32 0.5, %v1789_v9 }
 0x8f5   : > { %v1791_v45 = vmul.f32 %v1790_v26, %v1778_v28 }
 0x8f7   : > { %v7280_v19 = vmax.f32 %v1492_v40, %v1791_v45 }
 0x8f9   : > { %v1981_v60 = vpop.f32.mrb[14].mxu1 }
 0x8fa   : > { %v1985_v8 = vsub.f32 %v1981_v60, %v6537_v59  ;;  %v4052_v61 = vpop.f32.mrb[15].mxu1 }
 0x8fc   : > { %v1986_v62 = vpack.c.bf16 %v1985_v8, %v1985_v8  ;;  %v7369_v8 = vld [vmem:[%s5306_s23] sm:$0x3] }
 0x8fe   : > { %v1988_v13 = vsel %vm7905_vm14, %v1986_v62, 0  ;;  %vm7915_vm14 = vcmp.eq.f32.partialorder %v5472_v52, %v6425_v46 }
 0x8ff   : > { %4054 = vmatpush3.bf16.msra.mxu0 %v1988_v13 }
 0x900   : > { %4059 = vmatprep.subr.bf16.mxu0 %v7854_v23 }
 0x902   : > { %4056 = vmatmul.mubr.msk.bf16.vlgmr.msra.gmra.mrb[28].mxu0 %vm7906_vm15, %v6576_v0  ;;  %vm7916_vm15 = vcmp.eq.f32.partialorder %v5474_v56, %v6425_v46 }
 0x903   : > { %4061 = vmatprep.mubr.msk.bf16.mxu0 %vm7834_vm7, %v7854_v23  ;;  %vm4362_vm1 = vmpackc.low %vm7916_vm15, %vm7915_vm14  ;;  %vm7925_vm14 = vcmp.eq.f32.partialorder %v5456_v35, %v6647_v36  ;;  %vm7926_vm15 = vcmp.eq.f32.partialorder %v5458_v37, %v6647_v36 }
 0x9d5   : > { %v2024_v17 = vpop.f32.mrb[28].mxu0 }
 0x9d6   : > { %v2025_v21 = vadd.f32 %v2024_v17, %v7020_v18  ;;  %v4057_v1 = vpop.f32.mrb[29].mxu0 }
 0x9d7   : > { %v2027_v40 = vpop.f32.mrb[30].mxu0 }
 0x9d8   : > { %v2030_v29 = vmul.f32 %v2025_v21, %v2025_v21  ;;  %v4058_v59 = vpop.f32.mrb[31].mxu0 }
 0x9da   : > { %v2031_v42 = vmul.f32 %v2030_v29, %v2025_v21 }
 0x9dc   : > { %v2032_v44 = vmul.f32 0.044715, %v2031_v42 }
 0x9de   : > { %v2033_v15 = vadd.f32 %v2032_v44, %v2025_v21 }
 0x9e0   : > { %v2034_v3 = vmul.f32 0.7978846, %v2033_v15 }
 0x9e2   : > { %4590 = vtanh.f32 %v2034_v3 }
 0x9ec   : > { %v4591_v25 = vpop.eup %4590 }
 0x9ed   : > { %v2036_v63 = vadd.f32 1.0, %v4591_v25 }
 0x9ef   : > { %v2037_v32 = vmul.f32 0.5, %v2036_v63 }
 0x9f1   : > { %v2038_v47 = vmul.f32 %v2037_v32, %v2025_v21  ;;  %v7374_v21 = vld [vmem:[#allocation8] sm:$0x7] }
 0x9f3   : > { %v2039_v0 = vpack.c.bf16 %v2038_v47, %v2038_v47 }
 0x9f5   : > { %v2041_v14 = vand.u32 %v2039_v0, %v7024_v12 }
 0x9f7   : > { %4060 = vmatpush3.bf16.msra.mxu0 %v2041_v14 }
 0x9f8   : > { %4349 = vmatprep.subr.bf16.mxu0 %v4955_v49 }
 0x9fa   : > { %4062 = vmatmul.mubr.msk.bf16.vlgmr.msra.gmra.mrb[32].mxu0 %vm1134_vm12, %v7027_v30 }
 0x9fb   : > { %4351 = vmatpush3.bf16.msk.msra.mxu0 %vm4350_vm2, %v4958_v10  ;;  %4097 = vmatprep.mubr.msk.f32.mxu0 %vm7834_vm7, %v7854_v23  ;;  %vm7918_vm2 = vcmp.eq.f32.partialorder %v5478_v58, %v6425_v46 }
 0x9fc   : > { %4352 = vmatprep.subr.bf16.mxu0 %v4955_v49  ;;  %vm4365_vm3 = vmpackc.low %vm7918_vm2, %vm7917_vm0  ;;  %vm7927_vm0 = vcmp.eq.f32.partialorder %v5460_v38, %v6647_v36  ;;  %vm7928_vm2 = vcmp.eq.f32.partialorder %v5462_v39, %v6647_v36 }
 0x9ff   : > { %4354 = vmatpush3.bf16.msk.msra.mxu0 %vm4353_vm11, %v4958_v10  ;;  %vm7920_vm11 = vcmp.eq.f32.partialorder %v5506_v5, %v6425_v46 }
 0xa00   : > { %4355 = vmatprep.subr.bf16.mxu0 %v4955_v49  ;;  %vm4368_vm13 = vmpackc.low %vm7920_vm11, %vm7919_vm10  ;;  %vm7929_vm10 = vcmp.eq.f32.partialorder %v5464_v41, %v6647_v36  ;;  %vm7930_vm11 = vcmp.eq.f32.partialorder %v5466_v43, %v6647_v36 }
 0xa03   : > { %4357 = vmatpush3.bf16.msk.msra.mxu0 %vm4356_vm5, %v4958_v10  ;;  %vm7922_vm5 = vcmp.eq.f32.partialorder %v5510_v7, %v6425_v46 }
 0xa04   : > { %4358 = vmatprep.subr.bf16.mxu0 %v4955_v49  ;;  %vm4371_vm6 = vmpackc.low %vm7922_vm5, %vm7921_vm4  ;;  %vm7931_vm4 = vcmp.eq.f32.partialorder %v5468_v53, %v6647_v36  ;;  %vm7932_vm5 = vcmp.eq.f32.partialorder %v5470_v55, %v6647_v36 }
 0xa07   : > { %4360 = vmatpush3.bf16.msk.msra.mxu0 %vm4359_vm9, %v4958_v10  ;;  %vm7924_vm9 = vcmask 15360  }
 0xa08   : > { %4361 = vmatprep.subr.bf16.mxu0 %v4955_v49 }
 0xa0b   : > { %4363 = vmatpush3.bf16.msk.msra.mxu0 %vm4362_vm1, %v4958_v10  ;;  %vm4374_vm1 = vmpackc.low %vm7926_vm15, %vm7925_vm14  ;;  %vm7935_vm15 = vcmp.eq.f32.partialorder %v5476_v57, %v6647_v36 }
 0xa0c   : > { %4364 = vmatprep.subr.bf16.mxu0 %v4955_v49 }
 0xa0f   : > { %4366 = vmatpush3.bf16.msk.msra.mxu0 %vm4365_vm3, %v4958_v10  ;;  %vm4377_vm3 = vmpackc.low %vm7928_vm2, %vm7927_vm0  ;;  %vm7937_vm2 = vcmp.eq.f32.partialorder %v5504_v4, %v6647_v36 }
 0xa10   : > { %4367 = vmatprep.subr.bf16.mxu0 %v4955_v49 }
 0xa13   : > { %4369 = vmatpush3.bf16.msk.msra.mxu0 %vm4368_vm13, %v4958_v10  ;;  %vm4380_vm13 = vmpackc.low %vm7930_vm11, %vm7929_vm10  ;;  %vm7939_vm11 = vcmp.eq.f32.partialorder %v5508_v6, %v6647_v36 }
 0xa14   : > { %4370 = vmatprep.subr.bf16.mxu0 %v4955_v49 }
 0xa17   : > { %4372 = vmatpush3.bf16.msk.msra.mxu0 %vm4371_vm6, %v4958_v10  ;;  %vm4383_vm6 = vmpackc.low %vm7932_vm5, %vm7931_vm4  ;;  %vm7941_vm5 = vcmask 1040384  }
 0xa18   : > { %4147 = vmatprep.subr.bf16.mxu0 %v7854_v23 }
 0xa1a   : > { %4098 = vmatmul.mubr.f32.vlgmr.msra.gmra.mrb[36].mxu0 %v7099_v48 }
 0xa1b   : > { %4149 = vmatprep.mubr.msk.bf16.mxu0 %vm7834_vm7, %v7854_v23 }
 0xacd   : > { %v2077_v2 = vpop.f32.mrb[32].mxu0 }
 0xace   : > { %v2078_v28 = vadd.f32 %v2077_v2, %v7185_v24  ;;  %v4063_v11 = vpop.f32.mrb[33].mxu0 }
 0xacf   : > { %v2080_v16 = vpop.f32.mrb[34].mxu0 }
 0xad0   : > { %v2083_v20 = vmul.f32 %v2078_v28, %v2078_v28  ;;  %v4064_v31 = vpop.f32.mrb[35].mxu0 }
 0xad2   : > { %v2084_v34 = vmul.f32 %v2083_v20, %v2078_v28 }
 0xad4   : > { %v2085_v46 = vmul.f32 0.044715, %v2084_v34 }
 0xad6   : > { %v2086_v50 = vadd.f32 %v2085_v46, %v2078_v28 }
 0xad8   : > { %v2087_v33 = vmul.f32 0.7978846, %v2086_v50 }
 0xada   : > { %4592 = vtanh.f32 %v2087_v33 }
 0xae4   : > { %v4593_v22 = vpop.eup %4592 }
 0xae5   : > { %v2089_v27 = vadd.f32 1.0, %v4593_v22 }
 0xae7   : > { %v2090_v9 = vmul.f32 0.5, %v2089_v27 }
 0xae9   : > { %v7364_v26 = vmul.f32 %v2090_v9, %v2078_v28 }
 0xaeb   : > { %v2092_v45 = vmax.f32 %v7280_v19, %v7364_v26 }
 0xaed   : > { %v2281_v60 = vpop.f32.mrb[36].mxu0 }
 0xaee   : > { %v2285_v61 = vsub.f32 %v2281_v60, %v7369_v8  ;;  %v4099_v62 = vpop.f32.mrb[37].mxu0 }
 0xaf0   : > { %v2286_v13 = vpack.c.bf16 %v2285_v61, %v2285_v61 }
 0xaf2   : > { %v2288_v17 = vsel %vm7923_vm8, %v2286_v13, 0  ;;  %vm7933_vm8 = vcmp.eq.f32.partialorder %v5472_v52, %v6647_v36 }
 0xaf3   : > { %4101 = vmatpush3.bf16.msra.mxu1 %v2288_v17 }
 0xaf4   : > { %4106 = vmatprep.subr.bf16.mxu1 %v7854_v23 }
 0xaf6   : > { %4103 = vmatmul.mubr.msk.bf16.vlgmr.msra.gmra.mrb[24].mxu1 %vm7924_vm9, %v7374_v21  ;;  %vm7934_vm9 = vcmp.eq.f32.partialorder %v5474_v56, %v6647_v36 }
 0xaf7   : > { %4108 = vmatprep.mubr.msk.bf16.mxu1 %vm7834_vm7, %v7854_v23  ;;  %vm4386_vm14 = vmpackc.low %vm7934_vm9, %vm7933_vm8  ;;  %vm7943_vm8 = vcmp.eq.f32.partialorder %v5456_v35, %v6857_v54  ;;  %vm7944_vm9 = vcmp.eq.f32.partialorder %v5458_v37, %v6857_v54 }
 0xbc9   : > { %v2324_v1 = vpop.f32.mrb[24].mxu1 }
 0xbca   : > { %v2325_v40 = vadd.f32 %v2324_v1, %v7020_v18  ;;  %v4104_v29 = vpop.f32.mrb[25].mxu1 }
 0xbcb   : > { %v2327_v59 = vpop.f32.mrb[26].mxu1 }
 0xbcc   : > { %v2330_v42 = vmul.f32 %v2325_v40, %v2325_v40  ;;  %v4105_v44 = vpop.f32.mrb[27].mxu1 }
 0xbce   : > { %v2331_v15 = vmul.f32 %v2330_v42, %v2325_v40 }
 0xbd0   : > { %v2332_v3 = vmul.f32 0.044715, %v2331_v15 }
 0xbd2   : > { %v2333_v25 = vadd.f32 %v2332_v3, %v2325_v40 }
 0xbd4   : > { %v2334_v63 = vmul.f32 0.7978846, %v2333_v25 }
 0xbd6   : > { %4594 = vtanh.f32 %v2334_v63 }
 0xbe0   : > { %v4595_v32 = vpop.eup %4594 }
 0xbe1   : > { %v2336_v47 = vadd.f32 1.0, %v4595_v32 }
 0xbe3   : > { %v2337_v0 = vmul.f32 0.5, %v2336_v47 }
 0xbe5   : > { %v2338_v14 = vmul.f32 %v2337_v0, %v2325_v40 }
 0xbe7   : > { %v2339_v2 = vpack.c.bf16 %v2338_v14, %v2338_v14 }
 0xbe9   : > { %v2341_v28 = vand.u32 %v2339_v2, %v7024_v12 }
 0xbeb   : > { %4107 = vmatpush3.bf16.msra.mxu1 %v2341_v28 }
 0xbec   : > { %4373 = vmatprep.subr.bf16.mxu1 %v4955_v49 }
 0xbee   : > { %4109 = vmatmul.mubr.msk.bf16.vlgmr.msra.gmra.mrb[28].mxu1 %vm1134_vm12, %v7027_v30 }
 0xbef   : > { %4375 = vmatpush3.bf16.msk.msra.mxu1 %vm4374_vm1, %v4958_v10  ;;  %4144 = vmatprep.mubr.msk.f32.mxu1 %vm7834_vm7, %v7854_v23  ;;  %vm7936_vm1 = vcmp.eq.f32.partialorder %v5478_v58, %v6647_v36 }
 0xbf0   : > { %4376 = vmatprep.subr.bf16.mxu1 %v4955_v49  ;;  %vm4389_vm0 = vmpackc.low %vm7936_vm1, %vm7935_vm15  ;;  %vm7945_vm15 = vcmp.eq.f32.partialorder %v5460_v38, %v6857_v54  ;;  %vm7946_vm1 = vcmp.eq.f32.partialorder %v5462_v39, %v6857_v54 }
 0xbf3   : > { %4378 = vmatpush3.bf16.msk.msra.mxu1 %vm4377_vm3, %v4958_v10  ;;  %vm7938_vm3 = vcmp.eq.f32.partialorder %v5506_v5, %v6647_v36 }
 0xbf4   : > { %4379 = vmatprep.subr.bf16.mxu1 %v4955_v49  ;;  %vm4392_vm10 = vmpackc.low %vm7938_vm3, %vm7937_vm2  ;;  %vm7947_vm2 = vcmp.eq.f32.partialorder %v5464_v41, %v6857_v54  ;;  %vm7948_vm3 = vcmp.eq.f32.partialorder %v5466_v43, %v6857_v54 }
 0xbf7   : > { %4381 = vmatpush3.bf16.msk.msra.mxu1 %vm4380_vm13, %v4958_v10  ;;  %vm7940_vm13 = vcmp.eq.f32.partialorder %v5510_v7, %v6647_v36 }
 0xbf8   : > { %4382 = vmatprep.subr.bf16.mxu1 %v4955_v49  ;;  %vm4395_vm4 = vmpackc.low %vm7940_vm13, %vm7939_vm11  ;;  %vm7949_vm11 = vcmp.eq.f32.partialorder %v5468_v53, %v6857_v54  ;;  %vm7950_vm13 = vcmp.eq.f32.partialorder %v5470_v55, %v6857_v54 }
 0xbfb   : > { %4384 = vmatpush3.bf16.msk.msra.mxu1 %vm4383_vm6, %v4958_v10  ;;  %vm7942_vm6 = vcmask 15360  }
 0xbfc   : > { %4385 = vmatprep.subr.bf16.mxu1 %v4955_v49 }
 0xbff   : > { %4387 = vmatpush3.bf16.msk.msra.mxu1 %vm4386_vm14, %v4958_v10  ;;  %vm4398_vm14 = vmpackc.low %vm7944_vm9, %vm7943_vm8  ;;  %vm7953_vm9 = vcmp.eq.f32.partialorder %v5476_v57, %v6857_v54 }
 0xc00   : > { %4388 = vmatprep.subr.bf16.mxu1 %v4955_v49 }
 0xc03   : > { %4390 = vmatpush3.bf16.msk.msra.mxu1 %vm4389_vm0, %v4958_v10  ;;  %vm4401_vm0 = vmpackc.low %vm7946_vm1, %vm7945_vm15  ;;  %vm7955_vm1 = vcmp.eq.f32.partialorder %v5504_v4, %v6857_v54 }
 0xc04   : > { %4391 = vmatprep.subr.bf16.mxu1 %v4955_v49 }
 0xc07   : > { %4393 = vmatpush3.bf16.msk.msra.mxu1 %vm4392_vm10, %v4958_v10  ;;  %vm4404_vm10 = vmpackc.low %vm7948_vm3, %vm7947_vm2  ;;  %vm7957_vm3 = vcmp.eq.f32.partialorder %v5508_v6, %v6857_v54 }
 0xc08   : > { %4394 = vmatprep.subr.bf16.mxu1 %v4955_v49 }
 0xc0b   : > { %4396 = vmatpush3.bf16.msk.msra.mxu1 %vm4395_vm4, %v4958_v10  ;;  %vm4407_vm4 = vmpackc.low %vm7950_vm13, %vm7949_vm11  ;;  %vm7959_vm13 = vcmask 1040384  }
 0xc0c   : > { %4194 = vmatprep.subr.bf16.mxu1 %v7854_v23 }
 0xc0e   : > { %4145 = vmatmul.mubr.f32.vlgmr.msra.gmra.mrb[32].mxu1 %v7099_v48 }
 0xc0f   : > { %4196 = vmatprep.mubr.msk.bf16.mxu1 %vm7834_vm7, %v7854_v23 }
 0xcc1   : > { %v2377_v11 = vpop.f32.mrb[28].mxu1 }
 0xcc2   : > { %v2378_v16 = vadd.f32 %v2377_v11, %v7185_v24  ;;  %v4110_v20 = vpop.f32.mrb[29].mxu1 }
 0xcc3   : > { %v2380_v31 = vpop.f32.mrb[30].mxu1 }
 0xcc4   : > { %v2383_v34 = vmul.f32 %v2378_v16, %v2378_v16  ;;  %v4111_v46 = vpop.f32.mrb[31].mxu1 }
 0xcc6   : > { %v2384_v50 = vmul.f32 %v2383_v34, %v2378_v16 }
 0xcc8   : > { %v2385_v33 = vmul.f32 0.044715, %v2384_v50 }
 0xcca   : > { %v2386_v36 = vadd.f32 %v2385_v33, %v2378_v16 }
 0xccc   : > { %v2387_v22 = vmul.f32 0.7978846, %v2386_v36 }
 0xcce   : > { %4596 = vtanh.f32 %v2387_v22 }
 0xcd8   : > { %v4597_v27 = vpop.eup %4596 }
 0xcd9   : > { %v2389_v9 = vadd.f32 1.0, %v4597_v27 }
 0xcdb   : > { %v2390_v60 = vmul.f32 0.5, %v2389_v9 }
 0xcdd   : > { %v2391_v61 = vmul.f32 %v2390_v60, %v2378_v16 }
 0xcdf   : > { %v7458_v62 = vmax.f32 %v2092_v45, %v2391_v61 }
 0xce1   : > { %v2581_v13 = vpop.f32.mrb[32].mxu1 }
 0xce2   : > { %v2585_v17 = vsub.f32 %v2581_v13, %v7369_v8  ;;  %v4146_v1 = vpop.f32.mrb[33].mxu1 }
 0xce4   : > { %v2586_v40 = vpack.c.bf16 %v2585_v17, %v2585_v17 }
 0xce6   : > { %v2588_v29 = vsel %vm7941_vm5, %v2586_v40, 0  ;;  %vm7951_vm5 = vcmp.eq.f32.partialorder %v5472_v52, %v6857_v54 }
 0xce7   : > { %4148 = vmatpush3.bf16.msra.mxu0 %v2588_v29 }
 0xce8   : > { %4153 = vmatprep.subr.bf16.mxu0 %v7854_v23 }
 0xcea   : > { %4150 = vmatmul.mubr.msk.bf16.vlgmr.msra.gmra.mrb[40].mxu0 %vm7942_vm6, %v7374_v21  ;;  %vm7952_vm6 = vcmp.eq.f32.partialorder %v5474_v56, %v6857_v54 }
 0xceb   : > { %4155 = vmatprep.mubr.msk.bf16.mxu0 %vm7834_vm7, %v7854_v23  ;;  %vm4410_vm8 = vmpackc.low %vm7952_vm6, %vm7951_vm5 }
 0xdbd   : > { %v2624_v59 = vpop.f32.mrb[40].mxu0 }
 0xdbe   : > { %v2625_v19 = vadd.f32 %v2624_v59, %v7020_v18  ;;  %v4151_v26 = vpop.f32.mrb[41].mxu0 }
 0xdbf   : > { %v2627_v45 = vpop.f32.mrb[42].mxu0 }
 0xdc0   : > { %v2630_v42 = vmul.f32 %v2625_v19, %v2625_v19  ;;  %v4152_v44 = vpop.f32.mrb[43].mxu0 }
 0xdc2   : > { %v2631_v15 = vmul.f32 %v2630_v42, %v2625_v19 }
 0xdc4   : > { %v2632_v3 = vmul.f32 0.044715, %v2631_v15 }
 0xdc6   : > { %v2633_v25 = vadd.f32 %v2632_v3, %v2625_v19 }
 0xdc8   : > { %v2634_v63 = vmul.f32 0.7978846, %v2633_v25 }
 0xdca   : > { %4598 = vtanh.f32 %v2634_v63  ;;  %v3061_v63 = vrot.slane %v7017_v51, 4 }
 0xdd4   : > { %v4599_v32 = vpop.eup %4598 }
 0xdd5   : > { %v2636_v47 = vadd.f32 1.0, %v4599_v32 }
 0xdd7   : > { %v2637_v0 = vmul.f32 0.5, %v2636_v47  ;;  %v3062_v47 = vmin.f32 %v7017_v51, %v3061_v63 }
 0xdd9   : > { %v2638_v14 = vmul.f32 %v2637_v0, %v2625_v19  ;;  %v3063_v0 = vrot.slane %v3062_v47, 2 }
 0xddb   : > { %v2639_v2 = vpack.c.bf16 %v2638_v14, %v2638_v14  ;;  %v3064_v14 = vmin.f32 %v3062_v47, %v3063_v0 }
 0xddd   : > { %v2641_v28 = vand.u32 %v2639_v2, %v7024_v12 }
 0xddf   : > { %4154 = vmatpush3.bf16.msra.mxu0 %v2641_v28 }
 0xde0   : > { %4397 = vmatprep.subr.bf16.mxu0 %v4955_v49 }
 0xde2   : > { %4156 = vmatmul.mubr.msk.bf16.vlgmr.msra.gmra.mrb[44].mxu0 %vm1134_vm12, %v7027_v30 }
 0xde3   : > { %4399 = vmatpush3.bf16.msk.msra.mxu0 %vm4398_vm14, %v4958_v10  ;;  %4191 = vmatprep.mubr.msk.f32.mxu0 %vm7834_vm7, %v7854_v23  ;;  %vm7954_vm14 = vcmp.eq.f32.partialorder %v5478_v58, %v6857_v54 }
 0xde4   : > { %4400 = vmatprep.subr.bf16.mxu0 %v4955_v49  ;;  %vm4413_vm15 = vmpackc.low %vm7954_vm14, %vm7953_vm9 }
 0xde7   : > { %4402 = vmatpush3.bf16.msk.msra.mxu0 %vm4401_vm0, %v4958_v10  ;;  %vm7956_vm0 = vcmp.eq.f32.partialorder %v5506_v5, %v6857_v54 }
 0xde8   : > { %4403 = vmatprep.subr.bf16.mxu0 %v4955_v49  ;;  %vm4416_vm2 = vmpackc.low %vm7956_vm0, %vm7955_vm1 }
 0xdeb   : > { %4405 = vmatpush3.bf16.msk.msra.mxu0 %vm4404_vm10, %v4958_v10  ;;  %vm7958_vm10 = vcmp.eq.f32.partialorder %v5510_v7, %v6857_v54 }
 0xdec   : > { %4406 = vmatprep.subr.bf16.mxu0 %v4955_v49  ;;  %vm4419_vm11 = vmpackc.low %vm7958_vm10, %vm7957_vm3 }
 0xdef   : > { %4408 = vmatpush3.bf16.msk.msra.mxu0 %vm4407_vm4, %v4958_v10  ;;  %vm7960_vm4 = vcmask 15360  }
 0xdf0   : > { %4409 = vmatprep.subr.bf16.mxu0 %v4955_v49 }
 0xdf3   : > { %4411 = vmatpush3.bf16.msk.msra.mxu0 %vm4410_vm8, %v4958_v10 }
 0xdf4   : > { %4412 = vmatprep.subr.bf16.mxu0 %v4955_v49 }
 0xdf7   : > { %4414 = vmatpush3.bf16.msk.msra.mxu0 %vm4413_vm15, %v4958_v10 }
 0xdf8   : > { %4415 = vmatprep.subr.bf16.mxu0 %v4955_v49 }
 0xdfb   : > { %4417 = vmatpush3.bf16.msk.msra.mxu0 %vm4416_vm2, %v4958_v10 }
 0xdfc   : > { %4418 = vmatprep.subr.bf16.mxu0 %v4955_v49 }
 0xdff   : > { %4420 = vmatpush3.bf16.msk.msra.mxu0 %vm4419_vm11, %v4958_v10 }
 0xe00   : > { %4241 = vmatprep.subr.bf16.mxu0 %v7854_v23 }
 0xe02   : > { %4192 = vmatmul.mubr.f32.vlgmr.msra.gmra.mrb[38].mxu0 %v7099_v48 }
 0xe03   : > { %4243 = vmatprep.mubr.msk.bf16.mxu0 %vm7834_vm7, %v7854_v23 }
 0xeb5   : > { %v2677_v11 = vpop.f32.mrb[44].mxu0 }
 0xeb6   : > { %v2678_v16 = vadd.f32 %v2677_v11, %v7185_v24  ;;  %v4157_v20 = vpop.f32.mrb[45].mxu0  ;;  %v3065_v11 = vrot.slane %v3064_v14, 1 }
 0xeb7   : > { %v2680_v31 = vpop.f32.mrb[46].mxu0 }
 0xeb8   : > { %v2683_v34 = vmul.f32 %v2678_v16, %v2678_v16  ;;  %v4158_v46 = vpop.f32.mrb[47].mxu0  ;;  %v3066_v31 = vmin.f32 %v3064_v14, %v3065_v11 }
 0xeba   : > { %v2684_v50 = vmul.f32 %v2683_v34, %v2678_v16  ;;  %vm3067_vm5 = vcmp.eq.f32.partialorder %v5456_v35, %v3066_v31  ;;  %vm3068_vm6 = vcmp.eq.f32.partialorder %v5458_v37, %v3066_v31  ;;  %vm3069_vm9 = vcmp.eq.f32.partialorder %v5460_v38, %v3066_v31 }
 0xebb   : > { %vm4422_vm8 = vmpackc.low %vm3068_vm6, %vm3067_vm5  ;;  %vm3070_vm14 = vcmp.eq.f32.partialorder %v5462_v39, %v3066_v31  ;;  %vm3071_vm1 = vcmp.eq.f32.partialorder %v5464_v41, %v3066_v31  ;;  %vm3072_vm0 = vcmp.eq.f32.partialorder %v5466_v43, %v3066_v31  ;;  %vm3073_vm3 = vcmp.eq.f32.partialorder %v5468_v53, %v3066_v31 }
 0xebc   : > { %v2685_v33 = vmul.f32 0.044715, %v2684_v50  ;;  %vm4425_vm15 = vmpackc.low %vm3070_vm14, %vm3069_vm9  ;;  %vm3074_vm10 = vcmp.eq.f32.partialorder %v5470_v55, %v3066_v31  ;;  %vm3077_vm6 = vcmp.eq.f32.partialorder %v5476_v57, %v3066_v31  ;;  %vm3079_vm14 = vcmp.eq.f32.partialorder %v5504_v4, %v3066_v31 }
 0xebd   : > { %vm4428_vm2 = vmpackc.low %vm3072_vm0, %vm3071_vm1  ;;  %vm3081_vm0 = vcmp.eq.f32.partialorder %v5508_v6, %v3066_v31 }
 0xebe   : > { %v2686_v54 = vadd.f32 %v2685_v33, %v2678_v16  ;;  %vm4431_vm11 = vmpackc.low %vm3074_vm10, %vm3073_vm3  ;;  %vm7961_vm10 = vcmask 1040384  }
 0xec0   : > { %v2687_v36 = vmul.f32 0.7978846, %v2686_v54 }
 0xec2   : > { %4600 = vtanh.f32 %v2687_v36 }
 0xecc   : > { %v4601_v22 = vpop.eup %4600 }
 0xecd   : > { %v2689_v27 = vadd.f32 1.0, %v4601_v22 }
 0xecf   : > { %v2690_v9 = vmul.f32 0.5, %v2689_v27 }
 0xed1   : > { %v7542_v60 = vmul.f32 %v2690_v9, %v2678_v16 }
 0xed3   : > { %v2692_v61 = vmax.f32 %v7458_v62, %v7542_v60 }
 0xed5   : > { %v2881_v13 = vpop.f32.mrb[38].mxu0 }
 0xed6   : > { %v2885_v17 = vsub.f32 %v2881_v13, %v7369_v8  ;;  %v4193_v1 = vpop.f32.mrb[39].mxu0 }
 0xed8   : > { %v2886_v40 = vpack.c.bf16 %v2885_v17, %v2885_v17 }
 0xeda   : > { %v2888_v29 = vsel %vm7959_vm13, %v2886_v40, 0  ;;  %vm3075_vm13 = vcmp.eq.f32.partialorder %v5472_v52, %v3066_v31 }
 0xedb   : > { %4195 = vmatpush3.bf16.msra.mxu1 %v2888_v29 }
 0xedc   : > { %4200 = vmatprep.subr.bf16.mxu1 %v7854_v23 }
 0xede   : > { %4197 = vmatmul.mubr.msk.bf16.vlgmr.msra.gmra.mrb[36].mxu1 %vm7960_vm4, %v7374_v21  ;;  %vm3076_vm4 = vcmp.eq.f32.partialorder %v5474_v56, %v3066_v31 }
 0xedf   : > { %4202 = vmatprep.mubr.msk.bf16.mxu1 %vm7834_vm7, %v7854_v23  ;;  %vm4434_vm5 = vmpackc.low %vm3076_vm4, %vm3075_vm13 }
 0xfb1   : > { %v2924_v59 = vpop.f32.mrb[36].mxu1 }
 0xfb2   : > { %v2925_v19 = vadd.f32 %v2924_v59, %v7020_v18  ;;  %v4198_v26 = vpop.f32.mrb[37].mxu1 }
 0xfb3   : > { %v2927_v45 = vpop.f32.mrb[38].mxu1 }
 0xfb4   : > { %v2930_v42 = vmul.f32 %v2925_v19, %v2925_v19  ;;  %v4199_v44 = vpop.f32.mrb[39].mxu1 }
 0xfb6   : > { %v2931_v15 = vmul.f32 %v2930_v42, %v2925_v19 }
 0xfb8   : > { %v2932_v3 = vmul.f32 0.044715, %v2931_v15 }
 0xfba   : > { %v2933_v25 = vadd.f32 %v2932_v3, %v2925_v19 }
 0xfbc   : > { %v2934_v32 = vmul.f32 0.7978846, %v2933_v25 }
 0xfbe   : > { %4602 = vtanh.f32 %v2934_v32 }
 0xfc8   : > { %v4603_v2 = vpop.eup %4602 }
 0xfc9   : > { %v2936_v28 = vadd.f32 1.0, %v4603_v2 }
 0xfcb   : > { %v2937_v16 = vmul.f32 0.5, %v2936_v28 }
 0xfcd   : > { %v2938_v20 = vmul.f32 %v2937_v16, %v2925_v19 }
 0xfcf   : > { %v2939_v34 = vpack.c.bf16 %v2938_v20, %v2938_v20 }
 0xfd1   : > { %v2941_v46 = vand.u32 %v2939_v34, %v7024_v12 }
 0xfd3   : > { %4201 = vmatpush3.bf16.msra.mxu1 %v2941_v46 }
 0xfd4   : > { %4421 = vmatprep.subr.bf16.mxu1 %v4955_v49 }
 0xfd6   : > { %4203 = vmatmul.mubr.msk.bf16.vlgmr.msra.gmra.mrb[40].mxu1 %vm1134_vm12, %v7027_v30 }
 0xfd7   : > { %4423 = vmatpush3.bf16.msk.msra.mxu1 %vm4422_vm8, %v4958_v10  ;;  %4238 = vmatprep.mubr.msk.f32.mxu1 %vm7834_vm7, %v7854_v23  ;;  %vm3078_vm8 = vcmp.eq.f32.partialorder %v5478_v58, %v3066_v31 }
 0xfd8   : > { %4424 = vmatprep.subr.bf16.mxu1 %v4955_v49  ;;  %vm4437_vm9 = vmpackc.low %vm3078_vm8, %vm3077_vm6 }
 0xfdb   : > { %4426 = vmatpush3.bf16.msk.msra.mxu1 %vm4425_vm15, %v4958_v10  ;;  %vm3080_vm15 = vcmp.eq.f32.partialorder %v5506_v5, %v3066_v31 }
 0xfdc   : > { %4427 = vmatprep.subr.bf16.mxu1 %v4955_v49  ;;  %vm4440_vm1 = vmpackc.low %vm3080_vm15, %vm3079_vm14 }
 0xfdf   : > { %4429 = vmatpush3.bf16.msk.msra.mxu1 %vm4428_vm2, %v4958_v10  ;;  %vm3082_vm2 = vcmp.eq.f32.partialorder %v5510_v7, %v3066_v31 }
 0xfe0   : > { %4430 = vmatprep.subr.bf16.mxu1 %v4955_v49  ;;  %vm4443_vm3 = vmpackc.low %vm3082_vm2, %vm3081_vm0 }
 0xfe3   : > { %4432 = vmatpush3.bf16.msk.msra.mxu1 %vm4431_vm11, %v4958_v10  ;;  %vm7962_vm11 = vcmask 15360  }
 0xfe4   : > { %4433 = vmatprep.subr.bf16.mxu1 %v4955_v49 }
 0xfe7   : > { %4435 = vmatpush3.bf16.msk.msra.mxu1 %vm4434_vm5, %v4958_v10 }
 0xfe8   : > { %4436 = vmatprep.subr.bf16.mxu1 %v4955_v49 }
 0xfeb   : > { %4438 = vmatpush3.bf16.msk.msra.mxu1 %vm4437_vm9, %v4958_v10 }
 0xfec   : > { %4439 = vmatprep.subr.bf16.mxu1 %v4955_v49 }
 0xfef   : > { %4441 = vmatpush3.bf16.msk.msra.mxu1 %vm4440_vm1, %v4958_v10 }
 0xff0   : > { %4442 = vmatprep.subr.bf16.mxu1 %v4955_v49 }
 0xff3   : > { %4444 = vmatpush3.bf16.msk.msra.mxu1 %vm4443_vm3, %v4958_v10 }
 0xff6   : > { %4239 = vmatmul.mubr.f32.vlgmr.msra.gmra.mrb[34].mxu1 %v7099_v48 }
0x10a9   : > { %v2977_v35 = vpop.f32.mrb[40].mxu1 }
0x10aa   : > { %v2978_v37 = vadd.f32 %v2977_v35, %v7185_v24  ;;  %v4204_v38 = vpop.f32.mrb[41].mxu1 }
0x10ab   : > { %v2980_v39 = vpop.f32.mrb[42].mxu1 }
0x10ac   : > { %v2983_v41 = vmul.f32 %v2978_v37, %v2978_v37  ;;  %v4205_v43 = vpop.f32.mrb[43].mxu1 }
0x10ae   : > { %v2984_v53 = vmul.f32 %v2983_v41, %v2978_v37 }
0x10b0   : > { %v2985_v55 = vmul.f32 0.044715, %v2984_v53 }
0x10b2   : > { %v2986_v52 = vadd.f32 %v2985_v55, %v2978_v37 }
0x10b4   : > { %v2987_v56 = vmul.f32 0.7978846, %v2986_v52 }
0x10b6   : > { %4604 = vtanh.f32 %v2987_v56 }
0x10c0   : > { %v4605_v57 = vpop.eup %4604 }
0x10c1   : > { %v2989_v58 = vadd.f32 1.0, %v4605_v57 }
0x10c3   : > { %v2990_v49 = vmul.f32 0.5, %v2989_v58 }
0x10c5   : > { %v2991_v4 = vmul.f32 %v2990_v49, %v2978_v37 }
0x10c7   : > { %v2992_v5 = vmax.f32 %v2692_v61, %v2991_v4 }
0x10c9   : > { %v3165_v6 = vpop.f32.mrb[34].mxu1 }
0x10ca   : > { %v3169_v7 = vsub.f32 %v3165_v6, %v7369_v8  ;;  %v4240_v10 = vpop.f32.mrb[35].mxu1 }
0x10cc   : > { %v3170_v51 = vpack.c.bf16 %v3169_v7, %v3169_v7 }
0x10ce   : > { %v3172_v30 = vsel %vm7961_vm10, %v3170_v51, 0 }
0x10cf   : > { %4242 = vmatpush3.bf16.msra.mxu0 %v3172_v30 }
0x10d0   : > { %4247 = vmatprep.subr.bf16.mxu0 %v7854_v23 }
0x10d2   : > { %4244 = vmatmul.mubr.msk.bf16.vlgmr.msra.gmra.mrb[48].mxu0 %vm7962_vm11, %v7374_v21 }
0x10d3   : > { %4249 = vmatprep.mubr.msk.bf16.mxu0 %vm7834_vm7, %v7854_v23  ;;  %v4614_v23 = vld [vmem:[#allocation13] sm:$0xf] }
0x11a5   : > { %v3208_v48 = vpop.f32.mrb[48].mxu0 }
0x11a6   : > { %v3209_v62 = vadd.f32 %v3208_v48, %v7020_v18  ;;  %v4245_v50 = vpop.f32.mrb[49].mxu0 }
0x11a7   : > { %v3211_v33 = vpop.f32.mrb[50].mxu0 }
0x11a8   : > { %v3214_v54 = vmul.f32 %v3209_v62, %v3209_v62  ;;  %v4246_v8 = vpop.f32.mrb[51].mxu0 }
0x11aa   : > { %v3215_v36 = vmul.f32 %v3214_v54, %v3209_v62 }
0x11ac   : > { %v3216_v22 = vmul.f32 0.044715, %v3215_v36 }
0x11ae   : > { %v3217_v27 = vadd.f32 %v3216_v22, %v3209_v62 }
0x11b0   : > { %v3218_v9 = vmul.f32 0.7978846, %v3217_v27 }
0x11b2   : > { %4606 = vtanh.f32 %v3218_v9 }
0x11bc   : > { %v4607_v60 = vpop.eup %4606 }
0x11bd   : > { %v3220_v61 = vadd.f32 1.0, %v4607_v60 }
0x11bf   : > { %v3221_v13 = vmul.f32 0.5, %v3220_v61 }
0x11c1   : > { %v3222_v17 = vmul.f32 %v3221_v13, %v3209_v62 }
0x11c3   : > { %v3223_v21 = vpack.c.bf16 %v3222_v17, %v3222_v17 }
0x11c5   : > { %v3225_v1 = vand.u32 %v3223_v21, %v7024_v12 }
0x11c7   : > { %4248 = vmatpush3.bf16.msra.mxu0 %v3225_v1 }
0x11ca   : > { %4250 = vmatmul.mubr.msk.bf16.vlgmr.msra.gmra.mrb[52].mxu0 %vm1134_vm12, %v4614_v23 }
0x129d   : > { %v3261_v18 = vpop.f32.mrb[52].mxu0 }
0x129e   : > { %v3262_v40 = vadd.f32 %v3261_v18, %v7185_v24  ;;  %v4251_v29 = vpop.f32.mrb[53].mxu0 }
0x129f   : > { %v3264_v59 = vpop.f32.mrb[54].mxu0 }
0x12a0   : > { %v3267_v19 = vmul.f32 %v3262_v40, %v3262_v40  ;;  %v4252_v26 = vpop.f32.mrb[55].mxu0 }
0x12a2   : > { %v3268_v45 = vmul.f32 %v3267_v19, %v3262_v40 }
0x12a4   : > { %v3269_v42 = vmul.f32 0.044715, %v3268_v45 }
0x12a6   : > { %v3270_v44 = vadd.f32 %v3269_v42, %v3262_v40 }
0x12a8   : > { %v3271_v15 = vmul.f32 0.7978846, %v3270_v44 }
0x12aa   : > { %4608 = vtanh.f32 %v3271_v15 }
0x12b4   : > { %v4609_v12 = vpop.eup %4608 }
0x12b5   : > { %v3273_v3 = vadd.f32 1.0, %v4609_v12 }
0x12b7   : > { %v3274_v25 = vmul.f32 0.5, %v3273_v3 }
0x12b9   : > { %v3275_v63 = vmul.f32 %v3274_v25, %v3262_v40 }
0x12bb   : > { %v3276_v24 = vmax.f32 %v2992_v5, %v3275_v63 }
0x12bd   : > { %v3277_v32 = vpack.c.bf16 %v3276_v24, %v3276_v24 }
0x12bf   : > { %3278 = vst [vmem:[%s474_s24] sm:$0xf] %v3277_v32 }
0x12c0   : > { %4858 = shalt.err (!%p4855_p1)
}
0x12c1   : > { %s4859_s10 = scalar_lea.hbm %s7614_s1, 64  ;;  %s4863_s12 = scalar_lea.hbm %s7966_s16, 128 }
0x12c2   : > { %p4860_p5 = scmp.ne.s32.totalorder %s7614_s1, %s4859_s10  ;;  %p4864_p11 = scmp.lt.u32.totalorder %s7614_s1, %s7966_s16 }
0x12c3   : > { %p4865_p12 = scmp.lt.u32.totalorder %s4863_s12, %s4859_s10  ;;  %p4867_p6 = scmp.lt.u32.totalorder %s4859_s10, %s7614_s1 }
0x12c4   : > { %p4861_p9 = pnand %p4860_p5, %p7967_p0 }
0x12c5   : > { %p4866_p8 = por %p4865_p12, %p4864_p11 }
0x12c6   : > { %p4862_p3 = pneg %p4861_p9 }
0x12c7   : > { %p4868_p13 = por %p4867_p6, %p4866_p8 }
0x12c9   : > { %p4869_p4 = pnand %p4868_p13, %p4862_p3 }
0x12cb   : > { %4872 = shalt.err (!%p4869_p4)
}
0x12cc   : > { %4471 = dma.vmem_to_hbm [thread:$0]  (%p7967_p0), %s7616_s29, 64, %s7614_s1, %s3280_s14  }
0x12cd PF: > { %s7968_s26 = sld [smem:[#allocation23_spill]]  ;;  %s7969_s17 = sld [smem:[#allocation30_spill]] }
0x12ce   : > { %s7970_s11 = sld [smem:[#allocation26_spill]] }
0x12d3   : > { %s3306_s22 = sand.u32 1, %s7968_s26   ;;  %p7971_p2 = scmp.ne.s32.totalorder %s7969_s17, 0 }
0x12d4   : > { %p7972_p7 = scmp.ge.s32.totalorder %s7970_s11, 2  ;;  %s3307_s5 = scalar_lea.sflag [#allocation4], %s3306_s22 }
0x12d6   : > { %p4500_p10 = pnand %p7972_p7, %p7971_p2 }
0x12d8   : > { %4918 = dma.done.wait (!%p4500_p10), %s3307_s5, 64  }
0x12d9   : > { %4920 = vsyncadd (!%p4500_p10), %s3307_s5, 4294967232  ;;  %s30_s10 = sadd.s32 1, %s7970_s11   ;;  %s7973_s24 = sld [smem:[#allocation24_spill]] }
0x12da   : > { %p27_p1 = scmp.ge.s32.totalorder %s30_s10, 4   ;;  %s7974_s29 = sld [smem:[#allocation29_spill]] }
0x12db   : > { %s7975_s21 = sld [smem:[#allocation27_spill]]  ;;  %s7976_s27 = smov %s4927_s28 }
0x12dc   : > { %s7978_s30 = smov %s4939_s9  ;;  %29 = sbr.rel (!%p27_p1) target bundleno = 16 (0x10), region = 141 }
0x12df   : > { %s7977_s28 = smov %s7973_s24 }
0x12e1   : > { %s7979_s9 = smov %s7975_s21 }
0x12e3   :  { %3312 = vsyncpa [#allocation3], 1 }
0x12e4   :  { %3314 = vsyncpa [#allocation3 + $0x1], 1 }
0x12e5   :  { %3315 = vsyncpa [#allocation6], 1 }
0x12e6   :  { %3317 = vsyncpa [#allocation6 + $0x1], 1 }
0x12e7   :  { %3318 = vsyncpa [#allocation9], 1 }
0x12e8   :  { %3319 = vsyncpa [#allocation12], 1 }
0x12e9   :  { %3320 = vsyncpa [#allocation15], 1 }
0x12ea   :  { %3321 = vsyncpa [#allocation4], 1 }
0x12eb   :  { %3323 = vsyncpa [#allocation4 + $0x1], 1 }

// kernel: gcn_encoder_forward.4
= control target key start
LH: loop header
LB: loop body
LE: loop exit
PB: predicated region body
PF: predicated region fallthrough
CT: control target
= control target key end

     0   :  { %s8142_s0 = inlined_call_operand.hbm [shape: bf16[2,8,128], index: 0, kind: input, shape index: {}, may-alias: {0,2}]   ;;  %s8143_s1 = inlined_call_operand.hbm [shape: bf16[2,128,8], index: 1, kind: input, shape index: {}]   ;;  %s8144_s2 = inlined_call_operand.hbm [shape: bf16[2,8,128], index: 2, kind: input, shape index: {}, may-alias: {0,2}]   ;;  %s8145_s3 = inlined_call_operand.hbm [shape: bf16[22,8], index: 3, kind: input, shape index: {}]   ;;  %s8146_s4 = inlined_call_operand.hbm [shape: bf16[22,8], index: 4, kind: input, shape index: {}]   ;;  %s8147_s5 = inlined_call_operand.hbm [shape: f32[22,1], index: 5, kind: input, shape index: {}]   ;;  %s8148_s6 = inlined_call_operand.hbm [shape: bf16[32,22], index: 6, kind: input, shape index: {}]   ;;  %s8149_s7 = inlined_call_operand.hbm [shape: f32[32,1], index: 7, kind: input, shape index: {}]   ;;  %s8150_s8 = inlined_call_operand.hbm [shape: bf16[2,32,128], index: 8, kind: output, shape index: {}]  }
   0x1   :  { %8288 = sst [smem:[#allocation34_spill]] %s8143_s1 }
   0x2   :  { %8289 = sst [smem:[#allocation35_spill]] %s8145_s3 }
   0x3   :  { %8290 = sst [smem:[#allocation36_spill]] %s8147_s5 }
   0x4   :  { %8291 = sst [smem:[#allocation37_spill]] %s8150_s8 }
   0x5   :  { %13 = vsyncpa [#allocation3], 0 }
   0x6   :  { %15 = vsyncpa [#allocation3 + $0x1], 0 }
   0x7   :  { %16 = vsyncpa [#allocation6], 0 }
   0x8   :  { %18 = vsyncpa [#allocation6 + $0x1], 0 }
   0x9   :  { %19 = vsyncpa [#allocation9], 0 }
   0xa   :  { %20 = vsyncpa [#allocation12], 0 }
   0xb   :  { %21 = vsyncpa [#allocation15], 0 }
   0xc   :  { %22 = vsyncpa [#allocation4], 0 }
   0xd   :  { %24 = vsyncpa [#allocation4 + $0x1], 0  ;;  %s5266_s27 = smov 0   ;;  %s5268_s28 = smov 0  }
   0xe   :  { %s5270_s29 = smov 0   ;;  %s5272_s30 = smov 0  }
   0xf   :  { %s5274_s9 = smov 0   ;;  %s5276_s10 = smov 0  }
  0x10 LB: > { %8292 = sst [smem:[#allocation23_spill]] %s5180_s27  ;;  %s5297_s11 = sadd.s32 4294967295, %s5200_s10   ;;  %s5200_s10 = sphi %s5276_s10, %s30_s10   ;;  %s5196_s9 = sphi %s5274_s9, %s8505_s9   ;;  %s5192_s30 = sphi %s5272_s30, %s8504_s30   ;;  %s5188_s29 = sphi %s5270_s29, %s8500_s29   ;;  %s5184_s28 = sphi %s5268_s28, %s8503_s28   ;;  %s5180_s27 = sphi %s5266_s27, %s8502_s27  }
  0x11   : > { %8293 = sst [smem:[#allocation24_spill]] %s5188_s29  ;;  %p3906_p0 = scmp.ge.s32.totalorder %s5200_s10, 1 }
  0x12   : > { %8294 = sst [smem:[#allocation25_spill]] %s5192_s30  ;;  %p8153_p1 = scmp.eq.s32.totalorder %s5297_s11, 0 }
  0x13   : > { %8295 = sst [smem:[#allocation26_spill]] %s5200_s10  ;;  %p260_p2 = scmp.lt.s32.totalorder %s5200_s10, 3 }
  0x14   : > { %s5202_s13 = smov [#allocation8]   ;;  %s5203_s16 = smov [#allocation11]  }
  0x15   : > { %p5302_p3 = pnand %p3906_p0, %p260_p2  ;;  %s272_s14 = sshll.u32 %s5202_s13, 4  ;;  %s5306_s14 = int_to_ptr.vmem [resolvable:$true] %s272_s14 }
  0x16   : > { %s298_s17 = sshll.u32 %s5203_s16, 4  ;;  %s8298_s3 = sld [smem:[#allocation35_spill]]  ;;  %s5317_s17 = int_to_ptr.vmem [resolvable:$true] %s298_s17 }
  0x17   : > { %s8296_s12 = scalar_select %p5302_p3, 1, 0 }
  0x18   : > { %p4622_p4 = pneg %p5302_p3 }
  0x1a   : > { %p5313_p6 = pnand %p4622_p4, %p8153_p1 }
  0x1c   : > { %s8297_s15 = scalar_select %p5313_p6, 1, 0 }
  0x1d   : > { %s4872_s20 = scalar_lea.hbm %s8298_s3, 192  ;;  %p5327_p8 = pneg %p5313_p6 }
  0x1e   : > { %p4873_p7 = scmp.ne.s32.totalorder %s8298_s3, %s4872_s20  ;;  %p4879_p11 = scmp.lt.u32.totalorder %s4872_s20, %s8298_s3 }
  0x1f   : > { %s8299_s23 = scalar_select %p5327_p8, 1, 0 }
  0x20   : > { %p4875_p9 = pnand %p5327_p8, %p4873_p7 }
  0x22   : > { %p4876_p10 = pneg %p4875_p9 }
  0x24   : > { %p4881_p12 = pnand %p4879_p11, %p4876_p10 }
  0x26   : > { %4884 = shalt.err (!%p4881_p12)
}
  0x27   : > { %s4885_s26 = scalar_lea.vmem %s5306_s14, 192  ;;  %p4893_p4 = scmp.lt.s32.totalorder %s5306_s14, %s5306_s14 }
  0x28   : > { %p4886_p13 = scmp.ne.s32.totalorder %s5306_s14, %s4885_s26  ;;  %p4894_p5 = scmp.lt.s32.totalorder %s4885_s26, %s4885_s26 }
  0x2a   : > { %p4888_p0 = pnand %p4886_p13, %p5327_p8  ;;  %p4895_p7 = por %p4894_p5, %p4893_p4 }
  0x2c   : > { %p4889_p2 = pneg %p4888_p0 }
  0x2e   : > { %p4896_p9 = pnand %p4895_p7, %p4889_p2 }
  0x30   : > { %4899 = shalt.err (!%p4896_p9)
}
  0x31   : > { %s8155_s13 = smov 64   ;;  %s8157_s16 = smov 4  }
  0x32   : > { %4625 = dma.hbm_to_vmem [thread:$0]  (!%p5313_p6), %s8298_s3, 192, %s5306_s14, [#allocation9], %s8155_s13, %s8155_s13, %s8157_s16  }
  0x33   : > { %s8300_s5 = sld [smem:[#allocation36_spill]] }
  0x39   : > { %s4900_s22 = scalar_lea.hbm %s8300_s5, 384 }
  0x3a   : > { %p4901_p5 = scmp.ne.s32.totalorder %s8300_s5, %s4900_s22  ;;  %p4907_p12 = scmp.lt.u32.totalorder %s4900_s22, %s8300_s5 }
  0x3c   : > { %p4903_p10 = pnand %p4901_p5, %p5327_p8 }
  0x3e   : > { %p4904_p11 = pneg %p4903_p10 }
  0x40   : > { %p4909_p13 = pnand %p4907_p12, %p4904_p11 }
  0x42   : > { %4912 = shalt.err (!%p4909_p13)
}
  0x43   : > { %s4913_s14 = scalar_lea.vmem %s5317_s17, 384  ;;  %p4921_p7 = scmp.lt.s32.totalorder %s5317_s17, %s5317_s17 }
  0x44   : > { %p4914_p0 = scmp.ne.s32.totalorder %s5317_s17, %s4913_s14  ;;  %p4922_p9 = scmp.lt.s32.totalorder %s4913_s14, %s4913_s14 }
  0x46   : > { %p4916_p2 = pnand %p4914_p0, %p5327_p8  ;;  %p4923_p5 = por %p4922_p9, %p4921_p7 }
  0x48   : > { %p4917_p4 = pneg %p4916_p2 }
  0x4a   : > { %p4924_p10 = pnand %p4923_p5, %p4917_p4 }
  0x4c   : > { %4927 = shalt.err (!%p4924_p10)
}
  0x4d   : > { %s8152_s18 = smov 128   ;;  %s8154_s8 = smov 8  }
  0x4e   : > { %4631 = dma.hbm_to_vmem [thread:$0]  (!%p5313_p6), %s8300_s5, 384, %s5317_s17, [#allocation12], %s8152_s18, %s8152_s18, %s8154_s8  }
  0x4f   : > { %s3905_s21 = sadd.s32 4294967294, %s5200_s10   ;;  %s42_s22 = sadd.s32 1, %s5196_s9 }
  0x50   : > { %p44_p11 = scmp.ge.s32.totalorder %s42_s22, 2  ;;  %s51_s24 = sadd.s32 1, %s5188_s29 }
  0x51   : > { %p58_p12 = scmp.ne.s32.totalorder %s5188_s29, %s5184_s28  ;;  %p59_p13 = scmp.eq.s32.totalorder %s5200_s10, 0 }
  0x52   : > { %s8507_s22 = smov (%p44_p11, %s42_s22), 0  ;;  %p64_p2 = scmp.ne.s32.totalorder %s5184_s28, %s5180_s27 }
  0x53   : > { %8301 = sst [smem:[#allocation27_spill]] %s8507_s22  ;;  %p5385_p0 = por %p59_p13, %p58_p12 }
  0x54   : > { %s46_s17 = ssub.s32 %s5196_s9, %s8507_s22  ;;  %p247_p4 = scmp.eq.s32.totalorder %s5297_s11, 1 }
  0x55   : > { %p49_p7 = scmp.eq.s32.totalorder %s46_s17, 0  ;;  %p5396_p9 = por %p8153_p1, %p64_p2 }
  0x56   : > { %p5400_p5 = por %p247_p4, %p58_p12  ;;  %p253_p10 = scmp.eq.s32.totalorder %s3905_s21, 1 }
  0x57   : > { %s8303_s26 = scalar_select %p5396_p9, 1, 0 }
  0x58   : > { %s8304_s14 = scalar_select %p5400_p5, 1, 0 }
  0x59   : > { %s5405_s19 = scalar_select %p49_p7, %s5188_s29, %s51_s24  }
  0x5a   : > { %8305 = sst [smem:[#allocation28_spill]] %s8304_s14  ;;  %p5407_p11 = por %p253_p10, %p64_p2 }
  0x5b   : > { %8306 = sst [smem:[#allocation29_spill]] %s5405_s19  ;;  %p4657_p13 = scmp.lt.s32.totalorder %s5200_s10, 2 }
  0x5c   : > { %s8307_s20 = scalar_select %p5407_p11, 1, 0 }
  0x5d   : > { %s5413_s18 = sand.u32 1, %s5188_s29   ;;  %s357_s17 = sand.u32 1, %s5200_s10  }
  0x5e   : > { %8308 = sst [smem:[#allocation30_spill]] %s8307_s20  ;;  %p5418_p1 = pnand %p4657_p13, %p5385_p0 }
  0x5f   : > { %s3915_s13 = sshll.u32 %s5413_s18, 6  ;;  %s4123_s16 = sshll.u32 %s5196_s9, 10 }
  0x60   : > { %s8309_s8 = scalar_select %p5418_p1, 1, 0 }
  0x61   : > { %s8310_s1 = sld [smem:[#allocation34_spill]]  ;;  %s361_s5 = scalar_lea.vmem [#allocation5], %s3915_s13 }
  0x62   : > { %s368_s22 = sshll.u32 %s361_s5, 4  ;;  %s5431_s25 = scalar_lea.sflag [#allocation6], %s357_s17  ;;  %s5429_s22 = int_to_ptr.vmem [resolvable:$true] %s368_s22 }
  0x63   : > { %p5437_p0 = pneg %p5418_p1 }
  0x65   : > { %s8311_s29 = scalar_select %p5437_p0, 1, 0 }
  0x67   : > { %s5427_s3 = scalar_lea.hbm %s8310_s1, %s4123_s16  ;;  %s4933_s13 = scalar_lea.hbm %s8310_s1, 2048 }
  0x68   : > { %s4928_s19 = scalar_lea.hbm %s5427_s3, 1024  ;;  %p4934_p7 = scmp.lt.u32.totalorder %s5427_s3, %s8310_s1 }
  0x69   : > { %p4929_p12 = scmp.ne.s32.totalorder %s5427_s3, %s4928_s19  ;;  %p4935_p10 = scmp.lt.u32.totalorder %s4933_s13, %s4928_s19 }
  0x6a   : > { %p4937_p11 = scmp.lt.u32.totalorder %s4928_s19, %s5427_s3 }
  0x6b   : > { %p4931_p2 = pnand %p5437_p0, %p4929_p12  ;;  %p4936_p13 = por %p4935_p10, %p4934_p7 }
  0x6d   : > { %p4932_p4 = pneg %p4931_p2  ;;  %p4938_p5 = por %p4937_p11, %p4936_p13 }
  0x6f   : > { %p4939_p9 = pnand %p4938_p5, %p4932_p4 }
  0x71   : > { %4942 = shalt.err (!%p4939_p9)
}
  0x72   : > { %s4943_s17 = scalar_lea.vmem %s5429_s22, 1024  ;;  %s5208_s16 = smov [#allocation5]  }
  0x73   : > { %p4944_p12 = scmp.ne.s32.totalorder %s5429_s22, %s4943_s17  ;;  %s4948_s21 = sshll.u32 %s5208_s16, 4  ;;  %s4949_s21 = int_to_ptr.vmem [resolvable:$false] %s4948_s21 }
  0x74   : > { %s4950_s5 = scalar_lea.vmem %s4949_s21, 2048  ;;  %p4951_p6 = scmp.lt.s32.totalorder %s5429_s22, %s4949_s21 }
  0x75   : > { %p4946_p2 = pnand %p4944_p12, %p5437_p0  ;;  %p4952_p8 = scmp.lt.s32.totalorder %s4950_s5, %s4943_s17 }
  0x77   : > { %p4947_p3 = pneg %p4946_p2  ;;  %p4953_p7 = por %p4952_p8, %p4951_p6 }
  0x79   : > { %p4954_p10 = pnand %p4953_p7, %p4947_p3 }
  0x7b   : > { %4957 = shalt.err (!%p4954_p10)
}
  0x7c   : > { %s8312_s19 = smov 4   ;;  %s8313_s13 = smov 64  }
  0x7d   : > { %4644 = dma.hbm_to_vmem [thread:$0]  (!%p5418_p1), %s5427_s3, 1024, %s5429_s22, %s5431_s25, %s8313_s13, %s8313_s13, %s8312_s19  }
  0x7e   : > { %s5209_s24 = smov [#allocation10]   ;;  %s5210_s16 = smov [#allocation13]  }
  0x7f   : > { %s285_s1 = sshll.u32 %s5209_s24, 4  ;;  %s311_s10 = sshll.u32 %s5210_s16, 4  ;;  %s286_s1 = int_to_ptr.vmem [resolvable:$true] %s285_s1  ;;  %s312_s10 = int_to_ptr.vmem [resolvable:$true] %s311_s10 }
  0x80   : > { %s4958_s5 = scalar_lea.hbm %s8146_s4, 192  ;;  %p8314_p6 = scmp.ne.s32.totalorder %s8299_s23, 0 }
  0x81   : > { %p4959_p3 = scmp.ne.s32.totalorder %s8146_s4, %s4958_s5  ;;  %p4965_p5 = scmp.lt.u32.totalorder %s4958_s5, %s8146_s4 }
  0x83   : > { %p4961_p8 = pnand %p4959_p3, %p8314_p6 }
  0x85   : > { %p4962_p9 = pneg %p4961_p8 }
  0x87   : > { %p4967_p11 = pnand %p4965_p5, %p4962_p9 }
  0x89   : > { %4970 = shalt.err (!%p4967_p11)
}
  0x8a   : > { %s4971_s3 = scalar_lea.vmem %s286_s1, 192  ;;  %p4979_p2 = scmp.lt.s32.totalorder %s286_s1, %s286_s1 }
  0x8b   : > { %p4972_p4 = scmp.ne.s32.totalorder %s286_s1, %s4971_s3  ;;  %p4980_p7 = scmp.lt.s32.totalorder %s4971_s3, %s4971_s3 }
  0x8d   : > { %p4974_p13 = pnand %p4972_p4, %p8314_p6  ;;  %p4981_p10 = por %p4980_p7, %p4979_p2 }
  0x8f   : > { %p4975_p12 = pneg %p4974_p13 }
  0x91   : > { %p4982_p1 = pnand %p4981_p10, %p4975_p12 }
  0x93   : > { %4985 = shalt.err (!%p4982_p1)
}
  0x94   : > { %p8315_p3 = scmp.ne.s32.totalorder %s8297_s15, 0  ;;  %s4986_s20 = scalar_lea.hbm %s8148_s6, 256 }
  0x95   : > { %p4987_p8 = scmp.ne.s32.totalorder %s8148_s6, %s4986_s20  ;;  %p4993_p5 = scmp.lt.u32.totalorder %s4986_s20, %s8148_s6 }
  0x96   : > { %4628 = dma.hbm_to_vmem [thread:$0]  (!%p8315_p3), %s8146_s4, 192, %s286_s1, [#allocation9], %s8313_s13, %s8313_s13, %s8312_s19  }
  0x97   : > { %p4989_p1 = pnand %p4987_p8, %p8314_p6 }
  0x99   : > { %p4990_p9 = pneg %p4989_p1 }
  0x9b   : > { %p4995_p11 = pnand %p4993_p5, %p4990_p9 }
  0x9d   : > { %4998 = shalt.err (!%p4995_p11)
}
  0x9e   : > { %s4999_s5 = scalar_lea.vmem %s312_s10, 256  ;;  %p5007_p2 = scmp.lt.s32.totalorder %s312_s10, %s312_s10 }
  0x9f   : > { %p5000_p4 = scmp.ne.s32.totalorder %s312_s10, %s4999_s5  ;;  %p5008_p7 = scmp.lt.s32.totalorder %s4999_s5, %s4999_s5 }
  0xa1   : > { %p5002_p13 = pnand %p5000_p4, %p8314_p6  ;;  %p5009_p10 = por %p5008_p7, %p5007_p2 }
  0xa3   : > { %p5003_p12 = pneg %p5002_p13 }
  0xa5   : > { %p5010_p0 = pnand %p5009_p10, %p5003_p12 }
  0xa7   : > { %5013 = shalt.err (!%p5010_p0)
}
  0xa8   : > { %4634 = dma.hbm_to_vmem [thread:$0]  (!%p8315_p3), %s8148_s6, 256, %s312_s10, [#allocation12], %s8313_s13, %s8313_s13, %s8312_s19  }
  0xa9   : > { %s5211_s27 = smov [#allocation14]   ;;  %s3913_s22 = sshll.u32 %s5413_s18, 2 }
  0xaa   : > { %s324_s30 = sshll.u32 %s5211_s27, 4  ;;  %s5014_s24 = scalar_lea.hbm %s8149_s7, 512  ;;  %s325_s30 = int_to_ptr.vmem [resolvable:$true] %s324_s30 }
  0xab   : > { %p5015_p0 = scmp.ne.s32.totalorder %s8149_s7, %s5014_s24  ;;  %p5021_p9 = scmp.lt.u32.totalorder %s5014_s24, %s8149_s7 }
  0xad   : > { %p5017_p8 = pnand %p5015_p0, %p8314_p6 }
  0xaf   : > { %p5018_p1 = pneg %p5017_p8 }
  0xb1   : > { %p5023_p5 = pnand %p5021_p9, %p5018_p1 }
  0xb3   : > { %5026 = shalt.err (!%p5023_p5)
}
  0xb4   : > { %s5027_s10 = scalar_lea.vmem %s325_s30, 512  ;;  %p5035_p12 = scmp.lt.s32.totalorder %s325_s30, %s325_s30 }
  0xb5   : > { %p5028_p11 = scmp.ne.s32.totalorder %s325_s30, %s5027_s10  ;;  %p5036_p2 = scmp.lt.s32.totalorder %s5027_s10, %s5027_s10 }
  0xb7   : > { %p5030_p4 = pnand %p5028_p11, %p8314_p6  ;;  %p5037_p7 = por %p5036_p2, %p5035_p12 }
  0xb9   : > { %p5031_p13 = pneg %p5030_p4 }
  0xbb   : > { %p5038_p10 = pnand %p5037_p7, %p5031_p13 }
  0xbd   : > { %5041 = shalt.err (!%p5038_p10)
}
  0xbe   : > { %s8316_s19 = smov 8   ;;  %s8317_s13 = smov 128  }
  0xbf   : > { %4637 = dma.hbm_to_vmem [thread:$0]  (!%p8315_p3), %s8149_s7, 512, %s325_s30, [#allocation15], %s8317_s13, %s8317_s13, %s8316_s19  }
  0xc0   : > { %s3914_s23 = sshll.u32 %s5196_s9, 6  ;;  %s342_s15 = scalar_lea.vmem [#allocation2], %s3913_s22 }
  0xc1   : > { %s5534_s20 = scalar_lea.hbm %s8142_s0, %s3914_s23  ;;  %s350_s24 = sshll.u32 %s342_s15, 4  ;;  %s351_s24 = int_to_ptr.vmem [resolvable:$true] %s350_s24 }
  0xc2   : > { %s339_s16 = scalar_lea.sflag [#allocation3], %s5413_s18  ;;  %s5042_s21 = scalar_lea.hbm %s5534_s20, 64 }
  0xc3   : > { %p5043_p6 = scmp.ne.s32.totalorder %s5534_s20, %s5042_s21  ;;  %p8318_p0 = scmp.ne.s32.totalorder %s8311_s29, 0 }
  0xc4   : > { %s5047_s5 = scalar_lea.hbm %s8142_s0, 128  ;;  %p5048_p1 = scmp.lt.u32.totalorder %s5534_s20, %s8142_s0 }
  0xc5   : > { %p5045_p3 = pnand %p5043_p6, %p8318_p0  ;;  %p5049_p9 = scmp.lt.u32.totalorder %s5047_s5, %s5042_s21 }
  0xc6   : > { %p5051_p11 = scmp.lt.u32.totalorder %s5042_s21, %s5534_s20 }
  0xc7   : > { %p5046_p8 = pneg %p5045_p3  ;;  %p5050_p5 = por %p5049_p9, %p5048_p1 }
  0xc9   : > { %p5052_p4 = por %p5051_p11, %p5050_p5 }
  0xcb   : > { %p5053_p13 = pnand %p5052_p4, %p5046_p8 }
  0xcd   : > { %5056 = shalt.err (!%p5053_p13)
}
  0xce   : > { %s5057_s13 = scalar_lea.vmem %s351_s24, 64  ;;  %s5212_s1 = smov [#allocation2]  }
  0xcf   : > { %p5058_p12 = scmp.ne.s32.totalorder %s351_s24, %s5057_s13  ;;  %s5062_s3 = sshll.u32 %s5212_s1, 4  ;;  %s5063_s3 = int_to_ptr.vmem [resolvable:$false] %s5062_s3 }
  0xd0   : > { %s5064_s27 = scalar_lea.vmem %s5063_s3, 128  ;;  %p5065_p10 = scmp.lt.s32.totalorder %s351_s24, %s5063_s3 }
  0xd1   : > { %p5060_p2 = pnand %p5058_p12, %p8318_p0  ;;  %p5066_p6 = scmp.lt.s32.totalorder %s5064_s27, %s5057_s13 }
  0xd3   : > { %p5061_p7 = pneg %p5060_p2  ;;  %p5067_p3 = por %p5066_p6, %p5065_p10 }
  0xd5   : > { %p5068_p1 = pnand %p5067_p3, %p5061_p7 }
  0xd7   : > { %5071 = shalt.err (!%p5068_p1)
}
  0xd8   : > { %p8319_p9 = scmp.ne.s32.totalorder %s8309_s8, 0  ;;  %s5561_s21 = scalar_lea.hbm %s8144_s2, %s3914_s23 }
  0xd9   : > { %s382_s30 = scalar_lea.vmem [#allocation7], %s3913_s22  ;;  %s5072_s5 = scalar_lea.hbm %s5561_s21, 64 }
  0xda   : > { %4641 = dma.hbm_to_vmem [thread:$0]  (!%p8319_p9), %s5534_s20, 64, %s351_s24, %s339_s16  }
  0xdb   : > { %s389_s17 = sshll.u32 %s382_s30, 4  ;;  %p5073_p8 = scmp.ne.s32.totalorder %s5561_s21, %s5072_s5  ;;  %s390_s17 = int_to_ptr.vmem [resolvable:$true] %s389_s17 }
  0xdc   : > { %s5077_s16 = scalar_lea.hbm %s8144_s2, 128  ;;  %p5078_p4 = scmp.lt.u32.totalorder %s5561_s21, %s8144_s2 }
  0xdd   : > { %p5075_p5 = pnand %p5073_p8, %p8318_p0  ;;  %p5079_p13 = scmp.lt.u32.totalorder %s5077_s16, %s5072_s5 }
  0xde   : > { %p5081_p2 = scmp.lt.u32.totalorder %s5072_s5, %s5561_s21 }
  0xdf   : > { %p5076_p11 = pneg %p5075_p5  ;;  %p5080_p12 = por %p5079_p13, %p5078_p4 }
  0xe1   : > { %p5082_p7 = por %p5081_p2, %p5080_p12 }
  0xe3   : > { %p5083_p10 = pnand %p5082_p7, %p5076_p11 }
  0xe5   : > { %5086 = shalt.err (!%p5083_p10)
}
  0xe6   : > { %s5087_s18 = scalar_lea.vmem %s390_s17, 64  ;;  %s5213_s22 = smov [#allocation7]  }
  0xe7   : > { %p5088_p6 = scmp.ne.s32.totalorder %s390_s17, %s5087_s18  ;;  %s5092_s19 = sshll.u32 %s5213_s22, 4  ;;  %s5093_s19 = int_to_ptr.vmem [resolvable:$false] %s5092_s19 }
  0xe8   : > { %s5094_s13 = scalar_lea.vmem %s5093_s19, 128  ;;  %p5095_p8 = scmp.lt.s32.totalorder %s390_s17, %s5093_s19 }
  0xe9   : > { %p5090_p3 = pnand %p5088_p6, %p8318_p0  ;;  %p5096_p5 = scmp.lt.s32.totalorder %s5094_s13, %s5087_s18 }
  0xeb   : > { %p5091_p1 = pneg %p5090_p3  ;;  %p5097_p9 = por %p5096_p5, %p5095_p8 }
  0xed   : > { %p5098_p4 = pnand %p5097_p9, %p5091_p1 }
  0xef   : > { %5101 = shalt.err (!%p5098_p4)
}
  0xf0   : > { %p8320_p13 = scmp.ne.s32.totalorder %s8309_s8, 0  ;;  %p8321_p11 = scmp.ne.s32.totalorder %s8296_s12, 0 }
  0xf2   : > { %4647 = dma.hbm_to_vmem [thread:$0]  (!%p8320_p13), %s5561_s21, 64, %s390_s17, %s5431_s25  }
  0xf3   : > { %398 = sbr.rel (%p8321_p11) target bundleno = 4872 (0x1308), region = 52 }
  0xfa   : > { %s5586_s29 = sand.u32 1, %s5184_s28   ;;  %p8322_p0 = scmp.ne.s32.totalorder %s8303_s26, 0 }
  0xfb   : > { %s3921_s1 = sshll.u32 %s5586_s29, 2  ;;  %s401_s3 = scalar_lea.sflag [#allocation3], %s5586_s29 }
  0xfc   : > { %s5590_s27 = scalar_lea.vmem [#allocation2], %s3921_s1 }
  0xfd   : > { %5155 = dma.done.wait (%p8322_p0), %s401_s3, 64  }
  0xfe   : > { %5157 = vsyncadd (%p8322_p0), %s401_s3, 4294967232  ;;  %s409_s12 = sand.u32 1, %s5297_s11   ;;  %s3922_s8 = sshll.u32 %s5586_s29, 6 }
  0xff   : > { %s410_s25 = scalar_lea.sflag [#allocation6], %s409_s12  ;;  %s5598_s14 = scalar_lea.vmem [#allocation5], %s3922_s8 }
 0x100   : > { %5159 = dma.done.wait (%p8322_p0), %s410_s25, 1088  }
 0x101   : > { %5161 = vsyncadd (%p8322_p0), %s410_s25, 4294966208  ;;  %s5604_s15 = scalar_lea.vmem [#allocation7], %s3921_s1  ;;  %p8323_p9 = scmp.eq.s32.totalorder %s5297_s11, 0 }
 0x103   : > { %5163 = dma.done.wait (%p8323_p9), [#allocation9], 384   ;;  %p8324_p12 = pmov %p8323_p9 }
 0x104   : > { %p8325_p2 = pmov %p8323_p9 }
 0x105   : > { %5165 = vsyncadd (%p8324_p12), [#allocation9], 4294966912 }
 0x106   : > { %5167 = dma.done.wait (%p8325_p2), [#allocation12], 640   ;;  %p8326_p7 = pmov %p8325_p2 }
 0x107   : > { %p8327_p10 = pmov %p8325_p2 }
 0x108   : > { %5169 = vsyncadd (%p8326_p7), [#allocation12], 4294966656 }
 0x109   : > { %5171 = dma.done.wait (%p8327_p10), [#allocation15], 512   ;;  %p8328_p6 = pmov %p8325_p2 }
 0x10a   : > { %vm8180_vm0 = vcmask 1043456   ;;  %v486_v0 = vld [vmem:[%s5590_s27] sm:$0xf]  ;;  %v487_v1 = vld [vmem:[%s5598_s14] sm:$0xff]   ;;  %vm8181_vm1 = vcmask 64512   ;;  %v489_v2 = vld [vmem:[%s5598_s14 + $0x8] sm:$0xff]  }
 0x10b   : > { %5173 = vsyncadd (%p8328_p6), [#allocation15], 4294966784  ;;  %4576 = vmatprep.subr.msk.bf16.mxu0 %vm8180_vm0, %v486_v0  ;;  %v571_v3 = vsel %vm8180_vm0, %v486_v0, 0  ;;  %v491_v4 = vld [vmem:[%s5598_s14 + $0x10] sm:$0xff]   ;;  %4577 = vmatprep.subr.msk.bf16.mxu1 %vm8180_vm0, %v486_v0  ;;  %v670_v5 = vunpack.c.l.bf16 %v487_v1  ;;  %v672_v6 = vunpack.c.l.bf16 %v489_v2  ;;  %v671_v8 = vunpack.c.h.bf16 %v487_v1  ;;  %v493_v13 = vld [vmem:[%s5598_s14 + $0x18] sm:$0xff]   ;;  %s8490_s11 = sld [smem:[#allocation25_spill]] }
 0x10c   : > { %4281 = vmatpush3.bf16.msra.mxu0 %v571_v3  ;;  %4299 = vmatpush3.bf16.msra.mxu1 %v571_v3  ;;  %v673_v9 = vunpack.c.h.bf16 %v489_v2  ;;  %v674_v10 = vunpack.c.l.bf16 %v491_v4  ;;  %v675_v12 = vunpack.c.h.bf16 %v491_v4  ;;  %v495_v17 = vld [vmem:[%s5598_s14 + $0x20] sm:$0xff]   ;;  %v676_v21 = vunpack.c.l.bf16 %v493_v13  ;;  %v497_v31 = vld [vmem:[%s5598_s14 + $0x28] sm:$0xff]   ;;  %v499_v32 = vld [vmem:[%s5598_s14 + $0x30] sm:$0xff]   ;;  %s3929_s26 = sshll.u32 %s5586_s29, 4  ;;  %s8491_s21 = sld [smem:[#allocation28_spill]] }
 0x10d   : > { %4282 = vmatprep.mubr.msk.bf16.mxu0 %vm8181_vm1, %v487_v1  ;;  %v686_v7 = vmul.f32 %v670_v5, %v670_v5  ;;  %v688_v11 = vmul.f32 %v672_v6, %v672_v6  ;;  %v687_v15 = vmul.f32 %v671_v8, %v671_v8  ;;  %v677_v24 = vunpack.c.h.bf16 %v493_v13  ;;  %v501_v45 = vld [vmem:[%s5598_s14 + $0x38] sm:$0xff]   ;;  %s484_s17 = scalar_lea.vmem [#allocation16], %s3929_s26  ;;  %s8492_s16 = sld [smem:[#allocation37_spill]] }
 0x10e   : > { %v689_v16 = vmul.f32 %v673_v9, %v673_v9  ;;  %v690_v20 = vmul.f32 %v674_v10, %v674_v10  ;;  %v691_v23 = vmul.f32 %v675_v12, %v675_v12  ;;  %v692_v26 = vmul.f32 %v676_v21, %v676_v21  ;;  %v4737_v63 = vld [vmem:[#allocation10] sm:$0xff]   ;;  %v4738_v0 = vld [vmem:[#allocation10 + $0x8] ss:$0 sps:$4 sm:$0x77]   ;;  %s3729_s5 = sshll.u32 %s484_s17, 4  ;;  %s3715_s23 = scalar_lea.sflag [#allocation4], %s5586_s29  ;;  %s8093_s5 = int_to_ptr.vmem [resolvable:$true] %s3729_s5 }
 0x10f   : > { %4283 = vmatmul.mubr.msk.bf16.vlgmr.msra.gmra.mrb[0].mxu0 %vm8181_vm1, %v489_v2  ;;  %v702_v14 = vsel %vm8181_vm1, %v686_v7, 0.0  ;;  %v708_v18 = vsel %vm8181_vm1, %v688_v11, 0.0  ;;  %v705_v19 = vsel %vm8181_vm1, %v687_v15, 0.0  ;;  %v678_v27 = vunpack.c.l.bf16 %v495_v17  ;;  %4300 = vmatprep.mubr.msk.bf16.mxu1 %vm8181_vm1, %v4737_v63  ;;  %s5102_s18 = scalar_lea.vmem %s8093_s5, 256  ;;  %s5218_s22 = smov [#allocation16]  }
 0x110   : > { %4286 = vmatprep.mubr.msk.bf16.mxu0 %vm8181_vm1, %v491_v4  ;;  %703 = vadd.xlane.f32.xlu0 %v702_v14  ;;  %v711_v22 = vsel %vm8181_vm1, %v689_v16, 0.0  ;;  %v714_v25 = vsel %vm8181_vm1, %v690_v20, 0.0  ;;  %v717_v28 = vsel %vm8181_vm1, %v691_v23, 0.0  ;;  %v693_v29 = vmul.f32 %v677_v24, %v677_v24  ;;  %p5103_p3 = scmp.ne.s32.totalorder %s8093_s5, %s5102_s18  ;;  %s5106_s19 = sshll.u32 %s5218_s22, 4  ;;  %s5107_s19 = int_to_ptr.vmem [resolvable:$false] %s5106_s19 }
 0x111   : > { %709 = vadd.xlane.f32.xlu1 %v708_v18  ;;  %v679_v30 = vunpack.c.h.bf16 %v495_v17  ;;  %v720_v33 = vsel %vm8181_vm1, %v692_v26, 0.0  ;;  %v694_v34 = vmul.f32 %v678_v27, %v678_v27  ;;  %v680_v35 = vunpack.c.l.bf16 %v497_v31  ;;  %4301 = vmatmul.mubr.msk.bf16.vlgmr.msra.gmra.mrb[0].mxu1 %vm8181_vm1, %v4738_v0  ;;  %s4128_s30 = sshll.u32 %s8490_s11, 8  ;;  %s5108_s13 = scalar_lea.vmem %s5107_s19, 512 }
 0x112   : > { %v723_v36 = vsel %vm8181_vm1, %v693_v29, 0.0  ;;  %v681_v38 = vunpack.c.h.bf16 %v497_v31  ;;  %v682_v41 = vunpack.c.l.bf16 %v499_v32  ;;  %v683_v44 = vunpack.c.h.bf16 %v499_v32  ;;  %p8493_p1 = scmp.ne.s32.totalorder %s8491_s21, 0  ;;  %p5109_p4 = scmp.lt.s32.totalorder %s8093_s5, %s5107_s19 }
 0x113   : > { %v695_v37 = vmul.f32 %v679_v30, %v679_v30  ;;  %v726_v39 = vsel %vm8181_vm1, %v694_v34, 0.0  ;;  %v696_v40 = vmul.f32 %v680_v35, %v680_v35  ;;  %v684_v48 = vunpack.c.l.bf16 %v501_v45  ;;  %s8091_s10 = scalar_lea.hbm %s8492_s16, %s4128_s30  ;;  %p5110_p13 = scmp.lt.s32.totalorder %s5108_s13, %s5102_s18 }
 0x114   : > { %706 = vadd.xlane.f32.xlu0 %v705_v19  ;;  %v697_v43 = vmul.f32 %v681_v38, %v681_v38  ;;  %v698_v47 = vmul.f32 %v682_v41, %v682_v41  ;;  %v699_v50 = vmul.f32 %v683_v44, %v683_v44  ;;  %v685_v51 = vunpack.c.h.bf16 %v501_v45  ;;  %p5104_p8 = pnand %p5103_p3, %p8493_p1 }
 0x115   : > { %712 = vadd.xlane.f32.xlu1 %v711_v22  ;;  %v729_v42 = vsel %vm8181_vm1, %v695_v37, 0.0  ;;  %v732_v46 = vsel %vm8181_vm1, %v696_v40, 0.0  ;;  %v700_v53 = vmul.f32 %v684_v48, %v684_v48  ;;  %v8264_v58 = vmov 0.0   ;;  %p5111_p11 = por %p5110_p13, %p5109_p4 }
 0x116   : > { %v735_v49 = vsel %vm8181_vm1, %v697_v43, 0.0  ;;  %v738_v52 = vsel %vm8181_vm1, %v698_v47, 0.0  ;;  %v741_v54 = vsel %vm8181_vm1, %v699_v50, 0.0  ;;  %v701_v55 = vmul.f32 %v685_v51, %v685_v51  ;;  %4304 = vmatprep.subr.bf16.mxu0 %v8264_v58  ;;  %p5105_p5 = pneg %p5104_p8 }
 0x117   : > { %4287 = vmatmul.mubr.msk.bf16.gmra.mrb[4].mxu0 %vm8181_vm1, %v493_v13  ;;  %v744_v56 = vsel %vm8181_vm1, %v700_v53, 0.0  ;;  %vm8178_vm2 = vmmov 0  }
 0x118   : > { %4290 = vmatprep.mubr.msk.bf16.mxu0 %vm8181_vm1, %v495_v17  ;;  %715 = vadd.xlane.f32.xlu0 %v714_v25  ;;  %v747_v57 = vsel %vm8181_vm1, %v701_v55, 0.0  ;;  %p5112_p0 = pnand %p5111_p11, %p5105_p5 }
 0x119   : > { %718 = vadd.xlane.f32.xlu1 %v717_v28 }
 0x11c   : > { %721 = vadd.xlane.f32.xlu0 %v720_v33 }
 0x11d   : > { %724 = vadd.xlane.f32.xlu1 %v723_v36 }
 0x11f   : > { %4291 = vmatmul.mubr.msk.bf16.gmra.mrb[8].mxu0 %vm8181_vm1, %v497_v31 }
 0x120   : > { %4294 = vmatprep.mubr.msk.bf16.mxu0 %vm8181_vm1, %v499_v32  ;;  %727 = vadd.xlane.f32.xlu0 %v726_v39 }
 0x121   : > { %730 = vadd.xlane.f32.xlu1 %v729_v42 }
 0x124   : > { %733 = vadd.xlane.f32.xlu0 %v732_v46 }
 0x125   : > { %736 = vadd.xlane.f32.xlu1 %v735_v49 }
 0x127   : > { %4295 = vmatmul.mubr.msk.bf16.gmra.mrb[12].mxu0 %vm8181_vm1, %v501_v45 }
 0x128   : > { %739 = vadd.xlane.f32.xlu0 %v738_v52  ;;  %4320 = vmatprep.mubr.msk.bf16.mxu0 %vm8178_vm2, %v8264_v58 }
 0x129   : > { %742 = vadd.xlane.f32.xlu1 %v741_v54 }
 0x12c   : > { %745 = vadd.xlane.f32.xlu0 %v744_v56 }
 0x12d   : > { %748 = vadd.xlane.f32.xlu1 %v747_v57 }
 0x19d   : > { %v704_v59 = vpop.xlane.xlu0 %703 }
 0x19e   : > { %v710_v60 = vpop.xlane.xlu1 %709 }
 0x1a1   : > { %v707_v61 = vpop.xlane.xlu0 %706 }
 0x1a2   : > { %v713_v62 = vpop.xlane.xlu1 %712 }
 0x1a5   : > { %v716_v1 = vpop.xlane.xlu0 %715 }
 0x1a6   : > { %v719_v2 = vpop.xlane.xlu1 %718 }
 0x1a9   : > { %v722_v4 = vpop.xlane.xlu0 %721 }
 0x1aa   : > { %v725_v7 = vpop.xlane.xlu1 %724 }
 0x1ad   : > { %v728_v9 = vpop.xlane.xlu0 %727 }
 0x1ae   : > { %v731_v11 = vpop.xlane.xlu1 %730 }
 0x1b1   : > { %v734_v15 = vpop.xlane.xlu0 %733 }
 0x1b2   : > { %v737_v16 = vpop.xlane.xlu1 %736 }
 0x1b5   : > { %v740_v21 = vpop.xlane.xlu0 %739 }
 0x1b6   : > { %v743_v29 = vpop.xlane.xlu1 %742 }
 0x1b9   : > { %v746_v43 = vpop.xlane.xlu0 %745 }
 0x1ba   : > { %v749_v54 = vpop.xlane.xlu1 %748 }
 0x1e2   : > { %v4284_v3 = vpop.f32.mrb[0].mxu0 }
 0x1e3   : > { %v607_v5 = vpop.f32.mrb[1].mxu0  ;;  %v752_v25 = vmul.f32 2.0, %v4284_v3 }
 0x1e4   : > { %v4285_v6 = vpop.f32.mrb[2].mxu0  ;;  %v750_v26 = vmul.f32 2.0, %v607_v5 }
 0x1e5   : > { %v610_v8 = vpop.f32.mrb[3].mxu0  ;;  %v753_v30 = vmul.f32 2.0, %v4285_v6  ;;  %v5665_v38 = vsub.f32 %v752_v25, %v710_v60 }
 0x1e6   : > { %v751_v33 = vmul.f32 2.0, %v610_v8  ;;  %v5667_v39 = vsub.f32 %v750_v26, %v704_v59 }
 0x1e7   : > { %v5673_v44 = vsub.f32 %v753_v30, %v713_v62 }
 0x1e8   : > { %v5679_v49 = vsub.f32 %v751_v33, %v707_v61 }
 0x1ea   : > { %v4288_v10 = vpop.f32.mrb[4].mxu0 }
 0x1eb   : > { %v623_v12 = vpop.f32.mrb[5].mxu0  ;;  %v756_v22 = vmul.f32 2.0, %v4288_v10 }
 0x1ec   : > { %v4289_v13 = vpop.f32.mrb[6].mxu0  ;;  %v754_v19 = vmul.f32 2.0, %v623_v12  ;;  %v782_v12 = vlaneseq }
 0x1ed   : > { %v626_v14 = vpop.f32.mrb[7].mxu0  ;;  %v757_v23 = vmul.f32 2.0, %v4289_v13  ;;  %v5661_v36 = vsub.f32 %v756_v22, %v722_v4 }
 0x1ee   : > { %v755_v27 = vmul.f32 2.0, %v626_v14  ;;  %v5659_v34 = vsub.f32 %v754_v19, %v716_v1  ;;  %v783_v14 = vshrl.u32 %v782_v12, 7 }
 0x1ef   : > { %v5663_v37 = vsub.f32 %v757_v23, %v725_v7  ;;  %v912_v55 = vmax.f32 %v5665_v38, %v5661_v36 }
 0x1f0   : > { %v5669_v40 = vsub.f32 %v755_v27, %v719_v2  ;;  %v910_v50 = vmax.f32 %v5667_v39, %v5659_v34  ;;  %v785_v19 = vadd.s32 16, %v783_v14  ;;  %v788_v22 = vadd.s32 40, %v783_v14 }
 0x1f1   : > { %v913_v56 = vmax.f32 %v5673_v44, %v5663_v37  ;;  %v789_v23 = vadd.s32 48, %v783_v14  ;;  %v791_v25 = vadd.s32 64, %v783_v14  ;;  %v792_v27 = vadd.s32 72, %v783_v14 }
 0x1f2   : > { %v4292_v17 = vpop.f32.mrb[8].mxu0  ;;  %v911_v61 = vmax.f32 %v5679_v49, %v5669_v40  ;;  %v795_v30 = vadd.s32 96, %v783_v14  ;;  %v798_v33 = vadd.s32 120, %v783_v14 }
 0x1f3   : > { %v639_v18 = vpop.f32.mrb[9].mxu0  ;;  %v760_v31 = vmul.f32 2.0, %v4292_v17  ;;  %v784_v17 = vadd.s32 8, %v783_v14 }
 0x1f4   : > { %v4293_v20 = vpop.f32.mrb[10].mxu0  ;;  %v758_v28 = vmul.f32 2.0, %v639_v18  ;;  %v5761_v12 = vcvt.s32.f32 %v798_v33 }
 0x1f5   : > { %v642_v24 = vpop.f32.mrb[11].mxu0  ;;  %v761_v32 = vmul.f32 2.0, %v4293_v20  ;;  %v5675_v45 = vsub.f32 %v760_v31, %v734_v15  ;;  %v786_v20 = vadd.s32 24, %v783_v14  ;;  %v796_v31 = vadd.s32 104, %v783_v14 }
 0x1f6   : > { %v759_v35 = vmul.f32 2.0, %v642_v24  ;;  %v5671_v41 = vsub.f32 %v758_v28, %v728_v9  ;;  %v790_v24 = vadd.s32 56, %v783_v14  ;;  %v793_v28 = vadd.s32 80, %v783_v14 }
 0x1f7   : > { %v5677_v46 = vsub.f32 %v761_v32, %v737_v16  ;;  %v916_v1 = vmax.f32 %v912_v55, %v5675_v45  ;;  %v797_v32 = vadd.s32 112, %v783_v14 }
 0x1f8   : > { %v5683_v51 = vsub.f32 %v759_v35, %v731_v11  ;;  %v914_v62 = vmax.f32 %v910_v50, %v5671_v41  ;;  %v5721_v55 = vcvt.s32.f32 %v790_v24 }
 0x1f9   : > { %v917_v2 = vmax.f32 %v913_v56, %v5677_v46  ;;  %v5723_v56 = vcvt.s32.f32 %v791_v25 }
 0x1fa   : > { %v4296_v42 = vpop.f32.mrb[12].mxu0  ;;  %v915_v4 = vmax.f32 %v911_v61, %v5683_v51 }
 0x1fb   : > { %v764_v47 = vmul.f32 2.0, %v4296_v42  ;;  %v655_v48 = vpop.f32.mrb[13].mxu0  ;;  %v5707_v42 = vcvt.s32.f32 %v783_v14 }
 0x1fc   : > { %v762_v52 = vmul.f32 2.0, %v655_v48  ;;  %v4297_v53 = vpop.f32.mrb[14].mxu0  ;;  %v5713_v48 = vcvt.s32.f32 %v786_v20 }
 0x1fd   : > { %v5689_v57 = vsub.f32 %v764_v47, %v746_v43  ;;  %v765_v59 = vmul.f32 2.0, %v4297_v53  ;;  %v658_v60 = vpop.f32.mrb[15].mxu0  ;;  %v5709_v43 = vcvt.s32.f32 %v784_v17  ;;  %v5711_v47 = vcvt.s32.f32 %v785_v19 }
 0x1fe   : > { %v5694_v63 = vsub.f32 %v762_v52, %v740_v21  ;;  %v763_v0 = vmul.f32 2.0, %v658_v60  ;;  %v787_v21 = vadd.s32 32, %v783_v14  ;;  %v5717_v52 = vcvt.s32.f32 %v788_v22 }
 0x1ff   : > { %v5698_v3 = vsub.f32 %v765_v59, %v749_v54  ;;  %v920_v7 = vmax.f32 %v916_v1, %v5689_v57  ;;  %v5719_v53 = vcvt.s32.f32 %v789_v23  ;;  %v5725_v59 = vcvt.s32.f32 %v792_v27 }
 0x200   : > { %v918_v5 = vmax.f32 %v914_v62, %v5694_v63  ;;  %v5702_v6 = vsub.f32 %v763_v0, %v743_v29  ;;  %v794_v29 = vadd.s32 88, %v783_v14  ;;  %v5715_v50 = vcvt.s32.f32 %v787_v21 }
 0x201   : > { %v921_v8 = vmax.f32 %v917_v2, %v5698_v3  ;;  %v5727_v60 = vcvt.s32.f32 %v793_v28 }
 0x202   : > { %v919_v9 = vmax.f32 %v915_v4, %v5702_v6  ;;  %v5729_v61 = vcvt.s32.f32 %v794_v29 }
 0x203   : > { %v923_v10 = vmax.f32 %v920_v7, %v921_v8 }
 0x204   : > { %v922_v11 = vmax.f32 %v918_v5, %v919_v9  ;;  %v5755_v9 = vcvt.s32.f32 %v795_v30 }
 0x206   : > { %v924_v13 = vmax.f32 %v922_v11, %v923_v10  ;;  %v5757_v10 = vcvt.s32.f32 %v796_v31  ;;  %v5759_v11 = vcvt.s32.f32 %v797_v32 }
 0x208   : > { %v925_v15 = vrot.slane %v924_v13, 4 }
 0x20a   : > { %v926_v16 = vmax.f32 %v924_v13, %v925_v15 }
 0x20c   : > { %v927_v18 = vrot.slane %v926_v16, 2 }
 0x20e   : > { %v928_v26 = vmax.f32 %v926_v16, %v927_v18 }
 0x210   : > { %v929_v35 = vrot.slane %v928_v26, 1 }
 0x212   : > { %v930_v54 = vmax.f32 %v928_v26, %v929_v35 }
 0x214   : > { %vm931_vm3 = vcmp.eq.f32.partialorder %v5667_v39, %v930_v54  ;;  %vm932_vm4 = vcmp.eq.f32.partialorder %v5679_v49, %v930_v54  ;;  %vm933_vm5 = vcmp.eq.f32.partialorder %v5665_v38, %v930_v54  ;;  %vm934_vm6 = vcmp.eq.f32.partialorder %v5673_v44, %v930_v54 }
 0x215   : > { %vm935_vm7 = vcmp.eq.f32.partialorder %v5659_v34, %v930_v54  ;;  %vm936_vm8 = vcmp.eq.f32.partialorder %v5669_v40, %v930_v54  ;;  %vm937_vm9 = vcmp.eq.f32.partialorder %v5661_v36, %v930_v54  ;;  %vm938_vm10 = vcmp.eq.f32.partialorder %v5663_v37, %v930_v54 }
 0x216   : > { %vm939_vm11 = vcmp.eq.f32.partialorder %v5671_v41, %v930_v54  ;;  %vm940_vm12 = vcmp.eq.f32.partialorder %v5683_v51, %v930_v54  ;;  %vm942_vm13 = vcmp.eq.f32.partialorder %v5677_v46, %v930_v54  ;;  %vm943_vm14 = vcmp.eq.f32.partialorder %v5694_v63, %v930_v54 }
 0x217   : > { %vm944_vm15 = vcmp.eq.f32.partialorder %v5702_v6, %v930_v54  ;;  %vm945_vm2 = vcmp.eq.f32.partialorder %v5689_v57, %v930_v54  ;;  %vm946_vm0 = vcmp.eq.f32.partialorder %v5698_v3, %v930_v54  ;;  %v947_v62 = vsel %vm931_vm3, %v5707_v42, 128.0 }
 0x218   : > { %v948_v0 = vsel %vm932_vm4, %v5709_v43, 128.0  ;;  %v949_v1 = vsel %vm933_vm5, %v5711_v47, 128.0  ;;  %v950_v2 = vsel %vm934_vm6, %v5713_v48, 128.0  ;;  %v951_v4 = vsel %vm935_vm7, %v5715_v50, 128.0 }
 0x219   : > { %v952_v5 = vsel %vm936_vm8, %v5717_v52, 128.0  ;;  %v953_v7 = vsel %vm937_vm9, %v5719_v53, 128.0  ;;  %v954_v8 = vsel %vm938_vm10, %v5721_v55, 128.0  ;;  %vm941_vm1 = vcmp.eq.f32.partialorder %v5675_v45, %v930_v54 }
 0x21a   : > { %v963_v13 = vmin.f32 %v947_v62, %v951_v4  ;;  %v964_v14 = vmin.f32 %v948_v0, %v952_v5  ;;  %v965_v15 = vmin.f32 %v949_v1, %v953_v7  ;;  %v966_v16 = vmin.f32 %v950_v2, %v954_v8 }
 0x21b   : > { %v955_v17 = vsel %vm939_vm11, %v5723_v56, 128.0  ;;  %v956_v18 = vsel %vm940_vm12, %v5725_v59, 128.0  ;;  %v957_v19 = vsel %vm941_vm1, %v5727_v60, 128.0  ;;  %v958_v20 = vsel %vm942_vm13, %v5729_v61, 128.0 }
 0x21c   : > { %v967_v21 = vmin.f32 %v963_v13, %v955_v17  ;;  %v968_v22 = vmin.f32 %v964_v14, %v956_v18  ;;  %v969_v23 = vmin.f32 %v965_v15, %v957_v19  ;;  %v970_v24 = vmin.f32 %v966_v16, %v958_v20 }
 0x21d   : > { %v959_v25 = vsel %vm943_vm14, %v5755_v9, 128.0  ;;  %v960_v26 = vsel %vm944_vm15, %v5757_v10, 128.0  ;;  %v961_v27 = vsel %vm945_vm2, %v5759_v11, 128.0  ;;  %v962_v28 = vsel %vm946_vm0, %v5761_v12, 128.0 }
 0x21e   : > { %v971_v29 = vmin.f32 %v967_v21, %v959_v25  ;;  %v972_v30 = vmin.f32 %v968_v22, %v960_v26  ;;  %v973_v31 = vmin.f32 %v969_v23, %v961_v27  ;;  %v974_v32 = vmin.f32 %v970_v24, %v962_v28 }
 0x21f   : > { %v8246_v14 = vmov 1.0|1.0  }
 0x220   : > { %v975_v33 = vmin.f32 %v971_v29, %v972_v30  ;;  %v976_v35 = vmin.f32 %v973_v31, %v974_v32 }
 0x222   : > { %v977_v62 = vmin.f32 %v975_v33, %v976_v35  ;;  %v503_v33 = vld [vmem:[%s5604_s15] sm:$0xf] }
 0x224   : > { %v978_v0 = vrot.slane %v977_v62, 4 }
 0x226   : > { %v979_v1 = vmin.f32 %v977_v62, %v978_v0 }
 0x228   : > { %v980_v2 = vrot.slane %v979_v1, 2 }
 0x22a   : > { %v981_v4 = vmin.f32 %v979_v1, %v980_v2 }
 0x22c   : > { %v982_v5 = vrot.slane %v981_v4, 1 }
 0x22e   : > { %v5785_v7 = vmin.f32 %v981_v4, %v982_v5 }
 0x230   : > { %vm999_vm1 = vcmp.eq.f32.partialorder %v5761_v12, %v5785_v7  ;;  %vm984_vm0 = vcmp.eq.f32.partialorder %v5707_v42, %v5785_v7  ;;  %vm985_vm2 = vcmp.eq.f32.partialorder %v5709_v43, %v5785_v7  ;;  %vm986_vm3 = vcmp.eq.f32.partialorder %v5711_v47, %v5785_v7 }
 0x231   : > { %v5799_v54 = vsel %vm999_vm1, -1e+30, %v5698_v3  ;;  %v5802_v8 = vsel %vm984_vm0, -1e+30, %v5667_v39  ;;  %v5805_v13 = vsel %vm985_vm2, -1e+30, %v5679_v49  ;;  %vm3950_vm4 = vmpackc.low %vm985_vm2, %vm984_vm0  ;;  %vm987_vm5 = vcmp.eq.f32.partialorder %v5713_v48, %v5785_v7 }
 0x232   : > { %4305 = vmatpush3.bf16.msk.msra.mxu0 %vm3950_vm4, %v8246_v14  ;;  %v5814_v15 = vsel %vm986_vm3, -1e+30, %v5665_v38  ;;  %v5820_v39 = vsel %vm987_vm5, -1e+30, %v5673_v44  ;;  %vm988_vm6 = vcmp.eq.f32.partialorder %v5715_v50, %v5785_v7  ;;  %vm989_vm7 = vcmp.eq.f32.partialorder %v5717_v52, %v5785_v7  ;;  %vm3952_vm10 = vmpackc.low %vm987_vm5, %vm986_vm3 }
 0x233   : > { %4306 = vmatprep.subr.bf16.mxu0 %v8264_v58  ;;  %v5831_v38 = vsel %vm988_vm6, -1e+30, %v5659_v34  ;;  %v5837_v44 = vsel %vm989_vm7, -1e+30, %v5669_v40  ;;  %vm990_vm8 = vcmp.eq.f32.partialorder %v5719_v53, %v5785_v7  ;;  %vm991_vm9 = vcmp.eq.f32.partialorder %v5721_v55, %v5785_v7  ;;  %vm3954_vm2 = vmpackc.low %vm989_vm7, %vm988_vm6 }
 0x234   : > { %v1302_v49 = vmax.f32 %v5802_v8, %v5831_v38  ;;  %v1303_v3 = vmax.f32 %v5805_v13, %v5837_v44  ;;  %v5851_v34 = vsel %vm990_vm8, -1e+30, %v5661_v36  ;;  %v5857_v40 = vsel %vm991_vm9, -1e+30, %v5663_v37  ;;  %vm3956_vm4 = vmpackc.low %vm991_vm9, %vm990_vm8 }
 0x235   : > { %v1304_v16 = vmax.f32 %v5814_v15, %v5851_v34  ;;  %v1305_v36 = vmax.f32 %v5820_v39, %v5857_v40  ;;  %vm992_vm11 = vcmp.eq.f32.partialorder %v5723_v56, %v5785_v7  ;;  %vm993_vm12 = vcmp.eq.f32.partialorder %v5725_v59, %v5785_v7 }
 0x236   : > { %4307 = vmatpush3.bf16.msk.msra.mxu0 %vm3952_vm10, %v8246_v14  ;;  %v5878_v37 = vsel %vm992_vm11, -1e+30, %v5671_v41  ;;  %v5884_v17 = vsel %vm993_vm12, -1e+30, %v5683_v51  ;;  %vm994_vm13 = vcmp.eq.f32.partialorder %v5727_v60, %v5785_v7  ;;  %vm995_vm14 = vcmp.eq.f32.partialorder %v5729_v61, %v5785_v7  ;;  %vm3958_vm5 = vmpackc.low %vm993_vm12, %vm992_vm11 }
 0x237   : > { %4308 = vmatprep.subr.bf16.mxu0 %v8264_v58  ;;  %v1306_v18 = vmax.f32 %v1302_v49, %v5878_v37  ;;  %v1307_v19 = vmax.f32 %v1303_v3, %v5884_v17  ;;  %v5897_v41 = vsel %vm994_vm13, -1e+30, %v5675_v45  ;;  %v5903_v51 = vsel %vm995_vm14, -1e+30, %v5677_v46  ;;  %vm3960_vm6 = vmpackc.low %vm995_vm14, %vm994_vm13 }
 0x238   : > { %v1308_v20 = vmax.f32 %v1304_v16, %v5897_v41  ;;  %v1309_v21 = vmax.f32 %v1305_v36, %v5903_v51  ;;  %vm996_vm15 = vcmp.eq.f32.partialorder %v5755_v9, %v5785_v7  ;;  %vm997_vm0 = vcmp.eq.f32.partialorder %v5757_v10, %v5785_v7 }
 0x239   : > { %v5921_v45 = vsel %vm996_vm15, -1e+30, %v5694_v63  ;;  %v5927_v46 = vsel %vm997_vm0, -1e+30, %v5702_v6  ;;  %vm998_vm3 = vcmp.eq.f32.partialorder %v5759_v11, %v5785_v7  ;;  %vm3962_vm7 = vmpackc.low %vm997_vm0, %vm996_vm15 }
 0x23a   : > { %4309 = vmatpush3.bf16.msk.msra.mxu0 %vm3954_vm2, %v8246_v14  ;;  %v1313_v22 = vmax.f32 %v1309_v21, %v5799_v54  ;;  %v1310_v23 = vmax.f32 %v1306_v18, %v5921_v45  ;;  %v1311_v24 = vmax.f32 %v1307_v19, %v5927_v46  ;;  %v5939_v63 = vsel %vm998_vm3, -1e+30, %v5689_v57  ;;  %vm3964_vm8 = vmpackc.low %vm999_vm1, %vm998_vm3 }
 0x23b   : > { %4310 = vmatprep.subr.bf16.mxu0 %v8264_v58  ;;  %v1312_v6 = vmax.f32 %v1308_v20, %v5939_v63 }
 0x23c   : > { %v1314_v25 = vmax.f32 %v1310_v23, %v1311_v24 }
 0x23d   : > { %v1315_v26 = vmax.f32 %v1312_v6, %v1313_v22 }
 0x23e   : > { %4311 = vmatpush3.bf16.msk.msra.mxu0 %vm3956_vm4, %v8246_v14 }
 0x23f   : > { %4312 = vmatprep.subr.bf16.mxu0 %v8264_v58  ;;  %v1316_v27 = vmax.f32 %v1314_v25, %v1315_v26 }
 0x241   : > { %v1317_v57 = vrot.slane %v1316_v27, 4 }
 0x242   : > { %4313 = vmatpush3.bf16.msk.msra.mxu0 %vm3958_vm5, %v8246_v14 }
 0x243   : > { %4314 = vmatprep.subr.bf16.mxu0 %v8264_v58  ;;  %v1318_v28 = vmax.f32 %v1316_v27, %v1317_v57 }
 0x245   : > { %v1319_v29 = vrot.slane %v1318_v28, 2 }
 0x246   : > { %4315 = vmatpush3.bf16.msk.msra.mxu0 %vm3960_vm6, %v8246_v14 }
 0x247   : > { %4316 = vmatprep.subr.bf16.mxu0 %v8264_v58  ;;  %v1320_v30 = vmax.f32 %v1318_v28, %v1319_v29 }
 0x249   : > { %v1321_v31 = vrot.slane %v1320_v30, 1 }
 0x24a   : > { %4317 = vmatpush3.bf16.msk.msra.mxu0 %vm3962_vm7, %v8246_v14 }
 0x24b   : > { %4318 = vmatprep.subr.bf16.mxu0 %v8264_v58  ;;  %v1322_v32 = vmax.f32 %v1320_v30, %v1321_v31 }
 0x24d   : > { %vm1323_vm9 = vcmp.eq.f32.partialorder %v5802_v8, %v1322_v32  ;;  %vm1324_vm10 = vcmp.eq.f32.partialorder %v5805_v13, %v1322_v32  ;;  %vm1325_vm11 = vcmp.eq.f32.partialorder %v5814_v15, %v1322_v32  ;;  %vm1326_vm12 = vcmp.eq.f32.partialorder %v5820_v39, %v1322_v32 }
 0x24e   : > { %4319 = vmatpush3.bf16.msk.msra.mxu0 %vm3964_vm8, %v8246_v14  ;;  %vm1327_vm13 = vcmp.eq.f32.partialorder %v5831_v38, %v1322_v32  ;;  %vm1328_vm14 = vcmp.eq.f32.partialorder %v5837_v44, %v1322_v32  ;;  %vm1329_vm15 = vcmp.eq.f32.partialorder %v5851_v34, %v1322_v32  ;;  %vm1330_vm0 = vcmp.eq.f32.partialorder %v5857_v40, %v1322_v32 }
 0x24f   : > { %vm1331_vm1 = vcmp.eq.f32.partialorder %v5878_v37, %v1322_v32  ;;  %vm1332_vm2 = vcmp.eq.f32.partialorder %v5884_v17, %v1322_v32  ;;  %vm1333_vm3 = vcmp.eq.f32.partialorder %v5897_v41, %v1322_v32  ;;  %vm1334_vm4 = vcmp.eq.f32.partialorder %v5903_v51, %v1322_v32 }
 0x250   : > { %vm1337_vm5 = vcmp.eq.f32.partialorder %v5939_v63, %v1322_v32  ;;  %v1341_v35 = vsel %vm1325_vm11, %v5711_v47, 128.0  ;;  %v1339_v62 = vsel %vm1323_vm9, %v5707_v42, 128.0  ;;  %v1340_v0 = vsel %vm1324_vm10, %v5709_v43, 128.0 }
 0x251   : > { %v1342_v1 = vsel %vm1326_vm12, %v5713_v48, 128.0  ;;  %v1345_v2 = vsel %vm1329_vm15, %v5719_v53, 128.0  ;;  %4321 = vmatmul.mubr.bf16.vlgmr.msra.gmra.mrb[16].mxu0 %v503_v33  ;;  %v1343_v4 = vsel %vm1327_vm13, %v5715_v50, 128.0  ;;  %v1344_v5 = vsel %vm1328_vm14, %v5717_v52, 128.0 }
 0x252   : > { %v1346_v7 = vsel %vm1330_vm0, %v5721_v55, 128.0  ;;  %v1357_v49 = vmin.f32 %v1341_v35, %v1345_v2  ;;  %v1349_v3 = vsel %vm1333_vm3, %v5727_v60, 128.0  ;;  %vm1335_vm6 = vcmp.eq.f32.partialorder %v5921_v45, %v1322_v32 }
 0x253   : > { %vm1336_vm7 = vcmp.eq.f32.partialorder %v5927_v46, %v1322_v32  ;;  %vm1338_vm8 = vcmp.eq.f32.partialorder %v5799_v54, %v1322_v32  ;;  %v1353_v36 = vsel %vm1337_vm5, %v5759_v11, 128.0  ;;  %v1355_v18 = vmin.f32 %v1339_v62, %v1343_v4 }
 0x254   : > { %v1361_v16 = vmin.f32 %v1357_v49, %v1349_v3  ;;  %v1356_v19 = vmin.f32 %v1340_v0, %v1344_v5  ;;  %v1347_v21 = vsel %vm1331_vm1, %v5723_v56, 128.0  ;;  %v1348_v22 = vsel %vm1332_vm2, %v5725_v59, 128.0 }
 0x255   : > { %v1358_v23 = vmin.f32 %v1342_v1, %v1346_v7  ;;  %v1350_v24 = vsel %vm1334_vm4, %v5729_v61, 128.0  ;;  %v1359_v6 = vmin.f32 %v1355_v18, %v1347_v21  ;;  %v1351_v26 = vsel %vm1335_vm6, %v5755_v9, 128.0 }
 0x256   : > { %v1365_v20 = vmin.f32 %v1361_v16, %v1353_v36  ;;  %v1360_v25 = vmin.f32 %v1356_v19, %v1348_v22  ;;  %v1352_v27 = vsel %vm1336_vm7, %v5757_v10, 128.0  ;;  %v1354_v28 = vsel %vm1338_vm8, %v5761_v12, 128.0 }
 0x257   : > { %v1362_v57 = vmin.f32 %v1358_v23, %v1350_v24  ;;  %v1363_v29 = vmin.f32 %v1359_v6, %v1351_v26 }
 0x258   : > { %v1364_v30 = vmin.f32 %v1360_v25, %v1352_v27 }
 0x259   : > { %v1366_v31 = vmin.f32 %v1362_v57, %v1354_v28 }
 0x25a   : > { %v1367_v33 = vmin.f32 %v1363_v29, %v1364_v30 }
 0x25b   : > { %v1368_v35 = vmin.f32 %v1365_v20, %v1366_v31 }
 0x25d   : > { %v1369_v62 = vmin.f32 %v1367_v33, %v1368_v35 }
 0x25f   : > { %v1370_v0 = vrot.slane %v1369_v62, 4 }
 0x261   : > { %v1371_v1 = vmin.f32 %v1369_v62, %v1370_v0 }
 0x263   : > { %v1372_v2 = vrot.slane %v1371_v1, 2 }
 0x265   : > { %v1373_v32 = vmin.f32 %v1371_v1, %v1372_v2 }
 0x267   : > { %v1374_v4 = vrot.slane %v1373_v32, 1 }
 0x269   : > { %v6031_v5 = vmin.f32 %v1373_v32, %v1374_v4 }
 0x26b   : > { %vm8197_vm9 = vcmp.eq.f32.partialorder %v5707_v42, %v6031_v5  ;;  %vm8196_vm10 = vcmp.eq.f32.partialorder %v5709_v43, %v6031_v5  ;;  %vm8195_vm11 = vcmp.eq.f32.partialorder %v5711_v47, %v6031_v5  ;;  %vm8194_vm12 = vcmp.eq.f32.partialorder %v5713_v48, %v6031_v5 }
 0x26c   : > { %v6045_v7 = vsel %vm8197_vm9, -1e+30, %v5802_v8  ;;  %v6051_v49 = vsel %vm8196_vm10, -1e+30, %v5805_v13  ;;  %v6057_v3 = vsel %vm8195_vm11, -1e+30, %v5814_v15  ;;  %vm8193_vm13 = vcmp.eq.f32.partialorder %v5715_v50, %v6031_v5 }
 0x26d   : > { %v6065_v8 = vsel %vm8194_vm12, -1e+30, %v5820_v39  ;;  %vm8192_vm14 = vcmp.eq.f32.partialorder %v5717_v52, %v6031_v5  ;;  %v6073_v13 = vsel %vm8193_vm13, -1e+30, %v5831_v38  ;;  %vm8191_vm15 = vcmp.eq.f32.partialorder %v5719_v53, %v6031_v5 }
 0x26e   : > { %v6081_v15 = vsel %vm8192_vm14, -1e+30, %v5837_v44  ;;  %v1646_v39 = vmax.f32 %v6045_v7, %v6073_v13  ;;  %vm8190_vm0 = vcmp.eq.f32.partialorder %v5721_v55, %v6031_v5  ;;  %v6091_v38 = vsel %vm8191_vm15, -1e+30, %v5851_v34 }
 0x26f   : > { %v1647_v16 = vmax.f32 %v6051_v49, %v6081_v15  ;;  %v6099_v44 = vsel %vm8190_vm0, -1e+30, %v5857_v40  ;;  %v1648_v36 = vmax.f32 %v6057_v3, %v6091_v38  ;;  %vm8189_vm1 = vcmp.eq.f32.partialorder %v5723_v56, %v6031_v5 }
 0x270   : > { %v1649_v18 = vmax.f32 %v6065_v8, %v6099_v44  ;;  %vm8188_vm2 = vcmp.eq.f32.partialorder %v5725_v59, %v6031_v5  ;;  %v6113_v34 = vsel %vm8189_vm1, -1e+30, %v5878_v37  ;;  %vm8187_vm3 = vcmp.eq.f32.partialorder %v5727_v60, %v6031_v5 }
 0x271   : > { %v6121_v40 = vsel %vm8188_vm2, -1e+30, %v5884_v17  ;;  %v1650_v19 = vmax.f32 %v1646_v39, %v6113_v34  ;;  %vm8186_vm4 = vcmp.eq.f32.partialorder %v5729_v61, %v6031_v5  ;;  %v6130_v37 = vsel %vm8187_vm3, -1e+30, %v5897_v41 }
 0x272   : > { %v1651_v20 = vmax.f32 %v1647_v16, %v6121_v40  ;;  %v6137_v21 = vsel %vm8186_vm4, -1e+30, %v5903_v51  ;;  %v1652_v17 = vmax.f32 %v1648_v36, %v6130_v37  ;;  %vm8185_vm5 = vcmp.eq.f32.partialorder %v5755_v9, %v6031_v5 }
 0x273   : > { %v1653_v22 = vmax.f32 %v1649_v18, %v6137_v21  ;;  %vm8183_vm6 = vcmp.eq.f32.partialorder %v5757_v10, %v6031_v5  ;;  %v6149_v41 = vsel %vm8185_vm5, -1e+30, %v5921_v45  ;;  %vm8182_vm7 = vcmp.eq.f32.partialorder %v5759_v11, %v6031_v5 }
 0x274   : > { %v6157_v51 = vsel %vm8183_vm6, -1e+30, %v5927_v46  ;;  %v1654_v23 = vmax.f32 %v1650_v19, %v6149_v41  ;;  %vm8184_vm8 = vcmp.eq.f32.partialorder %v5761_v12, %v6031_v5  ;;  %v6166_v45 = vsel %vm8182_vm7, -1e+30, %v5939_v63 }
 0x275   : > { %v1655_v24 = vmax.f32 %v1651_v20, %v6157_v51  ;;  %v6173_v6 = vsel %vm8184_vm8, -1e+30, %v5799_v54  ;;  %v1656_v46 = vmax.f32 %v1652_v17, %v6166_v45 }
 0x276   : > { %v1657_v25 = vmax.f32 %v1653_v22, %v6173_v6 }
 0x277   : > { %v1658_v26 = vmax.f32 %v1654_v23, %v1655_v24 }
 0x278   : > { %v1659_v27 = vmax.f32 %v1656_v46, %v1657_v25 }
 0x27a   : > { %v1660_v57 = vmax.f32 %v1658_v26, %v1659_v27 }
 0x27c   : > { %v1661_v28 = vrot.slane %v1660_v57, 4 }
 0x27e   : > { %v1662_v29 = vmax.f32 %v1660_v57, %v1661_v28 }
 0x280   : > { %v1663_v30 = vrot.slane %v1662_v29, 2 }
 0x282   : > { %v1664_v63 = vmax.f32 %v1662_v29, %v1663_v30 }
 0x284   : > { %v1665_v31 = vrot.slane %v1664_v63, 1 }
 0x286   : > { %v1666_v33 = vmax.f32 %v1664_v63, %v1665_v31 }
 0x288   : > { %vm1667_vm7 = vcmp.eq.f32.partialorder %v6045_v7, %v1666_v33  ;;  %vm1668_vm6 = vcmp.eq.f32.partialorder %v6051_v49, %v1666_v33  ;;  %vm1669_vm8 = vcmp.eq.f32.partialorder %v6057_v3, %v1666_v33  ;;  %vm1670_vm5 = vcmp.eq.f32.partialorder %v6065_v8, %v1666_v33 }
 0x289   : > { %vm1671_vm4 = vcmp.eq.f32.partialorder %v6073_v13, %v1666_v33  ;;  %vm1672_vm3 = vcmp.eq.f32.partialorder %v6081_v15, %v1666_v33  ;;  %vm1673_vm2 = vcmp.eq.f32.partialorder %v6091_v38, %v1666_v33  ;;  %vm1674_vm1 = vcmp.eq.f32.partialorder %v6099_v44, %v1666_v33 }
 0x28a   : > { %vm1675_vm0 = vcmp.eq.f32.partialorder %v6113_v34, %v1666_v33  ;;  %vm1676_vm15 = vcmp.eq.f32.partialorder %v6121_v40, %v1666_v33  ;;  %vm1677_vm14 = vcmp.eq.f32.partialorder %v6130_v37, %v1666_v33  ;;  %vm1678_vm13 = vcmp.eq.f32.partialorder %v6137_v21, %v1666_v33 }
 0x28b   : > { %vm1679_vm12 = vcmp.eq.f32.partialorder %v6149_v41, %v1666_v33  ;;  %vm1680_vm11 = vcmp.eq.f32.partialorder %v6157_v51, %v1666_v33  ;;  %vm1681_vm10 = vcmp.eq.f32.partialorder %v6166_v45, %v1666_v33  ;;  %vm1682_vm9 = vcmp.eq.f32.partialorder %v6173_v6, %v1666_v33 }
 0x28c   : > { %v1683_v54 = vsel %vm1667_vm7, %v5707_v42, 128.0  ;;  %v1684_v35 = vsel %vm1668_vm6, %v5709_v43, 128.0  ;;  %v1685_v62 = vsel %vm1669_vm8, %v5711_v47, 128.0  ;;  %v1686_v0 = vsel %vm1670_vm5, %v5713_v48, 128.0 }
 0x28d   : > { %v1687_v1 = vsel %vm1671_vm4, %v5715_v50, 128.0  ;;  %v1688_v2 = vsel %vm1672_vm3, %v5717_v52, 128.0  ;;  %v1689_v32 = vsel %vm1673_vm2, %v5719_v53, 128.0  ;;  %v1690_v4 = vsel %vm1674_vm1, %v5721_v55, 128.0 }
 0x28e   : > { %v1699_v39 = vmin.f32 %v1683_v54, %v1687_v1  ;;  %v1700_v16 = vmin.f32 %v1684_v35, %v1688_v2  ;;  %v1701_v36 = vmin.f32 %v1685_v62, %v1689_v32  ;;  %v1702_v18 = vmin.f32 %v1686_v0, %v1690_v4 }
 0x28f   : > { %v1691_v19 = vsel %vm1675_vm0, %v5723_v56, 128.0  ;;  %v1692_v20 = vsel %vm1676_vm15, %v5725_v59, 128.0  ;;  %v1693_v17 = vsel %vm1677_vm14, %v5727_v60, 128.0  ;;  %v1694_v22 = vsel %vm1678_vm13, %v5729_v61, 128.0 }
 0x290   : > { %v1703_v23 = vmin.f32 %v1699_v39, %v1691_v19  ;;  %v1704_v24 = vmin.f32 %v1700_v16, %v1692_v20  ;;  %v1705_v46 = vmin.f32 %v1701_v36, %v1693_v17  ;;  %v1706_v25 = vmin.f32 %v1702_v18, %v1694_v22  ;;  %v831_v22 = vld [vmem:[#allocation11 + $0x8] sm:$0xff] }
 0x291   : > { %v1695_v26 = vsel %vm1679_vm12, %v5755_v9, 128.0  ;;  %v1696_v27 = vsel %vm1680_vm11, %v5757_v10, 128.0  ;;  %v1697_v57 = vsel %vm1681_vm10, %v5759_v11, 128.0  ;;  %v1698_v28 = vsel %vm1682_vm9, %v5761_v12, 128.0 }
 0x292   : > { %v1707_v29 = vmin.f32 %v1703_v23, %v1695_v26  ;;  %v1708_v30 = vmin.f32 %v1704_v24, %v1696_v27  ;;  %v1709_v63 = vmin.f32 %v1705_v46, %v1697_v57  ;;  %v1710_v31 = vmin.f32 %v1706_v25, %v1698_v28  ;;  %v830_v25 = vld [vmem:[#allocation11] sm:$0xff]  ;;  %v832_v27 = vld [vmem:[#allocation11 + $0x10] sm:$0x3f] }
 0x293   : > { %vm8329_vm3 = vcmask 64512   ;;  %v5217_v46 = vmov 0  }
 0x294   : > { %v1711_v54 = vmin.f32 %v1707_v29, %v1708_v30  ;;  %v1712_v35 = vmin.f32 %v1709_v63, %v1710_v31  ;;  %vm8330_vm4 = vmmov %vm8329_vm3  ;;  %4728 = vset.pattern.permute.xlu1 %v5217_v46  ;;  %4727 = vset.pattern.permute.xlu0 %v5217_v46 }
 0x295   : > { %840 = vperm.xlu1 %4728, %v831_v22   ;;  %835 = vperm.xlu0 %4727, %v830_v25  }
 0x296   : > { %v1713_v62 = vmin.f32 %v1711_v54, %v1712_v35  ;;  %v825_v54 = vld [vmem:[#allocation14] sm:$0xff] }
 0x298   : > { %v1714_v0 = vrot.slane %v1713_v62, 4 }
 0x299   : > { %845 = vperm.xlu1 %4728, %v832_v27  }
 0x29a   : > { %v1715_v1 = vmin.f32 %v1713_v62, %v1714_v0  ;;  %v6389_v62 = vpop.f32.mrb[0].mxu1 }
 0x29c   : > { %v1716_v2 = vrot.slane %v1715_v1, 2 }
 0x29d   : > { %1178 = vperm.xlu1 %4728, %v825_v54  }
 0x29e   : > { %v1717_v32 = vmin.f32 %v1715_v1, %v1716_v2  ;;  %v826_v1 = vld [vmem:[#allocation14 + $0x8] sm:$0xff] }
 0x2a0   : > { %v1718_v4 = vrot.slane %v1717_v32, 1 }
 0x2a1   : > { %1183 = vperm.xlu1 %4728, %v826_v1  }
 0x2a2   : > { %v6241_v39 = vmin.f32 %v1717_v32, %v1718_v4 }
 0x2a4   : > { %vm8213_vm10 = vcmp.eq.f32.partialorder %v5707_v42, %v6241_v39  ;;  %vm8212_vm9 = vcmp.eq.f32.partialorder %v5709_v43, %v6241_v39  ;;  %vm8211_vm11 = vcmp.eq.f32.partialorder %v5711_v47, %v6241_v39  ;;  %vm8210_vm12 = vcmp.eq.f32.partialorder %v5713_v48, %v6241_v39 }
 0x2a5   : > { %v6255_v33 = vsel %vm8213_vm10, -1e+30, %v6045_v7  ;;  %v6261_v16 = vsel %vm8212_vm9, -1e+30, %v6051_v49  ;;  %v6267_v36 = vsel %vm8211_vm11, -1e+30, %v6057_v3  ;;  %vm8209_vm13 = vcmp.eq.f32.partialorder %v5715_v50, %v6241_v39 }
 0x2a6   : > { %v6275_v7 = vsel %vm8210_vm12, -1e+30, %v6065_v8  ;;  %vm8208_vm14 = vcmp.eq.f32.partialorder %v5717_v52, %v6241_v39  ;;  %v6283_v49 = vsel %vm8209_vm13, -1e+30, %v6073_v13  ;;  %vm8207_vm15 = vcmp.eq.f32.partialorder %v5719_v53, %v6241_v39  ;;  %v4739_v3 = vld [vmem:[#allocation8] sm:$0xff]  }
 0x2a7   : > { %v6291_v18 = vsel %vm8208_vm14, -1e+30, %v6081_v15  ;;  %v1990_v8 = vmax.f32 %v6255_v33, %v6283_v49  ;;  %vm8206_vm0 = vcmp.eq.f32.partialorder %v5721_v55, %v6241_v39  ;;  %vm8205_vm1 = vcmp.eq.f32.partialorder %v5723_v56, %v6241_v39  ;;  %4326 = vmatprep.mubr.msk.bf16.mxu1 %vm8329_vm3, %v4739_v3  ;;  %4360 = vmatprep.mubr.msk.bf16.mxu0 %vm8330_vm4, %v4739_v3  ;;  %v827_v3 = vld [vmem:[#allocation14 + $0x10] sm:$0xff] }
 0x2a8   : > { %v1991_v13 = vmax.f32 %v6261_v16, %v6291_v18  ;;  %v6305_v19 = vsel %vm8207_vm15, -1e+30, %v6091_v38  ;;  %v6311_v15 = vsel %vm8206_vm0, -1e+30, %v6099_v44  ;;  %vm8204_vm2 = vcmp.eq.f32.partialorder %v5725_v59, %v6241_v39  ;;  %1188 = vperm.xlu1 %4728, %v827_v3  }
 0x2a9   : > { %v1992_v20 = vmax.f32 %v6267_v36, %v6305_v19  ;;  %v1993_v38 = vmax.f32 %v6275_v7, %v6311_v15  ;;  %v6325_v17 = vsel %vm8205_vm1, -1e+30, %v6113_v34  ;;  %v6331_v44 = vsel %vm8204_vm2, -1e+30, %v6121_v40 }
 0x2aa   : > { %v1994_v23 = vmax.f32 %v1990_v8, %v6325_v17  ;;  %v1995_v24 = vmax.f32 %v1991_v13, %v6331_v44  ;;  %vm8203_vm5 = vcmp.eq.f32.partialorder %v5727_v60, %v6241_v39  ;;  %vm8202_vm6 = vcmp.eq.f32.partialorder %v5729_v61, %v6241_v39 }
 0x2ab   : > { %v6343_v34 = vsel %vm8203_vm5, -1e+30, %v6130_v37  ;;  %vm8201_vm7 = vcmp.eq.f32.partialorder %v5755_v9, %v6241_v39  ;;  %vm8200_vm8 = vcmp.eq.f32.partialorder %v5757_v10, %v6241_v39  ;;  %v6353_v40 = vsel %vm8202_vm6, -1e+30, %v6137_v21 }
 0x2ac   : > { %v1996_v26 = vmax.f32 %v1992_v20, %v6343_v34  ;;  %v6360_v37 = vsel %vm8201_vm7, -1e+30, %v6149_v41  ;;  %vm8199_vm3 = vcmp.eq.f32.partialorder %v5759_v11, %v6241_v39  ;;  %v1997_v57 = vmax.f32 %v1993_v38, %v6353_v40  ;;  %v828_v20 = vld [vmem:[#allocation14 + $0x18] sm:$0xff] }
 0x2ad   : > { %v6369_v21 = vsel %vm8200_vm8, -1e+30, %v6157_v51  ;;  %v1998_v28 = vmax.f32 %v1994_v23, %v6360_v37  ;;  %vm8198_vm4 = vcmp.eq.f32.partialorder %v5761_v12, %v6241_v39  ;;  %v6379_v29 = vsel %vm8199_vm3, -1e+30, %v6166_v45  ;;  %v6391_v45 = vpop.f32.mrb[1].mxu1  ;;  %1193 = vperm.xlu1 %4728, %v828_v20  }
 0x2ae   : > { %v1999_v41 = vmax.f32 %v1995_v24, %v6369_v21  ;;  %v6385_v30 = vsel %vm8198_vm4, -1e+30, %v6173_v6  ;;  %v2000_v51 = vmax.f32 %v1996_v26, %v6379_v29  ;;  %v4303_v2 = vpop.f32.mrb[2].mxu1 }
 0x2af   : > { %v2001_v63 = vmax.f32 %v1997_v57, %v6385_v30  ;;  %v6393_v4 = vpop.f32.mrb[3].mxu1 }
 0x2b0   : > { %v2002_v31 = vmax.f32 %v1998_v28, %v1999_v41 }
 0x2b1   : > { %v2003_v35 = vmax.f32 %v2000_v51, %v2001_v63 }
 0x2b3   : > { %v2004_v0 = vmax.f32 %v2002_v31, %v2003_v35 }
 0x2b5   : > { %v2005_v32 = vrot.slane %v2004_v0, 4 }
 0x2b7   : > { %v2006_v6 = vmax.f32 %v2004_v0, %v2005_v32 }
 0x2b9   : > { %v2007_v8 = vrot.slane %v2006_v6, 2 }
 0x2bb   : > { %v2008_v13 = vmax.f32 %v2006_v6, %v2007_v8 }
 0x2bd   : > { %v2009_v38 = vrot.slane %v2008_v13, 1 }
 0x2bf   : > { %v2010_v22 = vmax.f32 %v2008_v13, %v2009_v38 }
 0x2c1   : > { %vm2011_vm4 = vcmp.eq.f32.partialorder %v6255_v33, %v2010_v22  ;;  %vm2012_vm3 = vcmp.eq.f32.partialorder %v6261_v16, %v2010_v22  ;;  %vm2013_vm8 = vcmp.eq.f32.partialorder %v6267_v36, %v2010_v22  ;;  %vm2014_vm7 = vcmp.eq.f32.partialorder %v6275_v7, %v2010_v22 }
 0x2c2   : > { %vm2015_vm6 = vcmp.eq.f32.partialorder %v6283_v49, %v2010_v22  ;;  %vm2016_vm5 = vcmp.eq.f32.partialorder %v6291_v18, %v2010_v22  ;;  %vm2017_vm2 = vcmp.eq.f32.partialorder %v6305_v19, %v2010_v22  ;;  %vm2018_vm1 = vcmp.eq.f32.partialorder %v6311_v15, %v2010_v22 }
 0x2c3   : > { %vm2019_vm0 = vcmp.eq.f32.partialorder %v6325_v17, %v2010_v22  ;;  %vm2020_vm15 = vcmp.eq.f32.partialorder %v6331_v44, %v2010_v22  ;;  %vm2021_vm14 = vcmp.eq.f32.partialorder %v6343_v34, %v2010_v22  ;;  %vm2022_vm13 = vcmp.eq.f32.partialorder %v6353_v40, %v2010_v22 }
 0x2c4   : > { %vm2023_vm12 = vcmp.eq.f32.partialorder %v6360_v37, %v2010_v22  ;;  %vm2024_vm11 = vcmp.eq.f32.partialorder %v6369_v21, %v2010_v22  ;;  %vm2025_vm9 = vcmp.eq.f32.partialorder %v6379_v29, %v2010_v22  ;;  %vm2026_vm10 = vcmp.eq.f32.partialorder %v6385_v30, %v2010_v22 }
 0x2c5   : > { %v2027_v23 = vsel %vm2011_vm4, %v5707_v42, 128.0  ;;  %v2028_v24 = vsel %vm2012_vm3, %v5709_v43, 128.0  ;;  %v2029_v46 = vsel %vm2013_vm8, %v5711_v47, 128.0  ;;  %v2030_v25 = vsel %vm2014_vm7, %v5713_v48, 128.0 }
 0x2c6   : > { %v2031_v26 = vsel %vm2015_vm6, %v5715_v50, 128.0  ;;  %v2032_v27 = vsel %vm2016_vm5, %v5717_v52, 128.0  ;;  %v2033_v57 = vsel %vm2017_vm2, %v5719_v53, 128.0  ;;  %v2034_v28 = vsel %vm2018_vm1, %v5721_v55, 128.0 }
 0x2c7   : > { %v2043_v41 = vmin.f32 %v2027_v23, %v2031_v26  ;;  %v2044_v51 = vmin.f32 %v2028_v24, %v2032_v27  ;;  %v2045_v63 = vmin.f32 %v2029_v46, %v2033_v57  ;;  %v2046_v31 = vmin.f32 %v2030_v25, %v2034_v28 }
 0x2c8   : > { %v2035_v54 = vsel %vm2019_vm0, %v5723_v56, 128.0  ;;  %v2036_v35 = vsel %vm2020_vm15, %v5725_v59, 128.0  ;;  %v2037_v0 = vsel %vm2021_vm14, %v5727_v60, 128.0  ;;  %v2038_v1 = vsel %vm2022_vm13, %v5729_v61, 128.0 }
 0x2c9   : > { %v2047_v2 = vmin.f32 %v2043_v41, %v2035_v54  ;;  %v2048_v32 = vmin.f32 %v2044_v51, %v2036_v35  ;;  %v2049_v6 = vmin.f32 %v2045_v63, %v2037_v0  ;;  %v2050_v3 = vmin.f32 %v2046_v31, %v2038_v1 }
 0x2ca   : > { %v2039_v8 = vsel %vm2023_vm12, %v5755_v9, 128.0  ;;  %v2040_v13 = vsel %vm2024_vm11, %v5757_v10, 128.0  ;;  %v2041_v20 = vsel %vm2025_vm9, %v5759_v11, 128.0  ;;  %v2042_v38 = vsel %vm2026_vm10, %v5761_v12, 128.0 }
 0x2cb   : > { %v2051_v23 = vmin.f32 %v2047_v2, %v2039_v8  ;;  %v2052_v24 = vmin.f32 %v2048_v32, %v2040_v13  ;;  %v2053_v46 = vmin.f32 %v2049_v6, %v2041_v20  ;;  %v2054_v25 = vmin.f32 %v2050_v3, %v2042_v38 }
 0x2cd   : > { %v2055_v26 = vmin.f32 %v2051_v23, %v2052_v24  ;;  %v2056_v27 = vmin.f32 %v2053_v46, %v2054_v25 }
 0x2cf   : > { %v2057_v57 = vmin.f32 %v2055_v26, %v2056_v27 }
 0x2d1   : > { %v2058_v28 = vrot.slane %v2057_v57, 4 }
 0x2d3   : > { %v2059_v41 = vmin.f32 %v2057_v57, %v2058_v28 }
 0x2d5   : > { %v2060_v51 = vrot.slane %v2059_v41, 2 }
 0x2d7   : > { %v2061_v63 = vmin.f32 %v2059_v41, %v2060_v51 }
 0x2d9   : > { %v2062_v31 = vrot.slane %v2061_v63, 1 }
 0x2db   : > { %v6459_v54 = vmin.f32 %v2061_v63, %v2062_v31 }
 0x2dd   : > { %vm8229_vm9 = vcmp.eq.f32.partialorder %v5707_v42, %v6459_v54  ;;  %vm8228_vm10 = vcmp.eq.f32.partialorder %v5709_v43, %v6459_v54  ;;  %vm8227_vm11 = vcmp.eq.f32.partialorder %v5711_v47, %v6459_v54  ;;  %vm8226_vm12 = vcmp.eq.f32.partialorder %v5713_v48, %v6459_v54 }
 0x2de   : > { %v6473_v22 = vsel %vm8229_vm9, -1e+30, %v6255_v33  ;;  %v6479_v35 = vsel %vm8228_vm10, -1e+30, %v6261_v16  ;;  %v6485_v0 = vsel %vm8227_vm11, -1e+30, %v6267_v36  ;;  %vm8225_vm13 = vcmp.eq.f32.partialorder %v5715_v50, %v6459_v54 }
 0x2df   : > { %v6493_v33 = vsel %vm8226_vm12, -1e+30, %v6275_v7  ;;  %vm8224_vm14 = vcmp.eq.f32.partialorder %v5717_v52, %v6459_v54  ;;  %v6501_v16 = vsel %vm8225_vm13, -1e+30, %v6283_v49  ;;  %vm8223_vm15 = vcmp.eq.f32.partialorder %v5719_v53, %v6459_v54 }
 0x2e0   : > { %v6509_v36 = vsel %vm8224_vm14, -1e+30, %v6291_v18  ;;  %v2334_v7 = vmax.f32 %v6473_v22, %v6501_v16  ;;  %vm8222_vm0 = vcmp.eq.f32.partialorder %v5721_v55, %v6459_v54  ;;  %v6519_v49 = vsel %vm8223_vm15, -1e+30, %v6305_v19 }
 0x2e1   : > { %v2335_v1 = vmax.f32 %v6479_v35, %v6509_v36  ;;  %v6527_v18 = vsel %vm8222_vm0, -1e+30, %v6311_v15  ;;  %v2336_v2 = vmax.f32 %v6485_v0, %v6519_v49  ;;  %vm8221_vm1 = vcmp.eq.f32.partialorder %v5723_v56, %v6459_v54 }
 0x2e2   : > { %v2337_v32 = vmax.f32 %v6493_v33, %v6527_v18  ;;  %vm8220_vm2 = vcmp.eq.f32.partialorder %v5725_v59, %v6459_v54  ;;  %v6541_v19 = vsel %vm8221_vm1, -1e+30, %v6325_v17  ;;  %vm8219_vm5 = vcmp.eq.f32.partialorder %v5727_v60, %v6459_v54 }
 0x2e3   : > { %v6549_v15 = vsel %vm8220_vm2, -1e+30, %v6331_v44  ;;  %v2338_v6 = vmax.f32 %v2334_v7, %v6541_v19  ;;  %vm8218_vm6 = vcmp.eq.f32.partialorder %v5729_v61, %v6459_v54  ;;  %v6558_v17 = vsel %vm8219_vm5, -1e+30, %v6343_v34 }
 0x2e4   : > { %v2339_v3 = vmax.f32 %v2335_v1, %v6549_v15  ;;  %v6565_v8 = vsel %vm8218_vm6, -1e+30, %v6353_v40  ;;  %v2340_v44 = vmax.f32 %v2336_v2, %v6558_v17  ;;  %vm8217_vm7 = vcmp.eq.f32.partialorder %v5755_v9, %v6459_v54 }
 0x2e5   : > { %v2341_v13 = vmax.f32 %v2337_v32, %v6565_v8  ;;  %vm8215_vm8 = vcmp.eq.f32.partialorder %v5757_v10, %v6459_v54  ;;  %v6577_v34 = vsel %vm8217_vm7, -1e+30, %v6360_v37  ;;  %vm8214_vm3 = vcmp.eq.f32.partialorder %v5759_v11, %v6459_v54 }
 0x2e6   : > { %v6585_v40 = vsel %vm8215_vm8, -1e+30, %v6369_v21  ;;  %v2342_v20 = vmax.f32 %v2338_v6, %v6577_v34  ;;  %vm8216_vm4 = vcmp.eq.f32.partialorder %v5761_v12, %v6459_v54  ;;  %v6594_v37 = vsel %vm8214_vm3, -1e+30, %v6379_v29 }
 0x2e7   : > { %v2343_v38 = vmax.f32 %v2339_v3, %v6585_v40  ;;  %v6601_v23 = vsel %vm8216_vm4, -1e+30, %v6385_v30  ;;  %v2344_v21 = vmax.f32 %v2340_v44, %v6594_v37 }
 0x2e8   : > { %v2345_v24 = vmax.f32 %v2341_v13, %v6601_v23 }
 0x2e9   : > { %v2346_v46 = vmax.f32 %v2342_v20, %v2343_v38 }
 0x2ea   : > { %v2347_v25 = vmax.f32 %v2344_v21, %v2345_v24 }
 0x2ec   : > { %v2348_v26 = vmax.f32 %v2346_v46, %v2347_v25 }
 0x2ee   : > { %v2349_v27 = vrot.slane %v2348_v26, 4 }
 0x2f0   : > { %v2350_v57 = vmax.f32 %v2348_v26, %v2349_v27 }
 0x2f2   : > { %v2351_v28 = vrot.slane %v2350_v57, 2 }
 0x2f4   : > { %v2352_v29 = vmax.f32 %v2350_v57, %v2351_v28 }
 0x2f6   : > { %v2353_v41 = vrot.slane %v2352_v29, 1 }
 0x2f8   : > { %v2354_v51 = vmax.f32 %v2352_v29, %v2353_v41 }
 0x2fa   : > { %vm2355_vm3 = vcmp.eq.f32.partialorder %v6473_v22, %v2354_v51  ;;  %vm2356_vm8 = vcmp.eq.f32.partialorder %v6479_v35, %v2354_v51  ;;  %vm2357_vm4 = vcmp.eq.f32.partialorder %v6485_v0, %v2354_v51  ;;  %vm2358_vm7 = vcmp.eq.f32.partialorder %v6493_v33, %v2354_v51 }
 0x2fb   : > { %vm2359_vm6 = vcmp.eq.f32.partialorder %v6501_v16, %v2354_v51  ;;  %vm2360_vm5 = vcmp.eq.f32.partialorder %v6509_v36, %v2354_v51  ;;  %vm2361_vm2 = vcmp.eq.f32.partialorder %v6519_v49, %v2354_v51  ;;  %vm2362_vm1 = vcmp.eq.f32.partialorder %v6527_v18, %v2354_v51 }
 0x2fc   : > { %vm2363_vm0 = vcmp.eq.f32.partialorder %v6541_v19, %v2354_v51  ;;  %vm2364_vm15 = vcmp.eq.f32.partialorder %v6549_v15, %v2354_v51  ;;  %vm2365_vm14 = vcmp.eq.f32.partialorder %v6558_v17, %v2354_v51  ;;  %vm2366_vm13 = vcmp.eq.f32.partialorder %v6565_v8, %v2354_v51 }
 0x2fd   : > { %vm2367_vm12 = vcmp.eq.f32.partialorder %v6577_v34, %v2354_v51  ;;  %vm2368_vm11 = vcmp.eq.f32.partialorder %v6585_v40, %v2354_v51  ;;  %vm2369_vm10 = vcmp.eq.f32.partialorder %v6594_v37, %v2354_v51  ;;  %vm2370_vm9 = vcmp.eq.f32.partialorder %v6601_v23, %v2354_v51 }
 0x2fe   : > { %v2371_v30 = vsel %vm2355_vm3, %v5707_v42, 128.0  ;;  %v2372_v63 = vsel %vm2356_vm8, %v5709_v43, 128.0  ;;  %v2373_v31 = vsel %vm2357_vm4, %v5711_v47, 128.0  ;;  %v2374_v7 = vsel %vm2358_vm7, %v5713_v48, 128.0 }
 0x2ff   : > { %v2375_v1 = vsel %vm2359_vm6, %v5715_v50, 128.0  ;;  %v2376_v2 = vsel %vm2360_vm5, %v5717_v52, 128.0  ;;  %v2377_v32 = vsel %vm2361_vm2, %v5719_v53, 128.0  ;;  %v2378_v6 = vsel %vm2362_vm1, %v5721_v55, 128.0 }
 0x300   : > { %v2387_v3 = vmin.f32 %v2371_v30, %v2375_v1  ;;  %v2388_v44 = vmin.f32 %v2372_v63, %v2376_v2  ;;  %v2389_v13 = vmin.f32 %v2373_v31, %v2377_v32  ;;  %v2390_v20 = vmin.f32 %v2374_v7, %v2378_v6 }
 0x301   : > { %v2379_v38 = vsel %vm2363_vm0, %v5723_v56, 128.0  ;;  %v2380_v21 = vsel %vm2364_vm15, %v5725_v59, 128.0  ;;  %v2381_v24 = vsel %vm2365_vm14, %v5727_v60, 128.0  ;;  %v2382_v46 = vsel %vm2366_vm13, %v5729_v61, 128.0 }
 0x302   : > { %v2391_v25 = vmin.f32 %v2387_v3, %v2379_v38  ;;  %v2392_v26 = vmin.f32 %v2388_v44, %v2380_v21  ;;  %v2393_v27 = vmin.f32 %v2389_v13, %v2381_v24  ;;  %v2394_v57 = vmin.f32 %v2390_v20, %v2382_v46  ;;  %v4863_v24 = vld [vmem:[%s5590_s27] sm:$0xf] }
 0x303   : > { %v2383_v28 = vsel %vm2367_vm12, %v5755_v9, 128.0  ;;  %v2384_v29 = vsel %vm2368_vm11, %v5757_v10, 128.0  ;;  %v2385_v41 = vsel %vm2369_vm10, %v5759_v11, 128.0  ;;  %v2386_v30 = vsel %vm2370_vm9, %v5761_v12, 128.0 }
 0x304   : > { %v2395_v63 = vmin.f32 %v2391_v25, %v2383_v28  ;;  %v2396_v31 = vmin.f32 %v2392_v26, %v2384_v29  ;;  %v2397_v7 = vmin.f32 %v2393_v27, %v2385_v41  ;;  %v2398_v1 = vmin.f32 %v2394_v57, %v2386_v30 }
 0x305   : > { %v6672_v46 = vunpack.c.l.bf16 %v4863_v24  ;;  %v6821_v24 = vld [vmem:[#allocation8 + $0x8] ss:$0 sps:$4 sm:$0x77]  }
 0x306   : > { %v2399_v2 = vmin.f32 %v2395_v63, %v2396_v31  ;;  %v2400_v32 = vmin.f32 %v2397_v7, %v2398_v1 }
 0x308   : > { %v2401_v6 = vmin.f32 %v2399_v2, %v2400_v32 }
 0x30a   : > { %v2402_v3 = vrot.slane %v2401_v6, 4 }
 0x30c   : > { %v2403_v44 = vmin.f32 %v2401_v6, %v2402_v3 }
 0x30e   : > { %v2404_v13 = vrot.slane %v2403_v44, 2 }
 0x310   : > { %v2405_v20 = vmin.f32 %v2403_v44, %v2404_v13 }
 0x312   : > { %v2406_v38 = vrot.slane %v2405_v20, 1 }
 0x314   : > { %v6669_v21 = vmin.f32 %v2405_v20, %v2406_v38 }
 0x316   : > { %vm8245_vm9 = vcmp.eq.f32.partialorder %v5707_v42, %v6669_v21  ;;  %vm8244_vm10 = vcmp.eq.f32.partialorder %v5709_v43, %v6669_v21  ;;  %vm8243_vm11 = vcmp.eq.f32.partialorder %v5711_v47, %v6669_v21  ;;  %vm8242_vm12 = vcmp.eq.f32.partialorder %v5713_v48, %v6669_v21 }
 0x317   : > { %v6686_v51 = vsel %vm8245_vm9, -1e+30, %v6473_v22  ;;  %v6692_v25 = vsel %vm8244_vm10, -1e+30, %v6479_v35  ;;  %v6698_v26 = vsel %vm8243_vm11, -1e+30, %v6485_v0  ;;  %vm8241_vm13 = vcmp.eq.f32.partialorder %v5715_v50, %v6669_v21 }
 0x318   : > { %v6706_v22 = vsel %vm8242_vm12, -1e+30, %v6493_v33  ;;  %vm8240_vm14 = vcmp.eq.f32.partialorder %v5717_v52, %v6669_v21  ;;  %v6714_v35 = vsel %vm8241_vm13, -1e+30, %v6501_v16  ;;  %vm8239_vm15 = vcmp.eq.f32.partialorder %v5719_v53, %v6669_v21 }
 0x319   : > { %v6722_v0 = vsel %vm8240_vm14, -1e+30, %v6509_v36  ;;  %v2678_v33 = vmax.f32 %v6686_v51, %v6714_v35  ;;  %vm8238_vm0 = vcmp.eq.f32.partialorder %v5721_v55, %v6669_v21  ;;  %v6732_v16 = vsel %vm8239_vm15, -1e+30, %v6519_v49 }
 0x31a   : > { %v2679_v27 = vmax.f32 %v6692_v25, %v6722_v0  ;;  %v6740_v36 = vsel %vm8238_vm0, -1e+30, %v6527_v18  ;;  %v2680_v57 = vmax.f32 %v6698_v26, %v6732_v16  ;;  %vm8237_vm1 = vcmp.eq.f32.partialorder %v5723_v56, %v6669_v21 }
 0x31b   : > { %v2681_v28 = vmax.f32 %v6706_v22, %v6740_v36  ;;  %vm8236_vm2 = vcmp.eq.f32.partialorder %v5725_v59, %v6669_v21  ;;  %v6754_v49 = vsel %vm8237_vm1, -1e+30, %v6541_v19  ;;  %vm8235_vm5 = vcmp.eq.f32.partialorder %v5727_v60, %v6669_v21 }
 0x31c   : > { %v6762_v18 = vsel %vm8236_vm2, -1e+30, %v6549_v15  ;;  %v2682_v29 = vmax.f32 %v2678_v33, %v6754_v49  ;;  %vm8234_vm6 = vcmp.eq.f32.partialorder %v5729_v61, %v6669_v21  ;;  %v6771_v19 = vsel %vm8235_vm5, -1e+30, %v6558_v17 }
 0x31d   : > { %v2683_v30 = vmax.f32 %v2679_v27, %v6762_v18  ;;  %v6778_v15 = vsel %vm8234_vm6, -1e+30, %v6565_v8  ;;  %v2684_v63 = vmax.f32 %v2680_v57, %v6771_v19  ;;  %vm8231_vm7 = vcmp.eq.f32.partialorder %v5755_v9, %v6669_v21 }
 0x31e   : > { %v2685_v17 = vmax.f32 %v2681_v28, %v6778_v15  ;;  %vm8230_vm8 = vcmp.eq.f32.partialorder %v5757_v10, %v6669_v21  ;;  %v6791_v1 = vsel %vm8231_vm7, -1e+30, %v6577_v34  ;;  %vm8232_vm3 = vcmp.eq.f32.partialorder %v5759_v11, %v6669_v21 }
 0x31f   : > { %v6797_v2 = vsel %vm8230_vm8, -1e+30, %v6585_v40  ;;  %v2686_v32 = vmax.f32 %v2682_v29, %v6791_v1  ;;  %vm8233_vm4 = vcmp.eq.f32.partialorder %v5761_v12, %v6669_v21  ;;  %v6809_v44 = vsel %vm8232_vm3, -1e+30, %v6594_v37 }
 0x320   : > { %v2687_v34 = vmax.f32 %v2683_v30, %v6797_v2  ;;  %v6815_v40 = vsel %vm8233_vm4, -1e+30, %v6601_v23  ;;  %v2688_v13 = vmax.f32 %v2684_v63, %v6809_v44  ;;  %vm8331_vm8 = vcmask 1043456  }
 0x321   : > { %v2689_v20 = vmax.f32 %v2685_v17, %v6815_v40  ;;  %vm8332_vm7 = vmmov %vm8331_vm8  ;;  %vm8333_vm3 = vcmask 64512  }
 0x322   : > { %v2690_v33 = vmax.f32 %v2686_v32, %v2687_v34 }
 0x323   : > { %v2691_v37 = vmax.f32 %v2688_v13, %v2689_v20 }
 0x324   : > { %v1074_v41 = vpop.f32.mrb[16].mxu0 }
 0x325   : > { %v1080_v31 = vsub.f32 %v1074_v41, %v6672_v46  ;;  %v4322_v7 = vpop.f32.mrb[17].mxu0  ;;  %v2692_v27 = vmax.f32 %v2690_v33, %v2691_v37 }
 0x326   : > { %v1077_v8 = vpop.f32.mrb[18].mxu0 }
 0x327   : > { %v1081_v6 = vpack.c.bf16 %v1080_v31, %v1080_v31  ;;  %v4323_v3 = vpop.f32.mrb[19].mxu0  ;;  %v2693_v57 = vrot.slane %v2692_v27, 4 }
 0x329   : > { %v1097_v38 = vsel %vm8331_vm8, %v1081_v6, 0  ;;  %4578 = vmatprep.subr.msk.bf16.mxu1 %vm8332_vm7, %v1081_v6  ;;  %v2694_v23 = vmax.f32 %v2692_v27, %v2693_v57 }
 0x32a   : > { %4325 = vmatpush3.bf16.msra.mxu1 %v1097_v38 }
 0x32b   : > { %v2695_v28 = vrot.slane %v2694_v23, 2 }
 0x32d   : > { %4327 = vmatmul.mubr.msk.bf16.vlgmr.msra.gmra.mrb[4].mxu1 %vm8333_vm3, %v6821_v24  ;;  %v2696_v29 = vmax.f32 %v2694_v23, %v2695_v28 }
 0x32f   : > { %v2697_v41 = vrot.slane %v2696_v29, 1 }
 0x331   : > { %v2698_v30 = vmax.f32 %v2696_v29, %v2697_v41 }
 0x333   : > { %vm2699_vm4 = vcmp.eq.f32.partialorder %v6686_v51, %v2698_v30  ;;  %vm2700_vm8 = vcmp.eq.f32.partialorder %v6692_v25, %v2698_v30  ;;  %vm2701_vm7 = vcmp.eq.f32.partialorder %v6698_v26, %v2698_v30  ;;  %vm2702_vm6 = vcmp.eq.f32.partialorder %v6706_v22, %v2698_v30 }
 0x334   : > { %vm2703_vm5 = vcmp.eq.f32.partialorder %v6714_v35, %v2698_v30  ;;  %vm2704_vm2 = vcmp.eq.f32.partialorder %v6722_v0, %v2698_v30  ;;  %vm2705_vm3 = vcmp.eq.f32.partialorder %v6732_v16, %v2698_v30  ;;  %vm2706_vm1 = vcmp.eq.f32.partialorder %v6740_v36, %v2698_v30 }
 0x335   : > { %vm2707_vm0 = vcmp.eq.f32.partialorder %v6754_v49, %v2698_v30  ;;  %vm2708_vm15 = vcmp.eq.f32.partialorder %v6762_v18, %v2698_v30  ;;  %vm2709_vm14 = vcmp.eq.f32.partialorder %v6771_v19, %v2698_v30  ;;  %vm2710_vm13 = vcmp.eq.f32.partialorder %v6778_v15, %v2698_v30 }
 0x336   : > { %vm2711_vm12 = vcmp.eq.f32.partialorder %v6791_v1, %v2698_v30  ;;  %vm2712_vm11 = vcmp.eq.f32.partialorder %v6797_v2, %v2698_v30  ;;  %vm2713_vm10 = vcmp.eq.f32.partialorder %v6809_v44, %v2698_v30  ;;  %vm2714_vm9 = vcmp.eq.f32.partialorder %v6815_v40, %v2698_v30 }
 0x337   : > { %v2715_v63 = vsel %vm2699_vm4, %v5707_v42, 128.0  ;;  %v2716_v31 = vsel %vm2700_vm8, %v5709_v43, 128.0  ;;  %v2717_v7 = vsel %vm2701_vm7, %v5711_v47, 128.0  ;;  %v2718_v17 = vsel %vm2702_vm6, %v5713_v48, 128.0 }
 0x338   : > { %v2719_v8 = vsel %vm2703_vm5, %v5715_v50, 128.0  ;;  %v2720_v32 = vsel %vm2704_vm2, %v5717_v52, 128.0  ;;  %v2721_v6 = vsel %vm2705_vm3, %v5719_v53, 128.0  ;;  %v2722_v3 = vsel %vm2706_vm1, %v5721_v55, 128.0 }
 0x339   : > { %v2731_v34 = vmin.f32 %v2715_v63, %v2719_v8  ;;  %v2732_v13 = vmin.f32 %v2716_v31, %v2720_v32  ;;  %v2733_v20 = vmin.f32 %v2717_v7, %v2721_v6  ;;  %v2734_v38 = vmin.f32 %v2718_v17, %v2722_v3 }
 0x33a   : > { %v2723_v33 = vsel %vm2707_vm0, %v5723_v56, 128.0  ;;  %v2724_v37 = vsel %vm2708_vm15, %v5725_v59, 128.0  ;;  %v2725_v27 = vsel %vm2709_vm14, %v5727_v60, 128.0  ;;  %v2726_v57 = vsel %vm2710_vm13, %v5729_v61, 128.0 }
 0x33b   : > { %v2735_v23 = vmin.f32 %v2731_v34, %v2723_v33  ;;  %v2736_v28 = vmin.f32 %v2732_v13, %v2724_v37  ;;  %v2737_v29 = vmin.f32 %v2733_v20, %v2725_v27  ;;  %v2738_v41 = vmin.f32 %v2734_v38, %v2726_v57 }
 0x33c   : > { %v2727_v63 = vsel %vm2711_vm12, %v5755_v9, 128.0  ;;  %v2728_v31 = vsel %vm2712_vm11, %v5757_v10, 128.0  ;;  %v2729_v7 = vsel %vm2713_vm10, %v5759_v11, 128.0  ;;  %v2730_v17 = vsel %vm2714_vm9, %v5761_v12, 128.0 }
 0x33d   : > { %v2739_v8 = vmin.f32 %v2735_v23, %v2727_v63  ;;  %v2740_v32 = vmin.f32 %v2736_v28, %v2728_v31  ;;  %v2741_v6 = vmin.f32 %v2737_v29, %v2729_v7  ;;  %v2742_v3 = vmin.f32 %v2738_v41, %v2730_v17 }
 0x33f   : > { %v2743_v34 = vmin.f32 %v2739_v8, %v2740_v32  ;;  %v2744_v13 = vmin.f32 %v2741_v6, %v2742_v3 }
 0x341   : > { %v2745_v20 = vmin.f32 %v2743_v34, %v2744_v13 }
 0x343   : > { %v2746_v38 = vrot.slane %v2745_v20, 4 }
 0x345   : > { %v2747_v33 = vmin.f32 %v2745_v20, %v2746_v38 }
 0x347   : > { %v2748_v37 = vrot.slane %v2747_v33, 2 }
 0x349   : > { %v2749_v27 = vmin.f32 %v2747_v33, %v2748_v37 }
 0x34b   : > { %v2750_v57 = vrot.slane %v2749_v27, 1 }
 0x34d   : > { %v6889_v14 = vmin.f32 %v2749_v27, %v2750_v57 }
 0x34f   : > { %8334 = vst [vmem:[#allocation31_spill] sm:$0xff] %v6889_v14  ;;  %vm8263_vm10 = vcmp.eq.f32.partialorder %v5707_v42, %v6889_v14  ;;  %vm8262_vm9 = vcmp.eq.f32.partialorder %v5709_v43, %v6889_v14  ;;  %vm8261_vm11 = vcmp.eq.f32.partialorder %v5711_v47, %v6889_v14  ;;  %vm8260_vm12 = vcmp.eq.f32.partialorder %v5713_v48, %v6889_v14 }
 0x350   : > { %v6903_v30 = vsel %vm8263_vm10, -1e+30, %v6686_v51  ;;  %v6909_v23 = vsel %vm8262_vm9, -1e+30, %v6692_v25  ;;  %v6915_v28 = vsel %vm8261_vm11, -1e+30, %v6698_v26  ;;  %vm8259_vm13 = vcmp.eq.f32.partialorder %v5715_v50, %v6889_v14 }
 0x351   : > { %v6923_v51 = vsel %vm8260_vm12, -1e+30, %v6706_v22  ;;  %vm8258_vm14 = vcmp.eq.f32.partialorder %v5717_v52, %v6889_v14  ;;  %v6931_v25 = vsel %vm8259_vm13, -1e+30, %v6714_v35  ;;  %vm8257_vm15 = vcmp.eq.f32.partialorder %v5719_v53, %v6889_v14 }
 0x352   : > { %v6939_v26 = vsel %vm8258_vm14, -1e+30, %v6722_v0  ;;  %v3022_v22 = vmax.f32 %v6903_v30, %v6931_v25  ;;  %vm8256_vm0 = vcmp.eq.f32.partialorder %v5721_v55, %v6889_v14  ;;  %v6949_v35 = vsel %vm8257_vm15, -1e+30, %v6732_v16 }
 0x353   : > { %v3023_v29 = vmax.f32 %v6909_v23, %v6939_v26  ;;  %v6957_v0 = vsel %vm8256_vm0, -1e+30, %v6740_v36  ;;  %v3024_v41 = vmax.f32 %v6915_v28, %v6949_v35  ;;  %vm8255_vm1 = vcmp.eq.f32.partialorder %v5723_v56, %v6889_v14 }
 0x354   : > { %v3025_v63 = vmax.f32 %v6923_v51, %v6957_v0  ;;  %vm8254_vm2 = vcmp.eq.f32.partialorder %v5725_v59, %v6889_v14  ;;  %v6971_v16 = vsel %vm8255_vm1, -1e+30, %v6754_v49  ;;  %vm8253_vm5 = vcmp.eq.f32.partialorder %v5727_v60, %v6889_v14 }
 0x355   : > { %v6979_v36 = vsel %vm8254_vm2, -1e+30, %v6762_v18  ;;  %v3026_v31 = vmax.f32 %v3022_v22, %v6971_v16  ;;  %vm8252_vm6 = vcmp.eq.f32.partialorder %v5729_v61, %v6889_v14  ;;  %v6988_v49 = vsel %vm8253_vm5, -1e+30, %v6771_v19 }
 0x356   : > { %v3027_v7 = vmax.f32 %v3023_v29, %v6979_v36  ;;  %v6995_v17 = vsel %vm8252_vm6, -1e+30, %v6778_v15  ;;  %v3028_v18 = vmax.f32 %v3024_v41, %v6988_v49  ;;  %vm8251_vm4 = vcmp.eq.f32.partialorder %v5755_v9, %v6889_v14 }
 0x357   : > { %v3029_v8 = vmax.f32 %v3025_v63, %v6995_v17  ;;  %vm8249_vm8 = vcmp.eq.f32.partialorder %v5757_v10, %v6889_v14  ;;  %v7007_v19 = vsel %vm8251_vm4, -1e+30, %v6791_v1  ;;  %vm8248_vm7 = vcmp.eq.f32.partialorder %v5759_v11, %v6889_v14 }
 0x358   : > { %v7015_v15 = vsel %vm8249_vm8, -1e+30, %v6797_v2  ;;  %v3030_v32 = vmax.f32 %v3026_v31, %v7007_v19  ;;  %vm8250_vm3 = vcmp.eq.f32.partialorder %v5761_v12, %v6889_v14  ;;  %v7024_v1 = vsel %vm8248_vm7, -1e+30, %v6809_v44 }
 0x359   : > { %v3031_v6 = vmax.f32 %v3027_v7, %v7015_v15  ;;  %v7031_v3 = vsel %vm8250_vm3, -1e+30, %v6815_v40  ;;  %v3032_v2 = vmax.f32 %v3028_v18, %v7024_v1 }
 0x35a   : > { %v3033_v34 = vmax.f32 %v3029_v8, %v7031_v3 }
 0x35b   : > { %v3034_v13 = vmax.f32 %v3030_v32, %v3031_v6 }
 0x35c   : > { %v3035_v20 = vmax.f32 %v3032_v2, %v3033_v34 }
 0x35e   : > { %v3036_v38 = vmax.f32 %v3034_v13, %v3035_v20 }
 0x360   : > { %v3037_v33 = vrot.slane %v3036_v38, 4 }
 0x362   : > { %v3038_v37 = vmax.f32 %v3036_v38, %v3037_v33 }
 0x364   : > { %v3039_v27 = vrot.slane %v3038_v37, 2 }
 0x366   : > { %v3040_v44 = vmax.f32 %v3038_v37, %v3039_v27 }
 0x368   : > { %v3041_v57 = vrot.slane %v3040_v44, 1 }
 0x36a   : > { %v3042_v22 = vmax.f32 %v3040_v44, %v3041_v57 }
 0x36c   : > { %vm3043_vm7 = vcmp.eq.f32.partialorder %v6903_v30, %v3042_v22  ;;  %vm3044_vm8 = vcmp.eq.f32.partialorder %v6909_v23, %v3042_v22  ;;  %vm3045_vm3 = vcmp.eq.f32.partialorder %v6915_v28, %v3042_v22  ;;  %vm3046_vm4 = vcmp.eq.f32.partialorder %v6923_v51, %v3042_v22 }
 0x36d   : > { %vm3047_vm6 = vcmp.eq.f32.partialorder %v6931_v25, %v3042_v22  ;;  %vm3048_vm5 = vcmp.eq.f32.partialorder %v6939_v26, %v3042_v22  ;;  %vm3049_vm2 = vcmp.eq.f32.partialorder %v6949_v35, %v3042_v22  ;;  %vm3050_vm1 = vcmp.eq.f32.partialorder %v6957_v0, %v3042_v22 }
 0x36e   : > { %vm3051_vm0 = vcmp.eq.f32.partialorder %v6971_v16, %v3042_v22  ;;  %vm3052_vm15 = vcmp.eq.f32.partialorder %v6979_v36, %v3042_v22  ;;  %vm3053_vm14 = vcmp.eq.f32.partialorder %v6988_v49, %v3042_v22  ;;  %vm3054_vm13 = vcmp.eq.f32.partialorder %v6995_v17, %v3042_v22 }
 0x36f   : > { %vm3055_vm12 = vcmp.eq.f32.partialorder %v7007_v19, %v3042_v22  ;;  %vm3056_vm11 = vcmp.eq.f32.partialorder %v7015_v15, %v3042_v22  ;;  %vm3057_vm9 = vcmp.eq.f32.partialorder %v7024_v1, %v3042_v22  ;;  %vm3058_vm10 = vcmp.eq.f32.partialorder %v7031_v3, %v3042_v22 }
 0x370   : > { %v3059_v40 = vsel %vm3043_vm7, %v5707_v42, 128.0  ;;  %v3060_v29 = vsel %vm3044_vm8, %v5709_v43, 128.0  ;;  %v3061_v41 = vsel %vm3045_vm3, %v5711_v47, 128.0  ;;  %v3062_v63 = vsel %vm3046_vm4, %v5713_v48, 128.0 }
 0x371   : > { %v3063_v31 = vsel %vm3047_vm6, %v5715_v50, 128.0  ;;  %v3064_v7 = vsel %vm3048_vm5, %v5717_v52, 128.0  ;;  %v3065_v18 = vsel %vm3049_vm2, %v5719_v53, 128.0  ;;  %v3066_v8 = vsel %vm3050_vm1, %v5721_v55, 128.0 }
 0x372   : > { %v3075_v32 = vmin.f32 %v3059_v40, %v3063_v31  ;;  %v3076_v6 = vmin.f32 %v3060_v29, %v3064_v7  ;;  %v3077_v2 = vmin.f32 %v3061_v41, %v3065_v18  ;;  %v3078_v34 = vmin.f32 %v3062_v63, %v3066_v8 }
 0x373   : > { %v3067_v13 = vsel %vm3051_vm0, %v5723_v56, 128.0  ;;  %v3068_v20 = vsel %vm3052_vm15, %v5725_v59, 128.0  ;;  %v3069_v38 = vsel %vm3053_vm14, %v5727_v60, 128.0  ;;  %v3070_v33 = vsel %vm3054_vm13, %v5729_v61, 128.0 }
 0x374   : > { %v3079_v37 = vmin.f32 %v3075_v32, %v3067_v13  ;;  %v3080_v27 = vmin.f32 %v3076_v6, %v3068_v20  ;;  %v3081_v44 = vmin.f32 %v3077_v2, %v3069_v38  ;;  %v3082_v57 = vmin.f32 %v3078_v34, %v3070_v33 }
 0x375   : > { %v3071_v40 = vsel %vm3055_vm12, %v5755_v9, 128.0  ;;  %v3072_v29 = vsel %vm3056_vm11, %v5757_v10, 128.0  ;;  %v3073_v41 = vsel %vm3057_vm9, %v5759_v11, 128.0  ;;  %v3074_v63 = vsel %vm3058_vm10, %v5761_v12, 128.0 }
 0x376   : > { %v3083_v31 = vmin.f32 %v3079_v37, %v3071_v40  ;;  %v3084_v7 = vmin.f32 %v3080_v27, %v3072_v29  ;;  %v3085_v18 = vmin.f32 %v3081_v44, %v3073_v41  ;;  %v3086_v8 = vmin.f32 %v3082_v57, %v3074_v63 }
 0x378   : > { %v3087_v32 = vmin.f32 %v3083_v31, %v3084_v7  ;;  %v3088_v6 = vmin.f32 %v3085_v18, %v3086_v8 }
 0x37a   : > { %v3089_v2 = vmin.f32 %v3087_v32, %v3088_v6 }
 0x37c   : > { %v3090_v34 = vrot.slane %v3089_v2, 4 }
 0x37e   : > { %v3091_v13 = vmin.f32 %v3089_v2, %v3090_v34 }
 0x380   : > { %v3092_v20 = vrot.slane %v3091_v13, 2 }
 0x382   : > { %v3093_v38 = vmin.f32 %v3091_v13, %v3092_v20 }
 0x384   : > { %v3094_v33 = vrot.slane %v3093_v38, 1 }
 0x386   : > { %v7099_v58 = vmin.f32 %v3093_v38, %v3094_v33  ;;  %v7224_v38 = vld [vmem:[#allocation13] sm:$0xff]  }
 0x388   : > { %8335 = vst [vmem:[#allocation32_spill] sm:$0xff] %v7099_v58  ;;  %vm8281_vm9 = vcmp.eq.f32.partialorder %v5707_v42, %v7099_v58  ;;  %vm8280_vm10 = vcmp.eq.f32.partialorder %v5709_v43, %v7099_v58  ;;  %vm8279_vm11 = vcmp.eq.f32.partialorder %v5711_v47, %v7099_v58  ;;  %vm8278_vm12 = vcmp.eq.f32.partialorder %v5713_v48, %v7099_v58 }
 0x389   : > { %v7113_v22 = vsel %vm8281_vm9, -1e+30, %v6903_v30  ;;  %v7119_v37 = vsel %vm8280_vm10, -1e+30, %v6909_v23  ;;  %v7125_v27 = vsel %vm8279_vm11, -1e+30, %v6915_v28  ;;  %vm8277_vm13 = vcmp.eq.f32.partialorder %v5715_v50, %v7099_v58 }
 0x38a   : > { %v7133_v30 = vsel %vm8278_vm12, -1e+30, %v6923_v51  ;;  %vm8276_vm14 = vcmp.eq.f32.partialorder %v5717_v52, %v7099_v58  ;;  %v7141_v23 = vsel %vm8277_vm13, -1e+30, %v6931_v25  ;;  %vm8275_vm15 = vcmp.eq.f32.partialorder %v5719_v53, %v7099_v58 }
 0x38b   : > { %v7149_v28 = vsel %vm8276_vm14, -1e+30, %v6939_v26  ;;  %v3366_v51 = vmax.f32 %v7113_v22, %v7141_v23  ;;  %vm8274_vm0 = vcmp.eq.f32.partialorder %v5721_v55, %v7099_v58  ;;  %v7159_v25 = vsel %vm8275_vm15, -1e+30, %v6949_v35 }
 0x38c   : > { %v3367_v44 = vmax.f32 %v7119_v37, %v7149_v28  ;;  %v7167_v26 = vsel %vm8274_vm0, -1e+30, %v6957_v0  ;;  %v3368_v57 = vmax.f32 %v7125_v27, %v7159_v25  ;;  %vm8273_vm1 = vcmp.eq.f32.partialorder %v5723_v56, %v7099_v58 }
 0x38d   : > { %v3369_v40 = vmax.f32 %v7133_v30, %v7167_v26  ;;  %vm8272_vm2 = vcmp.eq.f32.partialorder %v5725_v59, %v7099_v58  ;;  %v7181_v35 = vsel %vm8273_vm1, -1e+30, %v6971_v16  ;;  %vm8271_vm5 = vcmp.eq.f32.partialorder %v5727_v60, %v7099_v58 }
 0x38e   : > { %v3121_v0 = vsel %vm8272_vm2, -1e+30, %v6979_v36  ;;  %v3370_v29 = vmax.f32 %v3366_v51, %v7181_v35  ;;  %vm8270_vm6 = vcmp.eq.f32.partialorder %v5729_v61, %v7099_v58  ;;  %v3122_v41 = vsel %vm8271_vm5, -1e+30, %v6988_v49 }
 0x38f   : > { %v3371_v16 = vmax.f32 %v3367_v44, %v3121_v0  ;;  %v3123_v63 = vsel %vm8270_vm6, -1e+30, %v6995_v17  ;;  %v3372_v31 = vmax.f32 %v3368_v57, %v3122_v41  ;;  %vm8269_vm4 = vcmp.eq.f32.partialorder %v5755_v9, %v7099_v58 }
 0x390   : > { %v3373_v36 = vmax.f32 %v3369_v40, %v3123_v63  ;;  %vm8266_vm8 = vcmp.eq.f32.partialorder %v5757_v10, %v7099_v58  ;;  %v3124_v7 = vsel %vm8269_vm4, -1e+30, %v7007_v19  ;;  %vm8267_vm7 = vcmp.eq.f32.partialorder %v5759_v11, %v7099_v58 }
 0x391   : > { %v3125_v49 = vsel %vm8266_vm8, -1e+30, %v7015_v15  ;;  %v3374_v17 = vmax.f32 %v3370_v29, %v3124_v7  ;;  %vm8268_vm3 = vcmp.eq.f32.partialorder %v5761_v12, %v7099_v58  ;;  %v3126_v18 = vsel %vm8267_vm7, -1e+30, %v7024_v1 }
 0x392   : > { %v3375_v8 = vmax.f32 %v3371_v16, %v3125_v49  ;;  %v3127_v19 = vsel %vm8268_vm3, -1e+30, %v7031_v3  ;;  %v3376_v32 = vmax.f32 %v3372_v31, %v3126_v18  ;;  %vm8282_vm8 = vcmask 179200  }
 0x393   : > { %v3377_v6 = vmax.f32 %v3373_v36, %v3127_v19  ;;  %4334 = vmatprep.mubr.msk.bf16.mxu1 %vm8282_vm8, %v7224_v38 }
 0x394   : > { %v3378_v2 = vmax.f32 %v3374_v17, %v3375_v8 }
 0x395   : > { %v3379_v34 = vmax.f32 %v3376_v32, %v3377_v6 }
 0x397   : > { %v3380_v15 = vmax.f32 %v3378_v2, %v3379_v34 }
 0x399   : > { %v3381_v13 = vrot.slane %v3380_v15, 4 }
 0x39b   : > { %v3382_v20 = vmax.f32 %v3380_v15, %v3381_v13 }
 0x39d   : > { %v3383_v33 = vrot.slane %v3382_v20, 2 }
 0x39f   : > { %v3384_v1 = vmax.f32 %v3382_v20, %v3383_v33 }
 0x3a1   : > { %v3385_v51 = vrot.slane %v3384_v1, 1 }
 0x3a3   : > { %v3386_v44 = vmax.f32 %v3384_v1, %v3385_v51 }
 0x3a5   : > { %vm3387_vm7 = vcmp.eq.f32.partialorder %v7113_v22, %v3386_v44  ;;  %vm3388_vm3 = vcmp.eq.f32.partialorder %v7119_v37, %v3386_v44  ;;  %vm3389_vm4 = vcmp.eq.f32.partialorder %v7125_v27, %v3386_v44  ;;  %vm3390_vm6 = vcmp.eq.f32.partialorder %v7133_v30, %v3386_v44 }
 0x3a6   : > { %vm3391_vm5 = vcmp.eq.f32.partialorder %v7141_v23, %v3386_v44  ;;  %vm3392_vm2 = vcmp.eq.f32.partialorder %v7149_v28, %v3386_v44  ;;  %vm3393_vm1 = vcmp.eq.f32.partialorder %v7159_v25, %v3386_v44  ;;  %vm3394_vm0 = vcmp.eq.f32.partialorder %v7167_v26, %v3386_v44 }
 0x3a7   : > { %vm3395_vm15 = vcmp.eq.f32.partialorder %v7181_v35, %v3386_v44  ;;  %vm3396_vm14 = vcmp.eq.f32.partialorder %v3121_v0, %v3386_v44  ;;  %vm3397_vm13 = vcmp.eq.f32.partialorder %v3122_v41, %v3386_v44  ;;  %vm3398_vm12 = vcmp.eq.f32.partialorder %v3123_v63, %v3386_v44 }
 0x3a8   : > { %vm3399_vm11 = vcmp.eq.f32.partialorder %v3124_v7, %v3386_v44  ;;  %vm3400_vm10 = vcmp.eq.f32.partialorder %v3125_v49, %v3386_v44  ;;  %vm3401_vm9 = vcmp.eq.f32.partialorder %v3126_v18, %v3386_v44  ;;  %vm3402_vm8 = vcmp.eq.f32.partialorder %v3127_v19, %v3386_v44  ;;  %v836_v7 = vpop.permute.xlu0 %835 }
 0x3a9   : > { %v3403_v3 = vsel %vm3387_vm7, %v5707_v42, 128.0  ;;  %v3404_v57 = vsel %vm3388_vm3, %v5709_v43, 128.0  ;;  %v3405_v40 = vsel %vm3389_vm4, %v5711_v47, 128.0  ;;  %v3406_v29 = vsel %vm3390_vm6, %v5713_v48, 128.0 }
 0x3aa   : > { %v3407_v16 = vsel %vm3391_vm5, %v5715_v50, 128.0  ;;  %v3408_v22 = vsel %vm3392_vm2, %v5717_v52, 128.0  ;;  %v3409_v37 = vsel %vm3393_vm1, %v5719_v53, 128.0  ;;  %v3410_v27 = vsel %vm3394_vm0, %v5721_v55, 128.0 }
 0x3ab   : > { %v3419_v31 = vmin.f32 %v3403_v3, %v3407_v16  ;;  %v3420_v36 = vmin.f32 %v3404_v57, %v3408_v22  ;;  %v3421_v30 = vmin.f32 %v3405_v40, %v3409_v37  ;;  %v3422_v17 = vmin.f32 %v3406_v29, %v3410_v27  ;;  %v841_v3 = vpop.permute.xlu1 %840 }
 0x3ac   : > { %v3411_v23 = vsel %vm3395_vm15, %v5723_v56, 128.0  ;;  %v3412_v28 = vsel %vm3396_vm14, %v5725_v59, 128.0  ;;  %v3413_v8 = vsel %vm3397_vm13, %v5727_v60, 128.0  ;;  %v3414_v25 = vsel %vm3398_vm12, %v5729_v61, 128.0 }
 0x3ad   : > { %v3423_v32 = vmin.f32 %v3419_v31, %v3411_v23  ;;  %v3424_v26 = vmin.f32 %v3420_v36, %v3412_v28  ;;  %v3425_v6 = vmin.f32 %v3421_v30, %v3413_v8  ;;  %v3426_v2 = vmin.f32 %v3422_v17, %v3414_v25 }
 0x3ae   : > { %v3415_v34 = vsel %vm3399_vm11, %v5755_v9, 128.0  ;;  %v3416_v35 = vsel %vm3400_vm10, %v5757_v10, 128.0  ;;  %v3417_v0 = vsel %vm3401_vm9, %v5759_v11, 128.0  ;;  %v3418_v41 = vsel %vm3402_vm8, %v5761_v12, 128.0 }
 0x3af   : > { %v3427_v15 = vmin.f32 %v3423_v32, %v3415_v34  ;;  %v3428_v13 = vmin.f32 %v3424_v26, %v3416_v35  ;;  %v3429_v63 = vmin.f32 %v3425_v6, %v3417_v0  ;;  %v3430_v20 = vmin.f32 %v3426_v2, %v3418_v41  ;;  %v846_v57 = vpop.permute.xlu1 %845 }
 0x3b0   : > { %v7281_v49 = vadd.f32 %v6389_v62, %v846_v57  ;;  %v7284_v18 = vadd.f32 %v6391_v45, %v836_v7  ;;  %v7288_v29 = vadd.f32 %v6393_v4, %v841_v3  ;;  %vm1213_vm9 = vcmask 1042432  }
 0x3b1   : > { %v3431_v33 = vmin.f32 %v3427_v15, %v3428_v13  ;;  %v3432_v1 = vmin.f32 %v3429_v63, %v3430_v20  ;;  %vm8338_vm10 = vcmask 179200   ;;  %vm8339_vm11 = vcmp.eq.f32.partialorder %v5707_v42, %v6031_v5 }
 0x3b2   : > { %vm8340_vm12 = vcmp.eq.f32.partialorder %v5709_v43, %v6031_v5  ;;  %vm8342_vm14 = vmmov 0   ;;  %vm8343_vm15 = vcmp.eq.f32.partialorder %v5711_v47, %v6031_v5  ;;  %vm8344_vm0 = vcmp.eq.f32.partialorder %v5713_v48, %v6031_v5 }
 0x3b3   : > { %v7278_v51 = vmin.f32 %v3431_v33, %v3432_v1  ;;  %vm3974_vm13 = vmpackc.low %vm8340_vm12, %vm8339_vm11  ;;  %vm8345_vm2 = vcmp.eq.f32.partialorder %v5715_v50, %v6031_v5  ;;  %vm8346_vm5 = vcmp.eq.f32.partialorder %v5717_v52, %v6031_v5  ;;  %vm8347_vm4 = vcmp.eq.f32.partialorder %v5719_v53, %v6031_v5 }
 0x3b4   : > { %vm3976_vm1 = vmpackc.low %vm8344_vm0, %vm8343_vm15  ;;  %vm8348_vm8 = vcmp.eq.f32.partialorder %v5721_v55, %v6031_v5  ;;  %vm8349_vm3 = vcmp.eq.f32.partialorder %v5723_v56, %v6031_v5  ;;  %vm8351_vm12 = vcmp.eq.f32.partialorder %v5727_v60, %v6031_v5  ;;  %vm8353_vm0 = vcmp.eq.f32.partialorder %v5755_v9, %v6031_v5 }
 0x3b5   : > { %8336 = vst [vmem:[#allocation33_spill] sm:$0xff] %v7278_v51  ;;  %vm3978_vm6 = vmpackc.low %vm8346_vm5, %vm8345_vm2  ;;  %vm8355_vm5 = vcmp.eq.f32.partialorder %v5759_v11, %v6031_v5 }
 0x3b6   : > { %vm3980_vm7 = vmpackc.low %vm8348_vm8, %vm8347_vm4  ;;  %vm8357_vm8 = vcmask 64512  }
 0x400   : > { %v4328_v40 = vpop.f32.mrb[4].mxu1 }
 0x401   : > { %v1142_v19 = vadd.f32 %v4328_v40, %v7281_v49  ;;  %v1133_v44 = vpop.f32.mrb[5].mxu1 }
 0x402   : > { %v1134_v16 = vadd.f32 %v1133_v44, %v7284_v18  ;;  %v4329_v22 = vpop.f32.mrb[6].mxu1 }
 0x403   : > { %v1149_v37 = vmul.f32 %v1142_v19, %v1142_v19  ;;  %v1136_v27 = vpop.f32.mrb[7].mxu1  ;;  %v7294_v22 = vld [vmem:[#allocation13 + $0x8] sm:$0xff]  }
 0x404   : > { %v1147_v31 = vmul.f32 %v1134_v16, %v1134_v16  ;;  %v1137_v36 = vadd.f32 %v1136_v27, %v7288_v29  ;;  %v7368_v27 = vld [vmem:[#allocation8] sm:$0xff]  }
 0x405   : > { %v1152_v62 = vmul.f32 %v1149_v37, %v1142_v19  ;;  %v8337_v37 = vmov 0.0  }
 0x406   : > { %v1150_v30 = vmul.f32 %v1147_v31, %v1134_v16  ;;  %v1148_v17 = vmul.f32 %v1137_v36, %v1137_v36 }
 0x407   : > { %v1155_v45 = vmul.f32 0.044715, %v1152_v62 }
 0x408   : > { %v1153_v23 = vmul.f32 0.044715, %v1150_v30  ;;  %v1151_v28 = vmul.f32 %v1148_v17, %v1137_v36 }
 0x409   : > { %v1158_v8 = vadd.f32 %v1155_v45, %v1142_v19 }
 0x40a   : > { %v1156_v25 = vadd.f32 %v1153_v23, %v1134_v16  ;;  %v1154_v32 = vmul.f32 0.044715, %v1151_v28 }
 0x40b   : > { %v1161_v26 = vmul.f32 0.7978846, %v1158_v8 }
 0x40c   : > { %v1159_v4 = vmul.f32 0.7978846, %v1156_v25  ;;  %v1157_v6 = vadd.f32 %v1154_v32, %v1137_v36 }
 0x40d   : > { %4751 = vtanh.f32 %v1161_v26 }
 0x40e   : > { %4753 = vtanh.f32 %v1159_v4  ;;  %v1160_v2 = vmul.f32 0.7978846, %v1157_v6 }
 0x410   : > { %4755 = vtanh.f32 %v1160_v2 }
 0x417   : > { %v4752_v34 = vpop.eup %4751 }
 0x418   : > { %v4754_v35 = vpop.eup %4753  ;;  %v1167_v0 = vadd.f32 1.0, %v4752_v34 }
 0x419   : > { %v1165_v41 = vadd.f32 1.0, %v4754_v35 }
 0x41a   : > { %v4756_v15 = vpop.eup %4755  ;;  %v1170_v20 = vmul.f32 0.5, %v1167_v0 }
 0x41b   : > { %v1166_v13 = vadd.f32 1.0, %v4756_v15  ;;  %v1168_v63 = vmul.f32 0.5, %v1165_v41 }
 0x41c   : > { %v1173_v7 = vmul.f32 %v1170_v20, %v1142_v19  ;;  %v8341_v19 = vmov 1.0|1.0  }
 0x41d   : > { %v1169_v33 = vmul.f32 0.5, %v1166_v13  ;;  %v1171_v1 = vmul.f32 %v1168_v63, %v1134_v16  ;;  %v7365_v16 = vld [vmem:[%s5604_s15] sm:$0xf] }
 0x41e   : > { %v1175_v40 = vpack.c.bf16 %v1173_v7, %v1173_v7 }
 0x41f   : > { %v1172_v3 = vmul.f32 %v1169_v33, %v1137_v36 }
 0x420   : > { %v1215_v44 = vsel %vm1213_vm9, %v1175_v40, 0 }
 0x421   : > { %v1174_v57 = vpack.c.bf16 %v1172_v3, %v1171_v1 }
 0x423   : > { %4330 = vmatprep.subr.bf16.mxu1 %v1174_v57 }
 0x424   : > { %4331 = vmatpush3.bf16.msra.mxu1 %v1174_v57 }
 0x425   : > { %4579 = vmatprep.subr.msk.bf16.mxu1 %vm1213_vm9, %v1175_v40 }
 0x428   : > { %4333 = vmatpush3.bf16.msra.mxu1 %v1215_v44 }
 0x429   : > { %4338 = vmatprep.subr.bf16.mxu1 %v8337_v37 }
 0x42b   : > { %4335 = vmatmul.mubr.msk.bf16.vlgmr.msra.gmra.mrb[8].mxu1 %vm8338_vm10, %v7294_v22  ;;  %vm8350_vm10 = vcmp.eq.f32.partialorder %v5725_v59, %v6031_v5 }
 0x42c   : > { %4339 = vmatpush3.bf16.msk.msra.mxu1 %vm3974_vm13, %v8341_v19  ;;  %4354 = vmatprep.mubr.msk.bf16.mxu1 %vm8342_vm14, %v8337_v37  ;;  %vm3982_vm11 = vmpackc.low %vm8350_vm10, %vm8349_vm3  ;;  %vm8352_vm13 = vcmp.eq.f32.partialorder %v5729_v61, %v6031_v5 }
 0x42d   : > { %4340 = vmatprep.subr.bf16.mxu1 %v8337_v37  ;;  %vm3984_vm15 = vmpackc.low %vm8352_vm13, %vm8351_vm12  ;;  %vm8363_vm13 = vcmp.eq.f32.partialorder %v5707_v42, %v6241_v39 }
 0x42e   : > { %vm8360_vm10 = vmmov %vm8357_vm8 }
 0x430   : > { %4341 = vmatpush3.bf16.msk.msra.mxu1 %vm3976_vm1, %v8341_v19  ;;  %vm8354_vm1 = vcmp.eq.f32.partialorder %v5757_v10, %v6031_v5 }
 0x431   : > { %4342 = vmatprep.subr.bf16.mxu1 %v8337_v37  ;;  %vm3986_vm2 = vmpackc.low %vm8354_vm1, %vm8353_vm0  ;;  %vm8365_vm1 = vcmp.eq.f32.partialorder %v5711_v47, %v6241_v39 }
 0x434   : > { %4343 = vmatpush3.bf16.msk.msra.mxu1 %vm3978_vm6, %v8341_v19  ;;  %vm8356_vm6 = vcmp.eq.f32.partialorder %v5761_v12, %v6031_v5 }
 0x435   : > { %4344 = vmatprep.subr.bf16.mxu1 %v8337_v37  ;;  %vm3988_vm4 = vmpackc.low %vm8356_vm6, %vm8355_vm5  ;;  %vm8367_vm6 = vcmp.eq.f32.partialorder %v5715_v50, %v6241_v39 }
 0x438   : > { %4345 = vmatpush3.bf16.msk.msra.mxu1 %vm3980_vm7, %v8341_v19  ;;  %vm8358_vm7 = vcmask 1043456  }
 0x439   : > { %4346 = vmatprep.subr.bf16.mxu1 %v8337_v37  ;;  %vm8359_vm3 = vmmov %vm8358_vm7 }
 0x43c   : > { %4347 = vmatpush3.bf16.msk.msra.mxu1 %vm3982_vm11, %v8341_v19  ;;  %vm8361_vm11 = vcmask 179200  }
 0x43d   : > { %4348 = vmatprep.subr.bf16.mxu1 %v8337_v37  ;;  %vm8362_vm12 = vmmov %vm8361_vm11 }
 0x440   : > { %4349 = vmatpush3.bf16.msk.msra.mxu1 %vm3984_vm15, %v8341_v19  ;;  %vm8364_vm15 = vcmp.eq.f32.partialorder %v5709_v43, %v6241_v39 }
 0x441   : > { %4350 = vmatprep.subr.bf16.mxu1 %v8337_v37  ;;  %vm3994_vm0 = vmpackc.low %vm8364_vm15, %vm8363_vm13  ;;  %vm8373_vm15 = vcmp.eq.f32.partialorder %v5727_v60, %v6241_v39 }
 0x444   : > { %4351 = vmatpush3.bf16.msk.msra.mxu1 %vm3986_vm2, %v8341_v19  ;;  %vm8366_vm2 = vcmp.eq.f32.partialorder %v5713_v48, %v6241_v39 }
 0x445   : > { %4352 = vmatprep.subr.bf16.mxu1 %v8337_v37  ;;  %vm3996_vm5 = vmpackc.low %vm8366_vm2, %vm8365_vm1  ;;  %vm8375_vm2 = vcmp.eq.f32.partialorder %v5755_v9, %v6241_v39 }
 0x448   : > { %4353 = vmatpush3.bf16.msk.msra.mxu1 %vm3988_vm4, %v8341_v19  ;;  %vm8368_vm4 = vcmp.eq.f32.partialorder %v5717_v52, %v6241_v39 }
 0x44b   : > { %4355 = vmatmul.mubr.bf16.vlgmr.msra.gmra.mrb[12].mxu1 %v7365_v16 }
 0x44c   : > { %4394 = vmatprep.mubr.msk.bf16.mxu1 %vm8357_vm8, %v7368_v27  ;;  %vm3998_vm8 = vmpackc.low %vm8368_vm4, %vm8367_vm6  ;;  %vm8377_vm4 = vcmp.eq.f32.partialorder %v5759_v11, %v6241_v39 }
 0x4fe   : > { %v7372_v31 = vpop.f32.mrb[8].mxu1 }
 0x4ff   : > { %v7374_v36 = vpop.f32.mrb[9].mxu1 }
 0x500   : > { %v7376_v62 = vpop.f32.mrb[10].mxu1 }
 0x501   : > { %v7378_v30 = vpop.f32.mrb[11].mxu1 }
 0x51e   : > { %v1466_v5 = vpop.f32.mrb[12].mxu1 }
 0x51f   : > { %v1472_v17 = vsub.f32 %v1466_v5, %v6672_v46  ;;  %v4356_v45 = vpop.f32.mrb[13].mxu1 }
 0x520   : > { %v1469_v23 = vpop.f32.mrb[14].mxu1 }
 0x521   : > { %v1473_v28 = vpack.c.bf16 %v1472_v17, %v1472_v17  ;;  %v4357_v8 = vpop.f32.mrb[15].mxu1 }
 0x523   : > { %v1475_v25 = vsel %vm8358_vm7, %v1473_v28, 0  ;;  %4580 = vmatprep.subr.msk.bf16.mxu0 %vm8359_vm3, %v1473_v28  ;;  %vm8369_vm7 = vcmp.eq.f32.partialorder %v5719_v53, %v6241_v39  ;;  %vm8370_vm3 = vcmp.eq.f32.partialorder %v5721_v55, %v6241_v39 }
 0x524   : > { %4359 = vmatpush3.bf16.msra.mxu0 %v1475_v25 }
 0x527   : > { %4361 = vmatmul.mubr.msk.bf16.vlgmr.msra.gmra.mrb[20].mxu0 %vm8360_vm10, %v6821_v24  ;;  %vm4000_vm10 = vmpackc.low %vm8370_vm3, %vm8369_vm7  ;;  %vm8379_vm3 = vcmask 64512  }
 0x528   : > { %4368 = vmatprep.mubr.msk.bf16.mxu0 %vm8361_vm11, %v7224_v38  ;;  %vm8371_vm11 = vcmp.eq.f32.partialorder %v5723_v56, %v6241_v39 }
 0x5fa   : > { %v4362_v32 = vpop.f32.mrb[20].mxu0 }
 0x5fb   : > { %v1520_v26 = vadd.f32 %v4362_v32, %v7281_v49  ;;  %v1511_v4 = vpop.f32.mrb[21].mxu0 }
 0x5fc   : > { %v1512_v6 = vadd.f32 %v1511_v4, %v7284_v18  ;;  %v4363_v2 = vpop.f32.mrb[22].mxu0 }
 0x5fd   : > { %v1527_v34 = vmul.f32 %v1520_v26, %v1520_v26  ;;  %v1514_v35 = vpop.f32.mrb[23].mxu0 }
 0x5fe   : > { %v1525_v0 = vmul.f32 %v1512_v6, %v1512_v6  ;;  %v1515_v41 = vadd.f32 %v1514_v35, %v7288_v29 }
 0x5ff   : > { %v1530_v15 = vmul.f32 %v1527_v34, %v1520_v26 }
 0x600   : > { %v1528_v13 = vmul.f32 %v1525_v0, %v1512_v6  ;;  %v1526_v63 = vmul.f32 %v1515_v41, %v1515_v41 }
 0x601   : > { %v1533_v20 = vmul.f32 0.044715, %v1530_v15 }
 0x602   : > { %v1531_v24 = vmul.f32 0.044715, %v1528_v13  ;;  %v1529_v33 = vmul.f32 %v1526_v63, %v1515_v41 }
 0x603   : > { %v1536_v1 = vadd.f32 %v1533_v20, %v1520_v26 }
 0x604   : > { %v1534_v3 = vadd.f32 %v1531_v24, %v1512_v6  ;;  %v1532_v7 = vmul.f32 0.044715, %v1529_v33 }
 0x605   : > { %v1539_v57 = vmul.f32 0.7978846, %v1536_v1 }
 0x606   : > { %v1537_v40 = vmul.f32 0.7978846, %v1534_v3  ;;  %v1535_v44 = vadd.f32 %v1532_v7, %v1515_v41 }
 0x607   : > { %4757 = vtanh.f32 %v1539_v57 }
 0x608   : > { %4759 = vtanh.f32 %v1537_v40  ;;  %v1538_v5 = vmul.f32 0.7978846, %v1535_v44 }
 0x60a   : > { %4761 = vtanh.f32 %v1538_v5 }
 0x611   : > { %v4758_v17 = vpop.eup %4757 }
 0x612   : > { %v4760_v45 = vpop.eup %4759  ;;  %v1545_v23 = vadd.f32 1.0, %v4758_v17 }
 0x613   : > { %v1543_v28 = vadd.f32 1.0, %v4760_v45 }
 0x614   : > { %v4762_v8 = vpop.eup %4761  ;;  %v1548_v4 = vmul.f32 0.5, %v1545_v23 }
 0x615   : > { %v1544_v25 = vadd.f32 1.0, %v4762_v8  ;;  %v1546_v32 = vmul.f32 0.5, %v1543_v28 }
 0x616   : > { %v1551_v0 = vmul.f32 %v1548_v4, %v1520_v26  ;;  %v7463_v26 = vpop.permute.xlu1 %1178 }
 0x617   : > { %v1547_v2 = vmul.f32 0.5, %v1544_v25  ;;  %v1549_v34 = vmul.f32 %v1546_v32, %v1512_v6 }
 0x618   : > { %v1553_v13 = vpack.c.bf16 %v1551_v0, %v1551_v0 }
 0x619   : > { %v1550_v35 = vmul.f32 %v1547_v2, %v1515_v41 }
 0x61a   : > { %v1555_v63 = vsel %vm1213_vm9, %v1553_v13, 0  ;;  %v7465_v6 = vpop.permute.xlu1 %1183 }
 0x61b   : > { %v1552_v15 = vpack.c.bf16 %v1550_v35, %v1549_v34  ;;  %v7485_v1 = vadd.f32 %v7378_v30, %v7465_v6 }
 0x61d   : > { %4364 = vmatprep.subr.bf16.mxu0 %v1552_v15 }
 0x61e   : > { %4365 = vmatpush3.bf16.msra.mxu0 %v1552_v15  ;;  %v7467_v41 = vpop.permute.xlu1 %1188 }
 0x61f   : > { %4581 = vmatprep.subr.msk.bf16.mxu0 %vm1213_vm9, %v1553_v13  ;;  %v7471_v20 = vadd.f32 %v7372_v31, %v7467_v41 }
 0x621   : > { %v1268_v3 = vmul.f32 %v7471_v20, %v7471_v20 }
 0x622   : > { %4367 = vmatpush3.bf16.msra.mxu0 %v1555_v63  ;;  %v7473_v24 = vpop.permute.xlu1 %1193 }
 0x623   : > { %4372 = vmatprep.subr.bf16.mxu0 %v8337_v37  ;;  %v7481_v33 = vadd.f32 %v7376_v62, %v7473_v24  ;;  %v1272_v57 = vmul.f32 %v1268_v3, %v7471_v20 }
 0x625   : > { %4369 = vmatmul.mubr.msk.bf16.vlgmr.msra.gmra.mrb[24].mxu0 %vm8362_vm12, %v7294_v22  ;;  %vm8372_vm12 = vcmp.eq.f32.partialorder %v5725_v59, %v6241_v39  ;;  %v1269_v7 = vmul.f32 %v7481_v33, %v7481_v33  ;;  %v1276_v44 = vmul.f32 0.044715, %v1272_v57 }
 0x626   : > { %4373 = vmatpush3.bf16.msk.msra.mxu0 %vm3994_vm0, %v8341_v19  ;;  %4388 = vmatprep.mubr.msk.bf16.mxu0 %vm8342_vm14, %v8337_v37  ;;  %vm4002_vm13 = vmpackc.low %vm8372_vm12, %vm8371_vm11  ;;  %vm8374_vm0 = vcmp.eq.f32.partialorder %v5729_v61, %v6241_v39 }
 0x627   : > { %4374 = vmatprep.subr.bf16.mxu0 %v8337_v37  ;;  %vm4004_vm1 = vmpackc.low %vm8374_vm0, %vm8373_vm15  ;;  %v1273_v40 = vmul.f32 %v1269_v7, %v7481_v33  ;;  %v1280_v23 = vadd.f32 %v1276_v44, %v7471_v20  ;;  %vm8385_vm0 = vcmp.eq.f32.partialorder %v5707_v42, %v6459_v54 }
 0x628   : > { %vm8382_vm12 = vmmov %vm8379_vm3 }
 0x629   : > { %v1277_v17 = vmul.f32 0.044715, %v1273_v40  ;;  %v1284_v0 = vmul.f32 0.7978846, %v1280_v23 }
 0x62a   : > { %4375 = vmatpush3.bf16.msk.msra.mxu0 %vm3996_vm5, %v8341_v19  ;;  %vm8376_vm5 = vcmp.eq.f32.partialorder %v5757_v10, %v6241_v39 }
 0x62b   : > { %4376 = vmatprep.subr.bf16.mxu0 %v8337_v37  ;;  %vm4006_vm6 = vmpackc.low %vm8376_vm5, %vm8375_vm2  ;;  %v1281_v25 = vadd.f32 %v1277_v17, %v7481_v33  ;;  %4763 = vtanh.f32 %v1284_v0  ;;  %vm8387_vm5 = vcmp.eq.f32.partialorder %v5711_v47, %v6459_v54 }
 0x62e   : > { %4377 = vmatpush3.bf16.msk.msra.mxu0 %vm3998_vm8, %v8341_v19  ;;  %vm8378_vm8 = vcmp.eq.f32.partialorder %v5761_v12, %v6241_v39  ;;  %v7477_v39 = vadd.f32 %v7374_v36, %v7463_v26  ;;  %v1267_v36 = vmul.f32 %v7485_v1, %v7485_v1 }
 0x62f   : > { %4378 = vmatprep.subr.bf16.mxu0 %v8337_v37  ;;  %vm4008_vm7 = vmpackc.low %vm8378_vm8, %vm8377_vm4  ;;  %vm8389_vm8 = vcmp.eq.f32.partialorder %v5715_v50, %v6459_v54 }
 0x630   : > { %v1266_v31 = vmul.f32 %v7477_v39, %v7477_v39  ;;  %v1271_v30 = vmul.f32 %v1267_v36, %v7485_v1  ;;  %v1285_v36 = vmul.f32 0.7978846, %v1281_v25 }
 0x632   : > { %4379 = vmatpush3.bf16.msk.msra.mxu0 %vm4000_vm10, %v8341_v19  ;;  %v1270_v62 = vmul.f32 %v1266_v31, %v7477_v39  ;;  %v1275_v45 = vmul.f32 0.044715, %v1271_v30  ;;  %vm8380_vm10 = vcmask 1043456  }
 0x633   : > { %4380 = vmatprep.subr.bf16.mxu0 %v8337_v37  ;;  %vm8381_vm11 = vmmov %vm8380_vm10 }
 0x634   : > { %v1274_v5 = vmul.f32 0.044715, %v1270_v62  ;;  %v1279_v2 = vadd.f32 %v1275_v45, %v7485_v1 }
 0x636   : > { %4381 = vmatpush3.bf16.msk.msra.mxu0 %vm4002_vm13, %v8341_v19  ;;  %v1278_v28 = vadd.f32 %v1274_v5, %v7477_v39  ;;  %v1283_v40 = vmul.f32 0.7978846, %v1279_v2  ;;  %vm8383_vm13 = vcmask 179200  }
 0x637   : > { %4382 = vmatprep.subr.bf16.mxu0 %v8337_v37  ;;  %vm8384_vm15 = vmmov %vm8383_vm13 }
 0x638   : > { %v1282_v3 = vmul.f32 0.7978846, %v1278_v28 }
 0x63a   : > { %4383 = vmatpush3.bf16.msk.msra.mxu0 %vm4004_vm1, %v8341_v19  ;;  %4765 = vtanh.f32 %v1282_v3  ;;  %v4764_v3 = vpop.eup %4763  ;;  %vm8386_vm1 = vcmp.eq.f32.partialorder %v5709_v43, %v6459_v54 }
 0x63b   : > { %4384 = vmatprep.subr.bf16.mxu0 %v8337_v37  ;;  %4767 = vtanh.f32 %v1285_v36  ;;  %vm4014_vm2 = vmpackc.low %vm8386_vm1, %vm8385_vm0  ;;  %vm8395_vm1 = vcmp.eq.f32.partialorder %v5727_v60, %v6459_v54 }
 0x63c   : > { %4769 = vtanh.f32 %v1283_v40 }
 0x63e   : > { %4385 = vmatpush3.bf16.msk.msra.mxu0 %vm4006_vm6, %v8341_v19  ;;  %vm8388_vm6 = vcmp.eq.f32.partialorder %v5713_v48, %v6459_v54 }
 0x63f   : > { %4386 = vmatprep.subr.bf16.mxu0 %v8337_v37  ;;  %vm4016_vm4 = vmpackc.low %vm8388_vm6, %vm8387_vm5  ;;  %vm8397_vm6 = vcmp.eq.f32.partialorder %v5755_v9, %v6459_v54 }
 0x642   : > { %4387 = vmatpush3.bf16.msk.msra.mxu0 %vm4008_vm7, %v8341_v19  ;;  %vm8390_vm7 = vcmp.eq.f32.partialorder %v5717_v52, %v6459_v54 }
 0x644   : > { %v4766_v36 = vpop.eup %4765 }
 0x645   : > { %4389 = vmatmul.mubr.bf16.vlgmr.msra.gmra.mrb[28].mxu0 %v7365_v16  ;;  %v1290_v40 = vadd.f32 1.0, %v4766_v36 }
 0x646   : > { %4428 = vmatprep.mubr.msk.bf16.mxu0 %vm8379_vm3, %v7368_v27  ;;  %vm4018_vm3 = vmpackc.low %vm8390_vm7, %vm8389_vm8  ;;  %vm8399_vm7 = vcmp.eq.f32.partialorder %v5759_v11, %v6459_v54 }
 0x6f8   : > { %v4370_v8 = vpop.f32.mrb[24].mxu0 }
 0x6f9   : > { %v7503_v32 = vadd.f32 %v4370_v8, %v7467_v41  ;;  %v1591_v4 = vpop.f32.mrb[25].mxu0 }
 0x6fa   : > { %v7507_v34 = vadd.f32 %v1591_v4, %v7463_v26  ;;  %v4371_v35 = vpop.f32.mrb[26].mxu0 }
 0x6fb   : > { %v1608_v15 = vmul.f32 %v7503_v32, %v7503_v32  ;;  %v7512_v13 = vadd.f32 %v4371_v35, %v7473_v24  ;;  %v1594_v63 = vpop.f32.mrb[27].mxu0 }
 0x6fc   : > { %v1606_v31 = vmul.f32 %v7507_v34, %v7507_v34  ;;  %v1595_v7 = vadd.f32 %v1594_v63, %v7465_v6 }
 0x6fd   : > { %v1612_v57 = vmul.f32 %v1608_v15, %v7503_v32  ;;  %v1609_v62 = vmul.f32 %v7512_v13, %v7512_v13 }
 0x6fe   : > { %v1610_v30 = vmul.f32 %v1606_v31, %v7507_v34  ;;  %v1607_v44 = vmul.f32 %v1595_v7, %v1595_v7 }
 0x6ff   : > { %v1616_v5 = vmul.f32 0.044715, %v1612_v57  ;;  %v1613_v17 = vmul.f32 %v1609_v62, %v7512_v13  ;;  %v4768_v57 = vpop.eup %4767 }
 0x700   : > { %v1614_v45 = vmul.f32 0.044715, %v1610_v30  ;;  %v1611_v23 = vmul.f32 %v1607_v44, %v1595_v7  ;;  %v4770_v62 = vpop.eup %4769  ;;  %v1292_v30 = vadd.f32 1.0, %v4764_v3  ;;  %v1293_v44 = vadd.f32 1.0, %v4768_v57 }
 0x701   : > { %v1620_v28 = vadd.f32 %v1616_v5, %v7503_v32  ;;  %v1617_v8 = vmul.f32 0.044715, %v1613_v17  ;;  %v1291_v17 = vadd.f32 1.0, %v4770_v62 }
 0x702   : > { %v1618_v25 = vadd.f32 %v1614_v45, %v7507_v34  ;;  %v1615_v4 = vmul.f32 0.044715, %v1611_v23  ;;  %v1296_v23 = vmul.f32 0.5, %v1292_v30 }
 0x703   : > { %v1624_v35 = vmul.f32 0.7978846, %v1620_v28  ;;  %v1621_v2 = vadd.f32 %v1617_v8, %v7512_v13 }
 0x704   : > { %v1622_v15 = vmul.f32 0.7978846, %v1618_v25  ;;  %v1619_v63 = vadd.f32 %v1615_v4, %v1595_v7  ;;  %v1294_v25 = vmul.f32 0.5, %v1290_v40  ;;  %v7526_v58 = vmul.f32 %v1296_v23, %v7471_v20 }
 0x705   : > { %4771 = vtanh.f32 %v1624_v35  ;;  %v1625_v0 = vmul.f32 0.7978846, %v1621_v2  ;;  %v1297_v2 = vmul.f32 0.5, %v1293_v44 }
 0x706   : > { %4773 = vtanh.f32 %v1622_v15  ;;  %v1623_v31 = vmul.f32 0.7978846, %v1619_v63  ;;  %v7532_v57 = vmul.f32 %v1294_v25, %v7477_v39 }
 0x707   : > { %4775 = vtanh.f32 %v1625_v0  ;;  %v1295_v0 = vmul.f32 0.5, %v1291_v17  ;;  %v7538_v40 = vmul.f32 %v1297_v2, %v7481_v33 }
 0x708   : > { %4777 = vtanh.f32 %v1623_v31 }
 0x70f   : > { %v4772_v5 = vpop.eup %4771 }
 0x710   : > { %v4774_v45 = vpop.eup %4773  ;;  %v1632_v28 = vadd.f32 1.0, %v4772_v5 }
 0x711   : > { %v4776_v8 = vpop.eup %4775  ;;  %v1630_v4 = vadd.f32 1.0, %v4774_v45 }
 0x712   : > { %v4778_v35 = vpop.eup %4777  ;;  %v1636_v15 = vmul.f32 0.5, %v1632_v28  ;;  %v1633_v63 = vadd.f32 1.0, %v4776_v8 }
 0x713   : > { %v1634_v31 = vmul.f32 0.5, %v1630_v4  ;;  %v1631_v51 = vadd.f32 1.0, %v4778_v35 }
 0x714   : > { %v7529_v3 = vmul.f32 %v1636_v15, %v7503_v32  ;;  %v1637_v36 = vmul.f32 0.5, %v1633_v63  ;;  %v7546_v32 = vmul.f32 %v1295_v0, %v7485_v1 }
 0x715   : > { %v7535_v62 = vmul.f32 %v1634_v31, %v7507_v34  ;;  %v1635_v30 = vmul.f32 0.5, %v1631_v51 }
 0x716   : > { %v7543_v20 = vmul.f32 %v1637_v36, %v7512_v13 }
 0x717   : > { %v7550_v5 = vmul.f32 %v1635_v30, %v1595_v7  ;;  %v7559_v7 = vld [vmem:[#allocation8 + $0x8] ss:$0 sps:$4 sm:$0x77]  }
 0x718   : > { %v1810_v34 = vpop.f32.mrb[28].mxu0 }
 0x719   : > { %v1816_v17 = vsub.f32 %v1810_v34, %v6672_v46  ;;  %v4390_v45 = vpop.f32.mrb[29].mxu0 }
 0x71a   : > { %v1813_v13 = vpop.f32.mrb[30].mxu0 }
 0x71b   : > { %v1817_v23 = vpack.c.bf16 %v1816_v17, %v1816_v17  ;;  %v4391_v28 = vpop.f32.mrb[31].mxu0 }
 0x71d   : > { %v1819_v1 = vsel %vm8380_vm10, %v1817_v23, 0  ;;  %4582 = vmatprep.subr.msk.bf16.mxu1 %vm8381_vm11, %v1817_v23  ;;  %vm8391_vm10 = vcmp.eq.f32.partialorder %v5719_v53, %v6459_v54  ;;  %vm8392_vm11 = vcmp.eq.f32.partialorder %v5721_v55, %v6459_v54 }
 0x71e   : > { %4393 = vmatpush3.bf16.msra.mxu1 %v1819_v1 }
 0x721   : > { %4395 = vmatmul.mubr.msk.bf16.vlgmr.msra.gmra.mrb[16].mxu1 %vm8382_vm12, %v7559_v7  ;;  %vm4020_vm12 = vmpackc.low %vm8392_vm11, %vm8391_vm10  ;;  %vm8401_vm11 = vcmask 64512  }
 0x722   : > { %4402 = vmatprep.mubr.msk.bf16.mxu1 %vm8383_vm13, %v7224_v38  ;;  %vm8393_vm13 = vcmp.eq.f32.partialorder %v5723_v56, %v6459_v54 }
 0x7f4   : > { %v4396_v8 = vpop.f32.mrb[16].mxu1 }
 0x7f5   : > { %v1864_v25 = vadd.f32 %v4396_v8, %v7281_v49  ;;  %v1855_v4 = vpop.f32.mrb[17].mxu1 }
 0x7f6   : > { %v1856_v35 = vadd.f32 %v1855_v4, %v7284_v18  ;;  %v4397_v2 = vpop.f32.mrb[18].mxu1 }
 0x7f7   : > { %v1871_v15 = vmul.f32 %v1864_v25, %v1864_v25  ;;  %v1858_v63 = vpop.f32.mrb[19].mxu1 }
 0x7f8   : > { %v1869_v0 = vmul.f32 %v1856_v35, %v1856_v35  ;;  %v1859_v31 = vadd.f32 %v1858_v63, %v7288_v29 }
 0x7f9   : > { %v1874_v36 = vmul.f32 %v1871_v15, %v1864_v25 }
 0x7fa   : > { %v1872_v30 = vmul.f32 %v1869_v0, %v1856_v35  ;;  %v1870_v34 = vmul.f32 %v1859_v31, %v1859_v31 }
 0x7fb   : > { %v1877_v17 = vmul.f32 0.044715, %v1874_v36 }
 0x7fc   : > { %v1875_v45 = vmul.f32 0.044715, %v1872_v30  ;;  %v1873_v13 = vmul.f32 %v1870_v34, %v1859_v31 }
 0x7fd   : > { %v1880_v23 = vadd.f32 %v1877_v17, %v1864_v25 }
 0x7fe   : > { %v1878_v28 = vadd.f32 %v1875_v45, %v1856_v35  ;;  %v1876_v1 = vmul.f32 0.044715, %v1873_v13 }
 0x7ff   : > { %v1883_v33 = vmul.f32 0.7978846, %v1880_v23 }
 0x800   : > { %v1881_v8 = vmul.f32 0.7978846, %v1878_v28  ;;  %v1879_v51 = vadd.f32 %v1876_v1, %v1859_v31 }
 0x801   : > { %4779 = vtanh.f32 %v1883_v33 }
 0x802   : > { %4781 = vtanh.f32 %v1881_v8  ;;  %v1882_v4 = vmul.f32 0.7978846, %v1879_v51 }
 0x804   : > { %4783 = vtanh.f32 %v1882_v4 }
 0x80b   : > { %v4780_v2 = vpop.eup %4779 }
 0x80c   : > { %v4782_v39 = vpop.eup %4781  ;;  %v1889_v44 = vadd.f32 1.0, %v4780_v2 }
 0x80d   : > { %v1887_v63 = vadd.f32 1.0, %v4782_v39 }
 0x80e   : > { %v4784_v15 = vpop.eup %4783  ;;  %v1892_v36 = vmul.f32 0.5, %v1889_v44 }
 0x80f   : > { %v1888_v0 = vadd.f32 1.0, %v4784_v15  ;;  %v1890_v14 = vmul.f32 0.5, %v1887_v63 }
 0x810   : > { %v1895_v45 = vmul.f32 %v1892_v36, %v1864_v25 }
 0x811   : > { %v1891_v30 = vmul.f32 0.5, %v1888_v0  ;;  %v1893_v34 = vmul.f32 %v1890_v14, %v1856_v35 }
 0x812   : > { %v1897_v23 = vpack.c.bf16 %v1895_v45, %v1895_v45 }
 0x813   : > { %v1894_v17 = vmul.f32 %v1891_v30, %v1859_v31 }
 0x814   : > { %v1899_v51 = vsel %vm1213_vm9, %v1897_v23, 0 }
 0x815   : > { %v1896_v13 = vpack.c.bf16 %v1894_v17, %v1893_v34 }
 0x817   : > { %4398 = vmatprep.subr.bf16.mxu1 %v1896_v13 }
 0x818   : > { %4399 = vmatpush3.bf16.msra.mxu1 %v1896_v13 }
 0x819   : > { %4583 = vmatprep.subr.msk.bf16.mxu1 %vm1213_vm9, %v1897_v23 }
 0x81c   : > { %4401 = vmatpush3.bf16.msra.mxu1 %v1899_v51 }
 0x81d   : > { %4406 = vmatprep.subr.bf16.mxu1 %v8337_v37 }
 0x81f   : > { %4403 = vmatmul.mubr.msk.bf16.vlgmr.msra.gmra.mrb[20].mxu1 %vm8384_vm15, %v7294_v22  ;;  %vm8394_vm15 = vcmp.eq.f32.partialorder %v5725_v59, %v6459_v54 }
 0x820   : > { %4407 = vmatpush3.bf16.msk.msra.mxu1 %vm4014_vm2, %v8341_v19  ;;  %4422 = vmatprep.mubr.msk.bf16.mxu1 %vm8342_vm14, %v8337_v37  ;;  %vm4022_vm0 = vmpackc.low %vm8394_vm15, %vm8393_vm13  ;;  %vm8396_vm2 = vcmp.eq.f32.partialorder %v5729_v61, %v6459_v54 }
 0x821   : > { %4408 = vmatprep.subr.bf16.mxu1 %v8337_v37  ;;  %vm4024_vm5 = vmpackc.low %vm8396_vm2, %vm8395_vm1  ;;  %vm8411_vm2 = vcmp.eq.f32.partialorder %v5707_v42, %v6669_v21 }
 0x822   : > { %vm8408_vm15 = vmmov %vm8401_vm11 }
 0x824   : > { %4409 = vmatpush3.bf16.msk.msra.mxu1 %vm4016_vm4, %v8341_v19  ;;  %vm8398_vm4 = vcmp.eq.f32.partialorder %v5757_v10, %v6459_v54 }
 0x825   : > { %4410 = vmatprep.subr.bf16.mxu1 %v8337_v37  ;;  %vm4026_vm8 = vmpackc.low %vm8398_vm4, %vm8397_vm6  ;;  %vm8413_vm4 = vcmp.eq.f32.partialorder %v5711_v47, %v6669_v21 }
 0x828   : > { %4411 = vmatpush3.bf16.msk.msra.mxu1 %vm4018_vm3, %v8341_v19  ;;  %vm8400_vm3 = vcmp.eq.f32.partialorder %v5761_v12, %v6459_v54 }
 0x829   : > { %4412 = vmatprep.subr.bf16.mxu1 %v8337_v37  ;;  %vm4028_vm10 = vmpackc.low %vm8400_vm3, %vm8399_vm7  ;;  %vm8415_vm3 = vcmp.eq.f32.partialorder %v5715_v50, %v6669_v21 }
 0x82c   : > { %4413 = vmatpush3.bf16.msk.msra.mxu1 %vm4020_vm12, %v8341_v19  ;;  %vm8406_vm12 = vcmask 1043456  }
 0x82d   : > { %4414 = vmatprep.subr.bf16.mxu1 %v8337_v37  ;;  %vm8407_vm13 = vmmov %vm8406_vm12 }
 0x830   : > { %4415 = vmatpush3.bf16.msk.msra.mxu1 %vm4022_vm0, %v8341_v19  ;;  %vm8409_vm0 = vcmask 179200  }
 0x831   : > { %4416 = vmatprep.subr.bf16.mxu1 %v8337_v37  ;;  %vm8410_vm1 = vmmov %vm8409_vm0 }
 0x834   : > { %4417 = vmatpush3.bf16.msk.msra.mxu1 %vm4024_vm5, %v8341_v19  ;;  %vm8412_vm5 = vcmp.eq.f32.partialorder %v5709_v43, %v6669_v21 }
 0x835   : > { %4418 = vmatprep.subr.bf16.mxu1 %v8337_v37  ;;  %vm4034_vm6 = vmpackc.low %vm8412_vm5, %vm8411_vm2  ;;  %vm8421_vm5 = vcmp.eq.f32.partialorder %v5727_v60, %v6669_v21 }
 0x838   : > { %4419 = vmatpush3.bf16.msk.msra.mxu1 %vm4026_vm8, %v8341_v19  ;;  %vm8414_vm8 = vcmp.eq.f32.partialorder %v5713_v48, %v6669_v21 }
 0x839   : > { %4420 = vmatprep.subr.bf16.mxu1 %v8337_v37  ;;  %vm4036_vm7 = vmpackc.low %vm8414_vm8, %vm8413_vm4  ;;  %vm8423_vm8 = vcmp.eq.f32.partialorder %v5755_v9, %v6669_v21 }
 0x83c   : > { %4421 = vmatpush3.bf16.msk.msra.mxu1 %vm4028_vm10, %v8341_v19  ;;  %vm8416_vm10 = vcmp.eq.f32.partialorder %v5717_v52, %v6669_v21 }
 0x83f   : > { %4423 = vmatmul.mubr.bf16.vlgmr.msra.gmra.mrb[24].mxu1 %v7365_v16 }
 0x840   : > { %4462 = vmatprep.mubr.msk.bf16.mxu1 %vm8401_vm11, %v7368_v27  ;;  %vm4038_vm11 = vmpackc.low %vm8416_vm10, %vm8415_vm3  ;;  %vm8425_vm10 = vcmp.eq.f32.partialorder %v5759_v11, %v6669_v21 }
 0x8f2   : > { %v4404_v14 = vpop.f32.mrb[20].mxu1 }
 0x8f3   : > { %v1944_v44 = vadd.f32 %v4404_v14, %v7467_v41  ;;  %v1935_v39 = vpop.f32.mrb[21].mxu1 }
 0x8f4   : > { %v1936_v33 = vadd.f32 %v1935_v39, %v7463_v26  ;;  %v4405_v25 = vpop.f32.mrb[22].mxu1 }
 0x8f5   : > { %v1952_v35 = vmul.f32 %v1944_v44, %v1944_v44  ;;  %v1947_v31 = vadd.f32 %v4405_v25, %v7473_v24  ;;  %v1938_v28 = vpop.f32.mrb[23].mxu1 }
 0x8f6   : > { %v1950_v54 = vmul.f32 %v1936_v33, %v1936_v33  ;;  %v1939_v1 = vadd.f32 %v1938_v28, %v7465_v6 }
 0x8f7   : > { %v1956_v8 = vmul.f32 %v1952_v35, %v1944_v44  ;;  %v1953_v4 = vmul.f32 %v1947_v31, %v1947_v31 }
 0x8f8   : > { %v1954_v2 = vmul.f32 %v1950_v54, %v1936_v33  ;;  %v1951_v63 = vmul.f32 %v1939_v1, %v1939_v1 }
 0x8f9   : > { %v1960_v15 = vmul.f32 0.044715, %v1956_v8  ;;  %v1957_v0 = vmul.f32 %v1953_v4, %v1947_v31 }
 0x8fa   : > { %v1958_v36 = vmul.f32 0.044715, %v1954_v2  ;;  %v1955_v30 = vmul.f32 %v1951_v63, %v1939_v1 }
 0x8fb   : > { %v1964_v34 = vadd.f32 %v1960_v15, %v1944_v44  ;;  %v1961_v17 = vmul.f32 0.044715, %v1957_v0 }
 0x8fc   : > { %v1962_v45 = vadd.f32 %v1958_v36, %v1936_v33  ;;  %v1959_v13 = vmul.f32 0.044715, %v1955_v30 }
 0x8fd   : > { %v1968_v23 = vmul.f32 0.7978846, %v1964_v34  ;;  %v1965_v51 = vadd.f32 %v1961_v17, %v1947_v31 }
 0x8fe   : > { %v1966_v14 = vmul.f32 0.7978846, %v1962_v45  ;;  %v1963_v39 = vadd.f32 %v1959_v13, %v1939_v1 }
 0x8ff   : > { %4785 = vtanh.f32 %v1968_v23  ;;  %v1969_v25 = vmul.f32 0.7978846, %v1965_v51  ;;  %v8402_v23 = vmax.f32 %v7526_v58, %v7529_v3 }
 0x900   : > { %4787 = vtanh.f32 %v1966_v14  ;;  %v1967_v28 = vmul.f32 0.7978846, %v1963_v39  ;;  %v8403_v39 = vmax.f32 %v7532_v57, %v7535_v62 }
 0x901   : > { %4789 = vtanh.f32 %v1969_v25 }
 0x902   : > { %4791 = vtanh.f32 %v1967_v28 }
 0x909   : > { %v4786_v35 = vpop.eup %4785 }
 0x90a   : > { %v4788_v54 = vpop.eup %4787  ;;  %v1976_v8 = vadd.f32 1.0, %v4786_v35  ;;  %v8404_v35 = vmax.f32 %v7538_v40, %v7543_v20 }
 0x90b   : > { %v4790_v4 = vpop.eup %4789  ;;  %v1974_v2 = vadd.f32 1.0, %v4788_v54 }
 0x90c   : > { %v4792_v63 = vpop.eup %4791  ;;  %v1980_v15 = vmul.f32 0.5, %v1976_v8  ;;  %v1977_v0 = vadd.f32 1.0, %v4790_v4 }
 0x90d   : > { %v1978_v36 = vmul.f32 0.5, %v1974_v2  ;;  %v1975_v30 = vadd.f32 1.0, %v4792_v63 }
 0x90e   : > { %v1984_v34 = vmul.f32 %v1980_v15, %v1944_v44  ;;  %v1981_v17 = vmul.f32 0.5, %v1977_v0 }
 0x90f   : > { %v1982_v45 = vmul.f32 %v1978_v36, %v1936_v33  ;;  %v1979_v13 = vmul.f32 0.5, %v1975_v30  ;;  %v8405_v33 = vmax.f32 %v7546_v32, %v7550_v5 }
 0x910   : > { %v7648_v51 = vmax.f32 %v8402_v23, %v1984_v34  ;;  %v1985_v14 = vmul.f32 %v1981_v17, %v1947_v31 }
 0x911   : > { %v7653_v25 = vmax.f32 %v8403_v39, %v1982_v45  ;;  %v1983_v28 = vmul.f32 %v1979_v13, %v1939_v1 }
 0x912   : > { %v7658_v54 = vmax.f32 %v8404_v35, %v1985_v14  ;;  %v2154_v44 = vpop.f32.mrb[24].mxu1 }
 0x913   : > { %v7663_v8 = vmax.f32 %v8405_v33, %v1983_v28  ;;  %v2160_v58 = vsub.f32 %v2154_v44, %v6672_v46  ;;  %v4424_v3 = vpop.f32.mrb[25].mxu1 }
 0x914   : > { %v2157_v31 = vpop.f32.mrb[26].mxu1 }
 0x915   : > { %v2161_v4 = vpack.c.bf16 %v2160_v58, %v2160_v58  ;;  %v4425_v57 = vpop.f32.mrb[27].mxu1 }
 0x917   : > { %v2163_v62 = vsel %vm8406_vm12, %v2161_v4, 0  ;;  %4584 = vmatprep.subr.msk.bf16.mxu0 %vm8407_vm13, %v2161_v4  ;;  %vm8417_vm12 = vcmp.eq.f32.partialorder %v5719_v53, %v6669_v21  ;;  %vm8418_vm13 = vcmp.eq.f32.partialorder %v5721_v55, %v6669_v21 }
 0x918   : > { %4427 = vmatpush3.bf16.msra.mxu0 %v2163_v62 }
 0x91b   : > { %4429 = vmatmul.mubr.msk.bf16.vlgmr.msra.gmra.mrb[32].mxu0 %vm8408_vm15, %v7559_v7  ;;  %vm4040_vm15 = vmpackc.low %vm8418_vm13, %vm8417_vm12  ;;  %vm8427_vm13 = vcmask 64512  }
 0x91c   : > { %4436 = vmatprep.mubr.msk.bf16.mxu0 %vm8409_vm0, %v7224_v38  ;;  %vm8419_vm0 = vcmp.eq.f32.partialorder %v5723_v56, %v6669_v21 }
 0x9ee   : > { %v4430_v40 = vpop.f32.mrb[32].mxu0 }
 0x9ef   : > { %v2208_v20 = vadd.f32 %v4430_v40, %v7281_v49  ;;  %v2199_v32 = vpop.f32.mrb[33].mxu0 }
 0x9f0   : > { %v2200_v5 = vadd.f32 %v2199_v32, %v7284_v18  ;;  %v4431_v1 = vpop.f32.mrb[34].mxu0 }
 0x9f1   : > { %v2215_v2 = vmul.f32 %v2208_v20, %v2208_v20  ;;  %v2202_v63 = vpop.f32.mrb[35].mxu0 }
 0x9f2   : > { %v2213_v15 = vmul.f32 %v2200_v5, %v2200_v5  ;;  %v2203_v0 = vadd.f32 %v2202_v63, %v7288_v29 }
 0x9f3   : > { %v2218_v36 = vmul.f32 %v2215_v2, %v2208_v20 }
 0x9f4   : > { %v2216_v30 = vmul.f32 %v2213_v15, %v2200_v5  ;;  %v2214_v34 = vmul.f32 %v2203_v0, %v2203_v0 }
 0x9f5   : > { %v2221_v17 = vmul.f32 0.044715, %v2218_v36 }
 0x9f6   : > { %v2219_v45 = vmul.f32 0.044715, %v2216_v30  ;;  %v2217_v13 = vmul.f32 %v2214_v34, %v2203_v0 }
 0x9f7   : > { %v2224_v23 = vadd.f32 %v2221_v17, %v2208_v20 }
 0x9f8   : > { %v2222_v38 = vadd.f32 %v2219_v45, %v2200_v5  ;;  %v2220_v14 = vmul.f32 0.044715, %v2217_v13 }
 0x9f9   : > { %v2227_v39 = vmul.f32 0.7978846, %v2224_v23 }
 0x9fa   : > { %v2225_v28 = vmul.f32 0.7978846, %v2222_v38  ;;  %v2223_v35 = vadd.f32 %v2220_v14, %v2203_v0 }
 0x9fb   : > { %4793 = vtanh.f32 %v2227_v39 }
 0x9fc   : > { %4795 = vtanh.f32 %v2225_v28  ;;  %v2226_v44 = vmul.f32 0.7978846, %v2223_v35 }
 0x9fe   : > { %4797 = vtanh.f32 %v2226_v44 }
 0xa05   : > { %v4794_v33 = vpop.eup %4793 }
 0xa06   : > { %v4796_v58 = vpop.eup %4795  ;;  %v2233_v3 = vadd.f32 1.0, %v4794_v33 }
 0xa07   : > { %v2231_v31 = vadd.f32 1.0, %v4796_v58 }
 0xa08   : > { %v4798_v4 = vpop.eup %4797  ;;  %v2236_v40 = vmul.f32 0.5, %v2233_v3 }
 0xa09   : > { %v2232_v57 = vadd.f32 1.0, %v4798_v4  ;;  %v2234_v62 = vmul.f32 0.5, %v2231_v31 }
 0xa0a   : > { %v2239_v63 = vmul.f32 %v2236_v40, %v2208_v20 }
 0xa0b   : > { %v2235_v32 = vmul.f32 0.5, %v2232_v57  ;;  %v2237_v1 = vmul.f32 %v2234_v62, %v2200_v5 }
 0xa0c   : > { %v2241_v36 = vpack.c.bf16 %v2239_v63, %v2239_v63 }
 0xa0d   : > { %v2238_v2 = vmul.f32 %v2235_v32, %v2203_v0 }
 0xa0e   : > { %v2243_v30 = vsel %vm1213_vm9, %v2241_v36, 0 }
 0xa0f   : > { %v2240_v15 = vpack.c.bf16 %v2238_v2, %v2237_v1 }
 0xa11   : > { %4432 = vmatprep.subr.bf16.mxu0 %v2240_v15 }
 0xa12   : > { %4433 = vmatpush3.bf16.msra.mxu0 %v2240_v15 }
 0xa13   : > { %4585 = vmatprep.subr.msk.bf16.mxu0 %vm1213_vm9, %v2241_v36 }
 0xa16   : > { %4435 = vmatpush3.bf16.msra.mxu0 %v2243_v30 }
 0xa17   : > { %4440 = vmatprep.subr.bf16.mxu0 %v8337_v37 }
 0xa19   : > { %4437 = vmatmul.mubr.msk.bf16.vlgmr.msra.gmra.mrb[36].mxu0 %vm8410_vm1, %v7294_v22  ;;  %vm8420_vm1 = vcmp.eq.f32.partialorder %v5725_v59, %v6669_v21 }
 0xa1a   : > { %4441 = vmatpush3.bf16.msk.msra.mxu0 %vm4034_vm6, %v8341_v19  ;;  %4456 = vmatprep.mubr.msk.bf16.mxu0 %vm8342_vm14, %v8337_v37  ;;  %vm4042_vm2 = vmpackc.low %vm8420_vm1, %vm8419_vm0  ;;  %vm8422_vm6 = vcmp.eq.f32.partialorder %v5729_v61, %v6669_v21 }
 0xa1b   : > { %4442 = vmatprep.subr.bf16.mxu0 %v8337_v37  ;;  %vm4044_vm4 = vmpackc.low %vm8422_vm6, %vm8421_vm5 }
 0xa1c   : > { %vm8430_vm1 = vmmov %vm8427_vm13 }
 0xa1e   : > { %4443 = vmatpush3.bf16.msk.msra.mxu0 %vm4036_vm7, %v8341_v19  ;;  %vm8424_vm7 = vcmp.eq.f32.partialorder %v5757_v10, %v6669_v21 }
 0xa1f   : > { %4444 = vmatprep.subr.bf16.mxu0 %v8337_v37  ;;  %vm4046_vm3 = vmpackc.low %vm8424_vm7, %vm8423_vm8 }
 0xa22   : > { %4445 = vmatpush3.bf16.msk.msra.mxu0 %vm4038_vm11, %v8341_v19  ;;  %vm8426_vm11 = vcmp.eq.f32.partialorder %v5761_v12, %v6669_v21 }
 0xa23   : > { %4446 = vmatprep.subr.bf16.mxu0 %v8337_v37  ;;  %vm4048_vm12 = vmpackc.low %vm8426_vm11, %vm8425_vm10 }
 0xa26   : > { %4447 = vmatpush3.bf16.msk.msra.mxu0 %vm4040_vm15, %v8341_v19  ;;  %vm8428_vm15 = vcmask 1043456  }
 0xa27   : > { %4448 = vmatprep.subr.bf16.mxu0 %v8337_v37  ;;  %vm8429_vm0 = vmmov %vm8428_vm15 }
 0xa2a   : > { %4449 = vmatpush3.bf16.msk.msra.mxu0 %vm4042_vm2, %v8341_v19  ;;  %vm8431_vm2 = vcmask 179200  }
 0xa2b   : > { %4450 = vmatprep.subr.bf16.mxu0 %v8337_v37  ;;  %vm8432_vm5 = vmmov %vm8431_vm2 }
 0xa2e   : > { %4451 = vmatpush3.bf16.msk.msra.mxu0 %vm4044_vm4, %v8341_v19 }
 0xa2f   : > { %4452 = vmatprep.subr.bf16.mxu0 %v8337_v37 }
 0xa32   : > { %4453 = vmatpush3.bf16.msk.msra.mxu0 %vm4046_vm3, %v8341_v19 }
 0xa33   : > { %4454 = vmatprep.subr.bf16.mxu0 %v8337_v37 }
 0xa36   : > { %4455 = vmatpush3.bf16.msk.msra.mxu0 %vm4048_vm12, %v8341_v19 }
 0xa39   : > { %4457 = vmatmul.mubr.bf16.vlgmr.msra.gmra.mrb[40].mxu0 %v7365_v16 }
 0xa3a   : > { %4496 = vmatprep.mubr.msk.bf16.mxu0 %vm8427_vm13, %v7368_v27 }
 0xaec   : > { %v4438_v22 = vpop.f32.mrb[36].mxu0 }
 0xaed   : > { %v2288_v20 = vadd.f32 %v4438_v22, %v7467_v41  ;;  %v2279_v5 = vpop.f32.mrb[37].mxu0 }
 0xaee   : > { %v2280_v0 = vadd.f32 %v2279_v5, %v7463_v26  ;;  %v4439_v34 = vpop.f32.mrb[38].mxu0 }
 0xaef   : > { %v2296_v17 = vmul.f32 %v2288_v20, %v2288_v20  ;;  %v2291_v45 = vadd.f32 %v4439_v34, %v7473_v24  ;;  %v2282_v13 = vpop.f32.mrb[39].mxu0 }
 0xaf0   : > { %v2294_v21 = vmul.f32 %v2280_v0, %v2280_v0  ;;  %v2283_v23 = vadd.f32 %v2282_v13, %v7465_v6 }
 0xaf1   : > { %v2300_v38 = vmul.f32 %v2296_v17, %v2288_v20  ;;  %v2297_v14 = vmul.f32 %v2291_v45, %v2291_v45 }
 0xaf2   : > { %v2298_v16 = vmul.f32 %v2294_v21, %v2280_v0  ;;  %v2295_v39 = vmul.f32 %v2283_v23, %v2283_v23 }
 0xaf3   : > { %v2304_v28 = vmul.f32 0.044715, %v2300_v38  ;;  %v2301_v27 = vmul.f32 %v2297_v14, %v2291_v45 }
 0xaf4   : > { %v2302_v35 = vmul.f32 0.044715, %v2298_v16  ;;  %v2299_v44 = vmul.f32 %v2295_v39, %v2283_v23 }
 0xaf5   : > { %v2308_v33 = vadd.f32 %v2304_v28, %v2288_v20  ;;  %v2305_v58 = vmul.f32 0.044715, %v2301_v27 }
 0xaf6   : > { %v2306_v3 = vadd.f32 %v2302_v35, %v2280_v0  ;;  %v2303_v31 = vmul.f32 0.044715, %v2299_v44 }
 0xaf7   : > { %v2312_v4 = vmul.f32 0.7978846, %v2308_v33  ;;  %v2309_v57 = vadd.f32 %v2305_v58, %v2291_v45 }
 0xaf8   : > { %v2310_v62 = vmul.f32 0.7978846, %v2306_v3  ;;  %v2307_v40 = vadd.f32 %v2303_v31, %v2283_v23 }
 0xaf9   : > { %4799 = vtanh.f32 %v2312_v4  ;;  %v2313_v32 = vmul.f32 0.7978846, %v2309_v57 }
 0xafa   : > { %4801 = vtanh.f32 %v2310_v62  ;;  %v2311_v1 = vmul.f32 0.7978846, %v2307_v40 }
 0xafb   : > { %4803 = vtanh.f32 %v2313_v32 }
 0xafc   : > { %4805 = vtanh.f32 %v2311_v1 }
 0xb03   : > { %v4800_v2 = vpop.eup %4799 }
 0xb04   : > { %v4802_v63 = vpop.eup %4801  ;;  %v2320_v15 = vadd.f32 1.0, %v4800_v2 }
 0xb05   : > { %v4804_v36 = vpop.eup %4803  ;;  %v2318_v30 = vadd.f32 1.0, %v4802_v63 }
 0xb06   : > { %v4806_v22 = vpop.eup %4805  ;;  %v2324_v5 = vmul.f32 0.5, %v2320_v15  ;;  %v2321_v34 = vadd.f32 1.0, %v4804_v36 }
 0xb07   : > { %v2322_v17 = vmul.f32 0.5, %v2318_v30  ;;  %v2319_v13 = vadd.f32 1.0, %v4806_v22 }
 0xb08   : > { %v7752_v21 = vmul.f32 %v2324_v5, %v2288_v20  ;;  %v2325_v38 = vmul.f32 0.5, %v2321_v34 }
 0xb09   : > { %v7754_v14 = vmul.f32 %v2322_v17, %v2280_v0  ;;  %v2323_v16 = vmul.f32 0.5, %v2319_v13 }
 0xb0a   : > { %v2332_v39 = vmax.f32 %v7648_v51, %v7752_v21  ;;  %v7758_v28 = vmul.f32 %v2325_v38, %v2291_v45 }
 0xb0b   : > { %v7762_v35 = vmul.f32 %v2323_v16, %v2283_v23  ;;  %v7773_v23 = vld [vmem:[#allocation13] sm:$0xff]  }
 0xb0c   : > { %v2498_v33 = vpop.f32.mrb[40].mxu0 }
 0xb0d   : > { %v2504_v0 = vsub.f32 %v2498_v33, %v6672_v46  ;;  %v4458_v58 = vpop.f32.mrb[41].mxu0 }
 0xb0e   : > { %v2501_v3 = vpop.f32.mrb[42].mxu0 }
 0xb0f   : > { %v2505_v31 = vpack.c.bf16 %v2504_v0, %v2504_v0  ;;  %v4459_v4 = vpop.f32.mrb[43].mxu0 }
 0xb11   : > { %v2507_v45 = vsel %vm8428_vm15, %v2505_v31, 0  ;;  %4586 = vmatprep.subr.msk.bf16.mxu1 %vm8429_vm0, %v2505_v31 }
 0xb12   : > { %4461 = vmatpush3.bf16.msra.mxu1 %v2507_v45 }
 0xb15   : > { %4463 = vmatmul.mubr.msk.bf16.vlgmr.msra.gmra.mrb[28].mxu1 %vm8430_vm1, %v7559_v7 }
 0xb16   : > { %4470 = vmatprep.mubr.msk.bf16.mxu1 %vm8431_vm2, %v7773_v23 }
 0xbe8   : > { %v4464_v57 = vpop.f32.mrb[28].mxu1 }
 0xbe9   : > { %v2552_v62 = vadd.f32 %v4464_v57, %v7281_v49  ;;  %v2543_v40 = vpop.f32.mrb[29].mxu1 }
 0xbea   : > { %v2544_v32 = vadd.f32 %v2543_v40, %v7284_v18  ;;  %v4465_v1 = vpop.f32.mrb[30].mxu1 }
 0xbeb   : > { %v2559_v2 = vmul.f32 %v2552_v62, %v2552_v62  ;;  %v2546_v63 = vpop.f32.mrb[31].mxu1 }
 0xbec   : > { %v2557_v15 = vmul.f32 %v2544_v32, %v2544_v32  ;;  %v2547_v36 = vadd.f32 %v2546_v63, %v7288_v29 }
 0xbed   : > { %v2562_v30 = vmul.f32 %v2559_v2, %v2552_v62 }
 0xbee   : > { %v2560_v22 = vmul.f32 %v2557_v15, %v2544_v32  ;;  %v2558_v5 = vmul.f32 %v2547_v36, %v2547_v36 }
 0xbef   : > { %v2565_v34 = vmul.f32 0.044715, %v2562_v30 }
 0xbf0   : > { %v2563_v17 = vmul.f32 0.044715, %v2560_v22  ;;  %v2561_v13 = vmul.f32 %v2558_v5, %v2547_v36 }
 0xbf1   : > { %v2568_v38 = vadd.f32 %v2565_v34, %v2552_v62 }
 0xbf2   : > { %v2566_v16 = vadd.f32 %v2563_v17, %v2544_v32  ;;  %v2564_v33 = vmul.f32 0.044715, %v2561_v13 }
 0xbf3   : > { %v2571_v0 = vmul.f32 0.7978846, %v2568_v38 }
 0xbf4   : > { %v2569_v58 = vmul.f32 0.7978846, %v2566_v16  ;;  %v2567_v3 = vadd.f32 %v2564_v33, %v2547_v36  ;;  %v7783_v16 = vld [vmem:[#allocation13 + $0x8] sm:$0xff]  }
 0xbf5   : > { %4807 = vtanh.f32 %v2571_v0 }
 0xbf6   : > { %4809 = vtanh.f32 %v2569_v58  ;;  %v2570_v31 = vmul.f32 0.7978846, %v2567_v3 }
 0xbf8   : > { %4811 = vtanh.f32 %v2570_v31 }
 0xbff   : > { %v4808_v4 = vpop.eup %4807 }
 0xc00   : > { %v4810_v45 = vpop.eup %4809  ;;  %v2577_v57 = vadd.f32 1.0, %v4808_v4 }
 0xc01   : > { %v2575_v40 = vadd.f32 1.0, %v4810_v45 }
 0xc02   : > { %v4812_v1 = vpop.eup %4811  ;;  %v2580_v15 = vmul.f32 0.5, %v2577_v57 }
 0xc03   : > { %v2576_v2 = vadd.f32 1.0, %v4812_v1  ;;  %v2578_v63 = vmul.f32 0.5, %v2575_v40 }
 0xc04   : > { %v2583_v34 = vmul.f32 %v2580_v15, %v2552_v62  ;;  %v7853_v62 = vld [vmem:[%s5604_s15] sm:$0xf] }
 0xc05   : > { %v2579_v30 = vmul.f32 0.5, %v2576_v2  ;;  %v2581_v22 = vmul.f32 %v2578_v63, %v2544_v32  ;;  %v8433_v32 = vld [vmem:[#allocation31_spill] sm:$0xff] }
 0xc06   : > { %v2585_v13 = vpack.c.bf16 %v2583_v34, %v2583_v34  ;;  %vm8434_vm6 = vcmp.eq.f32.partialorder %v5707_v42, %v8433_v32  ;;  %vm8435_vm4 = vcmp.eq.f32.partialorder %v5709_v43, %v8433_v32  ;;  %vm8436_vm7 = vcmp.eq.f32.partialorder %v5711_v47, %v8433_v32 }
 0xc07   : > { %v2582_v5 = vmul.f32 %v2579_v30, %v2547_v36  ;;  %vm4054_vm8 = vmpackc.low %vm8435_vm4, %vm8434_vm6  ;;  %vm8437_vm3 = vcmp.eq.f32.partialorder %v5713_v48, %v8433_v32  ;;  %vm8438_vm11 = vcmp.eq.f32.partialorder %v5715_v50, %v8433_v32  ;;  %vm8439_vm12 = vcmp.eq.f32.partialorder %v5717_v52, %v8433_v32  ;;  %v7856_v36 = vld [vmem:[#allocation8] sm:$0xff]  }
 0xc08   : > { %v2587_v38 = vsel %vm1213_vm9, %v2585_v13, 0  ;;  %vm4056_vm10 = vmpackc.low %vm8437_vm3, %vm8436_vm7  ;;  %vm8440_vm15 = vcmp.eq.f32.partialorder %v5719_v53, %v8433_v32  ;;  %vm8441_vm0 = vcmp.eq.f32.partialorder %v5721_v55, %v8433_v32  ;;  %vm8442_vm2 = vcmp.eq.f32.partialorder %v5723_v56, %v8433_v32 }
 0xc09   : > { %v2584_v17 = vpack.c.bf16 %v2582_v5, %v2581_v22  ;;  %vm4058_vm13 = vmpackc.low %vm8439_vm12, %vm8438_vm11  ;;  %vm8444_vm4 = vcmp.eq.f32.partialorder %v5727_v60, %v8433_v32  ;;  %vm8446_vm3 = vcmp.eq.f32.partialorder %v5755_v9, %v8433_v32  ;;  %vm8448_vm12 = vcmp.eq.f32.partialorder %v5759_v11, %v8433_v32 }
 0xc0a   : > { %vm4060_vm1 = vmpackc.low %vm8441_vm0, %vm8440_vm15  ;;  %vm8450_vm0 = vcmask 64512  }
 0xc0b   : > { %4466 = vmatprep.subr.bf16.mxu1 %v2584_v17 }
 0xc0c   : > { %4467 = vmatpush3.bf16.msra.mxu1 %v2584_v17 }
 0xc0d   : > { %4587 = vmatprep.subr.msk.bf16.mxu1 %vm1213_vm9, %v2585_v13 }
 0xc10   : > { %4469 = vmatpush3.bf16.msra.mxu1 %v2587_v38 }
 0xc11   : > { %4474 = vmatprep.subr.bf16.mxu1 %v8337_v37 }
 0xc13   : > { %4471 = vmatmul.mubr.msk.bf16.vlgmr.msra.gmra.mrb[32].mxu1 %vm8432_vm5, %v7783_v16  ;;  %vm8443_vm5 = vcmp.eq.f32.partialorder %v5725_v59, %v8433_v32 }
 0xc14   : > { %4475 = vmatpush3.bf16.msk.msra.mxu1 %vm4054_vm8, %v8341_v19  ;;  %4490 = vmatprep.mubr.msk.bf16.mxu1 %vm8342_vm14, %v8337_v37  ;;  %vm4062_vm6 = vmpackc.low %vm8443_vm5, %vm8442_vm2  ;;  %vm8445_vm8 = vcmp.eq.f32.partialorder %v5729_v61, %v8433_v32 }
 0xc15   : > { %4476 = vmatprep.subr.bf16.mxu1 %v8337_v37  ;;  %vm4064_vm7 = vmpackc.low %vm8445_vm8, %vm8444_vm4 }
 0xc16   : > { %vm8456_vm5 = vmmov %vm8450_vm0 }
 0xc18   : > { %4477 = vmatpush3.bf16.msk.msra.mxu1 %vm4056_vm10, %v8341_v19  ;;  %vm8447_vm10 = vcmp.eq.f32.partialorder %v5757_v10, %v8433_v32 }
 0xc19   : > { %4478 = vmatprep.subr.bf16.mxu1 %v8337_v37  ;;  %vm4066_vm11 = vmpackc.low %vm8447_vm10, %vm8446_vm3 }
 0xc1c   : > { %4479 = vmatpush3.bf16.msk.msra.mxu1 %vm4058_vm13, %v8341_v19  ;;  %vm8449_vm13 = vcmp.eq.f32.partialorder %v5761_v12, %v8433_v32 }
 0xc1d   : > { %4480 = vmatprep.subr.bf16.mxu1 %v8337_v37  ;;  %vm4068_vm15 = vmpackc.low %vm8449_vm13, %vm8448_vm12 }
 0xc20   : > { %4481 = vmatpush3.bf16.msk.msra.mxu1 %vm4060_vm1, %v8341_v19  ;;  %vm8454_vm1 = vcmask 1043456  }
 0xc21   : > { %4482 = vmatprep.subr.bf16.mxu1 %v8337_v37  ;;  %vm8455_vm2 = vmmov %vm8454_vm1 }
 0xc24   : > { %4483 = vmatpush3.bf16.msk.msra.mxu1 %vm4062_vm6, %v8341_v19  ;;  %vm8457_vm6 = vcmask 179200  }
 0xc25   : > { %4484 = vmatprep.subr.bf16.mxu1 %v8337_v37  ;;  %vm8458_vm4 = vmmov %vm8457_vm6 }
 0xc28   : > { %4485 = vmatpush3.bf16.msk.msra.mxu1 %vm4064_vm7, %v8341_v19 }
 0xc29   : > { %4486 = vmatprep.subr.bf16.mxu1 %v8337_v37 }
 0xc2c   : > { %4487 = vmatpush3.bf16.msk.msra.mxu1 %vm4066_vm11, %v8341_v19 }
 0xc2d   : > { %4488 = vmatprep.subr.bf16.mxu1 %v8337_v37 }
 0xc30   : > { %4489 = vmatpush3.bf16.msk.msra.mxu1 %vm4068_vm15, %v8341_v19 }
 0xc33   : > { %4491 = vmatmul.mubr.bf16.vlgmr.msra.gmra.mrb[36].mxu1 %v7853_v62 }
 0xc34   : > { %4530 = vmatprep.mubr.msk.bf16.mxu1 %vm8450_vm0, %v7856_v36 }
 0xce6   : > { %v4472_v33 = vpop.f32.mrb[32].mxu1 }
 0xce7   : > { %v2632_v0 = vadd.f32 %v4472_v33, %v7467_v41  ;;  %v2623_v58 = vpop.f32.mrb[33].mxu1 }
 0xce8   : > { %v2624_v3 = vadd.f32 %v2623_v58, %v7463_v26  ;;  %v4473_v31 = vpop.f32.mrb[34].mxu1 }
 0xce9   : > { %v2640_v4 = vmul.f32 %v2632_v0, %v2632_v0  ;;  %v2635_v45 = vadd.f32 %v4473_v31, %v7473_v24  ;;  %v2626_v57 = vpop.f32.mrb[35].mxu1 }
 0xcea   : > { %v2638_v40 = vmul.f32 %v2624_v3, %v2624_v3  ;;  %v2627_v1 = vadd.f32 %v2626_v57, %v7465_v6 }
 0xceb   : > { %v2644_v2 = vmul.f32 %v2640_v4, %v2632_v0  ;;  %v2641_v63 = vmul.f32 %v2635_v45, %v2635_v45 }
 0xcec   : > { %v2642_v15 = vmul.f32 %v2638_v40, %v2624_v3  ;;  %v2639_v30 = vmul.f32 %v2627_v1, %v2627_v1 }
 0xced   : > { %v2648_v22 = vmul.f32 0.044715, %v2644_v2  ;;  %v2645_v5 = vmul.f32 %v2641_v63, %v2635_v45 }
 0xcee   : > { %v2646_v34 = vmul.f32 0.044715, %v2642_v15  ;;  %v2643_v17 = vmul.f32 %v2639_v30, %v2627_v1 }
 0xcef   : > { %v2652_v13 = vadd.f32 %v2648_v22, %v2632_v0  ;;  %v2649_v38 = vmul.f32 0.044715, %v2645_v5 }
 0xcf0   : > { %v2650_v32 = vadd.f32 %v2646_v34, %v2624_v3  ;;  %v2647_v33 = vmul.f32 0.044715, %v2643_v17 }
 0xcf1   : > { %v2656_v58 = vmul.f32 0.7978846, %v2652_v13  ;;  %v2653_v20 = vadd.f32 %v2649_v38, %v2635_v45 }
 0xcf2   : > { %v2654_v44 = vmul.f32 0.7978846, %v2650_v32  ;;  %v2651_v31 = vadd.f32 %v2647_v33, %v2627_v1 }
 0xcf3   : > { %4813 = vtanh.f32 %v2656_v58  ;;  %v2657_v27 = vmul.f32 0.7978846, %v2653_v20  ;;  %v8451_v20 = vmax.f32 %v7653_v25, %v7754_v14 }
 0xcf4   : > { %4815 = vtanh.f32 %v2654_v44  ;;  %v2655_v57 = vmul.f32 0.7978846, %v2651_v31 }
 0xcf5   : > { %4817 = vtanh.f32 %v2657_v27 }
 0xcf6   : > { %4819 = vtanh.f32 %v2655_v57  ;;  %v8452_v57 = vmax.f32 %v7658_v54, %v7758_v28 }
 0xcfd   : > { %v4814_v4 = vpop.eup %4813 }
 0xcfe   : > { %v4816_v40 = vpop.eup %4815  ;;  %v2664_v2 = vadd.f32 1.0, %v4814_v4 }
 0xcff   : > { %v4818_v63 = vpop.eup %4817  ;;  %v2662_v15 = vadd.f32 1.0, %v4816_v40 }
 0xd00   : > { %v4820_v30 = vpop.eup %4819  ;;  %v2668_v22 = vmul.f32 0.5, %v2664_v2  ;;  %v2665_v5 = vadd.f32 1.0, %v4818_v63 }
 0xd01   : > { %v2666_v34 = vmul.f32 0.5, %v2662_v15  ;;  %v2663_v17 = vadd.f32 1.0, %v4820_v30 }
 0xd02   : > { %v2672_v13 = vmul.f32 %v2668_v22, %v2632_v0  ;;  %v2669_v38 = vmul.f32 0.5, %v2665_v5 }
 0xd03   : > { %v2670_v32 = vmul.f32 %v2666_v34, %v2624_v3  ;;  %v2667_v33 = vmul.f32 0.5, %v2663_v17  ;;  %v8453_v3 = vmax.f32 %v7663_v8, %v7762_v35 }
 0xd04   : > { %v7867_v44 = vmax.f32 %v2332_v39, %v2672_v13  ;;  %v2673_v27 = vmul.f32 %v2669_v38, %v2635_v45 }
 0xd05   : > { %v7872_v58 = vmax.f32 %v8451_v20, %v2670_v32  ;;  %v2671_v31 = vmul.f32 %v2667_v33, %v2627_v1 }
 0xd06   : > { %v7877_v4 = vmax.f32 %v8452_v57, %v2673_v27  ;;  %v2842_v0 = vpop.f32.mrb[36].mxu1 }
 0xd07   : > { %v7882_v40 = vmax.f32 %v8453_v3, %v2671_v31  ;;  %v2848_v51 = vsub.f32 %v2842_v0, %v6672_v46  ;;  %v4492_v21 = vpop.f32.mrb[37].mxu1 }
 0xd08   : > { %v2845_v39 = vpop.f32.mrb[38].mxu1 }
 0xd09   : > { %v2849_v45 = vpack.c.bf16 %v2848_v51, %v2848_v51  ;;  %v4493_v25 = vpop.f32.mrb[39].mxu1 }
 0xd0b   : > { %v2851_v14 = vsel %vm8454_vm1, %v2849_v45, 0  ;;  %4588 = vmatprep.subr.msk.bf16.mxu0 %vm8455_vm2, %v2849_v45 }
 0xd0c   : > { %4495 = vmatpush3.bf16.msra.mxu0 %v2851_v14 }
 0xd0f   : > { %4497 = vmatmul.mubr.msk.bf16.vlgmr.msra.gmra.mrb[44].mxu0 %vm8456_vm5, %v7559_v7 }
 0xd10   : > { %4504 = vmatprep.mubr.msk.bf16.mxu0 %vm8457_vm6, %v7773_v23 }
 0xde2   : > { %v4498_v54 = vpop.f32.mrb[44].mxu0 }
 0xde3   : > { %v2896_v8 = vadd.f32 %v4498_v54, %v7281_v49  ;;  %v2887_v28 = vpop.f32.mrb[45].mxu0 }
 0xde4   : > { %v2888_v35 = vadd.f32 %v2887_v28, %v7284_v18  ;;  %v4499_v1 = vpop.f32.mrb[46].mxu0 }
 0xde5   : > { %v2903_v2 = vmul.f32 %v2896_v8, %v2896_v8  ;;  %v2890_v63 = vpop.f32.mrb[47].mxu0 }
 0xde6   : > { %v2901_v15 = vmul.f32 %v2888_v35, %v2888_v35  ;;  %v2891_v30 = vadd.f32 %v2890_v63, %v7288_v29 }
 0xde7   : > { %v2906_v22 = vmul.f32 %v2903_v2, %v2896_v8 }
 0xde8   : > { %v2904_v5 = vmul.f32 %v2901_v15, %v2888_v35  ;;  %v2902_v34 = vmul.f32 %v2891_v30, %v2891_v30 }
 0xde9   : > { %v2909_v17 = vmul.f32 0.044715, %v2906_v22 }
 0xdea   : > { %v2907_v7 = vmul.f32 0.044715, %v2904_v5  ;;  %v2905_v13 = vmul.f32 %v2902_v34, %v2891_v30  ;;  %v8459_v5 = vld [vmem:[#allocation32_spill] sm:$0xff] }
 0xdeb   : > { %v2912_v38 = vadd.f32 %v2909_v17, %v2896_v8  ;;  %vm8460_vm8 = vcmp.eq.f32.partialorder %v5707_v42, %v8459_v5  ;;  %vm8461_vm7 = vcmp.eq.f32.partialorder %v5709_v43, %v8459_v5  ;;  %vm8462_vm10 = vcmp.eq.f32.partialorder %v5711_v47, %v8459_v5 }
 0xdec   : > { %v2910_v32 = vadd.f32 %v2907_v7, %v2888_v35  ;;  %v2908_v33 = vmul.f32 0.044715, %v2905_v13  ;;  %vm4074_vm3 = vmpackc.low %vm8461_vm7, %vm8460_vm8  ;;  %vm8463_vm11 = vcmp.eq.f32.partialorder %v5713_v48, %v8459_v5  ;;  %vm8464_vm13 = vcmp.eq.f32.partialorder %v5715_v50, %v8459_v5 }
 0xded   : > { %v2915_v27 = vmul.f32 0.7978846, %v2912_v38  ;;  %vm4076_vm12 = vmpackc.low %vm8463_vm11, %vm8462_vm10  ;;  %vm8465_vm15 = vcmp.eq.f32.partialorder %v5717_v52, %v8459_v5  ;;  %vm8466_vm1 = vcmp.eq.f32.partialorder %v5719_v53, %v8459_v5  ;;  %vm8467_vm2 = vcmp.eq.f32.partialorder %v5721_v55, %v8459_v5 }
 0xdee   : > { %v2913_v20 = vmul.f32 0.7978846, %v2910_v32  ;;  %v2911_v31 = vadd.f32 %v2908_v33, %v2891_v30  ;;  %vm4078_vm0 = vmpackc.low %vm8465_vm15, %vm8464_vm13  ;;  %vm8468_vm6 = vcmp.eq.f32.partialorder %v5723_v56, %v8459_v5  ;;  %vm8470_vm7 = vcmp.eq.f32.partialorder %v5727_v60, %v8459_v5 }
 0xdef   : > { %4821 = vtanh.f32 %v2915_v27  ;;  %vm4080_vm5 = vmpackc.low %vm8467_vm2, %vm8466_vm1  ;;  %vm8472_vm11 = vcmp.eq.f32.partialorder %v5755_v9, %v8459_v5  ;;  %vm8474_vm15 = vcmp.eq.f32.partialorder %v5759_v11, %v8459_v5  ;;  %vm8476_vm2 = vcmask 64512  }
 0xdf0   : > { %4823 = vtanh.f32 %v2913_v20  ;;  %v2914_v57 = vmul.f32 0.7978846, %v2911_v31 }
 0xdf2   : > { %4825 = vtanh.f32 %v2914_v57 }
 0xdf9   : > { %v4822_v0 = vpop.eup %4821 }
 0xdfa   : > { %v4824_v3 = vpop.eup %4823  ;;  %v2921_v51 = vadd.f32 1.0, %v4822_v0 }
 0xdfb   : > { %v2919_v21 = vadd.f32 1.0, %v4824_v3 }
 0xdfc   : > { %v4826_v39 = vpop.eup %4825  ;;  %v2924_v14 = vmul.f32 0.5, %v2921_v51 }
 0xdfd   : > { %v2920_v45 = vadd.f32 1.0, %v4826_v39  ;;  %v2922_v25 = vmul.f32 0.5, %v2919_v21 }
 0xdfe   : > { %v2927_v2 = vmul.f32 %v2924_v14, %v2896_v8 }
 0xdff   : > { %v2923_v54 = vmul.f32 0.5, %v2920_v45  ;;  %v2925_v28 = vmul.f32 %v2922_v25, %v2888_v35 }
 0xe00   : > { %v2929_v15 = vpack.c.bf16 %v2927_v2, %v2927_v2 }
 0xe01   : > { %v2926_v1 = vmul.f32 %v2923_v54, %v2891_v30 }
 0xe02   : > { %v2931_v22 = vsel %vm1213_vm9, %v2929_v15, 0 }
 0xe03   : > { %v2928_v63 = vpack.c.bf16 %v2926_v1, %v2925_v28 }
 0xe05   : > { %4500 = vmatprep.subr.bf16.mxu0 %v2928_v63 }
 0xe06   : > { %4501 = vmatpush3.bf16.msra.mxu0 %v2928_v63 }
 0xe07   : > { %4589 = vmatprep.subr.msk.bf16.mxu0 %vm1213_vm9, %v2929_v15 }
 0xe0a   : > { %4503 = vmatpush3.bf16.msra.mxu0 %v2931_v22 }
 0xe0b   : > { %4508 = vmatprep.subr.bf16.mxu0 %v8337_v37 }
 0xe0d   : > { %4505 = vmatmul.mubr.msk.bf16.vlgmr.msra.gmra.mrb[48].mxu0 %vm8458_vm4, %v7783_v16  ;;  %vm8469_vm4 = vcmp.eq.f32.partialorder %v5725_v59, %v8459_v5 }
 0xe0e   : > { %4509 = vmatpush3.bf16.msk.msra.mxu0 %vm4074_vm3, %v8341_v19  ;;  %4524 = vmatprep.mubr.msk.bf16.mxu0 %vm8342_vm14, %v8337_v37  ;;  %vm4082_vm8 = vmpackc.low %vm8469_vm4, %vm8468_vm6  ;;  %vm8471_vm3 = vcmp.eq.f32.partialorder %v5729_v61, %v8459_v5 }
 0xe0f   : > { %4510 = vmatprep.subr.bf16.mxu0 %v8337_v37  ;;  %vm4084_vm10 = vmpackc.low %vm8471_vm3, %vm8470_vm7 }
 0xe10   : > { %vm8479_vm4 = vmmov %vm8476_vm2 }
 0xe12   : > { %4511 = vmatpush3.bf16.msk.msra.mxu0 %vm4076_vm12, %v8341_v19  ;;  %vm8473_vm12 = vcmp.eq.f32.partialorder %v5757_v10, %v8459_v5 }
 0xe13   : > { %4512 = vmatprep.subr.bf16.mxu0 %v8337_v37  ;;  %vm4086_vm13 = vmpackc.low %vm8473_vm12, %vm8472_vm11 }
 0xe16   : > { %4513 = vmatpush3.bf16.msk.msra.mxu0 %vm4078_vm0, %v8341_v19  ;;  %vm8475_vm0 = vcmp.eq.f32.partialorder %v5761_v12, %v8459_v5 }
 0xe17   : > { %4514 = vmatprep.subr.bf16.mxu0 %v8337_v37  ;;  %vm4088_vm1 = vmpackc.low %vm8475_vm0, %vm8474_vm15 }
 0xe1a   : > { %4515 = vmatpush3.bf16.msk.msra.mxu0 %vm4080_vm5, %v8341_v19  ;;  %vm8477_vm5 = vcmask 1043456  }
 0xe1b   : > { %4516 = vmatprep.subr.bf16.mxu0 %v8337_v37  ;;  %vm8478_vm6 = vmmov %vm8477_vm5 }
 0xe1e   : > { %4517 = vmatpush3.bf16.msk.msra.mxu0 %vm4082_vm8, %v8341_v19  ;;  %vm8480_vm8 = vcmask 179200  }
 0xe1f   : > { %4518 = vmatprep.subr.bf16.mxu0 %v8337_v37 }
 0xe22   : > { %4519 = vmatpush3.bf16.msk.msra.mxu0 %vm4084_vm10, %v8341_v19  ;;  %vm8482_vm10 = vmmov %vm8480_vm8 }
 0xe23   : > { %4520 = vmatprep.subr.bf16.mxu0 %v8337_v37 }
 0xe26   : > { %4521 = vmatpush3.bf16.msk.msra.mxu0 %vm4086_vm13, %v8341_v19 }
 0xe27   : > { %4522 = vmatprep.subr.bf16.mxu0 %v8337_v37 }
 0xe2a   : > { %4523 = vmatpush3.bf16.msk.msra.mxu0 %vm4088_vm1, %v8341_v19 }
 0xe2d   : > { %4525 = vmatmul.mubr.bf16.vlgmr.msra.gmra.mrb[52].mxu0 %v7853_v62 }
 0xe2e   : > { %4564 = vmatprep.mubr.msk.bf16.mxu0 %vm8476_vm2, %v7856_v36 }
 0xee0   : > { %v4506_v8 = vpop.f32.mrb[48].mxu0 }
 0xee1   : > { %v2976_v35 = vadd.f32 %v4506_v8, %v7467_v41  ;;  %v2967_v30 = vpop.f32.mrb[49].mxu0 }
 0xee2   : > { %v2968_v34 = vadd.f32 %v2967_v30, %v7463_v26  ;;  %v4507_v17 = vpop.f32.mrb[50].mxu0 }
 0xee3   : > { %v2984_v7 = vmul.f32 %v2976_v35, %v2976_v35  ;;  %v2979_v13 = vadd.f32 %v4507_v17, %v7473_v24  ;;  %v2970_v38 = vpop.f32.mrb[51].mxu0 }
 0xee4   : > { %v2982_v32 = vmul.f32 %v2968_v34, %v2968_v34  ;;  %v2971_v33 = vadd.f32 %v2970_v38, %v7465_v6 }
 0xee5   : > { %v2988_v27 = vmul.f32 %v2984_v7, %v2976_v35  ;;  %v2985_v20 = vmul.f32 %v2979_v13, %v2979_v13 }
 0xee6   : > { %v2986_v31 = vmul.f32 %v2982_v32, %v2968_v34  ;;  %v2983_v57 = vmul.f32 %v2971_v33, %v2971_v33 }
 0xee7   : > { %v2992_v0 = vmul.f32 0.044715, %v2988_v27  ;;  %v2989_v36 = vmul.f32 %v2985_v20, %v2979_v13 }
 0xee8   : > { %v2990_v3 = vmul.f32 0.044715, %v2986_v31  ;;  %v2987_v51 = vmul.f32 %v2983_v57, %v2971_v33 }
 0xee9   : > { %v2996_v21 = vadd.f32 %v2992_v0, %v2976_v35  ;;  %v2993_v39 = vmul.f32 0.044715, %v2989_v36 }
 0xeea   : > { %v2994_v45 = vadd.f32 %v2990_v3, %v2968_v34  ;;  %v2991_v25 = vmul.f32 0.044715, %v2987_v51 }
 0xeeb   : > { %v3000_v14 = vmul.f32 0.7978846, %v2996_v21  ;;  %v2997_v54 = vadd.f32 %v2993_v39, %v2979_v13 }
 0xeec   : > { %v2998_v28 = vmul.f32 0.7978846, %v2994_v45  ;;  %v2995_v1 = vadd.f32 %v2991_v25, %v2971_v33 }
 0xeed   : > { %4827 = vtanh.f32 %v3000_v14  ;;  %v3001_v2 = vmul.f32 0.7978846, %v2997_v54 }
 0xeee   : > { %4829 = vtanh.f32 %v2998_v28  ;;  %v2999_v63 = vmul.f32 0.7978846, %v2995_v1 }
 0xeef   : > { %4831 = vtanh.f32 %v3001_v2 }
 0xef0   : > { %4833 = vtanh.f32 %v2999_v63 }
 0xef7   : > { %v4828_v15 = vpop.eup %4827 }
 0xef8   : > { %v4830_v22 = vpop.eup %4829  ;;  %v3008_v5 = vadd.f32 1.0, %v4828_v15 }
 0xef9   : > { %v4832_v8 = vpop.eup %4831  ;;  %v3006_v30 = vadd.f32 1.0, %v4830_v22 }
 0xefa   : > { %v4834_v17 = vpop.eup %4833  ;;  %v3012_v7 = vmul.f32 0.5, %v3008_v5  ;;  %v3009_v38 = vadd.f32 1.0, %v4832_v8 }
 0xefb   : > { %v3010_v32 = vmul.f32 0.5, %v3006_v30  ;;  %v3007_v27 = vadd.f32 1.0, %v4834_v17 }
 0xefc   : > { %v7971_v20 = vmul.f32 %v3012_v7, %v2976_v35  ;;  %v3013_v31 = vmul.f32 0.5, %v3009_v38 }
 0xefd   : > { %v7973_v57 = vmul.f32 %v3010_v32, %v2968_v34  ;;  %v3011_v0 = vmul.f32 0.5, %v3007_v27 }
 0xefe   : > { %v3020_v36 = vmax.f32 %v7867_v44, %v7971_v20  ;;  %v7977_v3 = vmul.f32 %v3013_v31, %v2979_v13 }
 0xeff   : > { %v3018_v51 = vmax.f32 %v7872_v58, %v7973_v57  ;;  %v7981_v21 = vmul.f32 %v3011_v0, %v2971_v33  ;;  %v7990_v33 = vld [vmem:[#allocation8 + $0x8] ss:$0 sps:$4 sm:$0x77]  }
 0xf00   : > { %v3186_v45 = vpop.f32.mrb[52].mxu0 }
 0xf01   : > { %v3192_v34 = vsub.f32 %v3186_v45, %v6672_v46  ;;  %v4526_v25 = vpop.f32.mrb[53].mxu0 }
 0xf02   : > { %v3189_v14 = vpop.f32.mrb[54].mxu0 }
 0xf03   : > { %v3193_v54 = vpack.c.bf16 %v3192_v34, %v3192_v34  ;;  %v4527_v28 = vpop.f32.mrb[55].mxu0 }
 0xf05   : > { %v3195_v13 = vsel %vm8477_vm5, %v3193_v54, 0  ;;  %4590 = vmatprep.subr.msk.bf16.mxu1 %vm8478_vm6, %v3193_v54 }
 0xf06   : > { %4529 = vmatpush3.bf16.msra.mxu1 %v3195_v13 }
 0xf09   : > { %4531 = vmatmul.mubr.msk.bf16.vlgmr.msra.gmra.mrb[40].mxu1 %vm8479_vm4, %v7990_v33 }
 0xf0a   : > { %4538 = vmatprep.mubr.msk.bf16.mxu1 %vm8480_vm8, %v7773_v23 }
 0xfdc   : > { %v4532_v1 = vpop.f32.mrb[40].mxu1 }
 0xfdd   : > { %v3240_v2 = vadd.f32 %v4532_v1, %v7281_v49  ;;  %v3231_v63 = vpop.f32.mrb[41].mxu1  ;;  %v8481_v1 = vld [vmem:[#allocation33_spill] sm:$0xff] }
 0xfde   : > { %v3232_v15 = vadd.f32 %v3231_v63, %v7284_v18  ;;  %v4533_v22 = vpop.f32.mrb[42].mxu1  ;;  %v3434_v63 = vrot.slane %v8481_v1, 4 }
 0xfdf   : > { %v3247_v5 = vmul.f32 %v3240_v2, %v3240_v2  ;;  %v3234_v8 = vpop.f32.mrb[43].mxu1 }
 0xfe0   : > { %v3245_v30 = vmul.f32 %v3232_v15, %v3232_v15  ;;  %v3235_v17 = vadd.f32 %v3234_v8, %v7288_v29  ;;  %v3435_v22 = vmin.f32 %v8481_v1, %v3434_v63 }
 0xfe1   : > { %v3250_v7 = vmul.f32 %v3247_v5, %v3240_v2 }
 0xfe2   : > { %v3248_v38 = vmul.f32 %v3245_v30, %v3232_v15  ;;  %v3246_v32 = vmul.f32 %v3235_v17, %v3235_v17  ;;  %v3436_v30 = vrot.slane %v3435_v22, 2 }
 0xfe3   : > { %v3253_v27 = vmul.f32 0.044715, %v3250_v7 }
 0xfe4   : > { %v3251_v31 = vmul.f32 0.044715, %v3248_v38  ;;  %v3249_v0 = vmul.f32 %v3246_v32, %v3235_v17 }
 0xfe5   : > { %v3256_v45 = vadd.f32 %v3253_v27, %v3240_v2 }
 0xfe6   : > { %v3254_v34 = vadd.f32 %v3251_v31, %v3232_v15  ;;  %v3252_v25 = vmul.f32 0.044715, %v3249_v0 }
 0xfe7   : > { %v3259_v14 = vmul.f32 0.7978846, %v3256_v45  ;;  %v3437_v45 = vmin.f32 %v3435_v22, %v3436_v30 }
 0xfe8   : > { %v3257_v54 = vmul.f32 0.7978846, %v3254_v34  ;;  %v3255_v28 = vadd.f32 %v3252_v25, %v3235_v17 }
 0xfe9   : > { %4835 = vtanh.f32 %v3259_v14 }
 0xfea   : > { %4837 = vtanh.f32 %v3257_v54  ;;  %v3258_v13 = vmul.f32 0.7978846, %v3255_v28  ;;  %v3438_v28 = vrot.slane %v3437_v45, 1 }
 0xfec   : > { %4839 = vtanh.f32 %v3258_v13  ;;  %v3439_v39 = vmin.f32 %v3437_v45, %v3438_v28 }
 0xfee   : > { %vm3440_vm7 = vcmp.eq.f32.partialorder %v5707_v42, %v3439_v39  ;;  %vm3441_vm3 = vcmp.eq.f32.partialorder %v5709_v43, %v3439_v39  ;;  %vm3442_vm12 = vcmp.eq.f32.partialorder %v5711_v47, %v3439_v39  ;;  %vm3443_vm13 = vcmp.eq.f32.partialorder %v5713_v48, %v3439_v39 }
 0xfef   : > { %vm4094_vm11 = vmpackc.low %vm3441_vm3, %vm3440_vm7  ;;  %vm3444_vm0 = vcmp.eq.f32.partialorder %v5715_v50, %v3439_v39  ;;  %vm3445_vm1 = vcmp.eq.f32.partialorder %v5717_v52, %v3439_v39  ;;  %vm3446_vm5 = vcmp.eq.f32.partialorder %v5719_v53, %v3439_v39  ;;  %vm3447_vm6 = vcmp.eq.f32.partialorder %v5721_v55, %v3439_v39 }
 0xff0   : > { %vm4096_vm15 = vmpackc.low %vm3443_vm13, %vm3442_vm12  ;;  %vm3448_vm4 = vcmp.eq.f32.partialorder %v5723_v56, %v3439_v39  ;;  %vm3449_vm8 = vcmp.eq.f32.partialorder %v5725_v59, %v3439_v39  ;;  %vm3450_vm3 = vcmp.eq.f32.partialorder %v5727_v60, %v3439_v39  ;;  %vm3452_vm12 = vcmp.eq.f32.partialorder %v5755_v9, %v3439_v39 }
 0xff1   : > { %vm4098_vm2 = vmpackc.low %vm3445_vm1, %vm3444_vm0  ;;  %vm3453_vm13 = vcmp.eq.f32.partialorder %v5757_v10, %v3439_v39  ;;  %vm3454_vm0 = vcmp.eq.f32.partialorder %v5759_v11, %v3439_v39  ;;  %vm3455_vm1 = vcmp.eq.f32.partialorder %v5761_v12, %v3439_v39 }
 0xff2   : > { %vm4102_vm7 = vmpackc.low %vm3449_vm8, %vm3448_vm4  ;;  %vm8488_vm4 = vcmask 179200  }
 0xff3   : > { %v4836_v5 = vpop.eup %4835  ;;  %vm8489_vm8 = vmmov %vm8488_vm4 }
 0xff4   : > { %v4838_v8 = vpop.eup %4837  ;;  %v3265_v7 = vadd.f32 1.0, %v4836_v5 }
 0xff5   : > { %v3263_v38 = vadd.f32 1.0, %v4838_v8 }
 0xff6   : > { %v4840_v32 = vpop.eup %4839  ;;  %v3268_v0 = vmul.f32 0.5, %v3265_v7 }
 0xff7   : > { %v3264_v27 = vadd.f32 1.0, %v4840_v32  ;;  %v3266_v31 = vmul.f32 0.5, %v3263_v38 }
 0xff8   : > { %v3271_v54 = vmul.f32 %v3268_v0, %v3240_v2 }
 0xff9   : > { %v3267_v34 = vmul.f32 0.5, %v3264_v27  ;;  %v3269_v25 = vmul.f32 %v3266_v31, %v3232_v15 }
 0xffa   : > { %v3273_v13 = vpack.c.bf16 %v3271_v54, %v3271_v54 }
 0xffb   : > { %v3270_v14 = vmul.f32 %v3267_v34, %v3235_v17 }
 0xffc   : > { %v3275_v1 = vsel %vm1213_vm9, %v3273_v13, 0 }
 0xffd   : > { %v3272_v35 = vpack.c.bf16 %v3270_v14, %v3269_v25 }
 0xfff   : > { %4534 = vmatprep.subr.bf16.mxu1 %v3272_v35 }
0x1000   : > { %4535 = vmatpush3.bf16.msra.mxu1 %v3272_v35 }
0x1001   : > { %4591 = vmatprep.subr.msk.bf16.mxu1 %vm1213_vm9, %v3273_v13 }
0x1004   : > { %4537 = vmatpush3.bf16.msra.mxu1 %v3275_v1 }
0x1005   : > { %4542 = vmatprep.subr.bf16.mxu1 %v8337_v37 }
0x1007   : > { %4539 = vmatmul.mubr.msk.bf16.vlgmr.msra.gmra.mrb[44].mxu1 %vm8482_vm10, %v7783_v16  ;;  %vm3451_vm10 = vcmp.eq.f32.partialorder %v5729_v61, %v3439_v39 }
0x1008   : > { %4543 = vmatpush3.bf16.msk.msra.mxu1 %vm4094_vm11, %v8341_v19  ;;  %4558 = vmatprep.mubr.msk.bf16.mxu1 %vm8342_vm14, %v8337_v37  ;;  %vm4100_vm14 = vmpackc.low %vm3447_vm6, %vm3446_vm5  ;;  %vm8485_vm5 = vcmask 1043456  }
0x1009   : > { %4544 = vmatprep.subr.bf16.mxu1 %v8337_v37  ;;  %vm4104_vm11 = vmpackc.low %vm3451_vm10, %vm3450_vm3 }
0x100a   : > { %vm8486_vm6 = vmmov %vm8485_vm5 }
0x100c   : > { %4545 = vmatpush3.bf16.msk.msra.mxu1 %vm4096_vm15, %v8341_v19  ;;  %vm4106_vm15 = vmpackc.low %vm3453_vm13, %vm3452_vm12 }
0x100d   : > { %4546 = vmatprep.subr.bf16.mxu1 %v8337_v37 }
0x1010   : > { %4547 = vmatpush3.bf16.msk.msra.mxu1 %vm4098_vm2, %v8341_v19  ;;  %vm4108_vm2 = vmpackc.low %vm3455_vm1, %vm3454_vm0 }
0x1011   : > { %4548 = vmatprep.subr.bf16.mxu1 %v8337_v37 }
0x1014   : > { %4549 = vmatpush3.bf16.msk.msra.mxu1 %vm4100_vm14, %v8341_v19  ;;  %vm8487_vm14 = vcmask 64512  }
0x1015   : > { %4550 = vmatprep.subr.bf16.mxu1 %v8337_v37 }
0x1018   : > { %4551 = vmatpush3.bf16.msk.msra.mxu1 %vm4102_vm7, %v8341_v19 }
0x1019   : > { %4552 = vmatprep.subr.bf16.mxu1 %v8337_v37 }
0x101c   : > { %4553 = vmatpush3.bf16.msk.msra.mxu1 %vm4104_vm11, %v8341_v19 }
0x101d   : > { %4554 = vmatprep.subr.bf16.mxu1 %v8337_v37 }
0x1020   : > { %4555 = vmatpush3.bf16.msk.msra.mxu1 %vm4106_vm15, %v8341_v19 }
0x1021   : > { %4556 = vmatprep.subr.bf16.mxu1 %v8337_v37 }
0x1024   : > { %4557 = vmatpush3.bf16.msk.msra.mxu1 %vm4108_vm2, %v8341_v19 }
0x1027   : > { %4559 = vmatmul.mubr.bf16.vlgmr.msra.gmra.mrb[48].mxu1 %v7853_v62 }
0x10da   : > { %v4540_v42 = vpop.f32.mrb[44].mxu1 }
0x10db   : > { %v3320_v43 = vadd.f32 %v4540_v42, %v7467_v41  ;;  %v3311_v47 = vpop.f32.mrb[45].mxu1 }
0x10dc   : > { %v3312_v48 = vadd.f32 %v3311_v47, %v7463_v26  ;;  %v4541_v50 = vpop.f32.mrb[46].mxu1 }
0x10dd   : > { %v3328_v52 = vmul.f32 %v3320_v43, %v3320_v43  ;;  %v3323_v53 = vadd.f32 %v4541_v50, %v7473_v24  ;;  %v3314_v55 = vpop.f32.mrb[47].mxu1 }
0x10de   : > { %v3326_v56 = vmul.f32 %v3312_v48, %v3312_v48  ;;  %v3315_v59 = vadd.f32 %v3314_v55, %v7465_v6 }
0x10df   : > { %v3332_v60 = vmul.f32 %v3328_v52, %v3320_v43  ;;  %v3329_v61 = vmul.f32 %v3323_v53, %v3323_v53  ;;  %v8483_v52 = vmax.f32 %v7877_v4, %v7977_v3 }
0x10e0   : > { %v3330_v9 = vmul.f32 %v3326_v56, %v3312_v48  ;;  %v3327_v10 = vmul.f32 %v3315_v59, %v3315_v59 }
0x10e1   : > { %v3336_v11 = vmul.f32 0.044715, %v3332_v60  ;;  %v3333_v12 = vmul.f32 %v3329_v61, %v3323_v53 }
0x10e2   : > { %v3334_v37 = vmul.f32 0.044715, %v3330_v9  ;;  %v3331_v19 = vmul.f32 %v3327_v10, %v3315_v59 }
0x10e3   : > { %v3340_v62 = vadd.f32 %v3336_v11, %v3320_v43  ;;  %v3337_v39 = vmul.f32 0.044715, %v3333_v12 }
0x10e4   : > { %v3338_v35 = vadd.f32 %v3334_v37, %v3312_v48  ;;  %v3335_v2 = vmul.f32 0.044715, %v3331_v19 }
0x10e5   : > { %v3344_v15 = vmul.f32 0.7978846, %v3340_v62  ;;  %v3341_v17 = vadd.f32 %v3337_v39, %v3323_v53 }
0x10e6   : > { %v3342_v63 = vmul.f32 0.7978846, %v3338_v35  ;;  %v3339_v22 = vadd.f32 %v3335_v2, %v3315_v59 }
0x10e7   : > { %4841 = vtanh.f32 %v3344_v15  ;;  %v3345_v5 = vmul.f32 0.7978846, %v3341_v17 }
0x10e8   : > { %4843 = vtanh.f32 %v3342_v63  ;;  %v3343_v8 = vmul.f32 0.7978846, %v3339_v22 }
0x10e9   : > { %4845 = vtanh.f32 %v3345_v5 }
0x10ea   : > { %4847 = vtanh.f32 %v3343_v8 }
0x10f1   : > { %v4842_v30 = vpop.eup %4841 }
0x10f2   : > { %v4844_v7 = vpop.eup %4843  ;;  %v3352_v38 = vadd.f32 1.0, %v4842_v30 }
0x10f3   : > { %v4846_v32 = vpop.eup %4845  ;;  %v3350_v27 = vadd.f32 1.0, %v4844_v7 }
0x10f4   : > { %v4848_v31 = vpop.eup %4847  ;;  %v3356_v0 = vmul.f32 0.5, %v3352_v38  ;;  %v3353_v45 = vadd.f32 1.0, %v4846_v32 }
0x10f5   : > { %v3354_v34 = vmul.f32 0.5, %v3350_v27  ;;  %v3351_v25 = vadd.f32 1.0, %v4848_v31 }
0x10f6   : > { %v3360_v14 = vmul.f32 %v3356_v0, %v3320_v43  ;;  %v3357_v54 = vmul.f32 0.5, %v3353_v45 }
0x10f7   : > { %v3358_v28 = vmul.f32 %v3354_v34, %v3312_v48  ;;  %v3355_v13 = vmul.f32 0.5, %v3351_v25  ;;  %v8484_v48 = vmax.f32 %v7882_v40, %v7981_v21 }
0x10f8   : > { %v8047_v1 = vmax.f32 %v3020_v36, %v3360_v14  ;;  %v3361_v42 = vmul.f32 %v3357_v54, %v3323_v53 }
0x10f9   : > { %v8052_v47 = vmax.f32 %v3018_v51, %v3358_v28  ;;  %v3359_v50 = vmul.f32 %v3355_v13, %v3315_v59 }
0x10fa   : > { %v8057_v55 = vmax.f32 %v8483_v52, %v3361_v42  ;;  %v3514_v43 = vpop.f32.mrb[48].mxu1 }
0x10fb   : > { %v8062_v56 = vmax.f32 %v8484_v48, %v3359_v50  ;;  %v3520_v44 = vsub.f32 %v3514_v43, %v6672_v46  ;;  %v4560_v20 = vpop.f32.mrb[49].mxu1 }
0x10fc   : > { %v3517_v36 = vpop.f32.mrb[50].mxu1 }
0x10fd   : > { %v3521_v53 = vpack.c.bf16 %v3520_v44, %v3520_v44  ;;  %v4561_v58 = vpop.f32.mrb[51].mxu1 }
0x10ff   : > { %v3523_v57 = vsel %vm8485_vm5, %v3521_v53, 0  ;;  %4592 = vmatprep.subr.msk.bf16.mxu0 %vm8486_vm6, %v3521_v53 }
0x1100   : > { %4563 = vmatpush3.bf16.msra.mxu0 %v3523_v57 }
0x1103   : > { %4565 = vmatmul.mubr.msk.bf16.vlgmr.msra.gmra.mrb[56].mxu0 %vm8487_vm14, %v7990_v33 }
0x1104   : > { %4572 = vmatprep.mubr.msk.bf16.mxu0 %vm8488_vm4, %v7773_v23 }
0x11d6   : > { %v4566_v4 = vpop.f32.mrb[56].mxu0 }
0x11d7   : > { %v3568_v40 = vadd.f32 %v4566_v4, %v7281_v49  ;;  %v3559_v3 = vpop.f32.mrb[57].mxu0 }
0x11d8   : > { %v3560_v46 = vadd.f32 %v3559_v3, %v7284_v18  ;;  %v4567_v51 = vpop.f32.mrb[58].mxu0 }
0x11d9   : > { %v3575_v21 = vmul.f32 %v3568_v40, %v3568_v40  ;;  %v3562_v59 = vpop.f32.mrb[59].mxu0 }
0x11da   : > { %v3573_v60 = vmul.f32 %v3560_v46, %v3560_v46  ;;  %v3563_v61 = vadd.f32 %v3562_v59, %v7288_v29 }
0x11db   : > { %v3578_v9 = vmul.f32 %v3575_v21, %v3568_v40 }
0x11dc   : > { %v3576_v10 = vmul.f32 %v3573_v60, %v3560_v46  ;;  %v3574_v11 = vmul.f32 %v3563_v61, %v3563_v61 }
0x11dd   : > { %v3581_v12 = vmul.f32 0.044715, %v3578_v9 }
0x11de   : > { %v3579_v33 = vmul.f32 0.044715, %v3576_v10  ;;  %v3577_v37 = vmul.f32 %v3574_v11, %v3563_v61 }
0x11df   : > { %v3584_v19 = vadd.f32 %v3581_v12, %v3568_v40 }
0x11e0   : > { %v3582_v23 = vadd.f32 %v3579_v33, %v3560_v46  ;;  %v3580_v62 = vmul.f32 0.044715, %v3577_v37 }
0x11e1   : > { %v3587_v39 = vmul.f32 0.7978846, %v3584_v19 }
0x11e2   : > { %v3585_v49 = vmul.f32 0.7978846, %v3582_v23  ;;  %v3583_v35 = vadd.f32 %v3580_v62, %v3563_v61 }
0x11e3   : > { %4849 = vtanh.f32 %v3587_v39 }
0x11e4   : > { %4851 = vtanh.f32 %v3585_v49  ;;  %v3586_v18 = vmul.f32 0.7978846, %v3583_v35 }
0x11e6   : > { %4853 = vtanh.f32 %v3586_v18 }
0x11ed   : > { %v4850_v2 = vpop.eup %4849 }
0x11ee   : > { %v4852_v15 = vpop.eup %4851  ;;  %v3593_v17 = vadd.f32 1.0, %v4850_v2 }
0x11ef   : > { %v3591_v29 = vadd.f32 1.0, %v4852_v15 }
0x11f0   : > { %v4854_v63 = vpop.eup %4853  ;;  %v3596_v8 = vmul.f32 0.5, %v3593_v17 }
0x11f1   : > { %v3592_v22 = vadd.f32 1.0, %v4854_v63  ;;  %v3594_v5 = vmul.f32 0.5, %v3591_v29 }
0x11f2   : > { %v3599_v32 = vmul.f32 %v3596_v8, %v3568_v40 }
0x11f3   : > { %v3595_v30 = vmul.f32 0.5, %v3592_v22  ;;  %v3597_v7 = vmul.f32 %v3594_v5, %v3560_v46 }
0x11f4   : > { %v3601_v31 = vpack.c.bf16 %v3599_v32, %v3599_v32 }
0x11f5   : > { %v3598_v38 = vmul.f32 %v3595_v30, %v3563_v61 }
0x11f6   : > { %v3603_v0 = vsel %vm1213_vm9, %v3601_v31, 0 }
0x11f7   : > { %v3600_v27 = vpack.c.bf16 %v3598_v38, %v3597_v7 }
0x11f9   : > { %4568 = vmatprep.subr.bf16.mxu0 %v3600_v27 }
0x11fa   : > { %4569 = vmatpush3.bf16.msra.mxu0 %v3600_v27 }
0x11fb   : > { %4593 = vmatprep.subr.msk.bf16.mxu0 %vm1213_vm9, %v3601_v31 }
0x11fe   : > { %4571 = vmatpush3.bf16.msra.mxu0 %v3603_v0 }
0x1201   : > { %4573 = vmatmul.mubr.msk.bf16.vlgmr.msra.gmra.mrb[60].mxu0 %vm8489_vm8, %v7783_v16 }
0x12d4   : > { %v4574_v45 = vpop.f32.mrb[60].mxu0 }
0x12d5   : > { %v3648_v34 = vadd.f32 %v4574_v45, %v7467_v41  ;;  %v3639_v25 = vpop.f32.mrb[61].mxu0 }
0x12d6   : > { %v3640_v14 = vadd.f32 %v3639_v25, %v7463_v26  ;;  %v4575_v54 = vpop.f32.mrb[62].mxu0 }
0x12d7   : > { %v3656_v28 = vmul.f32 %v3648_v34, %v3648_v34  ;;  %v3651_v13 = vadd.f32 %v4575_v54, %v7473_v24  ;;  %v3642_v42 = vpop.f32.mrb[63].mxu0 }
0x12d8   : > { %v3654_v50 = vmul.f32 %v3640_v14, %v3640_v14  ;;  %v3643_v52 = vadd.f32 %v3642_v42, %v7465_v6 }
0x12d9   : > { %v3660_v43 = vmul.f32 %v3656_v28, %v3648_v34  ;;  %v3657_v48 = vmul.f32 %v3651_v13, %v3651_v13 }
0x12da   : > { %v3658_v44 = vmul.f32 %v3654_v50, %v3640_v14  ;;  %v3655_v20 = vmul.f32 %v3643_v52, %v3643_v52 }
0x12db   : > { %v3664_v36 = vmul.f32 0.044715, %v3660_v43  ;;  %v3661_v16 = vmul.f32 %v3657_v48, %v3651_v13 }
0x12dc   : > { %v3662_v53 = vmul.f32 0.044715, %v3658_v44  ;;  %v3659_v58 = vmul.f32 %v3655_v20, %v3643_v52 }
0x12dd   : > { %v3668_v41 = vadd.f32 %v3664_v36, %v3648_v34  ;;  %v3665_v57 = vmul.f32 0.044715, %v3661_v16 }
0x12de   : > { %v3666_v4 = vadd.f32 %v3662_v53, %v3640_v14  ;;  %v3663_v26 = vmul.f32 0.044715, %v3659_v58 }
0x12df   : > { %v3672_v40 = vmul.f32 0.7978846, %v3668_v41  ;;  %v3669_v3 = vadd.f32 %v3665_v57, %v3651_v13 }
0x12e0   : > { %v3670_v24 = vmul.f32 0.7978846, %v3666_v4  ;;  %v3667_v46 = vadd.f32 %v3663_v26, %v3643_v52 }
0x12e1   : > { %4855 = vtanh.f32 %v3672_v40  ;;  %v3673_v51 = vmul.f32 0.7978846, %v3669_v3 }
0x12e2   : > { %4857 = vtanh.f32 %v3670_v24  ;;  %v3671_v6 = vmul.f32 0.7978846, %v3667_v46 }
0x12e3   : > { %4859 = vtanh.f32 %v3673_v51 }
0x12e4   : > { %4861 = vtanh.f32 %v3671_v6 }
0x12eb   : > { %v4856_v21 = vpop.eup %4855 }
0x12ec   : > { %v4858_v59 = vpop.eup %4857  ;;  %v3680_v60 = vadd.f32 1.0, %v4856_v21 }
0x12ed   : > { %v4860_v61 = vpop.eup %4859  ;;  %v3678_v9 = vadd.f32 1.0, %v4858_v59 }
0x12ee   : > { %v4862_v10 = vpop.eup %4861  ;;  %v3684_v11 = vmul.f32 0.5, %v3680_v60  ;;  %v3681_v12 = vadd.f32 1.0, %v4860_v61 }
0x12ef   : > { %v3682_v33 = vmul.f32 0.5, %v3678_v9  ;;  %v3679_v37 = vadd.f32 1.0, %v4862_v10 }
0x12f0   : > { %v3688_v19 = vmul.f32 %v3684_v11, %v3648_v34  ;;  %v3685_v23 = vmul.f32 0.5, %v3681_v12 }
0x12f1   : > { %v3686_v62 = vmul.f32 %v3682_v33, %v3640_v14  ;;  %v3683_v39 = vmul.f32 0.5, %v3679_v37 }
0x12f2   : > { %v3692_v49 = vmax.f32 %v8047_v1, %v3688_v19  ;;  %v3689_v35 = vmul.f32 %v3685_v23, %v3651_v13 }
0x12f3   : > { %v3690_v18 = vmax.f32 %v8052_v47, %v3686_v62  ;;  %v3687_v2 = vmul.f32 %v3683_v39, %v3643_v52 }
0x12f4   : > { %v3693_v15 = vmax.f32 %v8057_v55, %v3689_v35 }
0x12f5   : > { %v3691_v17 = vmax.f32 %v8062_v56, %v3687_v2 }
0x12f6   : > { %v4137_v29 = vpack.c.bf16 %v3693_v15, %v3692_v49 }
0x12f7   : > { %v4132_v1 = vpack.c.bf16 %v3691_v17, %v3690_v18 }
0x12f8   : > { %4139 = vst [vmem:[%s484_s17 + $0x8] sm:$0xff] %v4137_v29  }
0x12f9   : > { %4133 = vst [vmem:[%s484_s17] sm:$0xff] %v4132_v1  }
0x12fa   : > { %5115 = shalt.err (!%p5112_p0)
}
0x12fb   : > { %s5116_s1 = scalar_lea.hbm %s8091_s10, 256  ;;  %s5120_s12 = scalar_lea.hbm %s8492_s16, 512 }
0x12fc   : > { %p5117_p9 = scmp.ne.s32.totalorder %s8091_s10, %s5116_s1  ;;  %p5121_p7 = scmp.lt.u32.totalorder %s8091_s10, %s8492_s16 }
0x12fd   : > { %p5122_p10 = scmp.lt.u32.totalorder %s5120_s12, %s5116_s1  ;;  %p5124_p3 = scmp.lt.u32.totalorder %s5116_s1, %s8091_s10 }
0x12fe   : > { %p5118_p12 = pnand %p5117_p9, %p8493_p1 }
0x12ff   : > { %p5123_p6 = por %p5122_p10, %p5121_p7 }
0x1300   : > { %p5119_p2 = pneg %p5118_p12 }
0x1301   : > { %p5125_p8 = por %p5124_p3, %p5123_p6 }
0x1303   : > { %p5126_p5 = pnand %p5125_p8, %p5119_p2 }
0x1305   : > { %5129 = shalt.err (!%p5126_p5)
}
0x1306   : > { %s5219_s14 = smov 64   ;;  %s5220_s15 = smov 4  }
0x1307   : > { %4620 = dma.vmem_to_hbm [thread:$0]  (%p8493_p1), %s8093_s5, 256, %s8091_s10, %s3715_s23, %s5219_s14, %s5219_s14, %s5220_s15  }
0x1308 PF: > { %s8494_s11 = sld [smem:[#allocation23_spill]]  ;;  %s8495_s26 = sld [smem:[#allocation30_spill]] }
0x1309   : > { %s8496_s30 = sld [smem:[#allocation26_spill]] }
0x130e   : > { %s3744_s17 = sand.u32 1, %s8494_s11   ;;  %p8497_p4 = scmp.ne.s32.totalorder %s8495_s26, 0 }
0x130f   : > { %p8498_p13 = scmp.ge.s32.totalorder %s8496_s30, 2  ;;  %s3745_s20 = scalar_lea.sflag [#allocation4], %s3744_s17 }
0x1311   : > { %p4649_p11 = pnand %p8498_p13, %p8497_p4 }
0x1313   : > { %5175 = dma.done.wait (!%p4649_p11), %s3745_s20, 256  }
0x1314   : > { %5177 = vsyncadd (!%p4649_p11), %s3745_s20, 4294967040  ;;  %s30_s10 = sadd.s32 1, %s8496_s30   ;;  %s8499_s24 = sld [smem:[#allocation24_spill]] }
0x1315   : > { %p27_p0 = scmp.ge.s32.totalorder %s30_s10, 4   ;;  %s8500_s29 = sld [smem:[#allocation29_spill]] }
0x1316   : > { %s8501_s21 = sld [smem:[#allocation27_spill]]  ;;  %s8502_s27 = smov %s5184_s28 }
0x1317   : > { %s8504_s30 = smov %s5196_s9  ;;  %29 = sbr.rel (!%p27_p0) target bundleno = 16 (0x10), region = 141 }
0x131a   : > { %s8503_s28 = smov %s8499_s24 }
0x131c   : > { %s8505_s9 = smov %s8501_s21 }
0x131e   :  { %3750 = vsyncpa [#allocation3], 1 }
0x131f   :  { %3752 = vsyncpa [#allocation3 + $0x1], 1 }
0x1320   :  { %3753 = vsyncpa [#allocation6], 1 }
0x1321   :  { %3755 = vsyncpa [#allocation6 + $0x1], 1 }
0x1322   :  { %3756 = vsyncpa [#allocation9], 1 }
0x1323   :  { %3757 = vsyncpa [#allocation12], 1 }
0x1324   :  { %3758 = vsyncpa [#allocation15], 1 }
0x1325   :  { %3759 = vsyncpa [#allocation4], 1 }
0x1326   :  { %3761 = vsyncpa [#allocation4 + $0x1], 1 }

</bundles_post_ra>
